<compile_context>
chip_gen: v5e
topology: v5e:2x2
jax: 0.10.0
libtpu: 0.0.40
codegen_flags: <defaults>
</compile_context>

<pallas_src>
import math
import jax
import jax.numpy as jnp
from jax.experimental import pallas as pl
from jax.experimental.pallas import tpu as pltpu

_NUM_WEIGHTS = 9  # 4 down + 1 shared linear + 4 up


# ---------------------------------------------------------------------------
# Pallas kernel: entire forward (down MLP -> 2x fused concat-linear -> up MLP)
# Weights stream from HBM via manual async DMA overlapped with compute.
# ---------------------------------------------------------------------------
def _netcc_kernel(
    # inputs (VMEM, f32)
    x_ref, att1_ref, att2_ref,
    # weights (HBM, bf16)
    dw0, dw1, dw2, dw3, lw, uw0, uw1, uw2, uw3,
    # biases (VMEM, f32)
    db0, db1, db2, db3, lb, ub0, ub1, ub2, ub3,
    # outputs (VMEM, f32)
    out_ref, h2_ref, h4_ref,
    # scratch: per-weight VMEM buffers + DMA semaphores
    dw0_v, dw1_v, dw2_v, dw3_v, lw_v, uw0_v, uw1_v, uw2_v, uw3_v,
    sems,
):
    w_hbm = (dw0, dw1, dw2, dw3, lw, uw0, uw1, uw2, uw3)
    w_vmem = (dw0_v, dw1_v, dw2_v, dw3_v, lw_v, uw0_v, uw1_v, uw2_v, uw3_v)

    # Kick off every weight DMA immediately; each layer then waits only on its
    # own weight, so transfers for later layers hide under earlier compute.
    for i in range(_NUM_WEIGHTS):
        pltpu.make_async_copy(w_hbm[i], w_vmem[i], sems.at[i]).start()

    def weight(i):
        pltpu.make_async_copy(w_hbm[i], w_vmem[i], sems.at[i]).wait()
        return w_vmem[i][...]

    def lin_relu(h, i, b_ref):
        y = jnp.dot(h.astype(jnp.bfloat16), weight(i),
                    preferred_element_type=jnp.float32)
        return jnp.maximum(y + b_ref[...], 0.0)

    # down(x)
    h = x_ref[...]
    h = lin_relu(h, 0, db0)
    h = lin_relu(h, 1, db1)
    h = lin_relu(h, 2, db2)
    h = lin_relu(h, 3, db3)                       # (B, att_dim)

    # hiden2 = relu(linear(cat([h, att1], 1)))  -- single K=2*att_dim dot
    lw_full = weight(4)
    h1 = jnp.concatenate([h, att1_ref[...]], axis=1).astype(jnp.bfloat16)
    h2 = jnp.maximum(
        jnp.dot(h1, lw_full, preferred_element_type=jnp.float32) + lb[...], 0.0)

    # hiden4 = relu(linear(cat([hiden2, att2], 1)))  (same shared linear)
    h3 = jnp.concatenate([h2, att2_ref[...]], axis=1).astype(jnp.bfloat16)
    h4 = jnp.maximum(
        jnp.dot(h3, lw_full, preferred_element_type=jnp.float32) + lb[...], 0.0)

    # up(hiden4)
    u = lin_relu(h4, 5, ub0)
    u = lin_relu(u, 6, ub1)
    u = lin_relu(u, 7, ub2)
    u = lin_relu(u, 8, ub3)                       # (B, out_dim)

    out_ref[...] = u
    h2_ref[...] = h2                              # == hiden2[:, :att_dim]
    h4_ref[...] = h4                              # == hiden4[:, :att_dim]


# ---------------------------------------------------------------------------
# Parameter construction (deterministic, PyTorch-Linear-style uniform init).
# Weights are stored in bf16 (HBM traffic), biases stay f32.
# ---------------------------------------------------------------------------
def _init_linear(key, in_dim, out_dim):
    kw, kb = jax.random.split(key)
    bound = 1.0 / math.sqrt(in_dim)
    w = jax.random.uniform(kw, (in_dim, out_dim), jnp.float32, -bound, bound)
    b = jax.random.uniform(kb, (1, out_dim), jnp.float32, -bound, bound)
    return w.astype(jnp.bfloat16), b


def make_params(key, att_dim, in_dim, out_dim):
    down_dims = [(in_dim, 1024), (1024, 512), (512, 256), (256, att_dim)]
    up_dims = [(att_dim, 256), (256, 512), (512, 1024), (1024, out_dim)]
    keys = jax.random.split(key, len(down_dims) + len(up_dims) + 1)

    params = {}
    params["down"] = [_init_linear(keys[i], di, do)
                      for i, (di, do) in enumerate(down_dims)]
    params["up"] = [_init_linear(keys[len(down_dims) + i], di, do)
                    for i, (di, do) in enumerate(up_dims)]
    # un-split (2*att_dim, att_dim) weight; the kernel concatenates instead
    params["linear"] = _init_linear(keys[-1], 2 * att_dim, att_dim)
    return params


# ---------------------------------------------------------------------------
# Wrapper
# ---------------------------------------------------------------------------
def netcc_forward(x, att1, att2, params):
    B = x.shape[0]
    att_dim = att1.shape[1]

    weights = [w for w, _ in params["down"]]
    biases = [b for _, b in params["down"]]
    lw, lb = params["linear"]
    weights.append(lw)
    biases.append(lb)
    weights += [w for w, _ in params["up"]]
    biases += [b for _, b in params["up"]]
    out_dim = weights[-1].shape[1]

    # Keep batch a multiple of 8 (f32 sublane) so output stores stay dense.
    pad = (-B) % 8
    if pad:
        x = jnp.pad(x, ((0, pad), (0, 0)))
        att1 = jnp.pad(att1, ((0, pad), (0, 0)))
        att2 = jnp.pad(att2, ((0, pad), (0, 0)))
    Bp = B + pad

    # Right-sized VMEM request (v1 asked for 128 MiB, > v7x's 64 MiB physical).
    weight_bytes = sum(int(w.size) * w.dtype.itemsize for w in weights)
    vmem_limit = int(min(64 << 20, max(24 << 20, 2 * weight_bytes + (8 << 20))))

    vmem_spec = pl.BlockSpec(memory_space=pltpu.MemorySpace.VMEM)
    hbm_spec = pl.BlockSpec(memory_space=pl.ANY)
    in_specs = ([vmem_spec] * 3
                + [hbm_spec] * _NUM_WEIGHTS
                + [vmem_spec] * _NUM_WEIGHTS)

    out_shapes = (
        jax.ShapeDtypeStruct((Bp, out_dim), jnp.float32),
        jax.ShapeDtypeStruct((Bp, att_dim), jnp.float32),
        jax.ShapeDtypeStruct((Bp, att_dim), jnp.float32),
    )
    scratch_shapes = [pltpu.VMEM(w.shape, jnp.bfloat16) for w in weights]
    scratch_shapes.append(pltpu.SemaphoreType.DMA((_NUM_WEIGHTS,)))

    # NOTE: grid-less single invocation is right for small batch; for B >~ 256
    # add a ("parallel",) batch grid so v7x's second TensorCore is used, and
    # for repeated inference pre-stage / keep weights resident across calls.
    out, h2, h4 = pl.pallas_call(
        _netcc_kernel,
        out_shape=out_shapes,
        in_specs=in_specs,
        out_specs=(vmem_spec, vmem_spec, vmem_spec),
        scratch_shapes=scratch_shapes,
        compiler_params=pltpu.CompilerParams(vmem_limit_bytes=vmem_limit),
    )(x, att1, att2, *weights, *biases)

    if pad:
        out, h2, h4 = out[:B], h2[:B], h4[:B]
    return out, h2, h4


# ---------------------------------------------------------------------------
# Pure-JAX reference (mirrors the kernel's bf16-weight / f32-accumulate math)
# ---------------------------------------------------------------------------
def netcc_reference(x, att1, att2, params):
    def lin_relu(h, w, b):
        y = jnp.dot(h.astype(jnp.bfloat16), w, preferred_element_type=jnp.float32)
        return jnp.maximum(y + b, 0.0)

    h = x
    for w, b in params["down"]:
        h = lin_relu(h, w, b)
    lw, lb = params["linear"]
    h1 = jnp.concatenate([h, att1], axis=1)
    h2 = jnp.maximum(
        jnp.dot(h1.astype(jnp.bfloat16), lw, preferred_element_type=jnp.float32)
        + lb, 0.0)
    h3 = jnp.concatenate([h2, att2], axis=1)
    h4 = jnp.maximum(
        jnp.dot(h3.astype(jnp.bfloat16), lw, preferred_element_type=jnp.float32)
        + lb, 0.0)
    u = h4
    for w, b in params["up"]:
        u = lin_relu(u, w, b)
    return u, h2, h4


if __name__ == "__main__":
    # small-but-consistent shapes: hidden chain 1024/512/256 is fixed by module
    B, IN_DIM, OUT_DIM, ATT_DIM = 8, 512, 512, 128

    key = jax.random.PRNGKey(0)
    kx, ka1, ka2, kp = jax.random.split(key, 4)
    x = jax.random.normal(kx, (B, IN_DIM), jnp.float32)
    att1 = jax.random.normal(ka1, (B, ATT_DIM), jnp.float32)
    att2 = jax.random.normal(ka2, (B, ATT_DIM), jnp.float32)
    params = make_params(kp, ATT_DIM, IN_DIM, OUT_DIM)

    out, h2, h4 = jax.block_until_ready(netcc_forward(x, att1, att2, params))

    ref_out, ref_h2, ref_h4 = netcc_reference(x, att1, att2, params)
    assert jnp.allclose(out, ref_out, atol=1e-2, rtol=1e-2)
    assert jnp.allclose(h2, ref_h2, atol=1e-2, rtol=1e-2)
    assert jnp.allclose(h4, ref_h4, atol=1e-2, rtol=1e-2)

    print("KERNEL_OK")
</pallas_src>

<mosaic_0001>
module attributes {stable_mosaic.version = 11 : i64} {
  func.func @_netcc_kernel(%arg0: memref<8x512xf32, #tpu.memory_space<vmem>>, %arg1: memref<8x128xf32, #tpu.memory_space<vmem>>, %arg2: memref<8x128xf32, #tpu.memory_space<vmem>>, %arg3: memref<512x1024xbf16, #tpu.memory_space<any>>, %arg4: memref<1024x512xbf16, #tpu.memory_space<any>>, %arg5: memref<512x256xbf16, #tpu.memory_space<any>>, %arg6: memref<256x128xbf16, #tpu.memory_space<any>>, %arg7: memref<256x128xbf16, #tpu.memory_space<any>>, %arg8: memref<128x256xbf16, #tpu.memory_space<any>>, %arg9: memref<256x512xbf16, #tpu.memory_space<any>>, %arg10: memref<512x1024xbf16, #tpu.memory_space<any>>, %arg11: memref<1024x512xbf16, #tpu.memory_space<any>>, %arg12: memref<1x1024xf32, #tpu.memory_space<vmem>>, %arg13: memref<1x512xf32, #tpu.memory_space<vmem>>, %arg14: memref<1x256xf32, #tpu.memory_space<vmem>>, %arg15: memref<1x128xf32, #tpu.memory_space<vmem>>, %arg16: memref<1x128xf32, #tpu.memory_space<vmem>>, %arg17: memref<1x256xf32, #tpu.memory_space<vmem>>, %arg18: memref<1x512xf32, #tpu.memory_space<vmem>>, %arg19: memref<1x1024xf32, #tpu.memory_space<vmem>>, %arg20: memref<1x512xf32, #tpu.memory_space<vmem>>, %arg21: memref<8x512xf32, #tpu.memory_space<vmem>>, %arg22: memref<8x128xf32, #tpu.memory_space<vmem>>, %arg23: memref<8x128xf32, #tpu.memory_space<vmem>>, %arg24: memref<512x1024xbf16, #tpu.memory_space<vmem>>, %arg25: memref<1024x512xbf16, #tpu.memory_space<vmem>>, %arg26: memref<512x256xbf16, #tpu.memory_space<vmem>>, %arg27: memref<256x128xbf16, #tpu.memory_space<vmem>>, %arg28: memref<256x128xbf16, #tpu.memory_space<vmem>>, %arg29: memref<128x256xbf16, #tpu.memory_space<vmem>>, %arg30: memref<256x512xbf16, #tpu.memory_space<vmem>>, %arg31: memref<512x1024xbf16, #tpu.memory_space<vmem>>, %arg32: memref<1024x512xbf16, #tpu.memory_space<vmem>>, %arg33: memref<9x!tpu.dma_semaphore, #tpu.memory_space<semaphore_mem>>) attributes {dimension_semantics = [], scalar_prefetch = 0 : i64, scratch_operands = 10 : i64, tpu.core_type = #tpu.core_type<tc>} {
    %c0_i32 = arith.constant 0 : i32
    %0 = tpu.memref_slice %arg33[%c0_i32] : memref<9x!tpu.dma_semaphore, #tpu.memory_space<semaphore_mem>> -> memref<1x!tpu.dma_semaphore, #tpu.memory_space<semaphore_mem>>
    %1 = tpu.memref_squeeze %0 : memref<1x!tpu.dma_semaphore, #tpu.memory_space<semaphore_mem>> -> memref<!tpu.dma_semaphore, #tpu.memory_space<semaphore_mem>>
    tpu.enqueue_dma source(%arg3 : memref<512x1024xbf16, #tpu.memory_space<any>>) target(%arg24 : memref<512x1024xbf16, #tpu.memory_space<vmem>>) target_semaphore(%1 : memref<!tpu.dma_semaphore, #tpu.memory_space<semaphore_mem>>)
    %c1_i32 = arith.constant 1 : i32
    %2 = tpu.memref_slice %arg33[%c1_i32] : memref<9x!tpu.dma_semaphore, #tpu.memory_space<semaphore_mem>> -> memref<1x!tpu.dma_semaphore, #tpu.memory_space<semaphore_mem>>
    %3 = tpu.memref_squeeze %2 : memref<1x!tpu.dma_semaphore, #tpu.memory_space<semaphore_mem>> -> memref<!tpu.dma_semaphore, #tpu.memory_space<semaphore_mem>>
    tpu.enqueue_dma source(%arg4 : memref<1024x512xbf16, #tpu.memory_space<any>>) target(%arg25 : memref<1024x512xbf16, #tpu.memory_space<vmem>>) target_semaphore(%3 : memref<!tpu.dma_semaphore, #tpu.memory_space<semaphore_mem>>)
    %c2_i32 = arith.constant 2 : i32
    %4 = tpu.memref_slice %arg33[%c2_i32] : memref<9x!tpu.dma_semaphore, #tpu.memory_space<semaphore_mem>> -> memref<1x!tpu.dma_semaphore, #tpu.memory_space<semaphore_mem>>
    %5 = tpu.memref_squeeze %4 : memref<1x!tpu.dma_semaphore, #tpu.memory_space<semaphore_mem>> -> memref<!tpu.dma_semaphore, #tpu.memory_space<semaphore_mem>>
    tpu.enqueue_dma source(%arg5 : memref<512x256xbf16, #tpu.memory_space<any>>) target(%arg26 : memref<512x256xbf16, #tpu.memory_space<vmem>>) target_semaphore(%5 : memref<!tpu.dma_semaphore, #tpu.memory_space<semaphore_mem>>)
    %c3_i32 = arith.constant 3 : i32
    %6 = tpu.memref_slice %arg33[%c3_i32] : memref<9x!tpu.dma_semaphore, #tpu.memory_space<semaphore_mem>> -> memref<1x!tpu.dma_semaphore, #tpu.memory_space<semaphore_mem>>
    %7 = tpu.memref_squeeze %6 : memref<1x!tpu.dma_semaphore, #tpu.memory_space<semaphore_mem>> -> memref<!tpu.dma_semaphore, #tpu.memory_space<semaphore_mem>>
    tpu.enqueue_dma source(%arg6 : memref<256x128xbf16, #tpu.memory_space<any>>) target(%arg27 : memref<256x128xbf16, #tpu.memory_space<vmem>>) target_semaphore(%7 : memref<!tpu.dma_semaphore, #tpu.memory_space<semaphore_mem>>)
    %c4_i32 = arith.constant 4 : i32
    %8 = tpu.memref_slice %arg33[%c4_i32] : memref<9x!tpu.dma_semaphore, #tpu.memory_space<semaphore_mem>> -> memref<1x!tpu.dma_semaphore, #tpu.memory_space<semaphore_mem>>
    %9 = tpu.memref_squeeze %8 : memref<1x!tpu.dma_semaphore, #tpu.memory_space<semaphore_mem>> -> memref<!tpu.dma_semaphore, #tpu.memory_space<semaphore_mem>>
    tpu.enqueue_dma source(%arg7 : memref<256x128xbf16, #tpu.memory_space<any>>) target(%arg28 : memref<256x128xbf16, #tpu.memory_space<vmem>>) target_semaphore(%9 : memref<!tpu.dma_semaphore, #tpu.memory_space<semaphore_mem>>)
    %c5_i32 = arith.constant 5 : i32
    %10 = tpu.memref_slice %arg33[%c5_i32] : memref<9x!tpu.dma_semaphore, #tpu.memory_space<semaphore_mem>> -> memref<1x!tpu.dma_semaphore, #tpu.memory_space<semaphore_mem>>
    %11 = tpu.memref_squeeze %10 : memref<1x!tpu.dma_semaphore, #tpu.memory_space<semaphore_mem>> -> memref<!tpu.dma_semaphore, #tpu.memory_space<semaphore_mem>>
    tpu.enqueue_dma source(%arg8 : memref<128x256xbf16, #tpu.memory_space<any>>) target(%arg29 : memref<128x256xbf16, #tpu.memory_space<vmem>>) target_semaphore(%11 : memref<!tpu.dma_semaphore, #tpu.memory_space<semaphore_mem>>)
    %c6_i32 = arith.constant 6 : i32
    %12 = tpu.memref_slice %arg33[%c6_i32] : memref<9x!tpu.dma_semaphore, #tpu.memory_space<semaphore_mem>> -> memref<1x!tpu.dma_semaphore, #tpu.memory_space<semaphore_mem>>
    %13 = tpu.memref_squeeze %12 : memref<1x!tpu.dma_semaphore, #tpu.memory_space<semaphore_mem>> -> memref<!tpu.dma_semaphore, #tpu.memory_space<semaphore_mem>>
    tpu.enqueue_dma source(%arg9 : memref<256x512xbf16, #tpu.memory_space<any>>) target(%arg30 : memref<256x512xbf16, #tpu.memory_space<vmem>>) target_semaphore(%13 : memref<!tpu.dma_semaphore, #tpu.memory_space<semaphore_mem>>)
    %c7_i32 = arith.constant 7 : i32
    %14 = tpu.memref_slice %arg33[%c7_i32] : memref<9x!tpu.dma_semaphore, #tpu.memory_space<semaphore_mem>> -> memref<1x!tpu.dma_semaphore, #tpu.memory_space<semaphore_mem>>
    %15 = tpu.memref_squeeze %14 : memref<1x!tpu.dma_semaphore, #tpu.memory_space<semaphore_mem>> -> memref<!tpu.dma_semaphore, #tpu.memory_space<semaphore_mem>>
    tpu.enqueue_dma source(%arg10 : memref<512x1024xbf16, #tpu.memory_space<any>>) target(%arg31 : memref<512x1024xbf16, #tpu.memory_space<vmem>>) target_semaphore(%15 : memref<!tpu.dma_semaphore, #tpu.memory_space<semaphore_mem>>)
    %c8_i32 = arith.constant 8 : i32
    %16 = tpu.memref_slice %arg33[%c8_i32] : memref<9x!tpu.dma_semaphore, #tpu.memory_space<semaphore_mem>> -> memref<1x!tpu.dma_semaphore, #tpu.memory_space<semaphore_mem>>
    %17 = tpu.memref_squeeze %16 : memref<1x!tpu.dma_semaphore, #tpu.memory_space<semaphore_mem>> -> memref<!tpu.dma_semaphore, #tpu.memory_space<semaphore_mem>>
    tpu.enqueue_dma source(%arg11 : memref<1024x512xbf16, #tpu.memory_space<any>>) target(%arg32 : memref<1024x512xbf16, #tpu.memory_space<vmem>>) target_semaphore(%17 : memref<!tpu.dma_semaphore, #tpu.memory_space<semaphore_mem>>)
    %c0 = arith.constant 0 : index
    %c0_0 = arith.constant 0 : index
    %18 = vector.load %arg0[%c0, %c0_0] : memref<8x512xf32, #tpu.memory_space<vmem>>, vector<8x512xf32>
    %19 = arith.truncf %18 : vector<8x512xf32> to vector<8x512xbf16>
    %c0_i32_1 = arith.constant 0 : i32
    %20 = tpu.memref_slice %arg33[%c0_i32_1] : memref<9x!tpu.dma_semaphore, #tpu.memory_space<semaphore_mem>> -> memref<1x!tpu.dma_semaphore, #tpu.memory_space<semaphore_mem>>
    %21 = tpu.memref_squeeze %20 : memref<1x!tpu.dma_semaphore, #tpu.memory_space<semaphore_mem>> -> memref<!tpu.dma_semaphore, #tpu.memory_space<semaphore_mem>>
    tpu.wait_dma2 semaphore(%21 : memref<!tpu.dma_semaphore, #tpu.memory_space<semaphore_mem>>) src(%arg3 : memref<512x1024xbf16, #tpu.memory_space<any>>) dst(%arg24 : memref<512x1024xbf16, #tpu.memory_space<vmem>>)
    %c0_2 = arith.constant 0 : index
    %c0_3 = arith.constant 0 : index
    %22 = vector.load %arg24[%c0_2, %c0_3] : memref<512x1024xbf16, #tpu.memory_space<vmem>>, vector<512x1024xbf16>
    %cst = arith.constant dense<0.000000e+00> : vector<8x1024xf32>
    %23 = tpu.matmul %19, %22, %cst {dimension_numbers = #tpu.dot_dimension_numbers<[1], [0], [0], [1], [0, 0, 1, 1], [], []>} : vector<8x512xbf16>, vector<512x1024xbf16>, vector<8x1024xf32> -> vector<8x1024xf32>
    %c0_4 = arith.constant 0 : index
    %c0_5 = arith.constant 0 : index
    %24 = vector.load %arg12[%c0_4, %c0_5] : memref<1x1024xf32, #tpu.memory_space<vmem>>, vector<1x1024xf32>
    %25 = vector.broadcast %24 : vector<1x1024xf32> to vector<8x1024xf32>
    %26 = arith.addf %23, %25 : vector<8x1024xf32>
    %cst_6 = arith.constant 0.000000e+00 : f32
    %27 = vector.broadcast %cst_6 : f32 to vector<8x1024xf32>
    %28 = arith.maximumf %26, %27 : vector<8x1024xf32>
    %29 = arith.truncf %28 : vector<8x1024xf32> to vector<8x1024xbf16>
    %c1_i32_7 = arith.constant 1 : i32
    %30 = tpu.memref_slice %arg33[%c1_i32_7] : memref<9x!tpu.dma_semaphore, #tpu.memory_space<semaphore_mem>> -> memref<1x!tpu.dma_semaphore, #tpu.memory_space<semaphore_mem>>
    %31 = tpu.memref_squeeze %30 : memref<1x!tpu.dma_semaphore, #tpu.memory_space<semaphore_mem>> -> memref<!tpu.dma_semaphore, #tpu.memory_space<semaphore_mem>>
    tpu.wait_dma2 semaphore(%31 : memref<!tpu.dma_semaphore, #tpu.memory_space<semaphore_mem>>) src(%arg4 : memref<1024x512xbf16, #tpu.memory_space<any>>) dst(%arg25 : memref<1024x512xbf16, #tpu.memory_space<vmem>>)
    %c0_8 = arith.constant 0 : index
    %c0_9 = arith.constant 0 : index
    %32 = vector.load %arg25[%c0_8, %c0_9] : memref<1024x512xbf16, #tpu.memory_space<vmem>>, vector<1024x512xbf16>
    %cst_10 = arith.constant dense<0.000000e+00> : vector<8x512xf32>
    %33 = tpu.matmul %29, %32, %cst_10 {dimension_numbers = #tpu.dot_dimension_numbers<[1], [0], [0], [1], [0, 0, 1, 1], [], []>} : vector<8x1024xbf16>, vector<1024x512xbf16>, vector<8x512xf32> -> vector<8x512xf32>
    %c0_11 = arith.constant 0 : index
    %c0_12 = arith.constant 0 : index
    %34 = vector.load %arg13[%c0_11, %c0_12] : memref<1x512xf32, #tpu.memory_space<vmem>>, vector<1x512xf32>
    %35 = vector.broadcast %34 : vector<1x512xf32> to vector<8x512xf32>
    %36 = arith.addf %33, %35 : vector<8x512xf32>
    %cst_13 = arith.constant 0.000000e+00 : f32
    %37 = vector.broadcast %cst_13 : f32 to vector<8x512xf32>
    %38 = arith.maximumf %36, %37 : vector<8x512xf32>
    %39 = arith.truncf %38 : vector<8x512xf32> to vector<8x512xbf16>
    %c2_i32_14 = arith.constant 2 : i32
    %40 = tpu.memref_slice %arg33[%c2_i32_14] : memref<9x!tpu.dma_semaphore, #tpu.memory_space<semaphore_mem>> -> memref<1x!tpu.dma_semaphore, #tpu.memory_space<semaphore_mem>>
    %41 = tpu.memref_squeeze %40 : memref<1x!tpu.dma_semaphore, #tpu.memory_space<semaphore_mem>> -> memref<!tpu.dma_semaphore, #tpu.memory_space<semaphore_mem>>
    tpu.wait_dma2 semaphore(%41 : memref<!tpu.dma_semaphore, #tpu.memory_space<semaphore_mem>>) src(%arg5 : memref<512x256xbf16, #tpu.memory_space<any>>) dst(%arg26 : memref<512x256xbf16, #tpu.memory_space<vmem>>)
    %c0_15 = arith.constant 0 : index
    %c0_16 = arith.constant 0 : index
    %42 = vector.load %arg26[%c0_15, %c0_16] : memref<512x256xbf16, #tpu.memory_space<vmem>>, vector<512x256xbf16>
    %cst_17 = arith.constant dense<0.000000e+00> : vector<8x256xf32>
    %43 = tpu.matmul %39, %42, %cst_17 {dimension_numbers = #tpu.dot_dimension_numbers<[1], [0], [0], [1], [0, 0, 1, 1], [], []>} : vector<8x512xbf16>, vector<512x256xbf16>, vector<8x256xf32> -> vector<8x256xf32>
    %c0_18 = arith.constant 0 : index
    %c0_19 = arith.constant 0 : index
    %44 = vector.load %arg14[%c0_18, %c0_19] : memref<1x256xf32, #tpu.memory_space<vmem>>, vector<1x256xf32>
    %45 = vector.broadcast %44 : vector<1x256xf32> to vector<8x256xf32>
    %46 = arith.addf %43, %45 : vector<8x256xf32>
    %cst_20 = arith.constant 0.000000e+00 : f32
    %47 = vector.broadcast %cst_20 : f32 to vector<8x256xf32>
    %48 = arith.maximumf %46, %47 : vector<8x256xf32>
    %49 = arith.truncf %48 : vector<8x256xf32> to vector<8x256xbf16>
    %c3_i32_21 = arith.constant 3 : i32
    %50 = tpu.memref_slice %arg33[%c3_i32_21] : memref<9x!tpu.dma_semaphore, #tpu.memory_space<semaphore_mem>> -> memref<1x!tpu.dma_semaphore, #tpu.memory_space<semaphore_mem>>
    %51 = tpu.memref_squeeze %50 : memref<1x!tpu.dma_semaphore, #tpu.memory_space<semaphore_mem>> -> memref<!tpu.dma_semaphore, #tpu.memory_space<semaphore_mem>>
    tpu.wait_dma2 semaphore(%51 : memref<!tpu.dma_semaphore, #tpu.memory_space<semaphore_mem>>) src(%arg6 : memref<256x128xbf16, #tpu.memory_space<any>>) dst(%arg27 : memref<256x128xbf16, #tpu.memory_space<vmem>>)
    %c0_22 = arith.constant 0 : index
    %c0_23 = arith.constant 0 : index
    %52 = vector.load %arg27[%c0_22, %c0_23] : memref<256x128xbf16, #tpu.memory_space<vmem>>, vector<256x128xbf16>
    %cst_24 = arith.constant dense<0.000000e+00> : vector<8x128xf32>
    %53 = tpu.matmul %49, %52, %cst_24 {dimension_numbers = #tpu.dot_dimension_numbers<[1], [0], [0], [1], [0, 0, 1, 1], [], []>} : vector<8x256xbf16>, vector<256x128xbf16>, vector<8x128xf32> -> vector<8x128xf32>
    %c0_25 = arith.constant 0 : index
    %c0_26 = arith.constant 0 : index
    %54 = vector.load %arg15[%c0_25, %c0_26] : memref<1x128xf32, #tpu.memory_space<vmem>>, vector<1x128xf32>
    %55 = vector.broadcast %54 : vector<1x128xf32> to vector<8x128xf32>
    %56 = arith.addf %53, %55 : vector<8x128xf32>
    %cst_27 = arith.constant 0.000000e+00 : f32
    %57 = vector.broadcast %cst_27 : f32 to vector<8x128xf32>
    %58 = arith.maximumf %56, %57 : vector<8x128xf32>
    %c4_i32_28 = arith.constant 4 : i32
    %59 = tpu.memref_slice %arg33[%c4_i32_28] : memref<9x!tpu.dma_semaphore, #tpu.memory_space<semaphore_mem>> -> memref<1x!tpu.dma_semaphore, #tpu.memory_space<semaphore_mem>>
    %60 = tpu.memref_squeeze %59 : memref<1x!tpu.dma_semaphore, #tpu.memory_space<semaphore_mem>> -> memref<!tpu.dma_semaphore, #tpu.memory_space<semaphore_mem>>
    tpu.wait_dma2 semaphore(%60 : memref<!tpu.dma_semaphore, #tpu.memory_space<semaphore_mem>>) src(%arg7 : memref<256x128xbf16, #tpu.memory_space<any>>) dst(%arg28 : memref<256x128xbf16, #tpu.memory_space<vmem>>)
    %c0_29 = arith.constant 0 : index
    %c0_30 = arith.constant 0 : index
    %61 = vector.load %arg28[%c0_29, %c0_30] : memref<256x128xbf16, #tpu.memory_space<vmem>>, vector<256x128xbf16>
    %c0_31 = arith.constant 0 : index
    %c0_32 = arith.constant 0 : index
    %62 = vector.load %arg1[%c0_31, %c0_32] : memref<8x128xf32, #tpu.memory_space<vmem>>, vector<8x128xf32>
    %63 = tpu.concatenate %58, %62 in 1 : vector<8x128xf32>, vector<8x128xf32> -> vector<8x256xf32>
    %64 = arith.truncf %63 : vector<8x256xf32> to vector<8x256xbf16>
    %cst_33 = arith.constant dense<0.000000e+00> : vector<8x128xf32>
    %65 = tpu.matmul %64, %61, %cst_33 {dimension_numbers = #tpu.dot_dimension_numbers<[1], [0], [0], [1], [0, 0, 1, 1], [], []>} : vector<8x256xbf16>, vector<256x128xbf16>, vector<8x128xf32> -> vector<8x128xf32>
    %c0_34 = arith.constant 0 : index
    %c0_35 = arith.constant 0 : index
    %66 = vector.load %arg16[%c0_34, %c0_35] : memref<1x128xf32, #tpu.memory_space<vmem>>, vector<1x128xf32>
    %67 = vector.broadcast %66 : vector<1x128xf32> to vector<8x128xf32>
    %68 = arith.addf %65, %67 : vector<8x128xf32>
    %cst_36 = arith.constant 0.000000e+00 : f32
    %69 = vector.broadcast %cst_36 : f32 to vector<8x128xf32>
    %70 = arith.maximumf %68, %69 : vector<8x128xf32>
    %c0_37 = arith.constant 0 : index
    %c0_38 = arith.constant 0 : index
    %71 = vector.load %arg2[%c0_37, %c0_38] : memref<8x128xf32, #tpu.memory_space<vmem>>, vector<8x128xf32>
    %72 = tpu.concatenate %70, %71 in 1 : vector<8x128xf32>, vector<8x128xf32> -> vector<8x256xf32>
    %73 = arith.truncf %72 : vector<8x256xf32> to vector<8x256xbf16>
    %cst_39 = arith.constant dense<0.000000e+00> : vector<8x128xf32>
    %74 = tpu.matmul %73, %61, %cst_39 {dimension_numbers = #tpu.dot_dimension_numbers<[1], [0], [0], [1], [0, 0, 1, 1], [], []>} : vector<8x256xbf16>, vector<256x128xbf16>, vector<8x128xf32> -> vector<8x128xf32>
    %c0_40 = arith.constant 0 : index
    %c0_41 = arith.constant 0 : index
    %75 = vector.load %arg16[%c0_40, %c0_41] : memref<1x128xf32, #tpu.memory_space<vmem>>, vector<1x128xf32>
    %76 = vector.broadcast %75 : vector<1x128xf32> to vector<8x128xf32>
    %77 = arith.addf %74, %76 : vector<8x128xf32>
    %cst_42 = arith.constant 0.000000e+00 : f32
    %78 = vector.broadcast %cst_42 : f32 to vector<8x128xf32>
    %79 = arith.maximumf %77, %78 : vector<8x128xf32>
    %80 = arith.truncf %79 : vector<8x128xf32> to vector<8x128xbf16>
    %c5_i32_43 = arith.constant 5 : i32
    %81 = tpu.memref_slice %arg33[%c5_i32_43] : memref<9x!tpu.dma_semaphore, #tpu.memory_space<semaphore_mem>> -> memref<1x!tpu.dma_semaphore, #tpu.memory_space<semaphore_mem>>
    %82 = tpu.memref_squeeze %81 : memref<1x!tpu.dma_semaphore, #tpu.memory_space<semaphore_mem>> -> memref<!tpu.dma_semaphore, #tpu.memory_space<semaphore_mem>>
    tpu.wait_dma2 semaphore(%82 : memref<!tpu.dma_semaphore, #tpu.memory_space<semaphore_mem>>) src(%arg8 : memref<128x256xbf16, #tpu.memory_space<any>>) dst(%arg29 : memref<128x256xbf16, #tpu.memory_space<vmem>>)
    %c0_44 = arith.constant 0 : index
    %c0_45 = arith.constant 0 : index
    %83 = vector.load %arg29[%c0_44, %c0_45] : memref<128x256xbf16, #tpu.memory_space<vmem>>, vector<128x256xbf16>
    %cst_46 = arith.constant dense<0.000000e+00> : vector<8x256xf32>
    %84 = tpu.matmul %80, %83, %cst_46 {dimension_numbers = #tpu.dot_dimension_numbers<[1], [0], [0], [1], [0, 0, 1, 1], [], []>} : vector<8x128xbf16>, vector<128x256xbf16>, vector<8x256xf32> -> vector<8x256xf32>
    %c0_47 = arith.constant 0 : index
    %c0_48 = arith.constant 0 : index
    %85 = vector.load %arg17[%c0_47, %c0_48] : memref<1x256xf32, #tpu.memory_space<vmem>>, vector<1x256xf32>
    %86 = vector.broadcast %85 : vector<1x256xf32> to vector<8x256xf32>
    %87 = arith.addf %84, %86 : vector<8x256xf32>
    %cst_49 = arith.constant 0.000000e+00 : f32
    %88 = vector.broadcast %cst_49 : f32 to vector<8x256xf32>
    %89 = arith.maximumf %87, %88 : vector<8x256xf32>
    %90 = arith.truncf %89 : vector<8x256xf32> to vector<8x256xbf16>
    %c6_i32_50 = arith.constant 6 : i32
    %91 = tpu.memref_slice %arg33[%c6_i32_50] : memref<9x!tpu.dma_semaphore, #tpu.memory_space<semaphore_mem>> -> memref<1x!tpu.dma_semaphore, #tpu.memory_space<semaphore_mem>>
    %92 = tpu.memref_squeeze %91 : memref<1x!tpu.dma_semaphore, #tpu.memory_space<semaphore_mem>> -> memref<!tpu.dma_semaphore, #tpu.memory_space<semaphore_mem>>
    tpu.wait_dma2 semaphore(%92 : memref<!tpu.dma_semaphore, #tpu.memory_space<semaphore_mem>>) src(%arg9 : memref<256x512xbf16, #tpu.memory_space<any>>) dst(%arg30 : memref<256x512xbf16, #tpu.memory_space<vmem>>)
    %c0_51 = arith.constant 0 : index
    %c0_52 = arith.constant 0 : index
    %93 = vector.load %arg30[%c0_51, %c0_52] : memref<256x512xbf16, #tpu.memory_space<vmem>>, vector<256x512xbf16>
    %cst_53 = arith.constant dense<0.000000e+00> : vector<8x512xf32>
    %94 = tpu.matmul %90, %93, %cst_53 {dimension_numbers = #tpu.dot_dimension_numbers<[1], [0], [0], [1], [0, 0, 1, 1], [], []>} : vector<8x256xbf16>, vector<256x512xbf16>, vector<8x512xf32> -> vector<8x512xf32>
    %c0_54 = arith.constant 0 : index
    %c0_55 = arith.constant 0 : index
    %95 = vector.load %arg18[%c0_54, %c0_55] : memref<1x512xf32, #tpu.memory_space<vmem>>, vector<1x512xf32>
    %96 = vector.broadcast %95 : vector<1x512xf32> to vector<8x512xf32>
    %97 = arith.addf %94, %96 : vector<8x512xf32>
    %cst_56 = arith.constant 0.000000e+00 : f32
    %98 = vector.broadcast %cst_56 : f32 to vector<8x512xf32>
    %99 = arith.maximumf %97, %98 : vector<8x512xf32>
    %100 = arith.truncf %99 : vector<8x512xf32> to vector<8x512xbf16>
    %c7_i32_57 = arith.constant 7 : i32
    %101 = tpu.memref_slice %arg33[%c7_i32_57] : memref<9x!tpu.dma_semaphore, #tpu.memory_space<semaphore_mem>> -> memref<1x!tpu.dma_semaphore, #tpu.memory_space<semaphore_mem>>
    %102 = tpu.memref_squeeze %101 : memref<1x!tpu.dma_semaphore, #tpu.memory_space<semaphore_mem>> -> memref<!tpu.dma_semaphore, #tpu.memory_space<semaphore_mem>>
    tpu.wait_dma2 semaphore(%102 : memref<!tpu.dma_semaphore, #tpu.memory_space<semaphore_mem>>) src(%arg10 : memref<512x1024xbf16, #tpu.memory_space<any>>) dst(%arg31 : memref<512x1024xbf16, #tpu.memory_space<vmem>>)
    %c0_58 = arith.constant 0 : index
    %c0_59 = arith.constant 0 : index
    %103 = vector.load %arg31[%c0_58, %c0_59] : memref<512x1024xbf16, #tpu.memory_space<vmem>>, vector<512x1024xbf16>
    %cst_60 = arith.constant dense<0.000000e+00> : vector<8x1024xf32>
    %104 = tpu.matmul %100, %103, %cst_60 {dimension_numbers = #tpu.dot_dimension_numbers<[1], [0], [0], [1], [0, 0, 1, 1], [], []>} : vector<8x512xbf16>, vector<512x1024xbf16>, vector<8x1024xf32> -> vector<8x1024xf32>
    %c0_61 = arith.constant 0 : index
    %c0_62 = arith.constant 0 : index
    %105 = vector.load %arg19[%c0_61, %c0_62] : memref<1x1024xf32, #tpu.memory_space<vmem>>, vector<1x1024xf32>
    %106 = vector.broadcast %105 : vector<1x1024xf32> to vector<8x1024xf32>
    %107 = arith.addf %104, %106 : vector<8x1024xf32>
    %cst_63 = arith.constant 0.000000e+00 : f32
    %108 = vector.broadcast %cst_63 : f32 to vector<8x1024xf32>
    %109 = arith.maximumf %107, %108 : vector<8x1024xf32>
    %110 = arith.truncf %109 : vector<8x1024xf32> to vector<8x1024xbf16>
    %c8_i32_64 = arith.constant 8 : i32
    %111 = tpu.memref_slice %arg33[%c8_i32_64] : memref<9x!tpu.dma_semaphore, #tpu.memory_space<semaphore_mem>> -> memref<1x!tpu.dma_semaphore, #tpu.memory_space<semaphore_mem>>
    %112 = tpu.memref_squeeze %111 : memref<1x!tpu.dma_semaphore, #tpu.memory_space<semaphore_mem>> -> memref<!tpu.dma_semaphore, #tpu.memory_space<semaphore_mem>>
    tpu.wait_dma2 semaphore(%112 : memref<!tpu.dma_semaphore, #tpu.memory_space<semaphore_mem>>) src(%arg11 : memref<1024x512xbf16, #tpu.memory_space<any>>) dst(%arg32 : memref<1024x512xbf16, #tpu.memory_space<vmem>>)
    %c0_65 = arith.constant 0 : index
    %c0_66 = arith.constant 0 : index
    %113 = vector.load %arg32[%c0_65, %c0_66] : memref<1024x512xbf16, #tpu.memory_space<vmem>>, vector<1024x512xbf16>
    %cst_67 = arith.constant dense<0.000000e+00> : vector<8x512xf32>
    %114 = tpu.matmul %110, %113, %cst_67 {dimension_numbers = #tpu.dot_dimension_numbers<[1], [0], [0], [1], [0, 0, 1, 1], [], []>} : vector<8x1024xbf16>, vector<1024x512xbf16>, vector<8x512xf32> -> vector<8x512xf32>
    %c0_68 = arith.constant 0 : index
    %c0_69 = arith.constant 0 : index
    %115 = vector.load %arg20[%c0_68, %c0_69] : memref<1x512xf32, #tpu.memory_space<vmem>>, vector<1x512xf32>
    %116 = vector.broadcast %115 : vector<1x512xf32> to vector<8x512xf32>
    %117 = arith.addf %114, %116 : vector<8x512xf32>
    %cst_70 = arith.constant 0.000000e+00 : f32
    %118 = vector.broadcast %cst_70 : f32 to vector<8x512xf32>
    %119 = arith.maximumf %117, %118 : vector<8x512xf32>
    %c0_71 = arith.constant 0 : index
    %c0_72 = arith.constant 0 : index
    %120 = vector.load %arg21[%c0_71, %c0_72] : memref<8x512xf32, #tpu.memory_space<vmem>>, vector<8x512xf32>
    tpu.vector_store %arg21[%c0_71, %c0_72], %119 {strides = array<i32>} : memref<8x512xf32, #tpu.memory_space<vmem>>, vector<8x512xf32>,
    %c0_73 = arith.constant 0 : index
    %c0_74 = arith.constant 0 : index
    %121 = vector.load %arg22[%c0_73, %c0_74] : memref<8x128xf32, #tpu.memory_space<vmem>>, vector<8x128xf32>
    tpu.vector_store %arg22[%c0_73, %c0_74], %70 {strides = array<i32>} : memref<8x128xf32, #tpu.memory_space<vmem>>, vector<8x128xf32>,
    %c0_75 = arith.constant 0 : index
    %c0_76 = arith.constant 0 : index
    %122 = vector.load %arg23[%c0_75, %c0_76] : memref<8x128xf32, #tpu.memory_space<vmem>>, vector<8x128xf32>
    tpu.vector_store %arg23[%c0_75, %c0_76], %79 {strides = array<i32>} : memref<8x128xf32, #tpu.memory_space<vmem>>, vector<8x128xf32>,
    return
  }
}

</mosaic_0001>

<bundles_post_ra>
// kernel: tpu_custom_call.1
= control target key start
LH: loop header
LB: loop body
LE: loop exit
PB: predicated region body
PF: predicated region fallthrough
CT: control target
= control target key end

     0   :  { %s16949_s0 = inlined_call_operand.hbm [shape: f32[8,512], index: 0, kind: input, shape index: {}]   ;;  %s16950_s1 = inlined_call_operand.hbm [shape: f32[8,128], index: 1, kind: input, shape index: {}]   ;;  %s16951_s2 = inlined_call_operand.hbm [shape: f32[8,128], index: 2, kind: input, shape index: {}]   ;;  %s16952_s3 = inlined_call_operand.hbm [shape: bf16[512,1024], index: 3, kind: input, shape index: {}]   ;;  %s16953_s4 = inlined_call_operand.hbm [shape: bf16[1024,512], index: 4, kind: input, shape index: {}]   ;;  %s16954_s5 = inlined_call_operand.hbm [shape: bf16[512,256], index: 5, kind: input, shape index: {}]   ;;  %s16955_s6 = inlined_call_operand.hbm [shape: bf16[256,128], index: 6, kind: input, shape index: {}]   ;;  %s16956_s7 = inlined_call_operand.hbm [shape: bf16[256,128], index: 7, kind: input, shape index: {}]   ;;  %s16957_s8 = inlined_call_operand.hbm [shape: bf16[128,256], index: 8, kind: input, shape index: {}]   ;;  %s16958_s9 = inlined_call_operand.hbm [shape: bf16[256,512], index: 9, kind: input, shape index: {}]   ;;  %s16959_s10 = inlined_call_operand.hbm [shape: bf16[512,1024], index: 10, kind: input, shape index: {}]   ;;  %s16960_s11 = inlined_call_operand.hbm [shape: bf16[1024,512], index: 11, kind: input, shape index: {}]   ;;  %s16961_s12 = inlined_call_operand.vmem [shape: f32[1,1024], index: 12, kind: input, shape index: {}]   ;;  %s16962_s13 = inlined_call_operand.hbm [shape: f32[1,512], index: 13, kind: input, shape index: {}]   ;;  %s16963_s14 = inlined_call_operand.hbm [shape: f32[1,256], index: 14, kind: input, shape index: {}]   ;;  %s16964_s15 = inlined_call_operand.hbm [shape: f32[1,128], index: 15, kind: input, shape index: {}]   ;;  %s16965_s16 = inlined_call_operand.hbm [shape: f32[1,128], index: 16, kind: input, shape index: {}]   ;;  %s16966_s17 = inlined_call_operand.hbm [shape: f32[1,256], index: 17, kind: input, shape index: {}]   ;;  %s16967_s18 = inlined_call_operand.hbm [shape: f32[1,512], index: 18, kind: input, shape index: {}]   ;;  %s16968_s19 = inlined_call_operand.vmem [shape: f32[1,1024], index: 19, kind: input, shape index: {}]   ;;  %s16969_s20 = inlined_call_operand.hbm [shape: f32[1,512], index: 20, kind: input, shape index: {}]   ;;  %s16970_s21 = inlined_call_operand.hbm [shape: f32[8,512], index: 21, kind: output, shape index: {0}]   ;;  %s16971_s22 = inlined_call_operand.hbm [shape: f32[8,128], index: 22, kind: output, shape index: {1}]   ;;  %s16972_s23 = inlined_call_operand.hbm [shape: f32[8,128], index: 23, kind: output, shape index: {2}]  }
   0x1   :  { %16973 = sst [smem:[#allocation70_spill]] %s16949_s0 }
   0x2   :  { %16974 = sst [smem:[#allocation71_spill]] %s16950_s1 }
   0x3   :  { %16975 = sst [smem:[#allocation72_spill]] %s16951_s2 }
   0x4   :  { %16976 = sst [smem:[#allocation73_spill]] %s16952_s3 }
   0x5   :  { %16977 = sst [smem:[#allocation74_spill]] %s16953_s4 }
   0x6   :  { %16978 = sst [smem:[#allocation75_spill]] %s16954_s5 }
   0x7   :  { %16979 = sst [smem:[#allocation76_spill]] %s16955_s6 }
   0x8   :  { %16980 = sst [smem:[#allocation77_spill]] %s16956_s7 }
   0x9   :  { %29 = vsyncpa [#allocation13], 0 }
   0xa   :  { %30 = vsyncpa [#allocation16], 0 }
   0xb   :  { %31 = vsyncpa [#allocation19], 0 }
   0xc   :  { %32 = vsyncpa [#allocation22], 0 }
   0xd   :  { %33 = vsyncpa [#allocation25], 0 }
   0xe   :  { %34 = vsyncpa [#allocation28], 0 }
   0xf   :  { %35 = vsyncpa [#allocation14], 0  ;;  %s16981_s24 = sld [smem:[#allocation71_spill]] }
  0x15   :  { %s53_s25 = sshll.u32 %s16981_s24, 4  ;;  %s54_s25 = int_to_ptr.hbm [resolvable:$true] %s53_s25 }
  0x16   :  { %36 = vsyncpa [#allocation31], 0  ;;  %s16464_s5 = smov [#allocation15]   ;;  %s77_s6 = sshll.u32 %s16962_s13, 4  ;;  %s78_s6 = int_to_ptr.hbm [resolvable:$true] %s77_s6 }
  0x17   :  { %s55_s1 = sshll.u32 %s16464_s5, 4  ;;  %s16465_s27 = smov [#allocation18]   ;;  %s56_s1 = int_to_ptr.vmem [resolvable:$true] %s55_s1 }
  0x18   :  { %58 = dma.hbm_to_vmem [thread:$0]  %s54_s25, 128, %s56_s1, [#allocation16]  }
  0x19   :  { %s79_s7 = sshll.u32 %s16465_s27, 4  ;;  %s99_s3 = sshll.u32 %s16964_s15, 4  ;;  %s80_s7 = int_to_ptr.vmem [resolvable:$true] %s79_s7  ;;  %s100_s3 = int_to_ptr.hbm [resolvable:$true] %s99_s3 }
  0x1a   :  { %82 = dma.hbm_to_vmem [thread:$0]  %s78_s6, 64, %s80_s7, [#allocation19]  }
  0x1b   :  { %s121_s30 = sshll.u32 %s16966_s17, 4  ;;  %s16466_s24 = smov [#allocation21]   ;;  %s122_s30 = int_to_ptr.hbm [resolvable:$true] %s121_s30 }
  0x1c   :  { %s101_s5 = sshll.u32 %s16466_s24, 4  ;;  %s16467_s13 = smov [#allocation24]   ;;  %s102_s5 = int_to_ptr.vmem [resolvable:$true] %s101_s5 }
  0x1d   :  { %104 = dma.hbm_to_vmem [thread:$0]  %s100_s3, 16, %s102_s5, [#allocation22]  }
  0x1e   :  { %s123_s25 = sshll.u32 %s16467_s13, 4  ;;  %s16982_s2 = sld [smem:[#allocation70_spill]]  ;;  %s124_s25 = int_to_ptr.vmem [resolvable:$true] %s123_s25 }
  0x1f   :  { %126 = dma.hbm_to_vmem [thread:$0]  %s122_s30, 32, %s124_s25, [#allocation25]  }
  0x20   :  { %s16983_s7 = sld [smem:[#allocation72_spill]]  ;;  %s16468_s29 = smov [#allocation12]  }
  0x21   :  { %s44_s17 = sshll.u32 %s16468_s29, 4  ;;  %s16469_s0 = smov [#allocation17]   ;;  %s45_s17 = int_to_ptr.vmem [resolvable:$true] %s44_s17 }
  0x22   :  { %s66_s3 = sshll.u32 %s16469_s0, 4  ;;  %s88_s5 = sshll.u32 %s16963_s14, 4  ;;  %s67_s3 = int_to_ptr.vmem [resolvable:$true] %s66_s3  ;;  %s89_s5 = int_to_ptr.hbm [resolvable:$true] %s88_s5 }
  0x23   :  { %s110_s25 = sshll.u32 %s16965_s16, 4  ;;  %s16470_s1 = smov [#allocation20]   ;;  %s111_s25 = int_to_ptr.hbm [resolvable:$true] %s110_s25 }
  0x24   :  { %s42_s27 = sshll.u32 %s16982_s2, 4  ;;  %s90_s26 = sshll.u32 %s16470_s1, 4  ;;  %s43_s27 = int_to_ptr.hbm [resolvable:$true] %s42_s27  ;;  %s91_s26 = int_to_ptr.vmem [resolvable:$true] %s90_s26 }
  0x25   :  { %47 = dma.hbm_to_vmem [thread:$0]  %s43_s27, 512, %s45_s17, [#allocation13]  }
  0x26   :  { %s64_s28 = sshll.u32 %s16983_s7, 4  ;;  %s16471_s2 = smov [#allocation23]   ;;  %s65_s28 = int_to_ptr.hbm [resolvable:$true] %s64_s28 }
  0x27   :  { %69 = dma.hbm_to_vmem [thread:$0]  %s65_s28, 128, %s67_s3, [#allocation16]  }
  0x28   :  { %93 = dma.hbm_to_vmem [thread:$0]  %s89_s5, 32, %s91_s26, [#allocation19]  }
  0x29   :  { %s112_s27 = sshll.u32 %s16471_s2, 4  ;;  %s132_s7 = sshll.u32 %s16967_s18, 4  ;;  %s113_s27 = int_to_ptr.vmem [resolvable:$true] %s112_s27  ;;  %s133_s7 = int_to_ptr.hbm [resolvable:$true] %s132_s7 }
  0x2a   :  { %115 = dma.hbm_to_vmem [thread:$0]  %s111_s25, 16, %s113_s27, [#allocation22]  }
  0x2b   :  { %s145_s29 = sshll.u32 %s16969_s20, 4  ;;  %s16472_s17 = smov [#allocation26]   ;;  %s146_s29 = int_to_ptr.hbm [resolvable:$true] %s145_s29 }
  0x2c   :  { %s134_s16 = sshll.u32 %s16472_s17, 4  ;;  %s16473_s0 = smov [#allocation27]   ;;  %s135_s16 = int_to_ptr.vmem [resolvable:$true] %s134_s16 }
  0x2d   :  { %137 = dma.hbm_to_vmem [thread:$0]  %s133_s7, 64, %s135_s16, [#allocation25]  }
  0x2e   :  { %s147_s3 = sshll.u32 %s16473_s0, 4  ;;  %s148_s3 = int_to_ptr.vmem [resolvable:$true] %s147_s3 }
  0x2f   :  { %150 = dma.hbm_to_vmem [thread:$0]  %s146_s29, 64, %s148_s3, [#allocation28]  }
  0x30   :  { %16430 = dma.done.wait [#allocation13], 512  }
  0x31   :  { %16431 = vsyncadd [#allocation13], 4294966784 }
  0x32   :  { %16432 = dma.done.wait [#allocation16], 256  }
  0x33   :  { %16433 = vsyncadd [#allocation16], 4294967040 }
  0x34   :  { %16434 = dma.done.wait [#allocation19], 96  }
  0x35   :  { %16435 = vsyncadd [#allocation19], 4294967200 }
  0x36   :  { %16436 = dma.done.wait [#allocation22], 32  }
  0x37   :  { %16437 = vsyncadd [#allocation22], 4294967264 }
  0x38   :  { %16438 = dma.done.wait [#allocation25], 96  }
  0x39   :  { %16439 = vsyncadd [#allocation25], 4294967200 }
  0x3a   :  { %16440 = dma.done.wait [#allocation28], 64  }
  0x3b   :  { %16441 = vsyncadd [#allocation28], 4294967232  ;;  %s16984_s4 = sld [smem:[#allocation73_spill]]  ;;  %s16474_s5 = smov [#allocation2]   ;;  %v316_v0 = vld [vmem:[#allocation12] sm:$0xff]  ;;  %v317_v1 = vld [vmem:[#allocation12 + $0x8] sm:$0xff] }
  0x3c   :  { %s200_s13 = sshll.u32 %s16474_s5, 4  ;;  %s16985_s1 = sld [smem:[#allocation74_spill]]  ;;  %v318_v2 = vld [vmem:[#allocation12 + $0x10] sm:$0xff]  ;;  %v319_v3 = vld [vmem:[#allocation12 + $0x18] sm:$0xff]  ;;  %v16645_v4 = vpack.c.bf16 %v316_v0, %v316_v0  ;;  %v16647_v5 = vpack.c.bf16 %v317_v1, %v317_v1  ;;  %s201_s13 = int_to_ptr.vmem [resolvable:$true] %s200_s13 }
  0x3d   :  { %s16475_s2 = smov [#allocation3]   ;;  %s16986_s7 = sld [smem:[#allocation75_spill]]  ;;  %v16649_v6 = vpack.c.bf16 %v318_v2, %v318_v2  ;;  %v16654_v7 = vpack.c.bf16 %v319_v3, %v319_v3 }
  0x3e   :  { %s214_s27 = sshll.u32 %s16475_s2, 4  ;;  %s16987_s17 = sld [smem:[#allocation76_spill]]  ;;  %s215_s27 = int_to_ptr.vmem [resolvable:$true] %s214_s27 }
  0x3f   :  { %s16476_s0 = smov [#allocation4]   ;;  %s16477_s18 = smov [#allocation5]  }
  0x40   :  { %s228_s3 = sshll.u32 %s16476_s0, 4  ;;  %s242_s20 = sshll.u32 %s16477_s18, 4  ;;  %s229_s3 = int_to_ptr.vmem [resolvable:$true] %s228_s3  ;;  %s243_s20 = int_to_ptr.vmem [resolvable:$true] %s242_s20 }
  0x41   :  { %s198_s24 = sshll.u32 %s16984_s4, 4  ;;  %s16988_s5 = sld [smem:[#allocation77_spill]]  ;;  %s199_s24 = int_to_ptr.hbm [resolvable:$true] %s198_s24 }
  0x42   :  { %s212_s26 = sshll.u32 %s16985_s1, 4  ;;  %s268_s1 = sshll.u32 %s16957_s8, 4  ;;  %s213_s26 = int_to_ptr.hbm [resolvable:$true] %s212_s26  ;;  %s269_s1 = int_to_ptr.hbm [resolvable:$true] %s268_s1 }
  0x43   :  { %203 = dma.hbm_to_vmem [thread:$0]  %s199_s24, 32768, %s201_s13, [#allocation11] }
  0x44   :  { %s226_s14 = sshll.u32 %s16986_s7, 4  ;;  %s240_s16 = sshll.u32 %s16987_s17, 4  ;;  %s227_s14 = int_to_ptr.hbm [resolvable:$true] %s226_s14  ;;  %s241_s16 = int_to_ptr.hbm [resolvable:$true] %s240_s16 }
  0x45   :  { %217 = dma.hbm_to_vmem [thread:$0]  %s213_s26, 32768, %s215_s27, [#allocation11 + $0x1] }
  0x46   :  { %231 = dma.hbm_to_vmem [thread:$0]  %s227_s14, 8192, %s229_s3, [#allocation11 + $0x2] }
  0x47   :  { %s254_s13 = sshll.u32 %s16988_s5, 4  ;;  %s16478_s26 = smov [#allocation6]   ;;  %s255_s13 = int_to_ptr.hbm [resolvable:$true] %s254_s13 }
  0x48   :  { %245 = dma.hbm_to_vmem [thread:$0]  %s241_s16, 2048, %s243_s20, [#allocation11 + $0x3] }
  0x49   :  { %s256_s2 = sshll.u32 %s16478_s26, 4  ;;  %s16479_s27 = smov [#allocation7]   ;;  %s257_s2 = int_to_ptr.vmem [resolvable:$true] %s256_s2 }
  0x4a   :  { %259 = dma.hbm_to_vmem [thread:$0]  %s255_s13, 2048, %s257_s2, [#allocation11 + $0x4] }
  0x4b   :  { %s270_s15 = sshll.u32 %s16479_s27, 4  ;;  %s282_s14 = sshll.u32 %s16958_s9, 4  ;;  %s271_s15 = int_to_ptr.vmem [resolvable:$true] %s270_s15  ;;  %s283_s14 = int_to_ptr.hbm [resolvable:$true] %s282_s14 }
  0x4c   :  { %273 = dma.hbm_to_vmem [thread:$0]  %s269_s1, 2048, %s271_s15, [#allocation11 + $0x5] }
  0x4d   :  { %s296_s17 = sshll.u32 %s16959_s10, 4  ;;  %s16480_s16 = smov [#allocation8]   ;;  %s297_s17 = int_to_ptr.hbm [resolvable:$true] %s296_s17 }
  0x4e   :  { %s284_s8 = sshll.u32 %s16480_s16, 4  ;;  %s16481_s0 = smov [#allocation9]   ;;  %s285_s8 = int_to_ptr.vmem [resolvable:$true] %s284_s8 }
  0x4f   :  { %287 = dma.hbm_to_vmem [thread:$0]  %s283_s14, 8192, %s285_s8, [#allocation11 + $0x6] }
  0x50   :  { %s298_s3 = sshll.u32 %s16481_s0, 4  ;;  %s310_s4 = sshll.u32 %s16960_s11, 4  ;;  %s299_s3 = int_to_ptr.vmem [resolvable:$true] %s298_s3  ;;  %s311_s4 = int_to_ptr.hbm [resolvable:$true] %s310_s4 }
  0x51   :  { %301 = dma.hbm_to_vmem [thread:$0]  %s297_s17, 32768, %s299_s3, [#allocation11 + $0x7] }
  0x52   :  { %s16482_s9 = smov [#allocation10]  }
  0x53   :  { %s312_s24 = sshll.u32 %s16482_s9, 4  ;;  %s313_s24 = int_to_ptr.vmem [resolvable:$true] %s312_s24 }
  0x54   :  { %315 = dma.hbm_to_vmem [thread:$0]  %s311_s4, 32768, %s313_s24, [#allocation11 + $0x8] }
  0x55   :  { %16442 = dma.done.wait [#allocation11], 32768 }
  0x56   :  { %16443 = vsyncadd [#allocation11], 4294934528  ;;  %v10095_v8 = vld [vmem:[#allocation2 + $0x1c0] sm:$0xf] }
  0x57   :  { %v14738_v9 = vld [vmem:[#allocation2 + $0x1dc] sm:$0xf0] }
  0x58   :  { %v10351_v10 = vld [vmem:[#allocation2 + $0x3c0] sm:$0xf]  ;;  %v10096_v11 = vor.u32 %v14738_v9, %v10095_v8 }
  0x59   :  { %v14802_v12 = vld [vmem:[#allocation2 + $0x3dc] sm:$0xf0] }
  0x5a   :  { %v10607_v13 = vld [vmem:[#allocation2 + $0x5c0] sm:$0xf]  ;;  %v10352_v15 = vor.u32 %v14802_v12, %v10351_v10  ;;  %1882 = vmatpush.bf16.msra.mxu0 %v10096_v11 }
  0x5b   :  { %v14866_v14 = vld [vmem:[#allocation2 + $0x5dc] sm:$0xf0] }
  0x5c   :  { %v10608_v16 = vor.u32 %v14866_v14, %v10607_v13  ;;  %v10863_v17 = vld [vmem:[#allocation2 + $0x7c0] sm:$0xf]  ;;  %1895 = vmatpush.bf16.msra.mxu1 %v10352_v15 }
  0x5d   :  { %v14930_v18 = vld [vmem:[#allocation2 + $0x7dc] sm:$0xf0] }
  0x5e   :  { %v10063_v19 = vld [vmem:[#allocation2 + $0x180] sm:$0xf]  ;;  %v10864_v20 = vor.u32 %v14930_v18, %v10863_v17  ;;  %1908 = vmatpush.bf16.msra.mxu2 %v10608_v16 }
  0x5f   :  { %v14730_v21 = vld [vmem:[#allocation2 + $0x19c] sm:$0xf0] }
  0x60   :  { %v10319_v22 = vld [vmem:[#allocation2 + $0x380] sm:$0xf]  ;;  %v10064_v24 = vor.u32 %v14730_v21, %v10063_v19  ;;  %1921 = vmatpush.bf16.msra.mxu3 %v10864_v20 }
  0x61   :  { %v14794_v23 = vld [vmem:[#allocation2 + $0x39c] sm:$0xf0] }
  0x62   :  { %v10320_v25 = vor.u32 %v14794_v23, %v10319_v22  ;;  %v10575_v26 = vld [vmem:[#allocation2 + $0x580] sm:$0xf]  ;;  %1883 = vmatpush.bf16.msra.mxu0 %v10064_v24 }
  0x63   :  { %v14858_v27 = vld [vmem:[#allocation2 + $0x59c] sm:$0xf0] }
  0x64   :  { %v10831_v28 = vld [vmem:[#allocation2 + $0x780] sm:$0xf]  ;;  %v10576_v29 = vor.u32 %v14858_v27, %v10575_v26  ;;  %1896 = vmatpush.bf16.msra.mxu1 %v10320_v25 }
  0x65   :  { %v14922_v30 = vld [vmem:[#allocation2 + $0x79c] sm:$0xf0] }
  0x66   :  { %v10031_v31 = vld [vmem:[#allocation2 + $0x140] sm:$0xf]  ;;  %v10832_v33 = vor.u32 %v14922_v30, %v10831_v28  ;;  %1909 = vmatpush.bf16.msra.mxu2 %v10576_v29 }
  0x67   :  { %v14722_v32 = vld [vmem:[#allocation2 + $0x15c] sm:$0xf0] }
  0x68   :  { %v10287_v34 = vld [vmem:[#allocation2 + $0x340] sm:$0xf]  ;;  %v10032_v37 = vor.u32 %v14722_v32, %v10031_v31  ;;  %1922 = vmatpush.bf16.msra.mxu3 %v10832_v33 }
  0x69   :  { %v14786_v35 = vld [vmem:[#allocation2 + $0x35c] sm:$0xf0] }
  0x6a   :  { %v10543_v36 = vld [vmem:[#allocation2 + $0x540] sm:$0xf]  ;;  %v10288_v41 = vor.u32 %v14786_v35, %v10287_v34  ;;  %1884 = vmatpush.bf16.msra.mxu0 %v10032_v37 }
  0x6b   :  { %v14850_v38 = vld [vmem:[#allocation2 + $0x55c] sm:$0xf0] }
  0x6c   :  { %v10799_v39 = vld [vmem:[#allocation2 + $0x740] sm:$0xf]  ;;  %v10544_v42 = vor.u32 %v14850_v38, %v10543_v36  ;;  %1897 = vmatpush.bf16.msra.mxu1 %v10288_v41  ;;  %v10097_v41 = vld [vmem:[#allocation2 + $0x1e0] sm:$0xf0] }
  0x6d   :  { %v14914_v40 = vld [vmem:[#allocation2 + $0x75c] sm:$0xf0] }
  0x6e   :  { %v9999_v43 = vld [vmem:[#allocation2 + $0x100] sm:$0xf]  ;;  %v10800_v46 = vor.u32 %v14914_v40, %v10799_v39  ;;  %1910 = vmatpush.bf16.msra.mxu2 %v10544_v42  ;;  %v14734_v40 = vld [vmem:[#allocation2 + $0x1c4] sm:$0xf] }
  0x6f   :  { %v14714_v44 = vld [vmem:[#allocation2 + $0x11c] sm:$0xf0]  ;;  %v14798_v42 = vld [vmem:[#allocation2 + $0x3c4] sm:$0xf] }
  0x70   :  { %v10255_v45 = vld [vmem:[#allocation2 + $0x300] sm:$0xf]  ;;  %v10000_v52 = vor.u32 %v14714_v44, %v9999_v43  ;;  %1923 = vmatpush.bf16.msra.mxu3 %v10800_v46  ;;  %v10353_v44 = vld [vmem:[#allocation2 + $0x3e0] sm:$0xf0] }
  0x71   :  { %v14778_v47 = vld [vmem:[#allocation2 + $0x31c] sm:$0xf0]  ;;  %v10609_v46 = vld [vmem:[#allocation2 + $0x5e0] sm:$0xf0] }
  0x72   :  { %v10511_v48 = vld [vmem:[#allocation2 + $0x500] sm:$0xf]  ;;  %v10256_v53 = vor.u32 %v14778_v47, %v10255_v45  ;;  %1885 = vmatpush.bf16.msra.mxu0 %v10000_v52  ;;  %v14862_v45 = vld [vmem:[#allocation2 + $0x5c4] sm:$0xf]  ;;  %v10100_v52 = vor.u32 %v14734_v40, %v10097_v41 }
  0x73   :  { %v14842_v49 = vld [vmem:[#allocation2 + $0x51c] sm:$0xf0] }
  0x74   :  { %v10767_v50 = vld [vmem:[#allocation2 + $0x700] sm:$0xf]  ;;  %v10512_v54 = vor.u32 %v14842_v49, %v10511_v48  ;;  %1898 = vmatpush.bf16.msra.mxu1 %v10256_v53  ;;  %v14926_v49 = vld [vmem:[#allocation2 + $0x7c4] sm:$0xf]  ;;  %v10356_v53 = vor.u32 %v14798_v42, %v10353_v44 }
  0x75   :  { %v14906_v51 = vld [vmem:[#allocation2 + $0x71c] sm:$0xf0]  ;;  %v9937_v44 = vld [vmem:[#allocation2 + $0xa0] sm:$0xf0] }
  0x76   :  { %v9967_v55 = vld [vmem:[#allocation2 + $0xc0] sm:$0xf]  ;;  %v10768_v58 = vor.u32 %v14906_v51, %v10767_v50  ;;  %1911 = vmatpush.bf16.msra.mxu2 %v10512_v54  ;;  %v10865_v50 = vld [vmem:[#allocation2 + $0x7e0] sm:$0xf0]  ;;  %v10612_v54 = vor.u32 %v14862_v45, %v10609_v46 }
  0x77   :  { %v14706_v56 = vld [vmem:[#allocation2 + $0xdc] sm:$0xf0]  ;;  %v14758_v45 = vld [vmem:[#allocation2 + $0x284] sm:$0xf] }
  0x78   :  { %v10223_v57 = vld [vmem:[#allocation2 + $0x2c0] sm:$0xf]  ;;  %v9968_v0 = vor.u32 %v14706_v56, %v9967_v55  ;;  %1924 = vmatpush.bf16.msra.mxu3 %v10768_v58  ;;  %v14726_v55 = vld [vmem:[#allocation2 + $0x184] sm:$0xf]  ;;  %v10868_v58 = vor.u32 %v14926_v49, %v10865_v50 }
  0x79   :  { %v14770_v59 = vld [vmem:[#allocation2 + $0x2dc] sm:$0xf0]  ;;  %v10065_v56 = vld [vmem:[#allocation2 + $0x1a0] sm:$0xf0] }
  0x7a   :  { %v10479_v60 = vld [vmem:[#allocation2 + $0x4c0] sm:$0xf]  ;;  %v10224_v1 = vor.u32 %v14770_v59, %v10223_v57  ;;  %1886 = vmatpush.bf16.msra.mxu0 %v9968_v0  ;;  %v14790_v57 = vld [vmem:[#allocation2 + $0x384] sm:$0xf]  ;;  %v10068_v0 = vor.u32 %v14726_v55, %v10065_v56 }
  0x7b   :  { %v14834_v61 = vld [vmem:[#allocation2 + $0x4dc] sm:$0xf0]  ;;  %v10321_v59 = vld [vmem:[#allocation2 + $0x3a0] sm:$0xf0] }
  0x7c   :  { %v10735_v62 = vld [vmem:[#allocation2 + $0x6c0] sm:$0xf]  ;;  %v10480_v2 = vor.u32 %v14834_v61, %v10479_v60  ;;  %1899 = vmatpush.bf16.msra.mxu1 %v10224_v1  ;;  %v14854_v60 = vld [vmem:[#allocation2 + $0x584] sm:$0xf]  ;;  %v10324_v1 = vor.u32 %v14790_v57, %v10321_v59 }
  0x7d   :  { %v14898_v63 = vld [vmem:[#allocation2 + $0x6dc] sm:$0xf0]  ;;  %v10577_v61 = vld [vmem:[#allocation2 + $0x5a0] sm:$0xf0] }
  0x7e   :  { %v9935_v3 = vld [vmem:[#allocation2 + $0x80] sm:$0xf]  ;;  %v10736_v10 = vor.u32 %v14898_v63, %v10735_v62  ;;  %1912 = vmatpush.bf16.msra.mxu2 %v10480_v2  ;;  %v14918_v62 = vld [vmem:[#allocation2 + $0x784] sm:$0xf]  ;;  %v10580_v2 = vor.u32 %v14854_v60, %v10577_v61 }
  0x7f   :  { %v14698_v8 = vld [vmem:[#allocation2 + $0x9c] sm:$0xf0]  ;;  %v10833_v63 = vld [vmem:[#allocation2 + $0x7a0] sm:$0xf0] }
  0x80   :  { %v10191_v9 = vld [vmem:[#allocation2 + $0x280] sm:$0xf]  ;;  %v9936_v16 = vor.u32 %v14698_v8, %v9935_v3  ;;  %1925 = vmatpush.bf16.msra.mxu3 %v10736_v10  ;;  %v14718_v3 = vld [vmem:[#allocation2 + $0x144] sm:$0xf]  ;;  %v10836_v10 = vor.u32 %v14918_v62, %v10833_v63 }
  0x81   :  { %v14762_v11 = vld [vmem:[#allocation2 + $0x29c] sm:$0xf0]  ;;  %v10033_v8 = vld [vmem:[#allocation2 + $0x160] sm:$0xf0] }
  0x82   :  { %v10447_v12 = vld [vmem:[#allocation2 + $0x480] sm:$0xf]  ;;  %v10192_v17 = vor.u32 %v14762_v11, %v10191_v9  ;;  %1887 = vmatpush.bf16.msra.mxu0 %v9936_v16  ;;  %v14782_v9 = vld [vmem:[#allocation2 + $0x344] sm:$0xf]  ;;  %v10036_v16 = vor.u32 %v14718_v3, %v10033_v8 }
  0x83   :  { %v14826_v13 = vld [vmem:[#allocation2 + $0x49c] sm:$0xf0]  ;;  %v10289_v11 = vld [vmem:[#allocation2 + $0x360] sm:$0xf0] }
  0x84   :  { %v10703_v14 = vld [vmem:[#allocation2 + $0x680] sm:$0xf]  ;;  %v10448_v18 = vor.u32 %v14826_v13, %v10447_v12  ;;  %1900 = vmatpush.bf16.msra.mxu1 %v10192_v17  ;;  %v14846_v12 = vld [vmem:[#allocation2 + $0x544] sm:$0xf]  ;;  %v10292_v17 = vor.u32 %v14782_v9, %v10289_v11 }
  0x85   :  { %v14890_v15 = vld [vmem:[#allocation2 + $0x69c] sm:$0xf0]  ;;  %v10545_v13 = vld [vmem:[#allocation2 + $0x560] sm:$0xf0] }
  0x86   :  { %v9903_v19 = vld [vmem:[#allocation2 + $0x40] sm:$0xf]  ;;  %v10704_v22 = vor.u32 %v14890_v15, %v10703_v14  ;;  %1913 = vmatpush.bf16.msra.mxu2 %v10448_v18  ;;  %v14910_v14 = vld [vmem:[#allocation2 + $0x744] sm:$0xf]  ;;  %v10548_v18 = vor.u32 %v14846_v12, %v10545_v13 }
  0x87   :  { %v14690_v20 = vld [vmem:[#allocation2 + $0x5c] sm:$0xf0]  ;;  %v10801_v15 = vld [vmem:[#allocation2 + $0x760] sm:$0xf0] }
  0x88   :  { %v10159_v21 = vld [vmem:[#allocation2 + $0x240] sm:$0xf]  ;;  %v9904_v28 = vor.u32 %v14690_v20, %v9903_v19  ;;  %1926 = vmatpush.bf16.msra.mxu3 %v10704_v22  ;;  %v14710_v19 = vld [vmem:[#allocation2 + $0x104] sm:$0xf]  ;;  %v10804_v22 = vor.u32 %v14910_v14, %v10801_v15 }
  0x89   :  { %v14754_v23 = vld [vmem:[#allocation2 + $0x25c] sm:$0xf0]  ;;  %v10001_v20 = vld [vmem:[#allocation2 + $0x120] sm:$0xf0] }
  0x8a   :  { %v10415_v24 = vld [vmem:[#allocation2 + $0x440] sm:$0xf]  ;;  %v10160_v31 = vor.u32 %v14754_v23, %v10159_v21  ;;  %1888 = vmatpush.bf16.msra.mxu0 %v9904_v28  ;;  %v14774_v21 = vld [vmem:[#allocation2 + $0x304] sm:$0xf]  ;;  %v10004_v28 = vor.u32 %v14710_v19, %v10001_v20  ;;  %v14803_v20 = vld [vmem:[#allocation2 + $0x3e4] sm:$0xf0] }
  0x8b   :  { %v14818_v25 = vld [vmem:[#allocation2 + $0x45c] sm:$0xf0]  ;;  %v10257_v23 = vld [vmem:[#allocation2 + $0x320] sm:$0xf0] }
  0x8c   :  { %v10671_v26 = vld [vmem:[#allocation2 + $0x640] sm:$0xf]  ;;  %v10416_v32 = vor.u32 %v14818_v25, %v10415_v24  ;;  %1901 = vmatpush.bf16.msra.mxu1 %v10160_v31  ;;  %v14838_v24 = vld [vmem:[#allocation2 + $0x504] sm:$0xf] }
  0x8d   :  { %v14882_v27 = vld [vmem:[#allocation2 + $0x65c] sm:$0xf0]  ;;  %v10513_v25 = vld [vmem:[#allocation2 + $0x520] sm:$0xf0] }
  0x8e   :  { %v9871_v29 = vld [vmem:[#allocation2] sm:$0xf]  ;;  %v10672_v36 = vor.u32 %v14882_v27, %v10671_v26  ;;  %1914 = vmatpush.bf16.msra.mxu2 %v10416_v32  ;;  %v14902_v26 = vld [vmem:[#allocation2 + $0x704] sm:$0xf] }
  0x8f   :  { %v14682_v30 = vld [vmem:[#allocation2 + $0x1c] sm:$0xf0]  ;;  %v10769_v27 = vld [vmem:[#allocation2 + $0x720] sm:$0xf0] }
  0x90   :  { %v10127_v33 = vld [vmem:[#allocation2 + $0x200] sm:$0xf]  ;;  %v9872_v43 = vor.u32 %v14682_v30, %v9871_v29  ;;  %1927 = vmatpush.bf16.msra.mxu3 %v10672_v36  ;;  %v10260_v29 = vor.u32 %v14774_v21, %v10257_v23  ;;  %v10516_v30 = vor.u32 %v14838_v24, %v10513_v25  ;;  %v14702_v31 = vld [vmem:[#allocation2 + $0xc4] sm:$0xf]  ;;  %v10615_v21 = vld [vmem:[#allocation2 + $0x5c8] sm:$0xf] }
  0x91   :  { %v14746_v34 = vld [vmem:[#allocation2 + $0x21c] sm:$0xf0]  ;;  %v9969_v32 = vld [vmem:[#allocation2 + $0xe0] sm:$0xf0]  ;;  %v10871_v25 = vld [vmem:[#allocation2 + $0x7c8] sm:$0xf] }
  0x92   :  { %v10383_v35 = vld [vmem:[#allocation2 + $0x400] sm:$0xf]  ;;  %v10128_v47 = vor.u32 %v14746_v34, %v10127_v33  ;;  %1889 = vmatpush.bf16.msra.mxu0 %v9872_v43  ;;  %v14766_v33 = vld [vmem:[#allocation2 + $0x2c4] sm:$0xf]  ;;  %v10772_v34 = vor.u32 %v14902_v26, %v10769_v27  ;;  %v9972_v40 = vor.u32 %v14702_v31, %v9969_v32  ;;  %v14931_v26 = vld [vmem:[#allocation2 + $0x7e4] sm:$0xf0] }
  0x93   :  { %v14810_v37 = vld [vmem:[#allocation2 + $0x41c] sm:$0xf0]  ;;  %v14830_v36 = vld [vmem:[#allocation2 + $0x4c4] sm:$0xf]  ;;  %v10071_v31 = vld [vmem:[#allocation2 + $0x188] sm:$0xf] }
  0x94   :  { %v10639_v38 = vld [vmem:[#allocation2 + $0x600] sm:$0xf]  ;;  %v10384_v48 = vor.u32 %v14810_v37, %v10383_v35  ;;  %1902 = vmatpush.bf16.msra.mxu1 %v10128_v47  ;;  %v10225_v35 = vld [vmem:[#allocation2 + $0x2e0] sm:$0xf0]  ;;  %v14731_v32 = vld [vmem:[#allocation2 + $0x1a4] sm:$0xf0] }
  0x95   :  { %v14874_v39 = vld [vmem:[#allocation2 + $0x61c] sm:$0xf0]  ;;  %1890 = vmatmul.bf16.vlgmr.msra.gmra.mxu0 %v16645_v4  ;;  %v10481_v37 = vld [vmem:[#allocation2 + $0x4e0] sm:$0xf0]  ;;  %v10228_v41 = vor.u32 %v14766_v33, %v10225_v35  ;;  %v10327_v33 = vld [vmem:[#allocation2 + $0x388] sm:$0xf] }
  0x96   :  { %v10640_v51 = vor.u32 %v14874_v39, %v10639_v38  ;;  %1915 = vmatpush.bf16.msra.mxu2 %v10384_v48  ;;  %1934 = vmatpush.bf16.msrb.mxu0 %v10100_v52  ;;  %v14894_v38 = vld [vmem:[#allocation2 + $0x6c4] sm:$0xf]  ;;  %v10484_v42 = vor.u32 %v14830_v36, %v10481_v37  ;;  %v14795_v35 = vld [vmem:[#allocation2 + $0x3a4] sm:$0xf0] }
  0x97   :  { %1903 = vmatmul.bf16.vlgmr.msra.gmra.mxu1 %v16647_v5  ;;  %v10737_v39 = vld [vmem:[#allocation2 + $0x6e0] sm:$0xf0]  ;;  %v10583_v36 = vld [vmem:[#allocation2 + $0x588] sm:$0xf] }
  0x98   :  { %1928 = vmatpush.bf16.msra.mxu3 %v10640_v51  ;;  %1947 = vmatpush.bf16.msrb.mxu1 %v10356_v53  ;;  %v14694_v43 = vld [vmem:[#allocation2 + $0x84] sm:$0xf]  ;;  %v10740_v46 = vor.u32 %v14894_v38, %v10737_v39  ;;  %v14859_v37 = vld [vmem:[#allocation2 + $0x5a4] sm:$0xf0] }
  0x99   :  { %1916 = vmatmul.bf16.vlgmr.msra.gmra.mxu2 %v16649_v6  ;;  %v10193_v47 = vld [vmem:[#allocation2 + $0x2a0] sm:$0xf0]  ;;  %v9940_v52 = vor.u32 %v14694_v43, %v9937_v44  ;;  %v10839_v38 = vld [vmem:[#allocation2 + $0x788] sm:$0xf] }
  0x9a   :  { %1960 = vmatpush.bf16.msrb.mxu2 %v10612_v54  ;;  %1935 = vmatpush.bf16.msrb.mxu0 %v10068_v0  ;;  %v14822_v48 = vld [vmem:[#allocation2 + $0x484] sm:$0xf]  ;;  %v10196_v53 = vor.u32 %v14758_v45, %v10193_v47  ;;  %v14923_v39 = vld [vmem:[#allocation2 + $0x7a4] sm:$0xf0] }
  0x9b   :  { %1929 = vmatmul.bf16.vlgmr.msra.gmra.mxu3 %v16654_v7  ;;  %v10449_v49 = vld [vmem:[#allocation2 + $0x4a0] sm:$0xf0]  ;;  %v10039_v43 = vld [vmem:[#allocation2 + $0x148] sm:$0xf] }
  0x9c   :  { %1973 = vmatpush.bf16.msrb.mxu3 %v10868_v58  ;;  %1948 = vmatpush.bf16.msrb.mxu1 %v10324_v1  ;;  %v14886_v50 = vld [vmem:[#allocation2 + $0x684] sm:$0xf]  ;;  %v10452_v54 = vor.u32 %v14822_v48, %v10449_v49  ;;  %v14723_v44 = vld [vmem:[#allocation2 + $0x164] sm:$0xf0] }
  0x9d   :  { %v10705_v51 = vld [vmem:[#allocation2 + $0x6a0] sm:$0xf0]  ;;  %v10295_v45 = vld [vmem:[#allocation2 + $0x348] sm:$0xf] }
  0x9e   :  { %1961 = vmatpush.bf16.msrb.mxu2 %v10580_v2  ;;  %1936 = vmatpush.bf16.msrb.mxu0 %v10036_v16  ;;  %v14686_v55 = vld [vmem:[#allocation2 + $0x44] sm:$0xf]  ;;  %v10708_v58 = vor.u32 %v14886_v50, %v10705_v51  ;;  %v10103_v16 = vld [vmem:[#allocation2 + $0x1c8] sm:$0xf] }
  0x9f   :  { %v9905_v56 = vld [vmem:[#allocation2 + $0x60] sm:$0xf0]  ;;  %v14787_v47 = vld [vmem:[#allocation2 + $0x364] sm:$0xf0] }
  0xa0   :  { %1974 = vmatpush.bf16.msrb.mxu3 %v10836_v10  ;;  %1949 = vmatpush.bf16.msrb.mxu1 %v10292_v17  ;;  %v14750_v57 = vld [vmem:[#allocation2 + $0x244] sm:$0xf]  ;;  %v9908_v0 = vor.u32 %v14686_v55, %v9905_v56  ;;  %v14739_v17 = vld [vmem:[#allocation2 + $0x1e4] sm:$0xf0] }
  0xa1   :  { %v10161_v59 = vld [vmem:[#allocation2 + $0x260] sm:$0xf0]  ;;  %v10551_v48 = vld [vmem:[#allocation2 + $0x548] sm:$0xf] }
  0xa2   :  { %1962 = vmatpush.bf16.msrb.mxu2 %v10548_v18  ;;  %1937 = vmatpush.bf16.msrb.mxu0 %v10004_v28  ;;  %v14814_v60 = vld [vmem:[#allocation2 + $0x444] sm:$0xf]  ;;  %v10164_v3 = vor.u32 %v14750_v57, %v10161_v59  ;;  %v10359_v18 = vld [vmem:[#allocation2 + $0x3c8] sm:$0xf]  ;;  %v10104_v28 = vor.u32 %v14739_v17, %v10103_v16 }
  0xa3   :  { %v10417_v61 = vld [vmem:[#allocation2 + $0x460] sm:$0xf0]  ;;  %v14851_v49 = vld [vmem:[#allocation2 + $0x564] sm:$0xf0] }
  0xa4   :  { %1975 = vmatpush.bf16.msrb.mxu3 %v10804_v22  ;;  %1950 = vmatpush.bf16.msrb.mxu1 %v10260_v29  ;;  %v14878_v62 = vld [vmem:[#allocation2 + $0x644] sm:$0xf]  ;;  %v10420_v8 = vor.u32 %v14814_v60, %v10417_v61  ;;  %v14867_v22 = vld [vmem:[#allocation2 + $0x5e4] sm:$0xf0]  ;;  %v10360_v29 = vor.u32 %v14803_v20, %v10359_v18 }
  0xa5   :  { %v10673_v63 = vld [vmem:[#allocation2 + $0x660] sm:$0xf0]  ;;  %v10807_v50 = vld [vmem:[#allocation2 + $0x748] sm:$0xf] }
  0xa6   :  { %1963 = vmatpush.bf16.msrb.mxu2 %v10516_v30  ;;  %1938 = vmatpush.bf16.msrb.mxu0 %v9972_v40  ;;  %v14678_v1 = vld [vmem:[#allocation2 + $0x4] sm:$0xf]  ;;  %v10676_v12 = vor.u32 %v14878_v62, %v10673_v63  ;;  %v10616_v30 = vor.u32 %v14867_v22, %v10615_v21  ;;  %v10072_v40 = vor.u32 %v14731_v32, %v10071_v31  ;;  %v14915_v51 = vld [vmem:[#allocation2 + $0x764] sm:$0xf0] }
  0xa7   :  { %v9873_v2 = vld [vmem:[#allocation2 + $0x20] sm:$0xf0]  ;;  %v10007_v55 = vld [vmem:[#allocation2 + $0x108] sm:$0xf] }
  0xa8   :  { %1976 = vmatpush.bf16.msrb.mxu3 %v10772_v34  ;;  %1951 = vmatpush.bf16.msrb.mxu1 %v10228_v41  ;;  %v14742_v9 = vld [vmem:[#allocation2 + $0x204] sm:$0xf]  ;;  %v9876_v19 = vor.u32 %v14678_v1, %v9873_v2  ;;  %v10872_v34 = vor.u32 %v14931_v26, %v10871_v25  ;;  %v10328_v41 = vor.u32 %v14795_v35, %v10327_v33  ;;  %v14715_v56 = vld [vmem:[#allocation2 + $0x124] sm:$0xf0] }
  0xa9   :  { %v10129_v10 = vld [vmem:[#allocation2 + $0x220] sm:$0xf0]  ;;  %v10263_v57 = vld [vmem:[#allocation2 + $0x308] sm:$0xf] }
  0xaa   :  { %1964 = vmatpush.bf16.msrb.mxu2 %v10484_v42  ;;  %1939 = vmatpush.bf16.msrb.mxu0 %v9940_v52  ;;  %v14806_v11 = vld [vmem:[#allocation2 + $0x404] sm:$0xf]  ;;  %v10132_v23 = vor.u32 %v14742_v9, %v10129_v10  ;;  %v10584_v42 = vor.u32 %v14859_v37, %v10583_v36  ;;  %v10040_v52 = vor.u32 %v14723_v44, %v10039_v43  ;;  %v14779_v59 = vld [vmem:[#allocation2 + $0x324] sm:$0xf0] }
  0xab   :  { %v10385_v13 = vld [vmem:[#allocation2 + $0x420] sm:$0xf0]  ;;  %v10519_v60 = vld [vmem:[#allocation2 + $0x508] sm:$0xf]  ;;  %v10264_v1 = vor.u32 %v14779_v59, %v10263_v57  ;;  %v14863_v57 = vld [vmem:[#allocation2 + $0x5cc] sm:$0xf] }
  0xac   :  { %1977 = vmatpush.bf16.msrb.mxu3 %v10740_v46  ;;  %1952 = vmatpush.bf16.msrb.mxu1 %v10196_v53  ;;  %v14870_v14 = vld [vmem:[#allocation2 + $0x604] sm:$0xf]  ;;  %v10388_v24 = vor.u32 %v14806_v11, %v10385_v13  ;;  %v10840_v46 = vor.u32 %v14923_v39, %v10839_v38  ;;  %v10296_v53 = vor.u32 %v14787_v47, %v10295_v45  ;;  %v14843_v61 = vld [vmem:[#allocation2 + $0x524] sm:$0xf0] }
  0xad   :  { %v10641_v15 = vld [vmem:[#allocation2 + $0x620] sm:$0xf0]  ;;  %v10775_v62 = vld [vmem:[#allocation2 + $0x708] sm:$0xf]  ;;  %v10520_v2 = vor.u32 %v14843_v61, %v10519_v60  ;;  %v14927_v61 = vld [vmem:[#allocation2 + $0x7cc] sm:$0xf] }
  0xae   :  { %1965 = vmatpush.bf16.msrb.mxu2 %v10452_v54  ;;  %1940 = vmatpush.bf16.msrb.mxu0 %v9908_v0  ;;  %v10644_v27 = vor.u32 %v14870_v14, %v10641_v15  ;;  %v10552_v54 = vor.u32 %v14851_v49, %v10551_v48  ;;  %v14907_v63 = vld [vmem:[#allocation2 + $0x724] sm:$0xf0]  ;;  %v10008_v0 = vor.u32 %v14715_v56, %v10007_v55  ;;  %v10361_v56 = vld [vmem:[#allocation2 + $0x3e8] sm:$0xf0] }
  0xaf   :  { %v10231_v9 = vld [vmem:[#allocation2 + $0x2c8] sm:$0xf]  ;;  %v10776_v10 = vor.u32 %v14907_v63, %v10775_v62  ;;  %v10873_v62 = vld [vmem:[#allocation2 + $0x7e8] sm:$0xf0] }
  0xb0   :  { %1978 = vmatpush.bf16.msrb.mxu3 %v10708_v58  ;;  %1953 = vmatpush.bf16.msrb.mxu1 %v10164_v3  ;;  %v10808_v58 = vor.u32 %v14915_v51, %v10807_v50  ;;  %v9975_v3 = vld [vmem:[#allocation2 + $0xc8] sm:$0xf] }
  0xb1   :  { %v14771_v11 = vld [vmem:[#allocation2 + $0x2e4] sm:$0xf0] }
  0xb2   :  { %1966 = vmatpush.bf16.msrb.mxu2 %v10420_v8  ;;  %1941 = vmatpush.bf16.msrb.mxu0 %v9876_v19  ;;  %v14707_v8 = vld [vmem:[#allocation2 + $0xe4] sm:$0xf0]  ;;  %v10232_v17 = vor.u32 %v14771_v11, %v10231_v9  ;;  %v14791_v9 = vld [vmem:[#allocation2 + $0x38c] sm:$0xf] }
  0xb3   :  { %v14835_v13 = vld [vmem:[#allocation2 + $0x4e4] sm:$0xf0]  ;;  %v9976_v16 = vor.u32 %v14707_v8, %v9975_v3  ;;  %v14727_v3 = vld [vmem:[#allocation2 + $0x18c] sm:$0xf] }
  0xb4   :  { %1979 = vmatpush.bf16.msrb.mxu3 %v10676_v12  ;;  %1954 = vmatpush.bf16.msrb.mxu1 %v10132_v23  ;;  %v10487_v12 = vld [vmem:[#allocation2 + $0x4c8] sm:$0xf]  ;;  %v10073_v8 = vld [vmem:[#allocation2 + $0x1a8] sm:$0xf0] }
  0xb5   :  { %1942 = vmatmul.bf16.vlgmr.msrb.gmra.mxu0 %v16645_v4  ;;  %v10743_v14 = vld [vmem:[#allocation2 + $0x6c8] sm:$0xf]  ;;  %v10488_v18 = vor.u32 %v14835_v13, %v10487_v12  ;;  %v10329_v11 = vld [vmem:[#allocation2 + $0x3a8] sm:$0xf0] }
  0xb6   :  { %1967 = vmatpush.bf16.msrb.mxu2 %v10388_v24  ;;  %1986 = vmatpush.bf16.msra.mxu0 %v10104_v28  ;;  %v14899_v15 = vld [vmem:[#allocation2 + $0x6e4] sm:$0xf0]  ;;  %v14855_v12 = vld [vmem:[#allocation2 + $0x58c] sm:$0xf] }
  0xb7   :  { %1955 = vmatmul.bf16.vlgmr.msrb.gmra.mxu1 %v16647_v5  ;;  %v9943_v19 = vld [vmem:[#allocation2 + $0x88] sm:$0xf]  ;;  %v10744_v22 = vor.u32 %v14899_v15, %v10743_v14  ;;  %v10585_v13 = vld [vmem:[#allocation2 + $0x5a8] sm:$0xf0] }
  0xb8   :  { %1980 = vmatpush.bf16.msrb.mxu3 %v10644_v27  ;;  %1999 = vmatpush.bf16.msra.mxu1 %v10360_v29  ;;  %v14699_v20 = vld [vmem:[#allocation2 + $0xa4] sm:$0xf0]  ;;  %v14919_v14 = vld [vmem:[#allocation2 + $0x78c] sm:$0xf] }
  0xb9   :  { %1968 = vmatmul.bf16.vlgmr.msrb.gmra.mxu2 %v16649_v6  ;;  %v10199_v21 = vld [vmem:[#allocation2 + $0x288] sm:$0xf]  ;;  %v9944_v28 = vor.u32 %v14699_v20, %v9943_v19  ;;  %v10841_v15 = vld [vmem:[#allocation2 + $0x7a8] sm:$0xf0] }
  0xba   :  { %2012 = vmatpush.bf16.msra.mxu2 %v10616_v30  ;;  %1987 = vmatpush.bf16.msra.mxu0 %v10072_v40  ;;  %v14763_v23 = vld [vmem:[#allocation2 + $0x2a4] sm:$0xf0]  ;;  %v14719_v19 = vld [vmem:[#allocation2 + $0x14c] sm:$0xf] }
  0xbb   :  { %1981 = vmatmul.bf16.vlgmr.msrb.gmra.mxu3 %v16654_v7  ;;  %v10455_v24 = vld [vmem:[#allocation2 + $0x488] sm:$0xf]  ;;  %v10200_v29 = vor.u32 %v14763_v23, %v10199_v21  ;;  %v10041_v20 = vld [vmem:[#allocation2 + $0x168] sm:$0xf0] }
  0xbc   :  { %2025 = vmatpush.bf16.msra.mxu3 %v10872_v34  ;;  %2000 = vmatpush.bf16.msra.mxu1 %v10328_v41  ;;  %v14827_v25 = vld [vmem:[#allocation2 + $0x4a4] sm:$0xf0]  ;;  %v14783_v21 = vld [vmem:[#allocation2 + $0x34c] sm:$0xf] }
  0xbd   :  { %v10711_v26 = vld [vmem:[#allocation2 + $0x688] sm:$0xf]  ;;  %v10456_v30 = vor.u32 %v14827_v25, %v10455_v24  ;;  %v10297_v23 = vld [vmem:[#allocation2 + $0x368] sm:$0xf0] }
  0xbe   :  { %2013 = vmatpush.bf16.msra.mxu2 %v10584_v42  ;;  %1988 = vmatpush.bf16.msra.mxu0 %v10040_v52  ;;  %v14891_v27 = vld [vmem:[#allocation2 + $0x6a4] sm:$0xf0]  ;;  %v14735_v52 = vld [vmem:[#allocation2 + $0x1cc] sm:$0xf] }
  0xbf   :  { %v9911_v31 = vld [vmem:[#allocation2 + $0x48] sm:$0xf]  ;;  %v10712_v34 = vor.u32 %v14891_v27, %v10711_v26  ;;  %v14847_v24 = vld [vmem:[#allocation2 + $0x54c] sm:$0xf] }
  0xc0   :  { %2026 = vmatpush.bf16.msra.mxu3 %v10840_v46  ;;  %2001 = vmatpush.bf16.msra.mxu1 %v10296_v53  ;;  %v14691_v32 = vld [vmem:[#allocation2 + $0x64] sm:$0xf0]  ;;  %v10105_v53 = vld [vmem:[#allocation2 + $0x1e8] sm:$0xf0] }
  0xc1   :  { %v10167_v33 = vld [vmem:[#allocation2 + $0x248] sm:$0xf]  ;;  %v9912_v40 = vor.u32 %v14691_v32, %v9911_v31  ;;  %v10553_v25 = vld [vmem:[#allocation2 + $0x568] sm:$0xf0] }
  0xc2   :  { %2014 = vmatpush.bf16.msra.mxu2 %v10552_v54  ;;  %1989 = vmatpush.bf16.msra.mxu0 %v10008_v0  ;;  %v14755_v35 = vld [vmem:[#allocation2 + $0x264] sm:$0xf0]  ;;  %v14799_v54 = vld [vmem:[#allocation2 + $0x3cc] sm:$0xf]  ;;  %v10108_v0 = vor.u32 %v14735_v52, %v10105_v53 }
  0xc3   :  { %v10423_v36 = vld [vmem:[#allocation2 + $0x448] sm:$0xf]  ;;  %v10168_v43 = vor.u32 %v14755_v35, %v10167_v33  ;;  %v14911_v26 = vld [vmem:[#allocation2 + $0x74c] sm:$0xf] }
  0xc4   :  { %2027 = vmatpush.bf16.msra.mxu3 %v10808_v58  ;;  %2002 = vmatpush.bf16.msra.mxu1 %v10264_v1  ;;  %v14819_v37 = vld [vmem:[#allocation2 + $0x464] sm:$0xf0]  ;;  %v10617_v58 = vld [vmem:[#allocation2 + $0x5e8] sm:$0xf0]  ;;  %v10364_v1 = vor.u32 %v14799_v54, %v10361_v56 }
  0xc5   :  { %v10679_v38 = vld [vmem:[#allocation2 + $0x648] sm:$0xf]  ;;  %v10424_v44 = vor.u32 %v14819_v37, %v10423_v36  ;;  %v10809_v27 = vld [vmem:[#allocation2 + $0x768] sm:$0xf0] }
  0xc6   :  { %2015 = vmatpush.bf16.msra.mxu2 %v10520_v2  ;;  %1990 = vmatpush.bf16.msra.mxu0 %v9976_v16  ;;  %v14883_v39 = vld [vmem:[#allocation2 + $0x664] sm:$0xf0]  ;;  %v10620_v2 = vor.u32 %v14863_v57, %v10617_v58  ;;  %v10076_v16 = vor.u32 %v14727_v3, %v10073_v8  ;;  %v14711_v31 = vld [vmem:[#allocation2 + $0x10c] sm:$0xf] }
  0xc7   :  { %v9879_v41 = vld [vmem:[#allocation2 + $0x8] sm:$0xf]  ;;  %v10680_v48 = vor.u32 %v14883_v39, %v10679_v38  ;;  %v10009_v32 = vld [vmem:[#allocation2 + $0x128] sm:$0xf0] }
  0xc8   :  { %2028 = vmatpush.bf16.msra.mxu3 %v10776_v10  ;;  %2003 = vmatpush.bf16.msra.mxu1 %v10232_v17  ;;  %v14683_v42 = vld [vmem:[#allocation2 + $0x24] sm:$0xf0]  ;;  %v10876_v10 = vor.u32 %v14927_v61, %v10873_v62  ;;  %v10332_v17 = vor.u32 %v14791_v9, %v10329_v11  ;;  %v14775_v33 = vld [vmem:[#allocation2 + $0x30c] sm:$0xf] }
  0xc9   :  { %v10135_v45 = vld [vmem:[#allocation2 + $0x208] sm:$0xf]  ;;  %v9880_v55 = vor.u32 %v14683_v42, %v9879_v41  ;;  %v10265_v35 = vld [vmem:[#allocation2 + $0x328] sm:$0xf0] }
  0xca   :  { %2016 = vmatpush.bf16.msra.mxu2 %v10488_v18  ;;  %1991 = vmatpush.bf16.msra.mxu0 %v9944_v28  ;;  %v14747_v46 = vld [vmem:[#allocation2 + $0x224] sm:$0xf0]  ;;  %v10588_v18 = vor.u32 %v14855_v12, %v10585_v13  ;;  %v10044_v28 = vor.u32 %v14719_v19, %v10041_v20  ;;  %v14839_v36 = vld [vmem:[#allocation2 + $0x50c] sm:$0xf]  ;;  %v10268_v41 = vor.u32 %v14775_v33, %v10265_v35  ;;  %v10623_v33 = vld [vmem:[#allocation2 + $0x5d0] sm:$0xf] }
  0xcb   :  { %v10391_v47 = vld [vmem:[#allocation2 + $0x408] sm:$0xf]  ;;  %v10136_v59 = vor.u32 %v14747_v46, %v10135_v45  ;;  %v10521_v37 = vld [vmem:[#allocation2 + $0x528] sm:$0xf0] }
  0xcc   :  { %2029 = vmatpush.bf16.msra.mxu3 %v10744_v22  ;;  %2004 = vmatpush.bf16.msra.mxu1 %v10200_v29  ;;  %v14811_v49 = vld [vmem:[#allocation2 + $0x424] sm:$0xf0]  ;;  %v10844_v22 = vor.u32 %v14919_v14, %v10841_v15  ;;  %v10300_v29 = vor.u32 %v14783_v21, %v10297_v23  ;;  %v14903_v38 = vld [vmem:[#allocation2 + $0x70c] sm:$0xf]  ;;  %v10524_v42 = vor.u32 %v14839_v36, %v10521_v37  ;;  %v10879_v37 = vld [vmem:[#allocation2 + $0x7d0] sm:$0xf] }
  0xcd   :  { %v10647_v50 = vld [vmem:[#allocation2 + $0x608] sm:$0xf]  ;;  %v10392_v60 = vor.u32 %v14811_v49, %v10391_v47  ;;  %v10777_v39 = vld [vmem:[#allocation2 + $0x728] sm:$0xf0] }
  0xce   :  { %2017 = vmatpush.bf16.msra.mxu2 %v10456_v30  ;;  %v14875_v51 = vld [vmem:[#allocation2 + $0x624] sm:$0xf0]  ;;  %1992 = vmatpush.bf16.msra.mxu0 %v9912_v40  ;;  %v10556_v30 = vor.u32 %v14847_v24, %v10553_v25  ;;  %v10012_v40 = vor.u32 %v14711_v31, %v10009_v32  ;;  %v14767_v45 = vld [vmem:[#allocation2 + $0x2cc] sm:$0xf]  ;;  %v10780_v46 = vor.u32 %v14903_v38, %v10777_v39  ;;  %v14804_v32 = vld [vmem:[#allocation2 + $0x3ec] sm:$0xf0] }
  0xcf   :  { %v10648_v63 = vor.u32 %v14875_v51, %v10647_v50  ;;  %v10233_v47 = vld [vmem:[#allocation2 + $0x2e8] sm:$0xf0]  ;;  %v14932_v38 = vld [vmem:[#allocation2 + $0x7ec] sm:$0xf0] }
  0xd0   :  { %2030 = vmatpush.bf16.msra.mxu3 %v10712_v34  ;;  %2005 = vmatpush.bf16.msra.mxu1 %v10168_v43  ;;  %v10812_v34 = vor.u32 %v14911_v26, %v10809_v27  ;;  %v14703_v43 = vld [vmem:[#allocation2 + $0xcc] sm:$0xf]  ;;  %v10236_v53 = vor.u32 %v14767_v45, %v10233_v47  ;;  %v10335_v45 = vld [vmem:[#allocation2 + $0x390] sm:$0xf] }
  0xd1   :  { %v10489_v49 = vld [vmem:[#allocation2 + $0x4e8] sm:$0xf0]  ;;  %v14796_v47 = vld [vmem:[#allocation2 + $0x3ac] sm:$0xf0] }
  0xd2   :  { %2018 = vmatpush.bf16.msra.mxu2 %v10424_v44  ;;  %1993 = vmatpush.bf16.msra.mxu0 %v9880_v55  ;;  %v9977_v44 = vld [vmem:[#allocation2 + $0xe8] sm:$0xf0] }
  0xd3   :  { %v14895_v50 = vld [vmem:[#allocation2 + $0x6cc] sm:$0xf]  ;;  %v9980_v52 = vor.u32 %v14703_v43, %v9977_v44  ;;  %v10079_v43 = vld [vmem:[#allocation2 + $0x190] sm:$0xf] }
  0xd4   :  { %2031 = vmatpush.bf16.msra.mxu3 %v10680_v48  ;;  %2006 = vmatpush.bf16.msra.mxu1 %v10136_v59  ;;  %v14831_v48 = vld [vmem:[#allocation2 + $0x4cc] sm:$0xf]  ;;  %v14732_v44 = vld [vmem:[#allocation2 + $0x1ac] sm:$0xf0] }
  0xd5   :  { %1994 = vmatmul.bf16.vlgmr.msra.gmra.mxu0 %v16645_v4  ;;  %v10745_v51 = vld [vmem:[#allocation2 + $0x6e8] sm:$0xf0]  ;;  %v10492_v54 = vor.u32 %v14831_v48, %v10489_v49  ;;  %v10591_v48 = vld [vmem:[#allocation2 + $0x590] sm:$0xf] }
  0xd6   :  { %2019 = vmatpush.bf16.msra.mxu2 %v10392_v60  ;;  %2038 = vmatpush.bf16.msrb.mxu0 %v10108_v0  ;;  %v14695_v55 = vld [vmem:[#allocation2 + $0x8c] sm:$0xf]  ;;  %v10748_v58 = vor.u32 %v14895_v50, %v10745_v51  ;;  %v14860_v49 = vld [vmem:[#allocation2 + $0x5ac] sm:$0xf0] }
  0xd7   :  { %2007 = vmatmul.bf16.vlgmr.msra.gmra.mxu1 %v16647_v5  ;;  %v9945_v56 = vld [vmem:[#allocation2 + $0xa8] sm:$0xf0]  ;;  %v10847_v50 = vld [vmem:[#allocation2 + $0x790] sm:$0xf] }
  0xd8   :  { %2032 = vmatpush.bf16.msra.mxu3 %v10648_v63  ;;  %2051 = vmatpush.bf16.msrb.mxu1 %v10364_v1  ;;  %v14759_v57 = vld [vmem:[#allocation2 + $0x28c] sm:$0xf]  ;;  %v9948_v0 = vor.u32 %v14695_v55, %v9945_v56  ;;  %v14924_v51 = vld [vmem:[#allocation2 + $0x7ac] sm:$0xf0] }
  0xd9   :  { %2020 = vmatmul.bf16.vlgmr.msra.gmra.mxu2 %v16649_v6  ;;  %v10201_v59 = vld [vmem:[#allocation2 + $0x2a8] sm:$0xf0]  ;;  %v10047_v55 = vld [vmem:[#allocation2 + $0x150] sm:$0xf] }
  0xda   :  { %2064 = vmatpush.bf16.msrb.mxu2 %v10620_v2  ;;  %2039 = vmatpush.bf16.msrb.mxu0 %v10076_v16  ;;  %v14823_v60 = vld [vmem:[#allocation2 + $0x48c] sm:$0xf]  ;;  %v10204_v1 = vor.u32 %v14759_v57, %v10201_v59  ;;  %v14724_v56 = vld [vmem:[#allocation2 + $0x16c] sm:$0xf0] }
  0xdb   :  { %2033 = vmatmul.bf16.vlgmr.msra.gmra.mxu3 %v16654_v7  ;;  %v10457_v61 = vld [vmem:[#allocation2 + $0x4a8] sm:$0xf0]  ;;  %v10303_v57 = vld [vmem:[#allocation2 + $0x350] sm:$0xf] }
  0xdc   :  { %2077 = vmatpush.bf16.msrb.mxu3 %v10876_v10  ;;  %2052 = vmatpush.bf16.msrb.mxu1 %v10332_v17  ;;  %v14887_v62 = vld [vmem:[#allocation2 + $0x68c] sm:$0xf]  ;;  %v10460_v2 = vor.u32 %v14823_v60, %v10457_v61  ;;  %v14788_v59 = vld [vmem:[#allocation2 + $0x36c] sm:$0xf0] }
  0xdd   :  { %v10713_v63 = vld [vmem:[#allocation2 + $0x6a8] sm:$0xf0]  ;;  %v10559_v60 = vld [vmem:[#allocation2 + $0x550] sm:$0xf] }
  0xde   :  { %2065 = vmatpush.bf16.msrb.mxu2 %v10588_v18  ;;  %2040 = vmatpush.bf16.msrb.mxu0 %v10044_v28  ;;  %v14687_v3 = vld [vmem:[#allocation2 + $0x4c] sm:$0xf]  ;;  %v10716_v10 = vor.u32 %v14887_v62, %v10713_v63  ;;  %v10111_v28 = vld [vmem:[#allocation2 + $0x1d0] sm:$0xf] }
  0xdf   :  { %v9913_v8 = vld [vmem:[#allocation2 + $0x68] sm:$0xf0]  ;;  %v14852_v61 = vld [vmem:[#allocation2 + $0x56c] sm:$0xf0] }
  0xe0   :  { %2078 = vmatpush.bf16.msrb.mxu3 %v10844_v22  ;;  %2053 = vmatpush.bf16.msrb.mxu1 %v10300_v29  ;;  %v14751_v9 = vld [vmem:[#allocation2 + $0x24c] sm:$0xf]  ;;  %v9916_v16 = vor.u32 %v14687_v3, %v9913_v8  ;;  %v14740_v29 = vld [vmem:[#allocation2 + $0x1ec] sm:$0xf0] }
  0xe1   :  { %v10169_v11 = vld [vmem:[#allocation2 + $0x268] sm:$0xf0]  ;;  %v10815_v62 = vld [vmem:[#allocation2 + $0x750] sm:$0xf] }
  0xe2   :  { %2066 = vmatpush.bf16.msrb.mxu2 %v10556_v30  ;;  %2041 = vmatpush.bf16.msrb.mxu0 %v10012_v40  ;;  %v14815_v12 = vld [vmem:[#allocation2 + $0x44c] sm:$0xf]  ;;  %v10172_v19 = vor.u32 %v14751_v9, %v10169_v11  ;;  %v10367_v30 = vld [vmem:[#allocation2 + $0x3d0] sm:$0xf]  ;;  %v10112_v40 = vor.u32 %v14740_v29, %v10111_v28 }
  0xe3   :  { %v10425_v13 = vld [vmem:[#allocation2 + $0x468] sm:$0xf0]  ;;  %v14916_v63 = vld [vmem:[#allocation2 + $0x76c] sm:$0xf0] }
  0xe4   :  { %2079 = vmatpush.bf16.msrb.mxu3 %v10812_v34  ;;  %2054 = vmatpush.bf16.msrb.mxu1 %v10268_v41  ;;  %v14879_v14 = vld [vmem:[#allocation2 + $0x64c] sm:$0xf]  ;;  %v10428_v20 = vor.u32 %v14815_v12, %v10425_v13  ;;  %v14868_v34 = vld [vmem:[#allocation2 + $0x5ec] sm:$0xf0]  ;;  %v10368_v41 = vor.u32 %v14804_v32, %v10367_v30 }
  0xe5   :  { %v10681_v15 = vld [vmem:[#allocation2 + $0x668] sm:$0xf0]  ;;  %v10015_v3 = vld [vmem:[#allocation2 + $0x110] sm:$0xf] }
  0xe6   :  { %2067 = vmatpush.bf16.msrb.mxu2 %v10524_v42  ;;  %2042 = vmatpush.bf16.msrb.mxu0 %v9980_v52  ;;  %v14679_v17 = vld [vmem:[#allocation2 + $0xc] sm:$0xf]  ;;  %v10684_v24 = vor.u32 %v14879_v14, %v10681_v15  ;;  %v10624_v42 = vor.u32 %v14868_v34, %v10623_v33  ;;  %v10080_v52 = vor.u32 %v14732_v44, %v10079_v43  ;;  %v14716_v8 = vld [vmem:[#allocation2 + $0x12c] sm:$0xf0] }
  0xe7   :  { %v9881_v18 = vld [vmem:[#allocation2 + $0x28] sm:$0xf0]  ;;  %v10271_v9 = vld [vmem:[#allocation2 + $0x310] sm:$0xf] }
  0xe8   :  { %2080 = vmatpush.bf16.msrb.mxu3 %v10780_v46  ;;  %2055 = vmatpush.bf16.msrb.mxu1 %v10236_v53  ;;  %v14743_v21 = vld [vmem:[#allocation2 + $0x20c] sm:$0xf]  ;;  %v9884_v31 = vor.u32 %v14679_v17, %v9881_v18  ;;  %v10880_v46 = vor.u32 %v14932_v38, %v10879_v37  ;;  %v10336_v53 = vor.u32 %v14796_v47, %v10335_v45  ;;  %v14780_v11 = vld [vmem:[#allocation2 + $0x32c] sm:$0xf0] }
  0xe9   :  { %v10137_v22 = vld [vmem:[#allocation2 + $0x228] sm:$0xf0]  ;;  %v10527_v12 = vld [vmem:[#allocation2 + $0x510] sm:$0xf]  ;;  %v10272_v17 = vor.u32 %v14780_v11, %v10271_v9  ;;  %v14864_v9 = vld [vmem:[#allocation2 + $0x5d4] sm:$0xf] }
  0xea   :  { %2068 = vmatpush.bf16.msrb.mxu2 %v10492_v54  ;;  %2043 = vmatpush.bf16.msrb.mxu0 %v9948_v0  ;;  %v14807_v23 = vld [vmem:[#allocation2 + $0x40c] sm:$0xf]  ;;  %v10140_v35 = vor.u32 %v14743_v21, %v10137_v22  ;;  %v10592_v54 = vor.u32 %v14860_v49, %v10591_v48  ;;  %v10048_v0 = vor.u32 %v14724_v56, %v10047_v55  ;;  %v14844_v13 = vld [vmem:[#allocation2 + $0x52c] sm:$0xf0] }
  0xeb   :  { %v10393_v25 = vld [vmem:[#allocation2 + $0x428] sm:$0xf0]  ;;  %v10783_v14 = vld [vmem:[#allocation2 + $0x710] sm:$0xf]  ;;  %v10528_v18 = vor.u32 %v14844_v13, %v10527_v12  ;;  %v14928_v13 = vld [vmem:[#allocation2 + $0x7d4] sm:$0xf] }
  0xec   :  { %2081 = vmatpush.bf16.msrb.mxu3 %v10748_v58  ;;  %2056 = vmatpush.bf16.msrb.mxu1 %v10204_v1  ;;  %v14871_v26 = vld [vmem:[#allocation2 + $0x60c] sm:$0xf]  ;;  %v10396_v36 = vor.u32 %v14807_v23, %v10393_v25  ;;  %v10848_v58 = vor.u32 %v14924_v51, %v10847_v50  ;;  %v10304_v1 = vor.u32 %v14788_v59, %v10303_v57  ;;  %v14908_v15 = vld [vmem:[#allocation2 + $0x72c] sm:$0xf0] }
  0xed   :  { %v10649_v27 = vld [vmem:[#allocation2 + $0x628] sm:$0xf0]  ;;  %v10239_v21 = vld [vmem:[#allocation2 + $0x2d0] sm:$0xf]  ;;  %v10784_v22 = vor.u32 %v14908_v15, %v10783_v14  ;;  %v10881_v14 = vld [vmem:[#allocation2 + $0x7f0] sm:$0xf0] }
  0xee   :  { %2069 = vmatpush.bf16.msrb.mxu2 %v10460_v2  ;;  %2044 = vmatpush.bf16.msrb.mxu0 %v9916_v16  ;;  %v10652_v39 = vor.u32 %v14871_v26, %v10649_v27  ;;  %v10560_v2 = vor.u32 %v14852_v61, %v10559_v60  ;;  %v10016_v16 = vor.u32 %v14716_v8, %v10015_v3  ;;  %v14772_v23 = vld [vmem:[#allocation2 + $0x2ec] sm:$0xf0]  ;;  %v10369_v8 = vld [vmem:[#allocation2 + $0x3f0] sm:$0xf0] }
  0xef   :  { %v14836_v25 = vld [vmem:[#allocation2 + $0x4ec] sm:$0xf0]  ;;  %v10240_v29 = vor.u32 %v14772_v23, %v10239_v21  ;;  %v14792_v21 = vld [vmem:[#allocation2 + $0x394] sm:$0xf] }
  0xf0   :  { %2082 = vmatpush.bf16.msrb.mxu3 %v10716_v10  ;;  %2057 = vmatpush.bf16.msrb.mxu1 %v10172_v19  ;;  %v10816_v10 = vor.u32 %v14916_v63, %v10815_v62  ;;  %v9983_v19 = vld [vmem:[#allocation2 + $0xd0] sm:$0xf]  ;;  %v10337_v23 = vld [vmem:[#allocation2 + $0x3b0] sm:$0xf0] }
  0xf1   :  { %v10751_v26 = vld [vmem:[#allocation2 + $0x6d0] sm:$0xf] }
  0xf2   :  { %2070 = vmatpush.bf16.msrb.mxu2 %v10428_v20  ;;  %2045 = vmatpush.bf16.msrb.mxu0 %v9884_v31  ;;  %v14708_v20 = vld [vmem:[#allocation2 + $0xec] sm:$0xf0] }
  0xf3   :  { %v14900_v27 = vld [vmem:[#allocation2 + $0x6ec] sm:$0xf0]  ;;  %v9984_v28 = vor.u32 %v14708_v20, %v9983_v19  ;;  %v14728_v19 = vld [vmem:[#allocation2 + $0x194] sm:$0xf] }
  0xf4   :  { %2083 = vmatpush.bf16.msrb.mxu3 %v10684_v24  ;;  %2058 = vmatpush.bf16.msrb.mxu1 %v10140_v35  ;;  %v10495_v24 = vld [vmem:[#allocation2 + $0x4d0] sm:$0xf]  ;;  %v10752_v34 = vor.u32 %v14900_v27, %v10751_v26  ;;  %v10081_v20 = vld [vmem:[#allocation2 + $0x1b0] sm:$0xf0] }
  0xf5   :  { %2046 = vmatmul.bf16.vlgmr.msrb.gmra.mxu0 %v16645_v4  ;;  %v10496_v30 = vor.u32 %v14836_v25, %v10495_v24  ;;  %v9951_v31 = vld [vmem:[#allocation2 + $0x90] sm:$0xf]  ;;  %v14856_v24 = vld [vmem:[#allocation2 + $0x594] sm:$0xf] }
  0xf6   :  { %2071 = vmatpush.bf16.msrb.mxu2 %v10396_v36  ;;  %2090 = vmatpush.bf16.msra.mxu0 %v10112_v40  ;;  %v14700_v32 = vld [vmem:[#allocation2 + $0xac] sm:$0xf0]  ;;  %v10593_v25 = vld [vmem:[#allocation2 + $0x5b0] sm:$0xf0] }
  0xf7   :  { %2059 = vmatmul.bf16.vlgmr.msrb.gmra.mxu1 %v16647_v5  ;;  %v10207_v33 = vld [vmem:[#allocation2 + $0x290] sm:$0xf]  ;;  %v9952_v40 = vor.u32 %v14700_v32, %v9951_v31  ;;  %v14920_v26 = vld [vmem:[#allocation2 + $0x794] sm:$0xf]  ;;  %v10596_v31 = vor.u32 %v14856_v24, %v10593_v25 }
  0xf8   :  { %2084 = vmatpush.bf16.msrb.mxu3 %v10652_v39  ;;  %2103 = vmatpush.bf16.msra.mxu1 %v10368_v41  ;;  %v14764_v35 = vld [vmem:[#allocation2 + $0x2ac] sm:$0xf0]  ;;  %v10849_v27 = vld [vmem:[#allocation2 + $0x7b0] sm:$0xf0] }
  0xf9   :  { %2072 = vmatmul.bf16.vlgmr.msrb.gmra.mxu2 %v16649_v6  ;;  %v10463_v36 = vld [vmem:[#allocation2 + $0x490] sm:$0xf]  ;;  %v10208_v41 = vor.u32 %v14764_v35, %v10207_v33  ;;  %v10049_v32 = vld [vmem:[#allocation2 + $0x170] sm:$0xf0]  ;;  %v10852_v35 = vor.u32 %v14920_v26, %v10849_v27 }
  0xfa   :  { %2116 = vmatpush.bf16.msra.mxu2 %v10624_v42  ;;  %2091 = vmatpush.bf16.msra.mxu0 %v10080_v52  ;;  %v14828_v37 = vld [vmem:[#allocation2 + $0x4ac] sm:$0xf0]  ;;  %v14784_v33 = vld [vmem:[#allocation2 + $0x354] sm:$0xf] }
  0xfb   :  { %2085 = vmatmul.bf16.vlgmr.msrb.gmra.mxu3 %v16654_v7  ;;  %v10719_v38 = vld [vmem:[#allocation2 + $0x690] sm:$0xf]  ;;  %v10464_v42 = vor.u32 %v14828_v37, %v10463_v36  ;;  %v14848_v36 = vld [vmem:[#allocation2 + $0x554] sm:$0xf] }
  0xfc   :  { %2129 = vmatpush.bf16.msra.mxu3 %v10880_v46  ;;  %2104 = vmatpush.bf16.msra.mxu1 %v10336_v53  ;;  %v14892_v39 = vld [vmem:[#allocation2 + $0x6ac] sm:$0xf0]  ;;  %v10561_v37 = vld [vmem:[#allocation2 + $0x570] sm:$0xf0] }
  0xfd   :  { %v9919_v43 = vld [vmem:[#allocation2 + $0x50] sm:$0xf]  ;;  %v10720_v46 = vor.u32 %v14892_v39, %v10719_v38  ;;  %v16691_v38 = vld [vmem:[%s16961_s12] sm:$0xff]  ;;  %v14912_v39 = vld [vmem:[#allocation2 + $0x754] sm:$0xf] }
  0xfe   :  { %2117 = vmatpush.bf16.msra.mxu2 %v10592_v54  ;;  %2092 = vmatpush.bf16.msra.mxu0 %v10048_v0  ;;  %v14692_v44 = vld [vmem:[#allocation2 + $0x6c] sm:$0xf0]  ;;  %v14736_v0 = vld [vmem:[#allocation2 + $0x1d4] sm:$0xf] }
  0xff   :  { %v10175_v45 = vld [vmem:[#allocation2 + $0x250] sm:$0xf]  ;;  %v9920_v52 = vor.u32 %v14692_v44, %v9919_v43  ;;  %v10564_v44 = vor.u32 %v14848_v36, %v10561_v37  ;;  %v10721_v24 = vld [vmem:[#allocation2 + $0x6b0] sm:$0xf0] }
 0x100   :  { %2130 = vmatpush.bf16.msra.mxu3 %v10848_v58  ;;  %2105 = vmatpush.bf16.msra.mxu1 %v10304_v1  ;;  %v14756_v47 = vld [vmem:[#allocation2 + $0x26c] sm:$0xf0]  ;;  %v10113_v1 = vld [vmem:[#allocation2 + $0x1f0] sm:$0xf0] }
 0x101   :  { %v10431_v48 = vld [vmem:[#allocation2 + $0x450] sm:$0xf]  ;;  %v10176_v55 = vor.u32 %v14756_v47, %v10175_v45  ;;  %v10017_v45 = vld [vmem:[#allocation2 + $0x130] sm:$0xf0]  ;;  %v586_v47 = vperm.slane %v16691_v38, 0 }
 0x102   :  { %2118 = vmatpush.bf16.msra.mxu2 %v10560_v2  ;;  %2093 = vmatpush.bf16.msra.mxu0 %v10016_v16  ;;  %v14820_v49 = vld [vmem:[#allocation2 + $0x46c] sm:$0xf0]  ;;  %v14800_v2 = vld [vmem:[#allocation2 + $0x3d4] sm:$0xf]  ;;  %v10116_v16 = vor.u32 %v14736_v0, %v10113_v1 }
 0x103   :  { %v10687_v50 = vld [vmem:[#allocation2 + $0x650] sm:$0xf]  ;;  %v10432_v56 = vor.u32 %v14820_v49, %v10431_v48  ;;  %v10273_v49 = vld [vmem:[#allocation2 + $0x330] sm:$0xf0] }
 0x104   :  { %2131 = vmatpush.bf16.msra.mxu3 %v10816_v10  ;;  %2106 = vmatpush.bf16.msra.mxu1 %v10272_v17  ;;  %v14884_v51 = vld [vmem:[#allocation2 + $0x66c] sm:$0xf0]  ;;  %v10625_v10 = vld [vmem:[#allocation2 + $0x5f0] sm:$0xf0]  ;;  %v10372_v17 = vor.u32 %v14800_v2, %v10369_v8 }
 0x105   :  { %v9887_v53 = vld [vmem:[#allocation2 + $0x10] sm:$0xf]  ;;  %v10688_v60 = vor.u32 %v14884_v51, %v10687_v50  ;;  %v14840_v50 = vld [vmem:[#allocation2 + $0x514] sm:$0xf] }
 0x106   :  { %2119 = vmatpush.bf16.msra.mxu2 %v10528_v18  ;;  %2094 = vmatpush.bf16.msra.mxu0 %v9984_v28  ;;  %v14684_v54 = vld [vmem:[#allocation2 + $0x2c] sm:$0xf0]  ;;  %v10628_v18 = vor.u32 %v14864_v9, %v10625_v10  ;;  %v10084_v28 = vor.u32 %v14728_v19, %v10081_v20  ;;  %v10529_v51 = vld [vmem:[#allocation2 + $0x530] sm:$0xf0] }
 0x107   :  { %v10143_v57 = vld [vmem:[#allocation2 + $0x210] sm:$0xf]  ;;  %v9888_v3 = vor.u32 %v14684_v54, %v9887_v53  ;;  %v10785_v53 = vld [vmem:[#allocation2 + $0x730] sm:$0xf0] }
 0x108   :  { %2132 = vmatpush.bf16.msra.mxu3 %v10784_v22  ;;  %2107 = vmatpush.bf16.msra.mxu1 %v10240_v29  ;;  %v14748_v58 = vld [vmem:[#allocation2 + $0x22c] sm:$0xf0]  ;;  %v10884_v22 = vor.u32 %v14928_v13, %v10881_v14  ;;  %v14720_v29 = vld [vmem:[#allocation2 + $0x154] sm:$0xf] }
 0x109   :  { %v10399_v59 = vld [vmem:[#allocation2 + $0x410] sm:$0xf]  ;;  %v10144_v11 = vor.u32 %v14748_v58, %v10143_v57  ;;  %v10532_v57 = vor.u32 %v14840_v50, %v10529_v51  ;;  %v14704_v58 = vld [vmem:[#allocation2 + $0xd4] sm:$0xf] }
 0x10a   :  { %2120 = vmatpush.bf16.msra.mxu2 %v10496_v30  ;;  %2095 = vmatpush.bf16.msra.mxu0 %v9952_v40  ;;  %v14812_v61 = vld [vmem:[#allocation2 + $0x42c] sm:$0xf0]  ;;  %v10340_v30 = vor.u32 %v14792_v21, %v10337_v23  ;;  %v10817_v40 = vld [vmem:[#allocation2 + $0x770] sm:$0xf0] }
 0x10b   :  { %v10655_v62 = vld [vmem:[#allocation2 + $0x610] sm:$0xf]  ;;  %v10400_v12 = vor.u32 %v14812_v61, %v10399_v59  ;;  %v10820_v48 = vor.u32 %v14912_v39, %v10817_v40  ;;  %v9985_v59 = vld [vmem:[#allocation2 + $0xf0] sm:$0xf0] }
 0x10c   :  { %2133 = vmatpush.bf16.msra.mxu3 %v10752_v34  ;;  %2108 = vmatpush.bf16.msra.mxu1 %v10208_v41  ;;  %v14876_v63 = vld [vmem:[#allocation2 + $0x62c] sm:$0xf0]  ;;  %v10305_v34 = vld [vmem:[#allocation2 + $0x370] sm:$0xf0]  ;;  %v10052_v41 = vor.u32 %v14720_v29, %v10049_v32  ;;  %v9988_v10 = vor.u32 %v14704_v58, %v9985_v59  ;;  %v14741_v58 = vld [vmem:[#allocation2 + $0x1f4] sm:$0xf0] }
 0x10d   :  { %v10656_v15 = vor.u32 %v14876_v63, %v10655_v62  ;;  %v10308_v43 = vor.u32 %v14784_v33, %v10305_v34  ;;  %v10241_v0 = vld [vmem:[#allocation2 + $0x2f0] sm:$0xf0]  ;;  %v10375_v59 = vld [vmem:[#allocation2 + $0x3d8] sm:$0xf] }
 0x10e   :  { %2121 = vmatpush.bf16.msra.mxu2 %v10464_v42  ;;  %2096 = vmatpush.bf16.msra.mxu0 %v9920_v52  ;;  %v14712_v42 = vld [vmem:[#allocation2 + $0x114] sm:$0xf] }
 0x10f   :  { %v14904_v52 = vld [vmem:[#allocation2 + $0x714] sm:$0xf]  ;;  %v10020_v54 = vor.u32 %v14712_v42, %v10017_v45 }
 0x110   :  { %2134 = vmatpush.bf16.msra.mxu3 %v10720_v46  ;;  %2109 = vmatpush.bf16.msra.mxu1 %v10176_v55  ;;  %v14776_v46 = vld [vmem:[#allocation2 + $0x314] sm:$0xf]  ;;  %v10788_v63 = vor.u32 %v14904_v52, %v10785_v53 }
 0x111   :  { %v14832_v1 = vld [vmem:[#allocation2 + $0x4d4] sm:$0xf] }
 0x112   :  { %2122 = vmatpush.bf16.msra.mxu2 %v10432_v56  ;;  %2097 = vmatpush.bf16.msra.mxu0 %v9888_v3  ;;  %v1891_v55 = vpop.f32.mrf.mxu0  ;;  %v10276_v56 = vor.u32 %v14776_v46, %v10273_v49  ;;  %v10497_v2 = vld [vmem:[#allocation2 + $0x4f0] sm:$0xf0] }
 0x113   :  { %v1892_v61 = vadd.f32 %v1891_v55, %v586_v47  ;;  %v14896_v3 = vld [vmem:[#allocation2 + $0x6d4] sm:$0xf] }
 0x114   :  { %2135 = vmatpush.bf16.msra.mxu3 %v10688_v60  ;;  %2110 = vmatpush.bf16.msra.mxu1 %v10144_v11  ;;  %v14768_v60 = vld [vmem:[#allocation2 + $0x2d4] sm:$0xf]  ;;  %v1904_v62 = vpop.f32.mrf.mxu1 }
 0x115   :  { %2098 = vmatmul.bf16.vlgmr.msra.gmra.mxu0 %v16645_v4  ;;  %v10753_v8 = vld [vmem:[#allocation2 + $0x6f0] sm:$0xf0]  ;;  %v1905_v9 = vadd.f32 %v1904_v62, %v1892_v61  ;;  %v10244_v11 = vor.u32 %v14768_v60, %v10241_v0  ;;  %v14805_v61 = vld [vmem:[#allocation2 + $0x3f4] sm:$0xf0] }
 0x116   :  { %2123 = vmatpush.bf16.msra.mxu2 %v10400_v12  ;;  %2142 = vmatpush.bf16.msrb.mxu0 %v10116_v16  ;;  %v10500_v12 = vor.u32 %v14832_v1, %v10497_v2  ;;  %v14696_v13 = vld [vmem:[#allocation2 + $0x94] sm:$0xf]  ;;  %v10631_v62 = vld [vmem:[#allocation2 + $0x5d8] sm:$0xf] }
 0x117   :  { %2111 = vmatmul.bf16.vlgmr.msra.gmra.mxu1 %v16647_v5  ;;  %v9953_v14 = vld [vmem:[#allocation2 + $0xb0] sm:$0xf0]  ;;  %v10887_v2 = vld [vmem:[#allocation2 + $0x7d8] sm:$0xf] }
 0x118   :  { %2136 = vmatpush.bf16.msra.mxu3 %v10656_v15  ;;  %2155 = vmatpush.bf16.msrb.mxu1 %v10372_v17  ;;  %v14760_v15 = vld [vmem:[#allocation2 + $0x294] sm:$0xf]  ;;  %v10756_v17 = vor.u32 %v14896_v3, %v10753_v8  ;;  %v9956_v25 = vor.u32 %v14696_v13, %v9953_v14  ;;  %v14933_v3 = vld [vmem:[#allocation2 + $0x7f4] sm:$0xf0] }
 0x119   :  { %2124 = vmatmul.bf16.vlgmr.msra.gmra.mxu2 %v16649_v6  ;;  %v14824_v19 = vld [vmem:[#allocation2 + $0x494] sm:$0xf]  ;;  %v14733_v13 = vld [vmem:[#allocation2 + $0x1b4] sm:$0xf0] }
 0x11a   :  { %2168 = vmatpush.bf16.msrb.mxu2 %v10628_v18  ;;  %2143 = vmatpush.bf16.msrb.mxu0 %v10084_v28  ;;  %v10209_v18 = vld [vmem:[#allocation2 + $0x2b0] sm:$0xf0]  ;;  %v1893_v28 = vpop.f32.mrf.mxu0  ;;  %v10343_v14 = vld [vmem:[#allocation2 + $0x398] sm:$0xf] }
 0x11b   :  { %2137 = vmatmul.bf16.vlgmr.msra.gmra.mxu3 %v16654_v7  ;;  %v10465_v20 = vld [vmem:[#allocation2 + $0x4b0] sm:$0xf0]  ;;  %v10212_v29 = vor.u32 %v14760_v15, %v10209_v18  ;;  %v10888_v15 = vor.u32 %v14933_v3, %v10887_v2  ;;  %v14861_v18 = vld [vmem:[#allocation2 + $0x5b4] sm:$0xf0] }
 0x11c   :  { %2181 = vmatpush.bf16.msrb.mxu3 %v10884_v22  ;;  %2156 = vmatpush.bf16.msrb.mxu1 %v10340_v30  ;;  %v1917_v16 = vpop.f32.mrf.mxu2  ;;  %v14888_v23 = vld [vmem:[#allocation2 + $0x694] sm:$0xf]  ;;  %v10468_v30 = vor.u32 %v14824_v19, %v10465_v20  ;;  %v1906_v34 = vpop.f32.mrf.mxu1  ;;  %v10855_v19 = vld [vmem:[#allocation2 + $0x798] sm:$0xf] }
 0x11d   :  { %v1918_v21 = vadd.f32 %v1917_v16, %v1905_v9  ;;  %v14688_v26 = vld [vmem:[#allocation2 + $0x54] sm:$0xf]  ;;  %v14797_v16 = vld [vmem:[#allocation2 + $0x3b4] sm:$0xf0] }
 0x11e   :  { %2169 = vmatpush.bf16.msrb.mxu2 %v10596_v31  ;;  %2144 = vmatpush.bf16.msrb.mxu0 %v10052_v41  ;;  %v1930_v22 = vpop.f32.mrf.mxu3  ;;  %v9921_v31 = vld [vmem:[#allocation2 + $0x70] sm:$0xf0]  ;;  %v14925_v20 = vld [vmem:[#allocation2 + $0x7b4] sm:$0xf0] }
 0x11f   :  { %v1931_v27 = vadd.f32 %v1930_v22, %v1918_v21  ;;  %v14752_v32 = vld [vmem:[#allocation2 + $0x254] sm:$0xf]  ;;  %v9924_v42 = vor.u32 %v14688_v26, %v9921_v31  ;;  %v10344_v22 = vor.u32 %v14797_v16, %v10343_v14  ;;  %v10311_v26 = vld [vmem:[#allocation2 + $0x358] sm:$0xf] }
 0x120   :  { %2182 = vmatpush.bf16.msrb.mxu3 %v10852_v35  ;;  %2157 = vmatpush.bf16.msrb.mxu1 %v10308_v43  ;;  %v10177_v33 = vld [vmem:[#allocation2 + $0x270] sm:$0xf0]  ;;  %v10724_v35 = vor.u32 %v14888_v23, %v10721_v24  ;;  %v10055_v24 = vld [vmem:[#allocation2 + $0x158] sm:$0xf] }
 0x121   :  { %v14816_v36 = vld [vmem:[#allocation2 + $0x454] sm:$0xf]  ;;  %v2298_v39 = vmax.f32 %v1931_v27, 0.0  ;;  %v10180_v46 = vor.u32 %v14752_v32, %v10177_v33  ;;  %v10856_v27 = vor.u32 %v14925_v20, %v10855_v19  ;;  %v14789_v28 = vld [vmem:[#allocation2 + $0x374] sm:$0xf0] }
 0x122   :  { %2170 = vmatpush.bf16.msrb.mxu2 %v10564_v44  ;;  %2145 = vmatpush.bf16.msrb.mxu0 %v10020_v54  ;;  %v10433_v37 = vld [vmem:[#allocation2 + $0x470] sm:$0xf0]  ;;  %v10823_v31 = vld [vmem:[#allocation2 + $0x758] sm:$0xf] }
 0x123   :  { %v14880_v40 = vld [vmem:[#allocation2 + $0x654] sm:$0xf]  ;;  %v16697_v45 = vpack.c.bf16 %v2298_v39, %v2298_v39  ;;  %v10436_v47 = vor.u32 %v14816_v36, %v10433_v37  ;;  %v14917_v32 = vld [vmem:[#allocation2 + $0x774] sm:$0xf0] }
 0x124   :  { %2183 = vmatpush.bf16.msrb.mxu3 %v10820_v48  ;;  %2158 = vmatpush.bf16.msrb.mxu1 %v10276_v56  ;;  %v10689_v41 = vld [vmem:[#allocation2 + $0x670] sm:$0xf0]  ;;  %v1919_v51 = vpop.f32.mrf.mxu2  ;;  %v10023_v34 = vld [vmem:[#allocation2 + $0x118] sm:$0xf] }
 0x125   :  { %v14680_v43 = vld [vmem:[#allocation2 + $0x14] sm:$0xf]  ;;  %v10692_v52 = vor.u32 %v14880_v40, %v10689_v41  ;;  %v14717_v37 = vld [vmem:[#allocation2 + $0x134] sm:$0xf0]  ;;  %v587_v40 = vperm.slane %v16691_v38, 1  ;;  %v10824_v41 = vor.u32 %v14917_v32, %v10823_v31 }
 0x126   :  { %2171 = vmatpush.bf16.msrb.mxu2 %v10532_v57  ;;  %2146 = vmatpush.bf16.msrb.mxu0 %v9988_v10  ;;  %v9889_v44 = vld [vmem:[#allocation2 + $0x30] sm:$0xf0]  ;;  %v1932_v56 = vpop.f32.mrf.mxu3  ;;  %v10119_v57 = vld [vmem:[#allocation2 + $0x1d8] sm:$0xf]  ;;  %v10376_v10 = vor.u32 %v14805_v61, %v10375_v59 }
 0x127   :  { %v14744_v48 = vld [vmem:[#allocation2 + $0x214] sm:$0xf]  ;;  %v9892_v60 = vor.u32 %v14680_v43, %v9889_v44  ;;  %v10120_v9 = vor.u32 %v14741_v58, %v10119_v57  ;;  %v10279_v39 = vld [vmem:[#allocation2 + $0x318] sm:$0xf] }
 0x128   :  { %2184 = vmatpush.bf16.msrb.mxu3 %v10788_v63  ;;  %2159 = vmatpush.bf16.msrb.mxu1 %v10244_v11  ;;  %v10145_v49 = vld [vmem:[#allocation2 + $0x230] sm:$0xf0]  ;;  %v14869_v63 = vld [vmem:[#allocation2 + $0x5f4] sm:$0xf0] }
 0x129   :  { %v14808_v50 = vld [vmem:[#allocation2 + $0x414] sm:$0xf]  ;;  %v10148_v0 = vor.u32 %v14744_v48, %v10145_v49  ;;  %v10632_v11 = vor.u32 %v14869_v63, %v10631_v62  ;;  %v10535_v43 = vld [vmem:[#allocation2 + $0x518] sm:$0xf]  ;;  %v10024_v48 = vor.u32 %v14717_v37, %v10023_v34 }
 0x12a   :  { %2172 = vmatpush.bf16.msrb.mxu2 %v10500_v12  ;;  %2147 = vmatpush.bf16.msrb.mxu0 %v9956_v25  ;;  %v10401_v53 = vld [vmem:[#allocation2 + $0x430] sm:$0xf0]  ;;  %v10087_v12 = vld [vmem:[#allocation2 + $0x198] sm:$0xf] }
 0x12b   :  { %v14872_v54 = vld [vmem:[#allocation2 + $0x614] sm:$0xf]  ;;  %v10404_v1 = vor.u32 %v14808_v50, %v10401_v53  ;;  %v10088_v21 = vor.u32 %v14733_v13, %v10087_v12  ;;  %v14725_v25 = vld [vmem:[#allocation2 + $0x174] sm:$0xf0] }
 0x12c   :  { %2185 = vmatpush.bf16.msrb.mxu3 %v10756_v17  ;;  %2160 = vmatpush.bf16.msrb.mxu1 %v10212_v29  ;;  %v10657_v55 = vld [vmem:[#allocation2 + $0x630] sm:$0xf0]  ;;  %v10599_v17 = vld [vmem:[#allocation2 + $0x598] sm:$0xf]  ;;  %v10056_v33 = vor.u32 %v14725_v25, %v10055_v24 }
 0x12d   :  { %v10660_v8 = vor.u32 %v14872_v54, %v10657_v55  ;;  %v10600_v23 = vor.u32 %v14861_v18, %v10599_v17  ;;  %v10567_v29 = vld [vmem:[#allocation2 + $0x558] sm:$0xf] }
 0x12e   :  { %2173 = vmatpush.bf16.msrb.mxu2 %v10468_v30  ;;  %2148 = vmatpush.bf16.msrb.mxu0 %v9924_v42  ;;  %v14853_v30 = vld [vmem:[#allocation2 + $0x574] sm:$0xf0] }
 0x12f   :  { %v10568_v36 = vor.u32 %v14853_v30, %v10567_v29  ;;  %v14781_v42 = vld [vmem:[#allocation2 + $0x334] sm:$0xf0] }
 0x130   :  { %2186 = vmatpush.bf16.msrb.mxu3 %v10724_v35  ;;  %2161 = vmatpush.bf16.msrb.mxu1 %v10180_v46  ;;  %v10312_v35 = vor.u32 %v14789_v28, %v10311_v26  ;;  %v14845_v44 = vld [vmem:[#allocation2 + $0x534] sm:$0xf0]  ;;  %v10280_v50 = vor.u32 %v14781_v42, %v10279_v39 }
 0x131   :  { %v10791_v46 = vld [vmem:[#allocation2 + $0x718] sm:$0xf]  ;;  %v10536_v51 = vor.u32 %v14845_v44, %v10535_v43 }
 0x132   :  { %2174 = vmatpush.bf16.msrb.mxu2 %v10436_v47  ;;  %2149 = vmatpush.bf16.msrb.mxu0 %v9892_v60  ;;  %v14909_v47 = vld [vmem:[#allocation2 + $0x734] sm:$0xf0]  ;;  %v1943_v49 = vpop.f32.mrf.mxu0 }
 0x133   :  { %v14709_v53 = vld [vmem:[#allocation2 + $0xf4] sm:$0xf0]  ;;  %v1944_v55 = vadd.f32 %v1943_v49, %v587_v40  ;;  %v10792_v57 = vor.u32 %v14909_v47, %v10791_v46 }
 0x134   :  { %2187 = vmatpush.bf16.msrb.mxu3 %v10692_v52  ;;  %2162 = vmatpush.bf16.msrb.mxu1 %v10148_v0  ;;  %v9991_v52 = vld [vmem:[#allocation2 + $0xd8] sm:$0xf]  ;;  %v1956_v56 = vpop.f32.mrf.mxu1 }
 0x135   :  { %2150 = vmatmul.bf16.vlgmr.msrb.gmra.mxu0 %v16645_v4  ;;  %v10247_v54 = vld [vmem:[#allocation2 + $0x2d8] sm:$0xf]  ;;  %v1957_v63 = vadd.f32 %v1956_v56, %v1944_v55  ;;  %v9992_v0 = vor.u32 %v14709_v53, %v9991_v52  ;;  %v14737_v52 = vld [vmem:[#allocation2 + $0x1dc] sm:$0xf] }
 0x136   :  { %2175 = vmatpush.bf16.msrb.mxu2 %v10404_v1  ;;  %2194 = vmatpush.bf16.msra.mxu0 %v10120_v9  ;;  %v14773_v58 = vld [vmem:[#allocation2 + $0x2f4] sm:$0xf0]  ;;  %v10121_v53 = vld [vmem:[#allocation2 + $0x1f8] sm:$0xf0] }
 0x137   :  { %2163 = vmatmul.bf16.vlgmr.msrb.gmra.mxu1 %v16647_v5  ;;  %v10503_v59 = vld [vmem:[#allocation2 + $0x4d8] sm:$0xf]  ;;  %v10248_v1 = vor.u32 %v14773_v58, %v10247_v54  ;;  %v14801_v54 = vld [vmem:[#allocation2 + $0x3dc] sm:$0xf] }
 0x138   :  { %2188 = vmatpush.bf16.msrb.mxu3 %v10660_v8  ;;  %2207 = vmatpush.bf16.msra.mxu1 %v10376_v10  ;;  %v14837_v60 = vld [vmem:[#allocation2 + $0x4f4] sm:$0xf0]  ;;  %v10377_v56 = vld [vmem:[#allocation2 + $0x3f8] sm:$0xf0] }
 0x139   :  { %2176 = vmatmul.bf16.vlgmr.msrb.gmra.mxu2 %v16649_v6  ;;  %v10759_v61 = vld [vmem:[#allocation2 + $0x6d8] sm:$0xf]  ;;  %v10504_v2 = vor.u32 %v14837_v60, %v10503_v59  ;;  %v10633_v58 = vld [vmem:[#allocation2 + $0x5f8] sm:$0xf0] }
 0x13a   :  { %2220 = vmatpush.bf16.msra.mxu2 %v10632_v11  ;;  %2195 = vmatpush.bf16.msra.mxu0 %v10088_v21  ;;  %v14901_v62 = vld [vmem:[#allocation2 + $0x6f4] sm:$0xf0] }
 0x13b   :  { %2189 = vmatmul.bf16.vlgmr.msrb.gmra.mxu3 %v16654_v7  ;;  %v9959_v3 = vld [vmem:[#allocation2 + $0x98] sm:$0xf]  ;;  %v10760_v11 = vor.u32 %v14901_v62, %v10759_v61  ;;  %v14929_v61 = vld [vmem:[#allocation2 + $0x7dc] sm:$0xf] }
 0x13c   :  { %2233 = vmatpush.bf16.msra.mxu3 %v10888_v15  ;;  %2208 = vmatpush.bf16.msra.mxu1 %v10344_v22  ;;  %v14701_v8 = vld [vmem:[#allocation2 + $0xb4] sm:$0xf0]  ;;  %v1969_v10 = vpop.f32.mrf.mxu2  ;;  %v1945_v22 = vpop.f32.mrf.mxu0  ;;  %v10889_v62 = vld [vmem:[#allocation2 + $0x7f8] sm:$0xf0] }
 0x13d   :  { %v10215_v9 = vld [vmem:[#allocation2 + $0x298] sm:$0xf]  ;;  %v1970_v15 = vadd.f32 %v1969_v10, %v1957_v63  ;;  %v9960_v19 = vor.u32 %v14701_v8, %v9959_v3  ;;  %v1958_v28 = vpop.f32.mrf.mxu1  ;;  %v14729_v3 = vld [vmem:[#allocation2 + $0x19c] sm:$0xf]  ;;  %v10892_v10 = vor.u32 %v14929_v61, %v10889_v62 }
 0x13e   :  { %2221 = vmatpush.bf16.msra.mxu2 %v10600_v23  ;;  %2196 = vmatpush.bf16.msra.mxu0 %v10056_v33  ;;  %v14765_v12 = vld [vmem:[#allocation2 + $0x2b4] sm:$0xf0]  ;;  %v1982_v16 = vpop.f32.mrf.mxu3  ;;  %v10089_v8 = vld [vmem:[#allocation2 + $0x1b8] sm:$0xf0] }
 0x13f   :  { %v10471_v13 = vld [vmem:[#allocation2 + $0x498] sm:$0xf]  ;;  %v1983_v21 = vadd.f32 %v1982_v16, %v1970_v15  ;;  %v10216_v23 = vor.u32 %v14765_v12, %v10215_v9  ;;  %v14793_v9 = vld [vmem:[#allocation2 + $0x39c] sm:$0xf]  ;;  %v10092_v16 = vor.u32 %v14729_v3, %v10089_v8 }
 0x140   :  { %2234 = vmatpush.bf16.msra.mxu3 %v10856_v27  ;;  %2209 = vmatpush.bf16.msra.mxu1 %v10312_v35  ;;  %v14829_v14 = vld [vmem:[#allocation2 + $0x4b4] sm:$0xf0]  ;;  %v14857_v12 = vld [vmem:[#allocation2 + $0x59c] sm:$0xf] }
 0x141   :  { %v10727_v17 = vld [vmem:[#allocation2 + $0x698] sm:$0xf]  ;;  %v10472_v24 = vor.u32 %v14829_v14, %v10471_v13  ;;  %v2299_v32 = vmax.f32 %v1983_v21, 0.0  ;;  %v10601_v13 = vld [vmem:[#allocation2 + $0x5b8] sm:$0xf0] }
 0x142   :  { %2222 = vmatpush.bf16.msra.mxu2 %v10568_v36  ;;  %2197 = vmatpush.bf16.msra.mxu0 %v10024_v48  ;;  %v14893_v18 = vld [vmem:[#allocation2 + $0x6b4] sm:$0xf0]  ;;  %v14921_v14 = vld [vmem:[#allocation2 + $0x79c] sm:$0xf] }
 0x143   :  { %v9927_v20 = vld [vmem:[#allocation2 + $0x58] sm:$0xf]  ;;  %v10728_v29 = vor.u32 %v14893_v18, %v10727_v17  ;;  %v16704_v39 = vpack.c.bf16 %v2299_v32, %v2299_v32  ;;  %v10857_v15 = vld [vmem:[#allocation2 + $0x7b8] sm:$0xf0]  ;;  %v10604_v18 = vor.u32 %v14857_v12, %v10601_v13 }
 0x144   :  { %2235 = vmatpush.bf16.msra.mxu3 %v10824_v41  ;;  %2210 = vmatpush.bf16.msra.mxu1 %v10280_v50  ;;  %v14693_v25 = vld [vmem:[#allocation2 + $0x74] sm:$0xf0]  ;;  %v1971_v46 = vpop.f32.mrf.mxu2  ;;  %v14785_v21 = vld [vmem:[#allocation2 + $0x35c] sm:$0xf]  ;;  %v10860_v22 = vor.u32 %v14921_v14, %v10857_v15 }
 0x145   :  { %v10183_v26 = vld [vmem:[#allocation2 + $0x258] sm:$0xf]  ;;  %v9928_v35 = vor.u32 %v14693_v25, %v9927_v20  ;;  %v10057_v20 = vld [vmem:[#allocation2 + $0x178] sm:$0xf0] }
 0x146   :  { %2223 = vmatpush.bf16.msra.mxu2 %v10536_v51  ;;  %2198 = vmatpush.bf16.msra.mxu0 %v9992_v0  ;;  %v14757_v27 = vld [vmem:[#allocation2 + $0x274] sm:$0xf0]  ;;  %v1984_v51 = vpop.f32.mrf.mxu3  ;;  %v10124_v0 = vor.u32 %v14737_v52, %v10121_v53  ;;  %v10569_v25 = vld [vmem:[#allocation2 + $0x578] sm:$0xf0] }
 0x147   :  { %v10439_v30 = vld [vmem:[#allocation2 + $0x458] sm:$0xf]  ;;  %v10184_v40 = vor.u32 %v14757_v27, %v10183_v26  ;;  %v14913_v26 = vld [vmem:[#allocation2 + $0x75c] sm:$0xf] }
 0x148   :  { %2236 = vmatpush.bf16.msra.mxu3 %v10792_v57  ;;  %2211 = vmatpush.bf16.msra.mxu1 %v10248_v1  ;;  %v14821_v31 = vld [vmem:[#allocation2 + $0x474] sm:$0xf0]  ;;  %v14865_v57 = vld [vmem:[#allocation2 + $0x5dc] sm:$0xf]  ;;  %v10380_v1 = vor.u32 %v14801_v54, %v10377_v56 }
 0x149   :  { %v10695_v33 = vld [vmem:[#allocation2 + $0x658] sm:$0xf]  ;;  %v10440_v41 = vor.u32 %v14821_v31, %v10439_v30  ;;  %v10825_v27 = vld [vmem:[#allocation2 + $0x778] sm:$0xf0] }
 0x14a   :  { %2224 = vmatpush.bf16.msra.mxu2 %v10504_v2  ;;  %v14885_v34 = vld [vmem:[#allocation2 + $0x674] sm:$0xf0]  ;;  %2199 = vmatpush.bf16.msra.mxu0 %v9960_v19  ;;  %v10636_v2 = vor.u32 %v14865_v57, %v10633_v58  ;;  %v14721_v19 = vld [vmem:[#allocation2 + $0x15c] sm:$0xf] }
 0x14b   :  { %v9895_v36 = vld [vmem:[#allocation2 + $0x18] sm:$0xf]  ;;  %v10696_v47 = vor.u32 %v14885_v34, %v10695_v33  ;;  %v10060_v28 = vor.u32 %v14721_v19, %v10057_v20  ;;  %v10025_v32 = vld [vmem:[#allocation2 + $0x138] sm:$0xf0]  ;;  %v588_v34 = vperm.slane %v16691_v38, 2 }
 0x14c   :  { %2237 = vmatpush.bf16.msra.mxu3 %v10760_v11  ;;  %v14685_v37 = vld [vmem:[#allocation2 + $0x34] sm:$0xf0]  ;;  %2212 = vmatpush.bf16.msra.mxu1 %v10216_v23  ;;  %v10345_v11 = vld [vmem:[#allocation2 + $0x3b8] sm:$0xf0] }
 0x14d   :  { %v10151_v42 = vld [vmem:[#allocation2 + $0x218] sm:$0xf]  ;;  %v9896_v55 = vor.u32 %v14685_v37, %v9895_v36  ;;  %v10348_v17 = vor.u32 %v14793_v9, %v10345_v11  ;;  %v10313_v23 = vld [vmem:[#allocation2 + $0x378] sm:$0xf0] }
 0x14e   :  { %2225 = vmatpush.bf16.msra.mxu2 %v10472_v24  ;;  %v14749_v43 = vld [vmem:[#allocation2 + $0x234] sm:$0xf0]  ;;  %2200 = vmatpush.bf16.msra.mxu0 %v9928_v35  ;;  %v14849_v24 = vld [vmem:[#allocation2 + $0x55c] sm:$0xf]  ;;  %v10316_v30 = vor.u32 %v14785_v21, %v10313_v23  ;;  %v10828_v35 = vor.u32 %v14913_v26, %v10825_v27 }
 0x14f   :  { %v10407_v44 = vld [vmem:[#allocation2 + $0x418] sm:$0xf]  ;;  %v10152_v59 = vor.u32 %v14749_v43, %v10151_v42  ;;  %v10572_v31 = vor.u32 %v14849_v24, %v10569_v25  ;;  %v14777_v33 = vld [vmem:[#allocation2 + $0x31c] sm:$0xf] }
 0x150   :  { %2238 = vmatpush.bf16.msra.mxu3 %v10728_v29  ;;  %v14813_v48 = vld [vmem:[#allocation2 + $0x434] sm:$0xf0]  ;;  %2213 = vmatpush.bf16.msra.mxu1 %v10184_v40  ;;  %v14713_v29 = vld [vmem:[#allocation2 + $0x11c] sm:$0xf] }
 0x151   :  { %v10663_v49 = vld [vmem:[#allocation2 + $0x618] sm:$0xf]  ;;  %v10408_v60 = vor.u32 %v14813_v48, %v10407_v44  ;;  %v10281_v36 = vld [vmem:[#allocation2 + $0x338] sm:$0xf0]  ;;  %v10028_v43 = vor.u32 %v14713_v29, %v10025_v32 }
 0x152   :  { %v14877_v50 = vld [vmem:[#allocation2 + $0x634] sm:$0xf0]  ;;  %2226 = vmatpush.bf16.msra.mxu2 %v10440_v41  ;;  %2201 = vmatpush.bf16.msra.mxu0 %v9896_v55  ;;  %v14841_v37 = vld [vmem:[#allocation2 + $0x51c] sm:$0xf]  ;;  %v1995_v44 = vpop.f32.mrf.mxu0  ;;  %v10284_v46 = vor.u32 %v14777_v33, %v10281_v36 }
 0x153   :  { %v10664_v63 = vor.u32 %v14877_v50, %v10663_v49  ;;  %v10537_v40 = vld [vmem:[#allocation2 + $0x538] sm:$0xf0]  ;;  %v1996_v51 = vadd.f32 %v1995_v44, %v588_v34 }
 0x154   :  { %2239 = vmatpush.bf16.msra.mxu3 %v10696_v47  ;;  %2214 = vmatpush.bf16.msra.mxu1 %v10152_v59  ;;  %v14905_v41 = vld [vmem:[#allocation2 + $0x71c] sm:$0xf]  ;;  %v10540_v47 = vor.u32 %v14841_v37, %v10537_v40  ;;  %v2008_v52 = vpop.f32.mrf.mxu1 }
 0x155   :  { %2202 = vmatmul.bf16.vlgmr.msra.gmra.mxu0 %v16645_v4  ;;  %v10793_v42 = vld [vmem:[#allocation2 + $0x738] sm:$0xf0]  ;;  %v2009_v59 = vadd.f32 %v2008_v52, %v1996_v51 }
 0x156   :  { %2227 = vmatpush.bf16.msra.mxu2 %v10408_v60  ;;  %2246 = vmatpush.bf16.msrb.mxu0 %v10124_v0  ;;  %v14705_v48 = vld [vmem:[#allocation2 + $0xdc] sm:$0xf]  ;;  %v10796_v53 = vor.u32 %v14905_v41, %v10793_v42 }
 0x157   :  { %2215 = vmatmul.bf16.vlgmr.msra.gmra.mxu1 %v16647_v5  ;;  %v9993_v49 = vld [vmem:[#allocation2 + $0xf8] sm:$0xf0] }
 0x158   :  { %2240 = vmatpush.bf16.msra.mxu3 %v10664_v63  ;;  %2259 = vmatpush.bf16.msrb.mxu1 %v10380_v1  ;;  %v14769_v50 = vld [vmem:[#allocation2 + $0x2dc] sm:$0xf]  ;;  %v9996_v60 = vor.u32 %v14705_v48, %v9993_v49 }
 0x159   :  { %2228 = vmatmul.bf16.vlgmr.msra.gmra.mxu2 %v16649_v6  ;;  %v10249_v54 = vld [vmem:[#allocation2 + $0x2f8] sm:$0xf0] }
 0x15a   :  { %2272 = vmatpush.bf16.msrb.mxu2 %v10636_v2  ;;  %2247 = vmatpush.bf16.msrb.mxu0 %v10092_v16  ;;  %v14833_v55 = vld [vmem:[#allocation2 + $0x4dc] sm:$0xf]  ;;  %v10252_v61 = vor.u32 %v14769_v50, %v10249_v54 }
 0x15b   :  { %2241 = vmatmul.bf16.vlgmr.msra.gmra.mxu3 %v16654_v7  ;;  %v10505_v56 = vld [vmem:[#allocation2 + $0x4f8] sm:$0xf0] }
 0x15c   :  { %2285 = vmatpush.bf16.msrb.mxu3 %v10892_v10  ;;  %2260 = vmatpush.bf16.msrb.mxu1 %v10348_v17  ;;  %v14897_v57 = vld [vmem:[#allocation2 + $0x6dc] sm:$0xf]  ;;  %v10508_v62 = vor.u32 %v14833_v55, %v10505_v56  ;;  %v2021_v2 = vpop.f32.mrf.mxu2  ;;  %v2010_v24 = vpop.f32.mrf.mxu1 }
 0x15d   :  { %v10761_v58 = vld [vmem:[#allocation2 + $0x6f8] sm:$0xf0]  ;;  %v2022_v11 = vadd.f32 %v2021_v2, %v2009_v59 }
 0x15e   :  { %2273 = vmatpush.bf16.msrb.mxu2 %v10604_v18  ;;  %2248 = vmatpush.bf16.msrb.mxu0 %v10060_v28  ;;  %v14697_v63 = vld [vmem:[#allocation2 + $0x9c] sm:$0xf]  ;;  %v10764_v3 = vor.u32 %v14897_v57, %v10761_v58  ;;  %v2034_v12 = vpop.f32.mrf.mxu3  ;;  %v1997_v18 = vpop.f32.mrf.mxu0 }
 0x15f   :  { %v9961_v0 = vld [vmem:[#allocation2 + $0xb8] sm:$0xf0]  ;;  %v2035_v17 = vadd.f32 %v2034_v12, %v2022_v11 }
 0x160   :  { %2286 = vmatpush.bf16.msrb.mxu3 %v10860_v22  ;;  %2261 = vmatpush.bf16.msrb.mxu1 %v10316_v30  ;;  %v14761_v1 = vld [vmem:[#allocation2 + $0x29c] sm:$0xf]  ;;  %v9964_v15 = vor.u32 %v14697_v63, %v9961_v0 }
 0x161   :  { %v10217_v8 = vld [vmem:[#allocation2 + $0x2b8] sm:$0xf0]  ;;  %v2300_v28 = vmax.f32 %v2035_v17, 0.0 }
 0x162   :  { %2274 = vmatpush.bf16.msrb.mxu2 %v10572_v31  ;;  %2249 = vmatpush.bf16.msrb.mxu0 %v10028_v43  ;;  %v14825_v9 = vld [vmem:[#allocation2 + $0x49c] sm:$0xf]  ;;  %v10220_v19 = vor.u32 %v14761_v1, %v10217_v8 }
 0x163   :  { %v10473_v10 = vld [vmem:[#allocation2 + $0x4b8] sm:$0xf0]  ;;  %v16711_v32 = vpack.c.bf16 %v2300_v28, %v2300_v28 }
 0x164   :  { %2287 = vmatpush.bf16.msrb.mxu3 %v10828_v35  ;;  %2262 = vmatpush.bf16.msrb.mxu1 %v10284_v46  ;;  %v14889_v13 = vld [vmem:[#allocation2 + $0x69c] sm:$0xf]  ;;  %v10476_v20 = vor.u32 %v14825_v9, %v10473_v10  ;;  %v2023_v40 = vpop.f32.mrf.mxu2 }
 0x165   :  { %v10729_v14 = vld [vmem:[#allocation2 + $0x6b8] sm:$0xf0] }
 0x166   :  { %2275 = vmatpush.bf16.msrb.mxu2 %v10540_v47  ;;  %2250 = vmatpush.bf16.msrb.mxu0 %v9996_v60  ;;  %v14689_v16 = vld [vmem:[#allocation2 + $0x5c] sm:$0xf]  ;;  %v10732_v25 = vor.u32 %v14889_v13, %v10729_v14  ;;  %v2036_v46 = vpop.f32.mrf.mxu3 }
 0x167   :  { %v9929_v21 = vld [vmem:[#allocation2 + $0x78] sm:$0xf0] }
 0x168   :  { %2288 = vmatpush.bf16.msrb.mxu3 %v10796_v53  ;;  %2263 = vmatpush.bf16.msrb.mxu1 %v10252_v61  ;;  %v14753_v22 = vld [vmem:[#allocation2 + $0x25c] sm:$0xf]  ;;  %v9932_v31 = vor.u32 %v14689_v16, %v9929_v21  ;;  %v589_v53 = vperm.slane %v16691_v38, 3 }
 0x169   :  { %v10185_v23 = vld [vmem:[#allocation2 + $0x278] sm:$0xf0] }
 0x16a   :  { %2276 = vmatpush.bf16.msrb.mxu2 %v10508_v62  ;;  %v14817_v26 = vld [vmem:[#allocation2 + $0x45c] sm:$0xf]  ;;  %2251 = vmatpush.bf16.msrb.mxu0 %v9964_v15  ;;  %v10188_v33 = vor.u32 %v14753_v22, %v10185_v23 }
 0x16b   :  { %v10441_v27 = vld [vmem:[#allocation2 + $0x478] sm:$0xf0] }
 0x16c   :  { %2289 = vmatpush.bf16.msrb.mxu3 %v10764_v3  ;;  %v14881_v29 = vld [vmem:[#allocation2 + $0x65c] sm:$0xf]  ;;  %2264 = vmatpush.bf16.msrb.mxu1 %v10220_v19  ;;  %v10444_v34 = vor.u32 %v14817_v26, %v10441_v27  ;;  %v591_v19 = vperm.slane %v16691_v38, 5 }
 0x16d   :  { %v10697_v30 = vld [vmem:[#allocation2 + $0x678] sm:$0xf0] }
 0x16e   :  { %2277 = vmatpush.bf16.msrb.mxu2 %v10476_v20  ;;  %v14681_v35 = vld [vmem:[#allocation2 + $0x1c] sm:$0xf]  ;;  %v10700_v41 = vor.u32 %v14881_v29, %v10697_v30  ;;  %2252 = vmatpush.bf16.msrb.mxu0 %v9932_v31 }
 0x16f   :  { %v9897_v36 = vld [vmem:[#allocation2 + $0x38] sm:$0xf0] }
 0x170   :  { %v14745_v37 = vld [vmem:[#allocation2 + $0x21c] sm:$0xf]  ;;  %2290 = vmatpush.bf16.msrb.mxu3 %v10732_v25  ;;  %v9900_v49 = vor.u32 %v14681_v35, %v9897_v36  ;;  %2265 = vmatpush.bf16.msrb.mxu1 %v10188_v33  ;;  %v592_v35 = vperm.slane %v16691_v38, 6 }
 0x171   :  { %v10153_v42 = vld [vmem:[#allocation2 + $0x238] sm:$0xf0] }
 0x172   :  { %v14809_v43 = vld [vmem:[#allocation2 + $0x41c] sm:$0xf]  ;;  %2278 = vmatpush.bf16.msrb.mxu2 %v10444_v34  ;;  %v10156_v50 = vor.u32 %v14745_v37, %v10153_v42  ;;  %2253 = vmatpush.bf16.msrb.mxu0 %v9900_v49  ;;  %v2047_v54 = vpop.f32.mrf.mxu0 }
 0x173   :  { %v10409_v44 = vld [vmem:[#allocation2 + $0x438] sm:$0xf0]  ;;  %v2048_v55 = vadd.f32 %v2047_v54, %v589_v53  ;;  %v593_v53 = vperm.slane %v16691_v38, 7 }
 0x174   :  { %v14873_v47 = vld [vmem:[#allocation2 + $0x61c] sm:$0xf]  ;;  %v10412_v51 = vor.u32 %v14809_v43, %v10409_v44  ;;  %2291 = vmatpush.bf16.msrb.mxu3 %v10700_v41  ;;  %2266 = vmatpush.bf16.msrb.mxu1 %v10156_v50  ;;  %v2060_v56 = vpop.f32.mrf.mxu1 }
 0x175   :  { %v10665_v48 = vld [vmem:[#allocation2 + $0x638] sm:$0xf0]  ;;  %2254 = vmatmul.bf16.vlgmr.msrb.gmra.mxu0 %v16645_v4  ;;  %v2061_v57 = vadd.f32 %v2060_v56, %v2048_v55 }
 0x176   :  { %v10668_v52 = vor.u32 %v14873_v47, %v10665_v48  ;;  %2279 = vmatpush.bf16.msrb.mxu2 %v10412_v51 }
 0x177   :  { %2267 = vmatmul.bf16.vlgmr.msrb.gmra.mxu1 %v16647_v5 }
 0x178   :  { %2292 = vmatpush.bf16.msrb.mxu3 %v10668_v52 }
 0x179   :  { %2280 = vmatmul.bf16.vlgmr.msrb.gmra.mxu2 %v16649_v6  ;;  %v590_v6 = vperm.slane %v16691_v38, 4 }
 0x17a   :  { %v2049_v62 = vpop.f32.mrf.mxu0 }
 0x17b   :  { %2293 = vmatmul.bf16.vlgmr.msrb.gmra.mxu3 %v16654_v7 }
 0x17c   :  { %v2073_v58 = vpop.f32.mrf.mxu2  ;;  %v2062_v63 = vpop.f32.mrf.mxu1 }
 0x17d   :  { %v2074_v59 = vadd.f32 %v2073_v58, %v2061_v57 }
 0x17e   :  { %v2086_v60 = vpop.f32.mrf.mxu3 }
 0x17f   :  { %v2087_v61 = vadd.f32 %v2086_v60, %v2074_v59 }
 0x181   :  { %v2301_v0 = vmax.f32 %v2087_v61, 0.0 }
 0x183   :  { %v16718_v4 = vpack.c.bf16 %v2301_v0, %v2301_v0 }
 0x184   :  { %v2075_v5 = vpop.f32.mrf.mxu2 }
 0x186   :  { %v2088_v1 = vpop.f32.mrf.mxu3 }
 0x192   :  { %v2099_v7 = vpop.f32.mrf.mxu0 }
 0x193   :  { %v2100_v2 = vadd.f32 %v2099_v7, %v590_v6 }
 0x194   :  { %v2112_v3 = vpop.f32.mrf.mxu1 }
 0x195   :  { %v2113_v8 = vadd.f32 %v2112_v3, %v2100_v2 }
 0x19a   :  { %v2101_v13 = vpop.f32.mrf.mxu0 }
 0x19c   :  { %v2125_v9 = vpop.f32.mrf.mxu2  ;;  %v2114_v14 = vpop.f32.mrf.mxu1 }
 0x19d   :  { %v2126_v10 = vadd.f32 %v2125_v9, %v2113_v8 }
 0x19e   :  { %v2138_v11 = vpop.f32.mrf.mxu3 }
 0x19f   :  { %v2139_v12 = vadd.f32 %v2138_v11, %v2126_v10 }
 0x1a1   :  { %v2302_v15 = vmax.f32 %v2139_v12, 0.0 }
 0x1a3   :  { %v16721_v16 = vpack.c.bf16 %v2302_v15, %v2302_v15 }
 0x1a4   :  { %v2127_v17 = vpop.f32.mrf.mxu2 }
 0x1a6   :  { %v2140_v18 = vpop.f32.mrf.mxu3 }
 0x1b2   :  { %v2151_v20 = vpop.f32.mrf.mxu0 }
 0x1b3   :  { %v2152_v21 = vadd.f32 %v2151_v20, %v591_v19 }
 0x1b4   :  { %v2164_v22 = vpop.f32.mrf.mxu1 }
 0x1b5   :  { %v2165_v23 = vadd.f32 %v2164_v22, %v2152_v21 }
 0x1ba   :  { %v2153_v28 = vpop.f32.mrf.mxu0 }
 0x1bc   :  { %v2177_v24 = vpop.f32.mrf.mxu2  ;;  %v2166_v29 = vpop.f32.mrf.mxu1 }
 0x1bd   :  { %v2178_v25 = vadd.f32 %v2177_v24, %v2165_v23 }
 0x1be   :  { %v2190_v26 = vpop.f32.mrf.mxu3 }
 0x1bf   :  { %v2191_v27 = vadd.f32 %v2190_v26, %v2178_v25 }
 0x1c1   :  { %v2303_v30 = vmax.f32 %v2191_v27, 0.0 }
 0x1c3   :  { %v16724_v31 = vpack.c.bf16 %v2303_v30, %v2303_v30 }
 0x1c4   :  { %v2179_v33 = vpop.f32.mrf.mxu2 }
 0x1c6   :  { %v2192_v34 = vpop.f32.mrf.mxu3 }
 0x1d2   :  { %v2203_v36 = vpop.f32.mrf.mxu0 }
 0x1d3   :  { %v2204_v37 = vadd.f32 %v2203_v36, %v592_v35 }
 0x1d4   :  { %v2216_v40 = vpop.f32.mrf.mxu1 }
 0x1d5   :  { %v2217_v41 = vadd.f32 %v2216_v40, %v2204_v37 }
 0x1da   :  { %v2205_v47 = vpop.f32.mrf.mxu0 }
 0x1dc   :  { %v2229_v42 = vpop.f32.mrf.mxu2  ;;  %v2218_v48 = vpop.f32.mrf.mxu1 }
 0x1dd   :  { %v2230_v43 = vadd.f32 %v2229_v42, %v2217_v41 }
 0x1de   :  { %v2242_v44 = vpop.f32.mrf.mxu3 }
 0x1df   :  { %v2243_v46 = vadd.f32 %v2242_v44, %v2230_v43 }
 0x1e1   :  { %v2304_v49 = vmax.f32 %v2243_v46, 0.0 }
 0x1e3   :  { %v16727_v50 = vpack.c.bf16 %v2304_v49, %v2304_v49 }
 0x1e4   :  { %v2231_v51 = vpop.f32.mrf.mxu2 }
 0x1e6   :  { %v2244_v52 = vpop.f32.mrf.mxu3 }
 0x1f2   :  { %v2255_v54 = vpop.f32.mrf.mxu0 }
 0x1f3   :  { %v2256_v55 = vadd.f32 %v2255_v54, %v593_v53 }
 0x1f4   :  { %v2268_v56 = vpop.f32.mrf.mxu1 }
 0x1f5   :  { %v2269_v57 = vadd.f32 %v2268_v56, %v2256_v55 }
 0x1fa   :  { %v2257_v61 = vpop.f32.mrf.mxu0 }
 0x1fc   :  { %v2281_v58 = vpop.f32.mrf.mxu2  ;;  %v2270_v62 = vpop.f32.mrf.mxu1 }
 0x1fd   :  { %v2282_v59 = vadd.f32 %v2281_v58, %v2269_v57 }
 0x1fe   :  { %v2294_v60 = vpop.f32.mrf.mxu3 }
 0x1ff   :  { %v2295_v63 = vadd.f32 %v2294_v60, %v2282_v59 }
 0x201   :  { %v2305_v0 = vmax.f32 %v2295_v63, 0.0 }
 0x203   :  { %v16730_v5 = vpack.c.bf16 %v2305_v0, %v2305_v0 }
 0x204   :  { %v2283_v1 = vpop.f32.mrf.mxu2 }
 0x206   :  { %v2296_v6 = vpop.f32.mrf.mxu3 }
 0x207   :  { %16444 = dma.done.wait [#allocation11 + $0x1], 32768 }
 0x208   :  { %16445 = vsyncadd [#allocation11 + $0x1], 4294934528  ;;  %v11007_v7 = vld [vmem:[#allocation3 + $0xe0] sm:$0xf]  ;;  %v14964_v2 = vld [vmem:[#allocation3 + $0xec] sm:$0xf0] }
 0x209   :  { %v11135_v38 = vld [vmem:[#allocation3 + $0x1e0] sm:$0xf]  ;;  %v11008_v3 = vor.u32 %v14964_v2, %v11007_v7  ;;  %v14996_v8 = vld [vmem:[#allocation3 + $0x1ec] sm:$0xf0] }
 0x20a   :  { %v11263_v9 = vld [vmem:[#allocation3 + $0x2e0] sm:$0xf]  ;;  %v15028_v10 = vld [vmem:[#allocation3 + $0x2ec] sm:$0xf0]  ;;  %v11136_v11 = vor.u32 %v14996_v8, %v11135_v38 }
 0x20b   :  { %v11264_v12 = vor.u32 %v15028_v10, %v11263_v9  ;;  %v11391_v13 = vld [vmem:[#allocation3 + $0x3e0] sm:$0xf]  ;;  %v15060_v14 = vld [vmem:[#allocation3 + $0x3ec] sm:$0xf0]  ;;  %3864 = vmatpush.bf16.msra.mxu0 %v11008_v3 }
 0x20c   :  { %v10991_v15 = vld [vmem:[#allocation3 + $0xc0] sm:$0xf]  ;;  %v11392_v17 = vor.u32 %v15060_v14, %v11391_v13  ;;  %v14960_v18 = vld [vmem:[#allocation3 + $0xcc] sm:$0xf0]  ;;  %3877 = vmatpush.bf16.msra.mxu1 %v11136_v11 }
 0x20d   :  { %v11119_v19 = vld [vmem:[#allocation3 + $0x1c0] sm:$0xf]  ;;  %v14992_v20 = vld [vmem:[#allocation3 + $0x1cc] sm:$0xf0]  ;;  %3890 = vmatpush.bf16.msra.mxu2 %v11264_v12  ;;  %v10992_v21 = vor.u32 %v14960_v18, %v10991_v15 }
 0x20e   :  { %v11120_v22 = vor.u32 %v14992_v20, %v11119_v19  ;;  %v11247_v23 = vld [vmem:[#allocation3 + $0x2c0] sm:$0xf]  ;;  %v15024_v24 = vld [vmem:[#allocation3 + $0x2cc] sm:$0xf0]  ;;  %3903 = vmatpush.bf16.msra.mxu3 %v11392_v17 }
 0x20f   :  { %v11375_v25 = vld [vmem:[#allocation3 + $0x3c0] sm:$0xf]  ;;  %v11248_v26 = vor.u32 %v15024_v24, %v11247_v23  ;;  %v15056_v27 = vld [vmem:[#allocation3 + $0x3cc] sm:$0xf0]  ;;  %3865 = vmatpush.bf16.msra.mxu0 %v10992_v21 }
 0x210   :  { %v10975_v28 = vld [vmem:[#allocation3 + $0xa0] sm:$0xf]  ;;  %v14956_v29 = vld [vmem:[#allocation3 + $0xac] sm:$0xf0]  ;;  %v11376_v30 = vor.u32 %v15056_v27, %v11375_v25  ;;  %3878 = vmatpush.bf16.msra.mxu1 %v11120_v22 }
 0x211   :  { %v11103_v33 = vld [vmem:[#allocation3 + $0x1a0] sm:$0xf]  ;;  %v14988_v34 = vld [vmem:[#allocation3 + $0x1ac] sm:$0xf0]  ;;  %v10976_v36 = vor.u32 %v14956_v29, %v10975_v28  ;;  %3891 = vmatpush.bf16.msra.mxu2 %v11248_v26 }
 0x212   :  { %v11231_v35 = vld [vmem:[#allocation3 + $0x2a0] sm:$0xf]  ;;  %v15020_v37 = vld [vmem:[#allocation3 + $0x2ac] sm:$0xf0]  ;;  %v11104_v42 = vor.u32 %v14988_v34, %v11103_v33  ;;  %3904 = vmatpush.bf16.msra.mxu3 %v11376_v30 }
 0x213   :  { %v11359_v40 = vld [vmem:[#allocation3 + $0x3a0] sm:$0xf]  ;;  %v15052_v41 = vld [vmem:[#allocation3 + $0x3ac] sm:$0xf0]  ;;  %v11232_v43 = vor.u32 %v15020_v37, %v11231_v35  ;;  %3866 = vmatpush.bf16.msra.mxu0 %v10976_v36 }
 0x214   :  { %v10959_v44 = vld [vmem:[#allocation3 + $0x80] sm:$0xf]  ;;  %v14952_v46 = vld [vmem:[#allocation3 + $0x8c] sm:$0xf0]  ;;  %v11360_v48 = vor.u32 %v15052_v41, %v11359_v40  ;;  %3879 = vmatpush.bf16.msra.mxu1 %v11104_v42 }
 0x215   :  { %v11087_v47 = vld [vmem:[#allocation3 + $0x180] sm:$0xf]  ;;  %v14984_v49 = vld [vmem:[#allocation3 + $0x18c] sm:$0xf0]  ;;  %v10960_v55 = vor.u32 %v14952_v46, %v10959_v44  ;;  %3892 = vmatpush.bf16.msra.mxu2 %v11232_v43 }
 0x216   :  { %v11215_v51 = vld [vmem:[#allocation3 + $0x280] sm:$0xf]  ;;  %v15016_v52 = vld [vmem:[#allocation3 + $0x28c] sm:$0xf0]  ;;  %v11088_v56 = vor.u32 %v14984_v49, %v11087_v47  ;;  %3905 = vmatpush.bf16.msra.mxu3 %v11360_v48 }
 0x217   :  { %v11343_v53 = vld [vmem:[#allocation3 + $0x380] sm:$0xf]  ;;  %v15048_v54 = vld [vmem:[#allocation3 + $0x38c] sm:$0xf0]  ;;  %v11216_v57 = vor.u32 %v15016_v52, %v11215_v51  ;;  %3867 = vmatpush.bf16.msra.mxu0 %v10960_v55 }
 0x218   :  { %v10943_v58 = vld [vmem:[#allocation3 + $0x60] sm:$0xf]  ;;  %v14948_v59 = vld [vmem:[#allocation3 + $0x6c] sm:$0xf0]  ;;  %v11344_v61 = vor.u32 %v15048_v54, %v11343_v53  ;;  %3880 = vmatpush.bf16.msra.mxu1 %v11088_v56 }
 0x219   :  { %v11071_v60 = vld [vmem:[#allocation3 + $0x160] sm:$0xf]  ;;  %v14980_v62 = vld [vmem:[#allocation3 + $0x16c] sm:$0xf0]  ;;  %v10944_v7 = vor.u32 %v14948_v59, %v10943_v58  ;;  %3893 = vmatpush.bf16.msra.mxu2 %v11216_v57 }
 0x21a   :  { %v11199_v63 = vld [vmem:[#allocation3 + $0x260] sm:$0xf]  ;;  %v15012_v0 = vld [vmem:[#allocation3 + $0x26c] sm:$0xf0]  ;;  %v11072_v2 = vor.u32 %v14980_v62, %v11071_v60  ;;  %3906 = vmatpush.bf16.msra.mxu3 %v11344_v61 }
 0x21b   :  { %v11327_v1 = vld [vmem:[#allocation3 + $0x360] sm:$0xf]  ;;  %v15044_v6 = vld [vmem:[#allocation3 + $0x36c] sm:$0xf0]  ;;  %v11200_v38 = vor.u32 %v15012_v0, %v11199_v63  ;;  %3868 = vmatpush.bf16.msra.mxu0 %v10944_v7 }
 0x21c   :  { %v10927_v3 = vld [vmem:[#allocation3 + $0x40] sm:$0xf]  ;;  %v14944_v8 = vld [vmem:[#allocation3 + $0x4c] sm:$0xf0]  ;;  %v11328_v10 = vor.u32 %v15044_v6, %v11327_v1  ;;  %3881 = vmatpush.bf16.msra.mxu1 %v11072_v2 }
 0x21d   :  { %v11055_v9 = vld [vmem:[#allocation3 + $0x140] sm:$0xf]  ;;  %v14976_v11 = vld [vmem:[#allocation3 + $0x14c] sm:$0xf0]  ;;  %v10928_v17 = vor.u32 %v14944_v8, %v10927_v3  ;;  %3894 = vmatpush.bf16.msra.mxu2 %v11200_v38 }
 0x21e   :  { %v11183_v12 = vld [vmem:[#allocation3 + $0x240] sm:$0xf]  ;;  %v15008_v13 = vld [vmem:[#allocation3 + $0x24c] sm:$0xf0]  ;;  %v11056_v18 = vor.u32 %v14976_v11, %v11055_v9  ;;  %3907 = vmatpush.bf16.msra.mxu3 %v11328_v10 }
 0x21f   :  { %v11311_v14 = vld [vmem:[#allocation3 + $0x340] sm:$0xf]  ;;  %v15040_v15 = vld [vmem:[#allocation3 + $0x34c] sm:$0xf0]  ;;  %v11184_v19 = vor.u32 %v15008_v13, %v11183_v12  ;;  %3869 = vmatpush.bf16.msra.mxu0 %v10928_v17 }
 0x220   :  { %v10911_v20 = vld [vmem:[#allocation3 + $0x20] sm:$0xf]  ;;  %v14940_v21 = vld [vmem:[#allocation3 + $0x2c] sm:$0xf0]  ;;  %v11312_v23 = vor.u32 %v15040_v15, %v11311_v14  ;;  %3882 = vmatpush.bf16.msra.mxu1 %v11056_v18 }
 0x221   :  { %v11039_v22 = vld [vmem:[#allocation3 + $0x120] sm:$0xf]  ;;  %v14972_v24 = vld [vmem:[#allocation3 + $0x12c] sm:$0xf0]  ;;  %v10912_v29 = vor.u32 %v14940_v21, %v10911_v20  ;;  %3895 = vmatpush.bf16.msra.mxu2 %v11184_v19 }
 0x222   :  { %v11167_v25 = vld [vmem:[#allocation3 + $0x220] sm:$0xf]  ;;  %v15004_v26 = vld [vmem:[#allocation3 + $0x22c] sm:$0xf0]  ;;  %v11040_v34 = vor.u32 %v14972_v24, %v11039_v22  ;;  %3908 = vmatpush.bf16.msra.mxu3 %v11312_v23 }
 0x223   :  { %v11295_v27 = vld [vmem:[#allocation3 + $0x320] sm:$0xf]  ;;  %v15036_v28 = vld [vmem:[#allocation3 + $0x32c] sm:$0xf0]  ;;  %v11168_v35 = vor.u32 %v15004_v26, %v11167_v25  ;;  %3870 = vmatpush.bf16.msra.mxu0 %v10912_v29 }
 0x224   :  { %v10895_v30 = vld [vmem:[#allocation3] sm:$0xf]  ;;  %v14936_v33 = vld [vmem:[#allocation3 + $0xc] sm:$0xf0]  ;;  %v11296_v41 = vor.u32 %v15036_v28, %v11295_v27  ;;  %3883 = vmatpush.bf16.msra.mxu1 %v11040_v34 }
 0x225   :  { %v11023_v36 = vld [vmem:[#allocation3 + $0x100] sm:$0xf]  ;;  %v14968_v37 = vld [vmem:[#allocation3 + $0x10c] sm:$0xf0]  ;;  %v10896_v49 = vor.u32 %v14936_v33, %v10895_v30  ;;  %3896 = vmatpush.bf16.msra.mxu2 %v11168_v35 }
 0x226   :  { %v11151_v40 = vld [vmem:[#allocation3 + $0x200] sm:$0xf]  ;;  %v15000_v42 = vld [vmem:[#allocation3 + $0x20c] sm:$0xf0]  ;;  %v11024_v54 = vor.u32 %v14968_v37, %v11023_v36  ;;  %3909 = vmatpush.bf16.msra.mxu3 %v11296_v41 }
 0x227   :  { %v11279_v43 = vld [vmem:[#allocation3 + $0x300] sm:$0xf]  ;;  %v15032_v44 = vld [vmem:[#allocation3 + $0x30c] sm:$0xf0]  ;;  %v11152_v55 = vor.u32 %v15000_v42, %v11151_v40  ;;  %3871 = vmatpush.bf16.msra.mxu0 %v10896_v49 }
 0x228   :  { %v11519_v46 = vld [vmem:[#allocation3 + $0x4e0] sm:$0xf]  ;;  %v15092_v47 = vld [vmem:[#allocation3 + $0x4ec] sm:$0xf0]  ;;  %v11280_v58 = vor.u32 %v15032_v44, %v11279_v43  ;;  %3884 = vmatpush.bf16.msra.mxu1 %v11024_v54 }
 0x229   :  { %v11647_v48 = vld [vmem:[#allocation3 + $0x5e0] sm:$0xf]  ;;  %v15124_v51 = vld [vmem:[#allocation3 + $0x5ec] sm:$0xf0]  ;;  %v11520_v59 = vor.u32 %v15092_v47, %v11519_v46  ;;  %3897 = vmatpush.bf16.msra.mxu2 %v11152_v55 }
 0x22a   :  { %v11775_v52 = vld [vmem:[#allocation3 + $0x6e0] sm:$0xf]  ;;  %v15156_v53 = vld [vmem:[#allocation3 + $0x6ec] sm:$0xf0]  ;;  %v11648_v60 = vor.u32 %v15124_v51, %v11647_v48  ;;  %3910 = vmatpush.bf16.msra.mxu3 %v11280_v58  ;;  %3872 = vmatmul.bf16.vlgmr.msra.gmra.mxu0 %v16697_v45 }
 0x22b   :  { %v11903_v56 = vld [vmem:[#allocation3 + $0x7e0] sm:$0xf]  ;;  %v15188_v57 = vld [vmem:[#allocation3 + $0x7ec] sm:$0xf0]  ;;  %v11776_v61 = vor.u32 %v15156_v53, %v11775_v52  ;;  %3916 = vmatpush.bf16.msrb.mxu0 %v11520_v59  ;;  %3885 = vmatmul.bf16.vlgmr.msra.gmra.mxu1 %v16704_v39 }
 0x22c   :  { %v11503_v62 = vld [vmem:[#allocation3 + $0x4c0] sm:$0xf]  ;;  %v15088_v63 = vld [vmem:[#allocation3 + $0x4cc] sm:$0xf0]  ;;  %v11904_v1 = vor.u32 %v15188_v57, %v11903_v56  ;;  %3929 = vmatpush.bf16.msrb.mxu1 %v11648_v60  ;;  %3898 = vmatmul.bf16.vlgmr.msra.gmra.mxu2 %v16711_v32 }
 0x22d   :  { %v11631_v0 = vld [vmem:[#allocation3 + $0x5c0] sm:$0xf]  ;;  %v15120_v6 = vld [vmem:[#allocation3 + $0x5cc] sm:$0xf0]  ;;  %v11504_v8 = vor.u32 %v15088_v63, %v11503_v62  ;;  %3942 = vmatpush.bf16.msrb.mxu2 %v11776_v61  ;;  %3911 = vmatmul.bf16.vlgmr.msra.gmra.mxu3 %v16718_v4 }
 0x22e   :  { %v11759_v7 = vld [vmem:[#allocation3 + $0x6c0] sm:$0xf]  ;;  %v15152_v2 = vld [vmem:[#allocation3 + $0x6cc] sm:$0xf0]  ;;  %v11632_v9 = vor.u32 %v15120_v6, %v11631_v0  ;;  %3955 = vmatpush.bf16.msrb.mxu3 %v11904_v1 }
 0x22f   :  { %v11887_v38 = vld [vmem:[#allocation3 + $0x7c0] sm:$0xf]  ;;  %v15184_v3 = vld [vmem:[#allocation3 + $0x7cc] sm:$0xf0]  ;;  %v11760_v10 = vor.u32 %v15152_v2, %v11759_v7  ;;  %3917 = vmatpush.bf16.msrb.mxu0 %v11504_v8 }
 0x230   :  { %v11487_v11 = vld [vmem:[#allocation3 + $0x4a0] sm:$0xf]  ;;  %v15084_v12 = vld [vmem:[#allocation3 + $0x4ac] sm:$0xf0]  ;;  %v11888_v14 = vor.u32 %v15184_v3, %v11887_v38  ;;  %3930 = vmatpush.bf16.msrb.mxu1 %v11632_v9 }
 0x231   :  { %v11615_v13 = vld [vmem:[#allocation3 + $0x5a0] sm:$0xf]  ;;  %v15116_v15 = vld [vmem:[#allocation3 + $0x5ac] sm:$0xf0]  ;;  %v11488_v21 = vor.u32 %v15084_v12, %v11487_v11  ;;  %3943 = vmatpush.bf16.msrb.mxu2 %v11760_v10 }
 0x232   :  { %v11743_v17 = vld [vmem:[#allocation3 + $0x6a0] sm:$0xf]  ;;  %v15148_v18 = vld [vmem:[#allocation3 + $0x6ac] sm:$0xf0]  ;;  %v11616_v22 = vor.u32 %v15116_v15, %v11615_v13  ;;  %3956 = vmatpush.bf16.msrb.mxu3 %v11888_v14 }
 0x233   :  { %v11871_v19 = vld [vmem:[#allocation3 + $0x7a0] sm:$0xf]  ;;  %v15180_v20 = vld [vmem:[#allocation3 + $0x7ac] sm:$0xf0]  ;;  %v11744_v23 = vor.u32 %v15148_v18, %v11743_v17  ;;  %3918 = vmatpush.bf16.msrb.mxu0 %v11488_v21 }
 0x234   :  { %v11471_v24 = vld [vmem:[#allocation3 + $0x480] sm:$0xf]  ;;  %v15080_v25 = vld [vmem:[#allocation3 + $0x48c] sm:$0xf0]  ;;  %v11872_v27 = vor.u32 %v15180_v20, %v11871_v19  ;;  %3931 = vmatpush.bf16.msrb.mxu1 %v11616_v22 }
 0x235   :  { %v11599_v26 = vld [vmem:[#allocation3 + $0x580] sm:$0xf]  ;;  %v15112_v28 = vld [vmem:[#allocation3 + $0x58c] sm:$0xf0]  ;;  %v11472_v35 = vor.u32 %v15080_v25, %v11471_v24  ;;  %3944 = vmatpush.bf16.msrb.mxu2 %v11744_v23  ;;  %v14962_v25 = vld [vmem:[#allocation3 + $0xe4] sm:$0xf] }
 0x236   :  { %v11727_v29 = vld [vmem:[#allocation3 + $0x680] sm:$0xf]  ;;  %v15144_v30 = vld [vmem:[#allocation3 + $0x68c] sm:$0xf0]  ;;  %v11600_v36 = vor.u32 %v15112_v28, %v11599_v26  ;;  %3957 = vmatpush.bf16.msrb.mxu3 %v11872_v27  ;;  %v11009_v26 = vld [vmem:[#allocation3 + $0xf0] sm:$0xf0] }
 0x237   :  { %v11855_v33 = vld [vmem:[#allocation3 + $0x780] sm:$0xf]  ;;  %v15176_v34 = vld [vmem:[#allocation3 + $0x78c] sm:$0xf0]  ;;  %v11728_v37 = vor.u32 %v15144_v30, %v11727_v29  ;;  %3919 = vmatpush.bf16.msrb.mxu0 %v11472_v35  ;;  %v14994_v27 = vld [vmem:[#allocation3 + $0x1e4] sm:$0xf] }
 0x238   :  { %v11455_v40 = vld [vmem:[#allocation3 + $0x460] sm:$0xf]  ;;  %v15076_v41 = vld [vmem:[#allocation3 + $0x46c] sm:$0xf0]  ;;  %v11856_v43 = vor.u32 %v15176_v34, %v11855_v33  ;;  %3932 = vmatpush.bf16.msrb.mxu1 %v11600_v36  ;;  %v11137_v29 = vld [vmem:[#allocation3 + $0x1f0] sm:$0xf0] }
 0x239   :  { %v11583_v42 = vld [vmem:[#allocation3 + $0x560] sm:$0xf]  ;;  %v15108_v44 = vld [vmem:[#allocation3 + $0x56c] sm:$0xf0]  ;;  %v11456_v51 = vor.u32 %v15076_v41, %v11455_v40  ;;  %3945 = vmatpush.bf16.msrb.mxu2 %v11728_v37  ;;  %v15026_v30 = vld [vmem:[#allocation3 + $0x2e4] sm:$0xf]  ;;  %v11012_v41 = vor.u32 %v14962_v25, %v11009_v26 }
 0x23a   :  { %v11711_v46 = vld [vmem:[#allocation3 + $0x660] sm:$0xf]  ;;  %v15140_v47 = vld [vmem:[#allocation3 + $0x66c] sm:$0xf0]  ;;  %v11584_v52 = vor.u32 %v15108_v44, %v11583_v42  ;;  %3958 = vmatpush.bf16.msrb.mxu3 %v11856_v43  ;;  %v11265_v33 = vld [vmem:[#allocation3 + $0x2f0] sm:$0xf0]  ;;  %v11140_v42 = vor.u32 %v14994_v27, %v11137_v29 }
 0x23b   :  { %v11839_v48 = vld [vmem:[#allocation3 + $0x760] sm:$0xf]  ;;  %v15172_v49 = vld [vmem:[#allocation3 + $0x76c] sm:$0xf0]  ;;  %v11712_v53 = vor.u32 %v15140_v47, %v11711_v46  ;;  %3920 = vmatpush.bf16.msrb.mxu0 %v11456_v51  ;;  %v15058_v36 = vld [vmem:[#allocation3 + $0x3e4] sm:$0xf]  ;;  %v11268_v43 = vor.u32 %v15026_v30, %v11265_v33 }
 0x23c   :  { %v11439_v54 = vld [vmem:[#allocation3 + $0x440] sm:$0xf]  ;;  %v15072_v55 = vld [vmem:[#allocation3 + $0x44c] sm:$0xf0]  ;;  %v11840_v57 = vor.u32 %v15172_v49, %v11839_v48  ;;  %3933 = vmatpush.bf16.msrb.mxu1 %v11584_v52  ;;  %v11393_v37 = vld [vmem:[#allocation3 + $0x3f0] sm:$0xf0] }
 0x23d   :  { %v11567_v56 = vld [vmem:[#allocation3 + $0x540] sm:$0xf]  ;;  %v15104_v58 = vld [vmem:[#allocation3 + $0x54c] sm:$0xf0]  ;;  %v11440_v63 = vor.u32 %v15072_v55, %v11439_v54  ;;  %3946 = vmatpush.bf16.msrb.mxu2 %v11712_v53  ;;  %v14958_v44 = vld [vmem:[#allocation3 + $0xc4] sm:$0xf]  ;;  %v11396_v48 = vor.u32 %v15058_v36, %v11393_v37 }
 0x23e   :  { %v11695_v59 = vld [vmem:[#allocation3 + $0x640] sm:$0xf]  ;;  %v15136_v60 = vld [vmem:[#allocation3 + $0x64c] sm:$0xf0]  ;;  %v11568_v0 = vor.u32 %v15104_v58, %v11567_v56  ;;  %3959 = vmatpush.bf16.msrb.mxu3 %v11840_v57  ;;  %v10993_v46 = vld [vmem:[#allocation3 + $0xd0] sm:$0xf0] }
 0x23f   :  { %v11823_v61 = vld [vmem:[#allocation3 + $0x740] sm:$0xf]  ;;  %v15168_v62 = vld [vmem:[#allocation3 + $0x74c] sm:$0xf0]  ;;  %v11696_v1 = vor.u32 %v15136_v60, %v11695_v59  ;;  %3921 = vmatpush.bf16.msrb.mxu0 %v11440_v63  ;;  %v14990_v47 = vld [vmem:[#allocation3 + $0x1c4] sm:$0xf]  ;;  %v10996_v55 = vor.u32 %v14958_v44, %v10993_v46 }
 0x240   :  { %v11423_v6 = vld [vmem:[#allocation3 + $0x420] sm:$0xf]  ;;  %v15068_v7 = vld [vmem:[#allocation3 + $0x42c] sm:$0xf0]  ;;  %v11824_v38 = vor.u32 %v15168_v62, %v11823_v61  ;;  %3934 = vmatpush.bf16.msrb.mxu1 %v11568_v0  ;;  %v11121_v49 = vld [vmem:[#allocation3 + $0x1d0] sm:$0xf0] }
 0x241   :  { %v11551_v2 = vld [vmem:[#allocation3 + $0x520] sm:$0xf]  ;;  %v15100_v3 = vld [vmem:[#allocation3 + $0x52c] sm:$0xf0]  ;;  %v11424_v12 = vor.u32 %v15068_v7, %v11423_v6  ;;  %3947 = vmatpush.bf16.msrb.mxu2 %v11696_v1  ;;  %v15022_v51 = vld [vmem:[#allocation3 + $0x2c4] sm:$0xf]  ;;  %v11124_v56 = vor.u32 %v14990_v47, %v11121_v49 }
 0x242   :  { %v11679_v8 = vld [vmem:[#allocation3 + $0x620] sm:$0xf]  ;;  %v15132_v9 = vld [vmem:[#allocation3 + $0x62c] sm:$0xf0]  ;;  %v11552_v15 = vor.u32 %v15100_v3, %v11551_v2  ;;  %3960 = vmatpush.bf16.msrb.mxu3 %v11824_v38  ;;  %v11249_v52 = vld [vmem:[#allocation3 + $0x2d0] sm:$0xf0] }
 0x243   :  { %v11807_v10 = vld [vmem:[#allocation3 + $0x720] sm:$0xf]  ;;  %v15164_v11 = vld [vmem:[#allocation3 + $0x72c] sm:$0xf0]  ;;  %v11680_v17 = vor.u32 %v15132_v9, %v11679_v8  ;;  %3922 = vmatpush.bf16.msrb.mxu0 %v11424_v12  ;;  %v15054_v53 = vld [vmem:[#allocation3 + $0x3c4] sm:$0xf]  ;;  %v11252_v57 = vor.u32 %v15022_v51, %v11249_v52 }
 0x244   :  { %v11407_v13 = vld [vmem:[#allocation3 + $0x400] sm:$0xf]  ;;  %v15064_v14 = vld [vmem:[#allocation3 + $0x40c] sm:$0xf0]  ;;  %v11808_v21 = vor.u32 %v15164_v11, %v11807_v10  ;;  %3935 = vmatpush.bf16.msrb.mxu1 %v11552_v15  ;;  %v11377_v54 = vld [vmem:[#allocation3 + $0x3d0] sm:$0xf0] }
 0x245   :  { %v11535_v18 = vld [vmem:[#allocation3 + $0x500] sm:$0xf]  ;;  %v15096_v19 = vld [vmem:[#allocation3 + $0x50c] sm:$0xf0]  ;;  %v11408_v28 = vor.u32 %v15064_v14, %v11407_v13  ;;  %3948 = vmatpush.bf16.msrb.mxu2 %v11680_v17  ;;  %v14954_v58 = vld [vmem:[#allocation3 + $0xa4] sm:$0xf]  ;;  %v11380_v61 = vor.u32 %v15054_v53, %v11377_v54 }
 0x246   :  { %v11663_v20 = vld [vmem:[#allocation3 + $0x600] sm:$0xf]  ;;  %v15128_v22 = vld [vmem:[#allocation3 + $0x60c] sm:$0xf0]  ;;  %v11536_v34 = vor.u32 %v15096_v19, %v11535_v18  ;;  %3961 = vmatpush.bf16.msrb.mxu3 %v11808_v21  ;;  %v10977_v59 = vld [vmem:[#allocation3 + $0xb0] sm:$0xf0] }
 0x247   :  { %v11791_v23 = vld [vmem:[#allocation3 + $0x700] sm:$0xf]  ;;  %v15160_v24 = vld [vmem:[#allocation3 + $0x70c] sm:$0xf0]  ;;  %v11664_v35 = vor.u32 %v15128_v22, %v11663_v20  ;;  %3923 = vmatpush.bf16.msrb.mxu0 %v11408_v28  ;;  %v14986_v60 = vld [vmem:[#allocation3 + $0x1a4] sm:$0xf]  ;;  %v10980_v7 = vor.u32 %v14954_v58, %v10977_v59 }
 0x248   :  { %v11792_v40 = vor.u32 %v15160_v24, %v11791_v23  ;;  %3936 = vmatpush.bf16.msrb.mxu1 %v11536_v34  ;;  %v11105_v62 = vld [vmem:[#allocation3 + $0x1b0] sm:$0xf0]  ;;  %v15018_v63 = vld [vmem:[#allocation3 + $0x2a4] sm:$0xf] }
 0x249   :  { %3949 = vmatpush.bf16.msrb.mxu2 %v11664_v35  ;;  %v11233_v0 = vld [vmem:[#allocation3 + $0x2b0] sm:$0xf0]  ;;  %v15050_v1 = vld [vmem:[#allocation3 + $0x3a4] sm:$0xf]  ;;  %v11108_v2 = vor.u32 %v14986_v60, %v11105_v62 }
 0x24a   :  { %3962 = vmatpush.bf16.msrb.mxu3 %v11792_v40  ;;  %3924 = vmatmul.bf16.vlgmr.msrb.gmra.mxu0 %v16721_v16  ;;  %v11361_v6 = vld [vmem:[#allocation3 + $0x3b0] sm:$0xf0]  ;;  %v11236_v38 = vor.u32 %v15018_v63, %v11233_v0  ;;  %v14950_v3 = vld [vmem:[#allocation3 + $0x84] sm:$0xf] }
 0x24b   :  { %3968 = vmatpush.bf16.msra.mxu0 %v11012_v41  ;;  %3937 = vmatmul.bf16.vlgmr.msrb.gmra.mxu1 %v16724_v31  ;;  %v10961_v8 = vld [vmem:[#allocation3 + $0x90] sm:$0xf0]  ;;  %v14982_v9 = vld [vmem:[#allocation3 + $0x184] sm:$0xf]  ;;  %v11364_v10 = vor.u32 %v15050_v1, %v11361_v6 }
 0x24c   :  { %3981 = vmatpush.bf16.msra.mxu1 %v11140_v42  ;;  %3950 = vmatmul.bf16.vlgmr.msrb.gmra.mxu2 %v16727_v50  ;;  %v11089_v11 = vld [vmem:[#allocation3 + $0x190] sm:$0xf0]  ;;  %v15014_v12 = vld [vmem:[#allocation3 + $0x284] sm:$0xf]  ;;  %v10964_v17 = vor.u32 %v14950_v3, %v10961_v8 }
 0x24d   :  { %3994 = vmatpush.bf16.msra.mxu2 %v11268_v43  ;;  %3963 = vmatmul.bf16.vlgmr.msrb.gmra.mxu3 %v16730_v5  ;;  %v11217_v13 = vld [vmem:[#allocation3 + $0x290] sm:$0xf0]  ;;  %v15046_v14 = vld [vmem:[#allocation3 + $0x384] sm:$0xf]  ;;  %v11092_v18 = vor.u32 %v14982_v9, %v11089_v11 }
 0x24e   :  { %4007 = vmatpush.bf16.msra.mxu3 %v11396_v48  ;;  %v11345_v15 = vld [vmem:[#allocation3 + $0x390] sm:$0xf0]  ;;  %v11220_v19 = vor.u32 %v15014_v12, %v11217_v13  ;;  %v14946_v20 = vld [vmem:[#allocation3 + $0x64] sm:$0xf] }
 0x24f   :  { %3969 = vmatpush.bf16.msra.mxu0 %v10996_v55  ;;  %v10945_v21 = vld [vmem:[#allocation3 + $0x70] sm:$0xf0]  ;;  %v14978_v22 = vld [vmem:[#allocation3 + $0x164] sm:$0xf]  ;;  %v11348_v23 = vor.u32 %v15046_v14, %v11345_v15 }
 0x250   :  { %3982 = vmatpush.bf16.msra.mxu1 %v11124_v56  ;;  %v11073_v24 = vld [vmem:[#allocation3 + $0x170] sm:$0xf0]  ;;  %v15010_v25 = vld [vmem:[#allocation3 + $0x264] sm:$0xf]  ;;  %v10948_v29 = vor.u32 %v14946_v20, %v10945_v21 }
 0x251   :  { %3995 = vmatpush.bf16.msra.mxu2 %v11252_v57  ;;  %v11201_v26 = vld [vmem:[#allocation3 + $0x270] sm:$0xf0]  ;;  %v15042_v27 = vld [vmem:[#allocation3 + $0x364] sm:$0xf]  ;;  %v11076_v30 = vor.u32 %v14978_v22, %v11073_v24 }
 0x252   :  { %4008 = vmatpush.bf16.msra.mxu3 %v11380_v61  ;;  %v11329_v28 = vld [vmem:[#allocation3 + $0x370] sm:$0xf0]  ;;  %v11204_v33 = vor.u32 %v15010_v25, %v11201_v26  ;;  %v14942_v34 = vld [vmem:[#allocation3 + $0x44] sm:$0xf] }
 0x253   :  { %3970 = vmatpush.bf16.msra.mxu0 %v10980_v7  ;;  %v10929_v35 = vld [vmem:[#allocation3 + $0x50] sm:$0xf0]  ;;  %v14974_v36 = vld [vmem:[#allocation3 + $0x144] sm:$0xf]  ;;  %v11332_v37 = vor.u32 %v15042_v27, %v11329_v28 }
 0x254   :  { %3983 = vmatpush.bf16.msra.mxu1 %v11108_v2  ;;  %v11057_v40 = vld [vmem:[#allocation3 + $0x150] sm:$0xf0]  ;;  %v15006_v41 = vld [vmem:[#allocation3 + $0x244] sm:$0xf]  ;;  %v10932_v46 = vor.u32 %v14942_v34, %v10929_v35 }
 0x255   :  { %3996 = vmatpush.bf16.msra.mxu2 %v11236_v38  ;;  %v11185_v42 = vld [vmem:[#allocation3 + $0x250] sm:$0xf0]  ;;  %v15038_v43 = vld [vmem:[#allocation3 + $0x344] sm:$0xf]  ;;  %v11060_v47 = vor.u32 %v14974_v36, %v11057_v40 }
 0x256   :  { %4009 = vmatpush.bf16.msra.mxu3 %v11364_v10  ;;  %v11313_v44 = vld [vmem:[#allocation3 + $0x350] sm:$0xf0]  ;;  %v11188_v48 = vor.u32 %v15006_v41, %v11185_v42  ;;  %v14938_v49 = vld [vmem:[#allocation3 + $0x24] sm:$0xf] }
 0x257   :  { %3971 = vmatpush.bf16.msra.mxu0 %v10964_v17  ;;  %v10913_v51 = vld [vmem:[#allocation3 + $0x30] sm:$0xf0]  ;;  %v14970_v52 = vld [vmem:[#allocation3 + $0x124] sm:$0xf]  ;;  %v11316_v53 = vor.u32 %v15038_v43, %v11313_v44 }
 0x258   :  { %3984 = vmatpush.bf16.msra.mxu1 %v11092_v18  ;;  %v11041_v54 = vld [vmem:[#allocation3 + $0x130] sm:$0xf0]  ;;  %v15002_v55 = vld [vmem:[#allocation3 + $0x224] sm:$0xf]  ;;  %v10916_v59 = vor.u32 %v14938_v49, %v10913_v51 }
 0x259   :  { %3997 = vmatpush.bf16.msra.mxu2 %v11220_v19  ;;  %v11169_v56 = vld [vmem:[#allocation3 + $0x230] sm:$0xf0]  ;;  %v15034_v57 = vld [vmem:[#allocation3 + $0x324] sm:$0xf]  ;;  %v11044_v62 = vor.u32 %v14970_v52, %v11041_v54 }
 0x25a   :  { %4010 = vmatpush.bf16.msra.mxu3 %v11348_v23  ;;  %v11297_v58 = vld [vmem:[#allocation3 + $0x330] sm:$0xf0]  ;;  %v14934_v60 = vld [vmem:[#allocation3 + $0x4] sm:$0xf]  ;;  %v11172_v63 = vor.u32 %v15002_v55, %v11169_v56 }
 0x25b   :  { %3972 = vmatpush.bf16.msra.mxu0 %v10948_v29  ;;  %v10897_v61 = vld [vmem:[#allocation3 + $0x10] sm:$0xf0]  ;;  %v14966_v0 = vld [vmem:[#allocation3 + $0x104] sm:$0xf]  ;;  %v11300_v7 = vor.u32 %v15034_v57, %v11297_v58 }
 0x25c   :  { %3985 = vmatpush.bf16.msra.mxu1 %v11076_v30  ;;  %v11025_v1 = vld [vmem:[#allocation3 + $0x110] sm:$0xf0]  ;;  %v14998_v6 = vld [vmem:[#allocation3 + $0x204] sm:$0xf]  ;;  %v10900_v11 = vor.u32 %v14934_v60, %v10897_v61 }
 0x25d   :  { %3998 = vmatpush.bf16.msra.mxu2 %v11204_v33  ;;  %v11153_v2 = vld [vmem:[#allocation3 + $0x210] sm:$0xf0]  ;;  %v15030_v38 = vld [vmem:[#allocation3 + $0x304] sm:$0xf]  ;;  %v11028_v15 = vor.u32 %v14966_v0, %v11025_v1 }
 0x25e   :  { %4011 = vmatpush.bf16.msra.mxu3 %v11332_v37  ;;  %v11281_v3 = vld [vmem:[#allocation3 + $0x310] sm:$0xf0]  ;;  %v15090_v8 = vld [vmem:[#allocation3 + $0x4e4] sm:$0xf]  ;;  %v11156_v17 = vor.u32 %v14998_v6, %v11153_v2 }
 0x25f   :  { %3973 = vmatpush.bf16.msra.mxu0 %v10932_v46  ;;  %v11521_v9 = vld [vmem:[#allocation3 + $0x4f0] sm:$0xf0]  ;;  %v15122_v10 = vld [vmem:[#allocation3 + $0x5e4] sm:$0xf]  ;;  %v11284_v20 = vor.u32 %v15030_v38, %v11281_v3 }
 0x260   :  { %3986 = vmatpush.bf16.msra.mxu1 %v11060_v47  ;;  %v11649_v12 = vld [vmem:[#allocation3 + $0x5f0] sm:$0xf0]  ;;  %v15154_v13 = vld [vmem:[#allocation3 + $0x6e4] sm:$0xf]  ;;  %v11524_v21 = vor.u32 %v15090_v8, %v11521_v9 }
 0x261   :  { %3999 = vmatpush.bf16.msra.mxu2 %v11188_v48  ;;  %v11777_v14 = vld [vmem:[#allocation3 + $0x6f0] sm:$0xf0]  ;;  %v15186_v18 = vld [vmem:[#allocation3 + $0x7e4] sm:$0xf]  ;;  %v11652_v22 = vor.u32 %v15122_v10, %v11649_v12 }
 0x262   :  { %4012 = vmatpush.bf16.msra.mxu3 %v11316_v53  ;;  %v11905_v19 = vld [vmem:[#allocation3 + $0x7f0] sm:$0xf0]  ;;  %v11780_v23 = vor.u32 %v15154_v13, %v11777_v14  ;;  %v15086_v24 = vld [vmem:[#allocation3 + $0x4c4] sm:$0xf] }
 0x263   :  { %3974 = vmatpush.bf16.msra.mxu0 %v10916_v59  ;;  %v11505_v25 = vld [vmem:[#allocation3 + $0x4d0] sm:$0xf0]  ;;  %v15118_v26 = vld [vmem:[#allocation3 + $0x5c4] sm:$0xf]  ;;  %v11908_v27 = vor.u32 %v15186_v18, %v11905_v19 }
 0x264   :  { %3987 = vmatpush.bf16.msra.mxu1 %v11044_v62  ;;  %v11633_v28 = vld [vmem:[#allocation3 + $0x5d0] sm:$0xf0]  ;;  %v15150_v29 = vld [vmem:[#allocation3 + $0x6c4] sm:$0xf]  ;;  %v11508_v35 = vor.u32 %v15086_v24, %v11505_v25 }
 0x265   :  { %4000 = vmatpush.bf16.msra.mxu2 %v11172_v63  ;;  %v11761_v30 = vld [vmem:[#allocation3 + $0x6d0] sm:$0xf0]  ;;  %v15182_v33 = vld [vmem:[#allocation3 + $0x7c4] sm:$0xf]  ;;  %v11636_v36 = vor.u32 %v15118_v26, %v11633_v28 }
 0x266   :  { %4013 = vmatpush.bf16.msra.mxu3 %v11300_v7  ;;  %v11889_v34 = vld [vmem:[#allocation3 + $0x7d0] sm:$0xf0]  ;;  %v11764_v37 = vor.u32 %v15150_v29, %v11761_v30  ;;  %v15082_v40 = vld [vmem:[#allocation3 + $0x4a4] sm:$0xf] }
 0x267   :  { %3975 = vmatpush.bf16.msra.mxu0 %v10900_v11  ;;  %v11489_v41 = vld [vmem:[#allocation3 + $0x4b0] sm:$0xf0]  ;;  %v15114_v42 = vld [vmem:[#allocation3 + $0x5a4] sm:$0xf]  ;;  %v11892_v43 = vor.u32 %v15182_v33, %v11889_v34 }
 0x268   :  { %3988 = vmatpush.bf16.msra.mxu1 %v11028_v15  ;;  %v11617_v44 = vld [vmem:[#allocation3 + $0x5b0] sm:$0xf0]  ;;  %v15146_v46 = vld [vmem:[#allocation3 + $0x6a4] sm:$0xf]  ;;  %v11492_v51 = vor.u32 %v15082_v40, %v11489_v41 }
 0x269   :  { %4001 = vmatpush.bf16.msra.mxu2 %v11156_v17  ;;  %v11745_v47 = vld [vmem:[#allocation3 + $0x6b0] sm:$0xf0]  ;;  %v15178_v48 = vld [vmem:[#allocation3 + $0x7a4] sm:$0xf]  ;;  %v11620_v52 = vor.u32 %v15114_v42, %v11617_v44 }
 0x26a   :  { %4014 = vmatpush.bf16.msra.mxu3 %v11284_v20  ;;  %v11873_v49 = vld [vmem:[#allocation3 + $0x7b0] sm:$0xf0]  ;;  %3976 = vmatmul.bf16.vlgmr.msra.gmra.mxu0 %v16697_v45  ;;  %v11748_v53 = vor.u32 %v15146_v46, %v11745_v47  ;;  %v15078_v54 = vld [vmem:[#allocation3 + $0x484] sm:$0xf] }
 0x26b   :  { %4020 = vmatpush.bf16.msrb.mxu0 %v11524_v21  ;;  %3989 = vmatmul.bf16.vlgmr.msra.gmra.mxu1 %v16704_v39  ;;  %v11473_v55 = vld [vmem:[#allocation3 + $0x490] sm:$0xf0]  ;;  %v15110_v56 = vld [vmem:[#allocation3 + $0x584] sm:$0xf]  ;;  %v11876_v57 = vor.u32 %v15178_v48, %v11873_v49 }
 0x26c   :  { %4033 = vmatpush.bf16.msrb.mxu1 %v11652_v22  ;;  %4002 = vmatmul.bf16.vlgmr.msra.gmra.mxu2 %v16711_v32  ;;  %v11601_v58 = vld [vmem:[#allocation3 + $0x590] sm:$0xf0]  ;;  %v15142_v59 = vld [vmem:[#allocation3 + $0x684] sm:$0xf]  ;;  %v11476_v63 = vor.u32 %v15078_v54, %v11473_v55  ;;  %v11015_v55 = vld [vmem:[#allocation3 + $0xe8] sm:$0xf] }
 0x26d   :  { %4046 = vmatpush.bf16.msrb.mxu2 %v11780_v23  ;;  %4015 = vmatmul.bf16.vlgmr.msra.gmra.mxu3 %v16718_v4  ;;  %v11729_v60 = vld [vmem:[#allocation3 + $0x690] sm:$0xf0]  ;;  %v15174_v61 = vld [vmem:[#allocation3 + $0x784] sm:$0xf]  ;;  %v11604_v0 = vor.u32 %v15110_v56, %v11601_v58  ;;  %v14965_v56 = vld [vmem:[#allocation3 + $0xf4] sm:$0xf0] }
 0x26e   :  { %4059 = vmatpush.bf16.msrb.mxu3 %v11908_v27  ;;  %v11857_v62 = vld [vmem:[#allocation3 + $0x790] sm:$0xf0]  ;;  %v11732_v1 = vor.u32 %v15142_v59, %v11729_v60  ;;  %v15074_v6 = vld [vmem:[#allocation3 + $0x464] sm:$0xf]  ;;  %v14997_v59 = vld [vmem:[#allocation3 + $0x1f4] sm:$0xf0] }
 0x26f   :  { %4021 = vmatpush.bf16.msrb.mxu0 %v11508_v35  ;;  %v11457_v7 = vld [vmem:[#allocation3 + $0x470] sm:$0xf0]  ;;  %v15106_v2 = vld [vmem:[#allocation3 + $0x564] sm:$0xf]  ;;  %v11860_v38 = vor.u32 %v15174_v61, %v11857_v62  ;;  %v11271_v60 = vld [vmem:[#allocation3 + $0x2e8] sm:$0xf] }
 0x270   :  { %4034 = vmatpush.bf16.msrb.mxu1 %v11636_v36  ;;  %v11585_v3 = vld [vmem:[#allocation3 + $0x570] sm:$0xf0]  ;;  %v15138_v8 = vld [vmem:[#allocation3 + $0x664] sm:$0xf]  ;;  %v11460_v12 = vor.u32 %v15074_v6, %v11457_v7  ;;  %v15029_v61 = vld [vmem:[#allocation3 + $0x2f4] sm:$0xf0]  ;;  %v11016_v7 = vor.u32 %v14965_v56, %v11015_v55 }
 0x271   :  { %4047 = vmatpush.bf16.msrb.mxu2 %v11764_v37  ;;  %v11713_v9 = vld [vmem:[#allocation3 + $0x670] sm:$0xf0]  ;;  %v15170_v10 = vld [vmem:[#allocation3 + $0x764] sm:$0xf]  ;;  %v11588_v13 = vor.u32 %v15106_v2, %v11585_v3  ;;  %v10999_v3 = vld [vmem:[#allocation3 + $0xc8] sm:$0xf] }
 0x272   :  { %4060 = vmatpush.bf16.msrb.mxu3 %v11892_v43  ;;  %v11841_v11 = vld [vmem:[#allocation3 + $0x770] sm:$0xf0]  ;;  %v11716_v14 = vor.u32 %v15138_v8, %v11713_v9  ;;  %v15070_v15 = vld [vmem:[#allocation3 + $0x444] sm:$0xf]  ;;  %v14961_v8 = vld [vmem:[#allocation3 + $0xd4] sm:$0xf0] }
 0x273   :  { %4022 = vmatpush.bf16.msrb.mxu0 %v11492_v51  ;;  %v11441_v17 = vld [vmem:[#allocation3 + $0x450] sm:$0xf0]  ;;  %v15102_v18 = vld [vmem:[#allocation3 + $0x544] sm:$0xf]  ;;  %v11844_v19 = vor.u32 %v15170_v10, %v11841_v11  ;;  %v11127_v9 = vld [vmem:[#allocation3 + $0x1c8] sm:$0xf] }
 0x274   :  { %4035 = vmatpush.bf16.msrb.mxu1 %v11620_v52  ;;  %v11569_v20 = vld [vmem:[#allocation3 + $0x550] sm:$0xf0]  ;;  %v15134_v21 = vld [vmem:[#allocation3 + $0x644] sm:$0xf]  ;;  %v11444_v25 = vor.u32 %v15070_v15, %v11441_v17  ;;  %v14993_v11 = vld [vmem:[#allocation3 + $0x1d4] sm:$0xf0]  ;;  %v11000_v17 = vor.u32 %v14961_v8, %v10999_v3 }
 0x275   :  { %4048 = vmatpush.bf16.msrb.mxu2 %v11748_v53  ;;  %v11697_v22 = vld [vmem:[#allocation3 + $0x650] sm:$0xf0]  ;;  %v15166_v23 = vld [vmem:[#allocation3 + $0x744] sm:$0xf]  ;;  %v11572_v26 = vor.u32 %v15102_v18, %v11569_v20  ;;  %v15057_v15 = vld [vmem:[#allocation3 + $0x3d4] sm:$0xf0]  ;;  %v11128_v18 = vor.u32 %v14993_v11, %v11127_v9 }
 0x276   :  { %4061 = vmatpush.bf16.msrb.mxu3 %v11876_v57  ;;  %v11825_v24 = vld [vmem:[#allocation3 + $0x750] sm:$0xf0]  ;;  %v11700_v27 = vor.u32 %v15134_v21, %v11697_v22  ;;  %v15066_v28 = vld [vmem:[#allocation3 + $0x424] sm:$0xf]  ;;  %v11143_v57 = vld [vmem:[#allocation3 + $0x1e8] sm:$0xf] }
 0x277   :  { %4023 = vmatpush.bf16.msrb.mxu0 %v11476_v63  ;;  %v11425_v29 = vld [vmem:[#allocation3 + $0x430] sm:$0xf0]  ;;  %v15098_v30 = vld [vmem:[#allocation3 + $0x524] sm:$0xf]  ;;  %v11828_v33 = vor.u32 %v15166_v23, %v11825_v24  ;;  %v11144_v2 = vor.u32 %v14997_v59, %v11143_v57  ;;  %v10983_v20 = vld [vmem:[#allocation3 + $0xa8] sm:$0xf] }
 0x278   :  { %4036 = vmatpush.bf16.msrb.mxu1 %v11604_v0  ;;  %v11553_v34 = vld [vmem:[#allocation3 + $0x530] sm:$0xf0]  ;;  %v15130_v35 = vld [vmem:[#allocation3 + $0x624] sm:$0xf]  ;;  %v11428_v41 = vor.u32 %v15066_v28, %v11425_v29  ;;  %v11399_v0 = vld [vmem:[#allocation3 + $0x3e8] sm:$0xf] }
 0x279   :  { %4049 = vmatpush.bf16.msrb.mxu2 %v11732_v1  ;;  %v11681_v36 = vld [vmem:[#allocation3 + $0x630] sm:$0xf0]  ;;  %v15162_v37 = vld [vmem:[#allocation3 + $0x724] sm:$0xf]  ;;  %v11556_v44 = vor.u32 %v15098_v30, %v11553_v34  ;;  %v15061_v1 = vld [vmem:[#allocation3 + $0x3f4] sm:$0xf0] }
 0x27a   :  { %4062 = vmatpush.bf16.msrb.mxu3 %v11860_v38  ;;  %v11809_v40 = vld [vmem:[#allocation3 + $0x730] sm:$0xf0]  ;;  %v15062_v42 = vld [vmem:[#allocation3 + $0x404] sm:$0xf]  ;;  %v11684_v46 = vor.u32 %v15130_v35, %v11681_v36  ;;  %v11272_v38 = vor.u32 %v15029_v61, %v11271_v60  ;;  %v11400_v10 = vor.u32 %v15061_v1, %v11399_v0  ;;  %v14957_v21 = vld [vmem:[#allocation3 + $0xb4] sm:$0xf0] }
 0x27b   :  { %4024 = vmatpush.bf16.msrb.mxu0 %v11460_v12  ;;  %v11409_v43 = vld [vmem:[#allocation3 + $0x410] sm:$0xf0]  ;;  %v15094_v47 = vld [vmem:[#allocation3 + $0x504] sm:$0xf]  ;;  %v11812_v51 = vor.u32 %v15162_v37, %v11809_v40  ;;  %v11255_v12 = vld [vmem:[#allocation3 + $0x2c8] sm:$0xf]  ;;  %v10984_v29 = vor.u32 %v14957_v21, %v10983_v20 }
 0x27c   :  { %4037 = vmatpush.bf16.msrb.mxu1 %v11588_v13  ;;  %v11537_v48 = vld [vmem:[#allocation3 + $0x510] sm:$0xf0]  ;;  %v15126_v49 = vld [vmem:[#allocation3 + $0x604] sm:$0xf]  ;;  %v11412_v58 = vor.u32 %v15062_v42, %v11409_v43  ;;  %v15025_v13 = vld [vmem:[#allocation3 + $0x2d4] sm:$0xf0] }
 0x27d   :  { %4050 = vmatpush.bf16.msrb.mxu2 %v11716_v14  ;;  %v11665_v52 = vld [vmem:[#allocation3 + $0x610] sm:$0xf0]  ;;  %v15158_v53 = vld [vmem:[#allocation3 + $0x704] sm:$0xf]  ;;  %v11540_v62 = vor.u32 %v15094_v47, %v11537_v48  ;;  %v11383_v14 = vld [vmem:[#allocation3 + $0x3c8] sm:$0xf] }
 0x27e   :  { %4063 = vmatpush.bf16.msrb.mxu3 %v11844_v19  ;;  %v11793_v54 = vld [vmem:[#allocation3 + $0x710] sm:$0xf0]  ;;  %v11668_v63 = vor.u32 %v15126_v49, %v11665_v52  ;;  %v11256_v19 = vor.u32 %v15025_v13, %v11255_v12  ;;  %v11111_v22 = vld [vmem:[#allocation3 + $0x1a8] sm:$0xf]  ;;  %v11384_v23 = vor.u32 %v15057_v15, %v11383_v14  ;;  %v14989_v24 = vld [vmem:[#allocation3 + $0x1b4] sm:$0xf0] }
 0x27f   :  { %4025 = vmatpush.bf16.msrb.mxu0 %v11444_v25  ;;  %v11796_v6 = vor.u32 %v15158_v53, %v11793_v54  ;;  %v11239_v25 = vld [vmem:[#allocation3 + $0x2a8] sm:$0xf]  ;;  %v15053_v28 = vld [vmem:[#allocation3 + $0x3b4] sm:$0xf0]  ;;  %v11112_v30 = vor.u32 %v14989_v24, %v11111_v22 }
 0x280   :  { %4038 = vmatpush.bf16.msrb.mxu1 %v11572_v26  ;;  %v15021_v26 = vld [vmem:[#allocation3 + $0x2b4] sm:$0xf0]  ;;  %v10967_v34 = vld [vmem:[#allocation3 + $0x88] sm:$0xf] }
 0x281   :  { %4051 = vmatpush.bf16.msrb.mxu2 %v11700_v27  ;;  %v11367_v27 = vld [vmem:[#allocation3 + $0x3a8] sm:$0xf]  ;;  %v14953_v35 = vld [vmem:[#allocation3 + $0x94] sm:$0xf0] }
 0x282   :  { %4064 = vmatpush.bf16.msrb.mxu3 %v11828_v33  ;;  %v11240_v33 = vor.u32 %v15021_v26, %v11239_v25  ;;  %v11095_v36 = vld [vmem:[#allocation3 + $0x188] sm:$0xf]  ;;  %v11368_v37 = vor.u32 %v15053_v28, %v11367_v27  ;;  %v14985_v40 = vld [vmem:[#allocation3 + $0x194] sm:$0xf0] }
 0x283   :  { %4026 = vmatpush.bf16.msrb.mxu0 %v11428_v41  ;;  %v11223_v41 = vld [vmem:[#allocation3 + $0x288] sm:$0xf]  ;;  %v15017_v42 = vld [vmem:[#allocation3 + $0x294] sm:$0xf0]  ;;  %v11096_v47 = vor.u32 %v14985_v40, %v11095_v36 }
 0x284   :  { %4039 = vmatpush.bf16.msrb.mxu1 %v11556_v44  ;;  %v11351_v43 = vld [vmem:[#allocation3 + $0x388] sm:$0xf]  ;;  %v15049_v44 = vld [vmem:[#allocation3 + $0x394] sm:$0xf0]  ;;  %v11224_v48 = vor.u32 %v15017_v42, %v11223_v41 }
 0x285   :  { %4052 = vmatpush.bf16.msrb.mxu2 %v11684_v46  ;;  %v10968_v46 = vor.u32 %v14953_v35, %v10967_v34  ;;  %v10951_v49 = vld [vmem:[#allocation3 + $0x68] sm:$0xf]  ;;  %v11352_v53 = vor.u32 %v15049_v44, %v11351_v43  ;;  %v14981_v54 = vld [vmem:[#allocation3 + $0x174] sm:$0xf0] }
 0x286   :  { %4065 = vmatpush.bf16.msrb.mxu3 %v11812_v51  ;;  %v14949_v51 = vld [vmem:[#allocation3 + $0x74] sm:$0xf0]  ;;  %v11079_v52 = vld [vmem:[#allocation3 + $0x168] sm:$0xf] }
 0x287   :  { %4027 = vmatpush.bf16.msrb.mxu0 %v11412_v58  ;;  %v11207_v55 = vld [vmem:[#allocation3 + $0x268] sm:$0xf]  ;;  %v15013_v56 = vld [vmem:[#allocation3 + $0x274] sm:$0xf0]  ;;  %v10952_v59 = vor.u32 %v14949_v51, %v10951_v49  ;;  %v11080_v60 = vor.u32 %v14981_v54, %v11079_v52 }
 0x288   :  { %4040 = vmatpush.bf16.msrb.mxu1 %v11540_v62  ;;  %v11335_v57 = vld [vmem:[#allocation3 + $0x368] sm:$0xf]  ;;  %v15045_v58 = vld [vmem:[#allocation3 + $0x374] sm:$0xf0]  ;;  %v11208_v61 = vor.u32 %v15013_v56, %v11207_v55 }
 0x289   :  { %4053 = vmatpush.bf16.msrb.mxu2 %v11668_v63  ;;  %v10935_v62 = vld [vmem:[#allocation3 + $0x48] sm:$0xf]  ;;  %v14945_v63 = vld [vmem:[#allocation3 + $0x54] sm:$0xf0]  ;;  %v11336_v1 = vor.u32 %v15045_v58, %v11335_v57 }
 0x28a   :  { %4066 = vmatpush.bf16.msrb.mxu3 %v11796_v6  ;;  %4028 = vmatmul.bf16.vlgmr.msrb.gmra.mxu0 %v16721_v16  ;;  %v11063_v0 = vld [vmem:[#allocation3 + $0x148] sm:$0xf]  ;;  %v14977_v6 = vld [vmem:[#allocation3 + $0x154] sm:$0xf0]  ;;  %v10936_v8 = vor.u32 %v14945_v63, %v10935_v62 }
 0x28b   :  { %4072 = vmatpush.bf16.msra.mxu0 %v11016_v7  ;;  %4041 = vmatmul.bf16.vlgmr.msrb.gmra.mxu1 %v16724_v31  ;;  %v11191_v7 = vld [vmem:[#allocation3 + $0x248] sm:$0xf]  ;;  %v15041_v3 = vld [vmem:[#allocation3 + $0x354] sm:$0xf0]  ;;  %v11064_v9 = vor.u32 %v14977_v6, %v11063_v0 }
 0x28c   :  { %4085 = vmatpush.bf16.msra.mxu1 %v11144_v2  ;;  %4054 = vmatmul.bf16.vlgmr.msrb.gmra.mxu2 %v16727_v50  ;;  %v15009_v2 = vld [vmem:[#allocation3 + $0x254] sm:$0xf0]  ;;  %v10919_v11 = vld [vmem:[#allocation3 + $0x28] sm:$0xf] }
 0x28d   :  { %4098 = vmatpush.bf16.msra.mxu2 %v11272_v38  ;;  %4067 = vmatmul.bf16.vlgmr.msrb.gmra.mxu3 %v16730_v5  ;;  %v11319_v38 = vld [vmem:[#allocation3 + $0x348] sm:$0xf]  ;;  %v14941_v12 = vld [vmem:[#allocation3 + $0x34] sm:$0xf0] }
 0x28e   :  { %4111 = vmatpush.bf16.msra.mxu3 %v11400_v10  ;;  %v11192_v10 = vor.u32 %v15009_v2, %v11191_v7  ;;  %v11047_v13 = vld [vmem:[#allocation3 + $0x128] sm:$0xf]  ;;  %v11320_v14 = vor.u32 %v15041_v3, %v11319_v38  ;;  %v14973_v15 = vld [vmem:[#allocation3 + $0x134] sm:$0xf0]  ;;  %v10920_v21 = vor.u32 %v14941_v12, %v10919_v11 }
 0x28f   :  { %4073 = vmatpush.bf16.msra.mxu0 %v11000_v17  ;;  %v11175_v17 = vld [vmem:[#allocation3 + $0x228] sm:$0xf]  ;;  %v15037_v20 = vld [vmem:[#allocation3 + $0x334] sm:$0xf0]  ;;  %v11048_v24 = vor.u32 %v14973_v15, %v11047_v13 }
 0x290   :  { %4086 = vmatpush.bf16.msra.mxu1 %v11128_v18  ;;  %v15005_v18 = vld [vmem:[#allocation3 + $0x234] sm:$0xf0]  ;;  %v10903_v22 = vld [vmem:[#allocation3 + $0x8] sm:$0xf] }
 0x291   :  { %4099 = vmatpush.bf16.msra.mxu2 %v11256_v19  ;;  %v11303_v19 = vld [vmem:[#allocation3 + $0x328] sm:$0xf]  ;;  %v11176_v25 = vor.u32 %v15005_v18, %v11175_v17  ;;  %v14969_v27 = vld [vmem:[#allocation3 + $0x114] sm:$0xf0] }
 0x292   :  { %4112 = vmatpush.bf16.msra.mxu3 %v11384_v23  ;;  %v14937_v23 = vld [vmem:[#allocation3 + $0x14] sm:$0xf0]  ;;  %v11031_v26 = vld [vmem:[#allocation3 + $0x108] sm:$0xf] }
 0x293   :  { %4074 = vmatpush.bf16.msra.mxu0 %v10984_v29  ;;  %v11159_v28 = vld [vmem:[#allocation3 + $0x208] sm:$0xf]  ;;  %v11304_v29 = vor.u32 %v15037_v20, %v11303_v19  ;;  %v15033_v34 = vld [vmem:[#allocation3 + $0x314] sm:$0xf0]  ;;  %v10904_v40 = vor.u32 %v14937_v23, %v10903_v22  ;;  %v11032_v44 = vor.u32 %v14969_v27, %v11031_v26 }
 0x294   :  { %4087 = vmatpush.bf16.msra.mxu1 %v11112_v30  ;;  %v15001_v30 = vld [vmem:[#allocation3 + $0x214] sm:$0xf0]  ;;  %v11527_v35 = vld [vmem:[#allocation3 + $0x4e8] sm:$0xf] }
 0x295   :  { %4100 = vmatpush.bf16.msra.mxu2 %v11240_v33  ;;  %v11287_v33 = vld [vmem:[#allocation3 + $0x308] sm:$0xf]  ;;  %v15093_v36 = vld [vmem:[#allocation3 + $0x4f4] sm:$0xf0] }
 0x296   :  { %4113 = vmatpush.bf16.msra.mxu3 %v11368_v37  ;;  %v11655_v37 = vld [vmem:[#allocation3 + $0x5e8] sm:$0xf]  ;;  %v15125_v41 = vld [vmem:[#allocation3 + $0x5f4] sm:$0xf0]  ;;  %v11288_v49 = vor.u32 %v15033_v34, %v11287_v33  ;;  %v11528_v51 = vor.u32 %v15093_v36, %v11527_v35 }
 0x297   :  { %4075 = vmatpush.bf16.msra.mxu0 %v10968_v46  ;;  %v11783_v42 = vld [vmem:[#allocation3 + $0x6e8] sm:$0xf]  ;;  %v15157_v43 = vld [vmem:[#allocation3 + $0x6f4] sm:$0xf0]  ;;  %v11160_v46 = vor.u32 %v15001_v30, %v11159_v28  ;;  %v11656_v52 = vor.u32 %v15125_v41, %v11655_v37 }
 0x298   :  { %4088 = vmatpush.bf16.msra.mxu1 %v11096_v47  ;;  %v11911_v47 = vld [vmem:[#allocation3 + $0x7e8] sm:$0xf]  ;;  %v15089_v55 = vld [vmem:[#allocation3 + $0x4d4] sm:$0xf0] }
 0x299   :  { %4101 = vmatpush.bf16.msra.mxu2 %v11224_v48  ;;  %v15189_v48 = vld [vmem:[#allocation3 + $0x7f4] sm:$0xf0]  ;;  %v11511_v54 = vld [vmem:[#allocation3 + $0x4c8] sm:$0xf] }
 0x29a   :  { %4114 = vmatpush.bf16.msra.mxu3 %v11352_v53  ;;  %v11784_v53 = vor.u32 %v15157_v43, %v11783_v42  ;;  %v11639_v56 = vld [vmem:[#allocation3 + $0x5c8] sm:$0xf]  ;;  %v11912_v57 = vor.u32 %v15189_v48, %v11911_v47  ;;  %v15121_v58 = vld [vmem:[#allocation3 + $0x5d4] sm:$0xf0]  ;;  %v11512_v63 = vor.u32 %v15089_v55, %v11511_v54 }
 0x29b   :  { %4076 = vmatpush.bf16.msra.mxu0 %v10952_v59  ;;  %v11767_v59 = vld [vmem:[#allocation3 + $0x6c8] sm:$0xf]  ;;  %v15185_v62 = vld [vmem:[#allocation3 + $0x7d4] sm:$0xf0] }
 0x29c   :  { %4089 = vmatpush.bf16.msra.mxu1 %v11080_v60  ;;  %v15153_v60 = vld [vmem:[#allocation3 + $0x6d4] sm:$0xf0]  ;;  %v11495_v0 = vld [vmem:[#allocation3 + $0x4a8] sm:$0xf] }
 0x29d   :  { %4102 = vmatpush.bf16.msra.mxu2 %v11208_v61  ;;  %v11895_v61 = vld [vmem:[#allocation3 + $0x7c8] sm:$0xf]  ;;  %v11768_v6 = vor.u32 %v15153_v60, %v11767_v59  ;;  %v15085_v7 = vld [vmem:[#allocation3 + $0x4b4] sm:$0xf0] }
 0x29e   :  { %4115 = vmatpush.bf16.msra.mxu3 %v11336_v1  ;;  %v11640_v1 = vor.u32 %v15121_v58, %v11639_v56  ;;  %v11623_v2 = vld [vmem:[#allocation3 + $0x5a8] sm:$0xf]  ;;  %v15117_v38 = vld [vmem:[#allocation3 + $0x5b4] sm:$0xf0]  ;;  %v11896_v3 = vor.u32 %v15185_v62, %v11895_v61  ;;  %v11496_v13 = vor.u32 %v15085_v7, %v11495_v0 }
 0x29f   :  { %4077 = vmatpush.bf16.msra.mxu0 %v10936_v8  ;;  %v11751_v8 = vld [vmem:[#allocation3 + $0x6a8] sm:$0xf]  ;;  %v15181_v12 = vld [vmem:[#allocation3 + $0x7b4] sm:$0xf0]  ;;  %v11624_v15 = vor.u32 %v15117_v38, %v11623_v2 }
 0x2a0   :  { %4090 = vmatpush.bf16.msra.mxu1 %v11064_v9  ;;  %v15149_v9 = vld [vmem:[#allocation3 + $0x6b4] sm:$0xf0]  ;;  %v11879_v11 = vld [vmem:[#allocation3 + $0x7a8] sm:$0xf] }
 0x2a1   :  { %4103 = vmatpush.bf16.msra.mxu2 %v11192_v10  ;;  %v16749_v10 = vld [vmem:[#allocation18] sm:$0xf]  ;;  %v11752_v17 = vor.u32 %v15149_v9, %v11751_v8  ;;  %v15081_v18 = vld [vmem:[#allocation3 + $0x494] sm:$0xf0]  ;;  %v11607_v19 = vld [vmem:[#allocation3 + $0x588] sm:$0xf] }
 0x2a2   :  { %4116 = vmatpush.bf16.msra.mxu3 %v11320_v14  ;;  %v11479_v14 = vld [vmem:[#allocation3 + $0x488] sm:$0xf]  ;;  %v2576_v20 = vperm.slane %v16749_v10, 0  ;;  %v15113_v22 = vld [vmem:[#allocation3 + $0x594] sm:$0xf0] }
 0x2a3   :  { %4078 = vmatpush.bf16.msra.mxu0 %v10920_v21  ;;  %v11880_v21 = vor.u32 %v15181_v12, %v11879_v11  ;;  %v11735_v23 = vld [vmem:[#allocation3 + $0x688] sm:$0xf]  ;;  %v15177_v26 = vld [vmem:[#allocation3 + $0x794] sm:$0xf0]  ;;  %v11480_v27 = vor.u32 %v15081_v18, %v11479_v14 }
 0x2a4   :  { %4091 = vmatpush.bf16.msra.mxu1 %v11048_v24  ;;  %v15145_v24 = vld [vmem:[#allocation3 + $0x694] sm:$0xf0]  ;;  %v11463_v33 = vld [vmem:[#allocation3 + $0x468] sm:$0xf] }
 0x2a5   :  { %4104 = vmatpush.bf16.msra.mxu2 %v11176_v25  ;;  %v11863_v25 = vld [vmem:[#allocation3 + $0x788] sm:$0xf]  ;;  %v11736_v30 = vor.u32 %v15145_v24, %v11735_v23  ;;  %v15077_v34 = vld [vmem:[#allocation3 + $0x474] sm:$0xf0] }
 0x2a6   :  { %4117 = vmatpush.bf16.msra.mxu3 %v11304_v29  ;;  %v11608_v29 = vor.u32 %v15113_v22, %v11607_v19  ;;  %v11591_v35 = vld [vmem:[#allocation3 + $0x568] sm:$0xf]  ;;  %v15109_v41 = vld [vmem:[#allocation3 + $0x574] sm:$0xf0]  ;;  %v11464_v48 = vor.u32 %v15077_v34, %v11463_v33  ;;  %v14963_v34 = vld [vmem:[#allocation3 + $0xec] sm:$0xf] }
 0x2a7   :  { %4079 = vmatpush.bf16.msra.mxu0 %v10904_v40  ;;  %v3873_v28 = vpop.f32.mrf.mxu0  ;;  %v11864_v40 = vor.u32 %v15177_v26, %v11863_v25  ;;  %v11719_v42 = vld [vmem:[#allocation3 + $0x668] sm:$0xf]  ;;  %v15141_v43 = vld [vmem:[#allocation3 + $0x674] sm:$0xf0] }
 0x2a8   :  { %4092 = vmatpush.bf16.msra.mxu1 %v11032_v44  ;;  %v3874_v36 = vadd.f32 %v3873_v28, %v2576_v20  ;;  %v3886_v37 = vpop.f32.mrf.mxu1  ;;  %v11847_v44 = vld [vmem:[#allocation3 + $0x768] sm:$0xf]  ;;  %v15137_v59 = vld [vmem:[#allocation3 + $0x654] sm:$0xf0] }
 0x2a9   :  { %4105 = vmatpush.bf16.msra.mxu2 %v11160_v46  ;;  %v15173_v46 = vld [vmem:[#allocation3 + $0x774] sm:$0xf0]  ;;  %v11575_v54 = vld [vmem:[#allocation3 + $0x548] sm:$0xf] }
 0x2aa   :  { %4118 = vmatpush.bf16.msra.mxu3 %v11288_v49  ;;  %4080 = vmatmul.bf16.vlgmr.msra.gmra.mxu0 %v16697_v45  ;;  %v3887_v47 = vadd.f32 %v3886_v37, %v3874_v36  ;;  %v11592_v49 = vor.u32 %v15109_v41, %v11591_v35  ;;  %v11848_v56 = vor.u32 %v15173_v46, %v11847_v44  ;;  %v11703_v58 = vld [vmem:[#allocation3 + $0x648] sm:$0xf]  ;;  %v15101_v12 = vld [vmem:[#allocation3 + $0x534] sm:$0xf0]  ;;  %v11017_v35 = vld [vmem:[#allocation3 + $0xf8] sm:$0xf0] }
 0x2ab   :  { %4124 = vmatpush.bf16.msrb.mxu0 %v11528_v51  ;;  %4093 = vmatmul.bf16.vlgmr.msra.gmra.mxu1 %v16704_v39  ;;  %v11720_v51 = vor.u32 %v15141_v43, %v11719_v42  ;;  %v11831_v62 = vld [vmem:[#allocation3 + $0x748] sm:$0xf]  ;;  %v11704_v2 = vor.u32 %v15137_v59, %v11703_v58  ;;  %v15133_v14 = vld [vmem:[#allocation3 + $0x634] sm:$0xf0]  ;;  %v14995_v36 = vld [vmem:[#allocation3 + $0x1ec] sm:$0xf] }
 0x2ac   :  { %4137 = vmatpush.bf16.msrb.mxu1 %v11656_v52  ;;  %4106 = vmatmul.bf16.vlgmr.msra.gmra.mxu2 %v16711_v32  ;;  %v11447_v52 = vld [vmem:[#allocation3 + $0x448] sm:$0xf]  ;;  %v15065_v20 = vld [vmem:[#allocation3 + $0x414] sm:$0xf0]  ;;  %v15027_v41 = vld [vmem:[#allocation3 + $0x2ec] sm:$0xf] }
 0x2ad   :  { %4150 = vmatpush.bf16.msrb.mxu2 %v11784_v53  ;;  %4119 = vmatmul.bf16.vlgmr.msra.gmra.mxu3 %v16718_v4  ;;  %v15073_v53 = vld [vmem:[#allocation3 + $0x454] sm:$0xf0]  ;;  %v11431_v38 = vld [vmem:[#allocation3 + $0x428] sm:$0xf]  ;;  %v11273_v42 = vld [vmem:[#allocation3 + $0x2f8] sm:$0xf0] }
 0x2ae   :  { %4163 = vmatpush.bf16.msrb.mxu3 %v11912_v57  ;;  %v15105_v57 = vld [vmem:[#allocation3 + $0x554] sm:$0xf0]  ;;  %v11448_v0 = vor.u32 %v15073_v53, %v11447_v52  ;;  %v11559_v8 = vld [vmem:[#allocation3 + $0x528] sm:$0xf]  ;;  %v15059_v46 = vld [vmem:[#allocation3 + $0x3ec] sm:$0xf]  ;;  %v11276_v52 = vor.u32 %v15027_v41, %v11273_v42 }
 0x2af   :  { %4125 = vmatpush.bf16.msrb.mxu0 %v11512_v63  ;;  %v3899_v55 = vpop.f32.mrf.mxu2  ;;  %v15169_v63 = vld [vmem:[#allocation3 + $0x754] sm:$0xf0]  ;;  %v11576_v7 = vor.u32 %v15105_v57, %v11575_v54  ;;  %v11415_v19 = vld [vmem:[#allocation3 + $0x408] sm:$0xf]  ;;  %v14959_v53 = vld [vmem:[#allocation3 + $0xcc] sm:$0xf] }
 0x2b0   :  { %4138 = vmatpush.bf16.msrb.mxu1 %v11640_v1  ;;  %v3900_v60 = vadd.f32 %v3899_v55, %v3887_v47  ;;  %v3912_v61 = vpop.f32.mrf.mxu3  ;;  %v3888_v9 = vpop.f32.mrf.mxu1  ;;  %v11832_v11 = vor.u32 %v15169_v63, %v11831_v62  ;;  %v11543_v23 = vld [vmem:[#allocation3 + $0x508] sm:$0xf]  ;;  %v15097_v24 = vld [vmem:[#allocation3 + $0x514] sm:$0xf0]  ;;  %v11416_v37 = vor.u32 %v15065_v20, %v11415_v19  ;;  %v11401_v47 = vld [vmem:[#allocation3 + $0x3f8] sm:$0xf0] }
 0x2b1   :  { %4151 = vmatpush.bf16.msrb.mxu2 %v11768_v6  ;;  %v3875_v6 = vpop.f32.mrf.mxu0  ;;  %v11671_v25 = vld [vmem:[#allocation3 + $0x608] sm:$0xf]  ;;  %v15129_v28 = vld [vmem:[#allocation3 + $0x614] sm:$0xf0]  ;;  %v11544_v43 = vor.u32 %v15097_v24, %v11543_v23  ;;  %v11001_v54 = vld [vmem:[#allocation3 + $0xd8] sm:$0xf0] }
 0x2b2   :  { %4164 = vmatpush.bf16.msrb.mxu3 %v11896_v3  ;;  %v16755_v1 = vadd.f32 %v3912_v61, %v3900_v60  ;;  %v15069_v3 = vld [vmem:[#allocation3 + $0x434] sm:$0xf0]  ;;  %v11672_v44 = vor.u32 %v15129_v28, %v11671_v25  ;;  %v14991_v55 = vld [vmem:[#allocation3 + $0x1cc] sm:$0xf]  ;;  %v11129_v57 = vld [vmem:[#allocation3 + $0x1d8] sm:$0xf0]  ;;  %v11004_v62 = vor.u32 %v14959_v53, %v11001_v54 }
 0x2b3   :  { %4126 = vmatpush.bf16.msrb.mxu0 %v11496_v13  ;;  %v11687_v13 = vld [vmem:[#allocation3 + $0x628] sm:$0xf]  ;;  %v11432_v18 = vor.u32 %v15069_v3, %v11431_v38  ;;  %v15023_v58 = vld [vmem:[#allocation3 + $0x2cc] sm:$0xf]  ;;  %v11257_v59 = vld [vmem:[#allocation3 + $0x2d8] sm:$0xf0]  ;;  %v11132_v63 = vor.u32 %v14991_v55, %v11129_v57 }
 0x2b4   :  { %4139 = vmatpush.bf16.msrb.mxu1 %v11624_v15  ;;  %v11815_v15 = vld [vmem:[#allocation3 + $0x728] sm:$0xf]  ;;  %v11688_v22 = vor.u32 %v15133_v14, %v11687_v13  ;;  %v15055_v60 = vld [vmem:[#allocation3 + $0x3cc] sm:$0xf]  ;;  %v11385_v61 = vld [vmem:[#allocation3 + $0x3d8] sm:$0xf0] }
 0x2b5   :  { %4152 = vmatpush.bf16.msrb.mxu2 %v11752_v17  ;;  %v15165_v17 = vld [vmem:[#allocation3 + $0x734] sm:$0xf0]  ;;  %v14955_v6 = vld [vmem:[#allocation3 + $0xac] sm:$0xf]  ;;  %v11388_v38 = vor.u32 %v15055_v60, %v11385_v61  ;;  %v11113_v3 = vld [vmem:[#allocation3 + $0x1b8] sm:$0xf0] }
 0x2b6   :  { %4165 = vmatpush.bf16.msrb.mxu3 %v11880_v21  ;;  %v11560_v21 = vor.u32 %v15101_v12, %v11559_v8  ;;  %v15019_v8 = vld [vmem:[#allocation3 + $0x2ac] sm:$0xf]  ;;  %v11241_v9 = vld [vmem:[#allocation3 + $0x2b8] sm:$0xf0] }
 0x2b7   :  { %4127 = vmatpush.bf16.msrb.mxu0 %v11480_v27  ;;  %v3901_v26 = vpop.f32.mrf.mxu2  ;;  %v11816_v27 = vor.u32 %v15165_v17, %v11815_v15  ;;  %v11369_v12 = vld [vmem:[#allocation3 + $0x3b8] sm:$0xf0]  ;;  %v11244_v15 = vor.u32 %v15019_v8, %v11241_v9  ;;  %v14951_v17 = vld [vmem:[#allocation3 + $0x8c] sm:$0xf] }
 0x2b8   :  { %4140 = vmatpush.bf16.msrb.mxu1 %v11608_v29  ;;  %v11799_v29 = vld [vmem:[#allocation3 + $0x708] sm:$0xf]  ;;  %v3914_v33 = vpop.f32.mrf.mxu3  ;;  %v14983_v19 = vld [vmem:[#allocation3 + $0x18c] sm:$0xf]  ;;  %v11225_v23 = vld [vmem:[#allocation3 + $0x298] sm:$0xf0] }
 0x2b9   :  { %4153 = vmatpush.bf16.msrb.mxu2 %v11736_v30  ;;  %v15161_v30 = vld [vmem:[#allocation3 + $0x714] sm:$0xf0]  ;;  %v15047_v24 = vld [vmem:[#allocation3 + $0x38c] sm:$0xf]  ;;  %v11353_v25 = vld [vmem:[#allocation3 + $0x398] sm:$0xf0] }
 0x2ba   :  { %4166 = vmatpush.bf16.msrb.mxu3 %v11864_v40  ;;  %v11145_v40 = vld [vmem:[#allocation3 + $0x1f8] sm:$0xf0]  ;;  %v15011_v41 = vld [vmem:[#allocation3 + $0x26c] sm:$0xf] }
 0x2bb   :  { %4128 = vmatpush.bf16.msrb.mxu0 %v11464_v48  ;;  %v11800_v48 = vor.u32 %v15161_v30, %v11799_v29  ;;  %v14947_v30 = vld [vmem:[#allocation3 + $0x6c] sm:$0xf]  ;;  %v10953_v33 = vld [vmem:[#allocation3 + $0x78] sm:$0xf0] }
 0x2bc   :  { %4141 = vmatpush.bf16.msrb.mxu1 %v11592_v49  ;;  %v11020_v49 = vor.u32 %v14963_v34, %v11017_v35  ;;  %v14979_v34 = vld [vmem:[#allocation3 + $0x16c] sm:$0xf]  ;;  %v11209_v42 = vld [vmem:[#allocation3 + $0x278] sm:$0xf0] }
 0x2bd   :  { %4154 = vmatpush.bf16.msrb.mxu2 %v11720_v51  ;;  %v11148_v51 = vor.u32 %v14995_v36, %v11145_v40  ;;  %v11081_v40 = vld [vmem:[#allocation3 + $0x178] sm:$0xf0]  ;;  %v14975_v53 = vld [vmem:[#allocation3 + $0x14c] sm:$0xf] }
 0x2be   :  { %4167 = vmatpush.bf16.msrb.mxu3 %v11848_v56  ;;  %v11404_v56 = vor.u32 %v15059_v46, %v11401_v47  ;;  %v10956_v47 = vor.u32 %v14947_v30, %v10953_v33  ;;  %v11065_v55 = vld [vmem:[#allocation3 + $0x158] sm:$0xf0]  ;;  %v15039_v60 = vld [vmem:[#allocation3 + $0x34c] sm:$0xf] }
 0x2bf   :  { %4129 = vmatpush.bf16.msrb.mxu0 %v11448_v0  ;;  %v11260_v0 = vor.u32 %v15023_v58, %v11257_v59  ;;  %v11193_v57 = vld [vmem:[#allocation3 + $0x258] sm:$0xf0]  ;;  %v15031_v30 = vld [vmem:[#allocation3 + $0x30c] sm:$0xf] }
 0x2c0   :  { %4142 = vmatpush.bf16.msrb.mxu1 %v11576_v7  ;;  %v10985_v7 = vld [vmem:[#allocation3 + $0xb8] sm:$0xf0] }
 0x2c1   :  { %4155 = vmatpush.bf16.msrb.mxu2 %v11704_v2  ;;  %v14987_v2 = vld [vmem:[#allocation3 + $0x1ac] sm:$0xf]  ;;  %v10988_v13 = vor.u32 %v14955_v6, %v10985_v7  ;;  %v11321_v61 = vld [vmem:[#allocation3 + $0x358] sm:$0xf0]  ;;  %v11068_v7 = vor.u32 %v14975_v53, %v11065_v55 }
 0x2c2   :  { %4168 = vmatpush.bf16.msrb.mxu3 %v11832_v11  ;;  %v15051_v11 = vld [vmem:[#allocation3 + $0x3ac] sm:$0xf]  ;;  %v11116_v14 = vor.u32 %v14987_v2, %v11113_v3  ;;  %v11049_v8 = vld [vmem:[#allocation3 + $0x138] sm:$0xf0] }
 0x2c3   :  { %4130 = vmatpush.bf16.msrb.mxu0 %v11432_v18  ;;  %v10969_v18 = vld [vmem:[#allocation3 + $0x98] sm:$0xf0]  ;;  %v11372_v20 = vor.u32 %v15051_v11, %v11369_v12  ;;  %v14971_v3 = vld [vmem:[#allocation3 + $0x12c] sm:$0xf]  ;;  %v11324_v11 = vor.u32 %v15039_v60, %v11321_v61 }
 0x2c4   :  { %4143 = vmatpush.bf16.msrb.mxu1 %v11560_v21  ;;  %v11097_v21 = vld [vmem:[#allocation3 + $0x198] sm:$0xf0]  ;;  %v10972_v26 = vor.u32 %v14951_v17, %v10969_v18  ;;  %v15119_v55 = vld [vmem:[#allocation3 + $0x5cc] sm:$0xf] }
 0x2c5   :  { %4156 = vmatpush.bf16.msrb.mxu2 %v11688_v22  ;;  %v15015_v22 = vld [vmem:[#allocation3 + $0x28c] sm:$0xf]  ;;  %v11100_v28 = vor.u32 %v14983_v19, %v11097_v21  ;;  %v11305_v17 = vld [vmem:[#allocation3 + $0x338] sm:$0xf0] }
 0x2c6   :  { %4169 = vmatpush.bf16.msrb.mxu3 %v11816_v27  ;;  %v11228_v29 = vor.u32 %v15015_v22, %v11225_v23  ;;  %v10905_v21 = vld [vmem:[#allocation3 + $0x18] sm:$0xf0]  ;;  %v11052_v22 = vor.u32 %v14971_v3, %v11049_v8  ;;  %v15183_v60 = vld [vmem:[#allocation3 + $0x7cc] sm:$0xf] }
 0x2c7   :  { %4131 = vmatpush.bf16.msrb.mxu0 %v11416_v37  ;;  %v3925_v27 = vpop.f32.mrf.mxu0  ;;  %v11356_v37 = vor.u32 %v15047_v24, %v11353_v25  ;;  %v14967_v24 = vld [vmem:[#allocation3 + $0x10c] sm:$0xf]  ;;  %v11033_v25 = vld [vmem:[#allocation3 + $0x118] sm:$0xf0] }
 0x2c8   :  { %4144 = vmatpush.bf16.msrb.mxu1 %v11544_v43  ;;  %v3926_v35 = vadd.f32 %v3925_v27, %v16755_v1  ;;  %v3938_v36 = vpop.f32.mrf.mxu1  ;;  %v15043_v43 = vld [vmem:[#allocation3 + $0x36c] sm:$0xf]  ;;  %v11289_v33 = vld [vmem:[#allocation3 + $0x318] sm:$0xf0] }
 0x2c9   :  { %4157 = vmatpush.bf16.msrb.mxu2 %v11672_v44  ;;  %v11337_v44 = vld [vmem:[#allocation3 + $0x378] sm:$0xf0]  ;;  %v15147_v8 = vld [vmem:[#allocation3 + $0x6ac] sm:$0xf] }
 0x2ca   :  { %4170 = vmatpush.bf16.msrb.mxu3 %v11800_v48  ;;  %4132 = vmatmul.bf16.vlgmr.msrb.gmra.mxu0 %v16721_v16  ;;  %v3939_v46 = vadd.f32 %v3938_v36, %v3926_v35  ;;  %v11084_v48 = vor.u32 %v14979_v34, %v11081_v40  ;;  %v11340_v1 = vor.u32 %v15043_v43, %v11337_v44  ;;  %v15091_v35 = vld [vmem:[#allocation3 + $0x4ec] sm:$0xf]  ;;  %v11529_v36 = vld [vmem:[#allocation3 + $0x4f8] sm:$0xf0] }
 0x2cb   :  { %4176 = vmatpush.bf16.msra.mxu0 %v11020_v49  ;;  %4145 = vmatmul.bf16.vlgmr.msrb.gmra.mxu1 %v16724_v31  ;;  %v11212_v49 = vor.u32 %v15011_v41, %v11209_v42  ;;  %v11657_v41 = vld [vmem:[#allocation3 + $0x5f8] sm:$0xf0]  ;;  %v15155_v42 = vld [vmem:[#allocation3 + $0x6ec] sm:$0xf]  ;;  %v11036_v44 = vor.u32 %v14967_v24, %v11033_v25 }
 0x2cc   :  { %4189 = vmatpush.bf16.msra.mxu1 %v11148_v51  ;;  %4158 = vmatmul.bf16.vlgmr.msrb.gmra.mxu2 %v16727_v50  ;;  %v14943_v51 = vld [vmem:[#allocation3 + $0x4c] sm:$0xf]  ;;  %v11785_v43 = vld [vmem:[#allocation3 + $0x6f8] sm:$0xf0] }
 0x2cd   :  { %4202 = vmatpush.bf16.msra.mxu2 %v11276_v52  ;;  %4171 = vmatmul.bf16.vlgmr.msrb.gmra.mxu3 %v16730_v5  ;;  %v10937_v52 = vld [vmem:[#allocation3 + $0x58] sm:$0xf0]  ;;  %v11788_v53 = vor.u32 %v15155_v42, %v11785_v43  ;;  %v15175_v24 = vld [vmem:[#allocation3 + $0x78c] sm:$0xf] }
 0x2ce   :  { %4215 = vmatpush.bf16.msra.mxu3 %v11404_v56  ;;  %v15007_v56 = vld [vmem:[#allocation3 + $0x24c] sm:$0xf]  ;;  %v11897_v61 = vld [vmem:[#allocation3 + $0x7d8] sm:$0xf0] }
 0x2cf   :  { %4177 = vmatpush.bf16.msra.mxu0 %v11004_v62  ;;  %v3951_v54 = vpop.f32.mrf.mxu2  ;;  %v10940_v62 = vor.u32 %v14943_v51, %v10937_v52  ;;  %v3927_v6 = vpop.f32.mrf.mxu0  ;;  %v11196_v2 = vor.u32 %v15007_v56, %v11193_v57  ;;  %v11532_v51 = vor.u32 %v15091_v35, %v11529_v36  ;;  %v11641_v57 = vld [vmem:[#allocation3 + $0x5d8] sm:$0xf0] }
 0x2d0   :  { %4190 = vmatpush.bf16.msra.mxu1 %v11132_v63  ;;  %v3952_v58 = vadd.f32 %v3951_v54, %v3939_v46  ;;  %v3964_v59 = vpop.f32.mrf.mxu3  ;;  %v3940_v9 = vpop.f32.mrf.mxu1  ;;  %v15087_v54 = vld [vmem:[#allocation3 + $0x4cc] sm:$0xf]  ;;  %v11625_v3 = vld [vmem:[#allocation3 + $0x5b8] sm:$0xf0] }
 0x2d1   :  { %4203 = vmatpush.bf16.msra.mxu2 %v11260_v0  ;;  %v14939_v0 = vld [vmem:[#allocation3 + $0x2c] sm:$0xf]  ;;  %v11753_v9 = vld [vmem:[#allocation3 + $0x6b8] sm:$0xf0] }
 0x2d2   :  { %4216 = vmatpush.bf16.msra.mxu3 %v11388_v38  ;;  %v3965_v63 = vadd.f32 %v3964_v59, %v3952_v58  ;;  %v10921_v38 = vld [vmem:[#allocation3 + $0x38] sm:$0xf0]  ;;  %v15151_v58 = vld [vmem:[#allocation3 + $0x6cc] sm:$0xf] }
 0x2d3   :  { %4178 = vmatpush.bf16.msra.mxu0 %v10988_v13  ;;  %v15003_v13 = vld [vmem:[#allocation3 + $0x22c] sm:$0xf]  ;;  %v10924_v19 = vor.u32 %v14939_v0, %v10921_v38  ;;  %v11769_v59 = vld [vmem:[#allocation3 + $0x6d8] sm:$0xf0]  ;;  %v11900_v38 = vor.u32 %v15183_v60, %v11897_v61 }
 0x2d4   :  { %4191 = vmatpush.bf16.msra.mxu1 %v11116_v14  ;;  %v4280_v12 = vmax.f32 %v3965_v63, 0.0  ;;  %v11177_v14 = vld [vmem:[#allocation3 + $0x238] sm:$0xf0]  ;;  %v11644_v63 = vor.u32 %v15119_v55, %v11641_v57  ;;  %v11772_v0 = vor.u32 %v15151_v58, %v11769_v59  ;;  %v15083_v6 = vld [vmem:[#allocation3 + $0x4ac] sm:$0xf] }
 0x2d5   :  { %4204 = vmatpush.bf16.msra.mxu2 %v11244_v15  ;;  %v15035_v15 = vld [vmem:[#allocation3 + $0x32c] sm:$0xf]  ;;  %v11180_v23 = vor.u32 %v15003_v13, %v11177_v14  ;;  %v11593_v36 = vld [vmem:[#allocation3 + $0x578] sm:$0xf0] }
 0x2d6   :  { %4217 = vmatpush.bf16.msra.mxu3 %v11372_v20  ;;  %v16762_v18 = vpack.c.bf16 %v4280_v12, %v4280_v12  ;;  %v14935_v20 = vld [vmem:[#allocation3 + $0xc] sm:$0xf]  ;;  %v11881_v12 = vld [vmem:[#allocation3 + $0x7b8] sm:$0xf0] }
 0x2d7   :  { %4179 = vmatpush.bf16.msra.mxu0 %v10972_v26  ;;  %v14999_v26 = vld [vmem:[#allocation3 + $0x20c] sm:$0xf]  ;;  %v3953_v27 = vpop.f32.mrf.mxu2  ;;  %v10908_v40 = vor.u32 %v14935_v20, %v10905_v21  ;;  %v2577_v20 = vperm.slane %v16749_v10, 1  ;;  %v11849_v42 = vld [vmem:[#allocation3 + $0x778] sm:$0xf0] }
 0x2d8   :  { %4192 = vmatpush.bf16.msra.mxu1 %v11100_v28  ;;  %v11308_v28 = vor.u32 %v15035_v15, %v11305_v17  ;;  %v3966_v34 = vpop.f32.mrf.mxu3  ;;  %v15079_v14 = vld [vmem:[#allocation3 + $0x48c] sm:$0xf]  ;;  %v11756_v17 = vor.u32 %v15147_v8, %v11753_v9  ;;  %v11705_v55 = vld [vmem:[#allocation3 + $0x658] sm:$0xf0] }
 0x2d9   :  { %4205 = vmatpush.bf16.msra.mxu2 %v11228_v29  ;;  %v11161_v29 = vld [vmem:[#allocation3 + $0x218] sm:$0xf0]  ;;  %v15167_v58 = vld [vmem:[#allocation3 + $0x74c] sm:$0xf] }
 0x2da   :  { %4218 = vmatpush.bf16.msra.mxu3 %v11356_v37  ;;  %v15123_v37 = vld [vmem:[#allocation3 + $0x5ec] sm:$0xf]  ;;  %v11164_v46 = vor.u32 %v14999_v26, %v11161_v29  ;;  %v11465_v29 = vld [vmem:[#allocation3 + $0x478] sm:$0xf0] }
 0x2db   :  { %4180 = vmatpush.bf16.msra.mxu0 %v10956_v47  ;;  %v15187_v47 = vld [vmem:[#allocation3 + $0x7ec] sm:$0xf]  ;;  %v11660_v52 = vor.u32 %v15123_v37, %v11657_v41  ;;  %v11833_v59 = vld [vmem:[#allocation3 + $0x758] sm:$0xf0] }
 0x2dc   :  { %4193 = vmatpush.bf16.msra.mxu1 %v11084_v48  ;;  %v11913_v48 = vld [vmem:[#allocation3 + $0x7f8] sm:$0xf0]  ;;  %v15139_v37 = vld [vmem:[#allocation3 + $0x66c] sm:$0xf] }
 0x2dd   :  { %4206 = vmatpush.bf16.msra.mxu2 %v11212_v49  ;;  %v11292_v49 = vor.u32 %v15031_v30, %v11289_v33  ;;  %v11916_v56 = vor.u32 %v15187_v47, %v11913_v48  ;;  %v15107_v30 = vld [vmem:[#allocation3 + $0x56c] sm:$0xf]  ;;  %v11561_v8 = vld [vmem:[#allocation3 + $0x538] sm:$0xf0] }
 0x2de   :  { %4219 = vmatpush.bf16.msra.mxu3 %v11340_v1  ;;  %v11513_v1 = vld [vmem:[#allocation3 + $0x4d8] sm:$0xf0]  ;;  %v15171_v41 = vld [vmem:[#allocation3 + $0x76c] sm:$0xf] }
 0x2df   :  { %4181 = vmatpush.bf16.msra.mxu0 %v10940_v62  ;;  %v11516_v62 = vor.u32 %v15087_v54, %v11513_v1  ;;  %v15071_v48 = vld [vmem:[#allocation3 + $0x44c] sm:$0xf]  ;;  %v11577_v54 = vld [vmem:[#allocation3 + $0x558] sm:$0xf0] }
 0x2e0   :  { %4194 = vmatpush.bf16.msra.mxu1 %v11068_v7  ;;  %v11497_v7 = vld [vmem:[#allocation3 + $0x4b8] sm:$0xf0]  ;;  %v15135_v1 = vld [vmem:[#allocation3 + $0x64c] sm:$0xf] }
 0x2e1   :  { %4207 = vmatpush.bf16.msra.mxu2 %v11196_v2  ;;  %v15115_v2 = vld [vmem:[#allocation3 + $0x5ac] sm:$0xf]  ;;  %v11500_v13 = vor.u32 %v15083_v6, %v11497_v7  ;;  %v11433_v7 = vld [vmem:[#allocation3 + $0x438] sm:$0xf0] }
 0x2e2   :  { %4220 = vmatpush.bf16.msra.mxu3 %v11324_v11  ;;  %v15179_v11 = vld [vmem:[#allocation3 + $0x7ac] sm:$0xf]  ;;  %v11628_v15 = vor.u32 %v15115_v2, %v11625_v3  ;;  %v11836_v3 = vor.u32 %v15167_v58, %v11833_v59 }
 0x2e3   :  { %4182 = vmatpush.bf16.msra.mxu0 %v10924_v19  ;;  %v11481_v19 = vld [vmem:[#allocation3 + $0x498] sm:$0xf0]  ;;  %v11884_v21 = vor.u32 %v15179_v11, %v11881_v12  ;;  %v15067_v6 = vld [vmem:[#allocation3 + $0x42c] sm:$0xf] }
 0x2e4   :  { %4195 = vmatpush.bf16.msra.mxu1 %v11052_v22  ;;  %v15143_v22 = vld [vmem:[#allocation3 + $0x68c] sm:$0xf]  ;;  %v11484_v25 = vor.u32 %v15079_v14, %v11481_v19  ;;  %v11689_v11 = vld [vmem:[#allocation3 + $0x638] sm:$0xf0]  ;;  %v11436_v14 = vor.u32 %v15067_v6, %v11433_v7 }
 0x2e5   :  { %4208 = vmatpush.bf16.msra.mxu2 %v11180_v23  ;;  %v11737_v23 = vld [vmem:[#allocation3 + $0x698] sm:$0xf0]  ;;  %v15099_v2 = vld [vmem:[#allocation3 + $0x52c] sm:$0xf] }
 0x2e6   :  { %4221 = vmatpush.bf16.msra.mxu3 %v11308_v28  ;;  %v11740_v27 = vor.u32 %v15143_v22, %v11737_v23  ;;  %v15075_v28 = vld [vmem:[#allocation3 + $0x46c] sm:$0xf]  ;;  %v11545_v22 = vld [vmem:[#allocation3 + $0x518] sm:$0xf0] }
 0x2e7   :  { %4183 = vmatpush.bf16.msra.mxu0 %v10908_v40  ;;  %v3977_v26 = vpop.f32.mrf.mxu0  ;;  %v11721_v40 = vld [vmem:[#allocation3 + $0x678] sm:$0xf0]  ;;  %v15131_v9 = vld [vmem:[#allocation3 + $0x62c] sm:$0xf] }
 0x2e8   :  { %4196 = vmatpush.bf16.msra.mxu1 %v11036_v44  ;;  %v3978_v33 = vadd.f32 %v3977_v26, %v2577_v20  ;;  %v3990_v34 = vpop.f32.mrf.mxu1  ;;  %v11468_v44 = vor.u32 %v15075_v28, %v11465_v29  ;;  %v11724_v47 = vor.u32 %v15139_v37, %v11721_v40  ;;  %v15163_v12 = vld [vmem:[#allocation3 + $0x72c] sm:$0xf]  ;;  %v11801_v26 = vld [vmem:[#allocation3 + $0x718] sm:$0xf0] }
 0x2e9   :  { %4209 = vmatpush.bf16.msra.mxu2 %v11164_v46  ;;  %v11596_v46 = vor.u32 %v15107_v30, %v11593_v36  ;;  %v15063_v19 = vld [vmem:[#allocation3 + $0x40c] sm:$0xf] }
 0x2ea   :  { %4222 = vmatpush.bf16.msra.mxu3 %v11292_v49  ;;  %4184 = vmatmul.bf16.vlgmr.msra.gmra.mxu0 %v16697_v45  ;;  %v11865_v45 = vld [vmem:[#allocation3 + $0x798] sm:$0xf0]  ;;  %v3991_v43 = vadd.f32 %v3990_v34, %v3978_v33  ;;  %v15095_v20 = vld [vmem:[#allocation3 + $0x50c] sm:$0xf] }
 0x2eb   :  { %4228 = vmatpush.bf16.msrb.mxu0 %v11532_v51  ;;  %4197 = vmatmul.bf16.vlgmr.msra.gmra.mxu1 %v16704_v39  ;;  %v11868_v35 = vor.u32 %v15175_v24, %v11865_v45  ;;  %v11449_v49 = vld [vmem:[#allocation3 + $0x458] sm:$0xf0]  ;;  %v15103_v51 = vld [vmem:[#allocation3 + $0x54c] sm:$0xf] }
 0x2ec   :  { %4241 = vmatpush.bf16.msrb.mxu1 %v11660_v52  ;;  %4210 = vmatmul.bf16.vlgmr.msra.gmra.mxu2 %v16711_v32  ;;  %v15111_v32 = vld [vmem:[#allocation3 + $0x58c] sm:$0xf]  ;;  %v11452_v60 = vor.u32 %v15071_v48, %v11449_v49  ;;  %v11673_v24 = vld [vmem:[#allocation3 + $0x618] sm:$0xf0] }
 0x2ed   :  { %4254 = vmatpush.bf16.msrb.mxu2 %v11788_v53  ;;  %4223 = vmatmul.bf16.vlgmr.msra.gmra.mxu3 %v16718_v4  ;;  %v11609_v4 = vld [vmem:[#allocation3 + $0x598] sm:$0xf0]  ;;  %v11852_v53 = vor.u32 %v15171_v41, %v11849_v42  ;;  %v15127_v23 = vld [vmem:[#allocation3 + $0x60c] sm:$0xf] }
 0x2ee   :  { %4267 = vmatpush.bf16.msrb.mxu3 %v11916_v56  ;;  %v11612_v39 = vor.u32 %v15111_v32, %v11609_v4  ;;  %v11417_v32 = vld [vmem:[#allocation3 + $0x418] sm:$0xf0]  ;;  %v11676_v28 = vor.u32 %v15127_v23, %v11673_v24 }
 0x2ef   :  { %4229 = vmatpush.bf16.msrb.mxu0 %v11516_v62  ;;  %v4003_v52 = vpop.f32.mrf.mxu2  ;;  %v3979_v62 = vpop.f32.mrf.mxu0 }
 0x2f0   :  { %4242 = vmatpush.bf16.msrb.mxu1 %v11644_v63  ;;  %v4004_v56 = vadd.f32 %v4003_v52, %v3991_v43  ;;  %v4016_v57 = vpop.f32.mrf.mxu3  ;;  %v11580_v63 = vor.u32 %v15103_v51, %v11577_v54 }
 0x2f1   :  { %4255 = vmatpush.bf16.msrb.mxu2 %v11772_v0  ;;  %v11708_v0 = vor.u32 %v15135_v1, %v11705_v55 }
 0x2f2   :  { %4268 = vmatpush.bf16.msrb.mxu3 %v11900_v38  ;;  %v4017_v61 = vadd.f32 %v4016_v57, %v4004_v56  ;;  %v3992_v38 = vpop.f32.mrf.mxu1 }
 0x2f3   :  { %4230 = vmatpush.bf16.msrb.mxu0 %v11500_v13  ;;  %v11817_v13 = vld [vmem:[#allocation3 + $0x738] sm:$0xf0] }
 0x2f4   :  { %4243 = vmatpush.bf16.msrb.mxu1 %v11628_v15  ;;  %v11564_v15 = vor.u32 %v15099_v2, %v11561_v8  ;;  %v11820_v4 = vor.u32 %v15163_v12, %v11817_v13 }
 0x2f5   :  { %4256 = vmatpush.bf16.msrb.mxu2 %v11756_v17  ;;  %v11692_v17 = vor.u32 %v15131_v9, %v11689_v11 }
 0x2f6   :  { %4269 = vmatpush.bf16.msrb.mxu3 %v11884_v21 }
 0x2f7   :  { %4231 = vmatpush.bf16.msrb.mxu0 %v11484_v25  ;;  %v4005_v21 = vpop.f32.mrf.mxu2  ;;  %v15159_v25 = vld [vmem:[#allocation3 + $0x70c] sm:$0xf] }
 0x2f8   :  { %4244 = vmatpush.bf16.msrb.mxu1 %v11612_v39  ;;  %v4018_v45 = vpop.f32.mrf.mxu3  ;;  %v11420_v39 = vor.u32 %v15063_v19, %v11417_v32  ;;  %v11804_v29 = vor.u32 %v15159_v25, %v11801_v26  ;;  %v2579_v19 = vperm.slane %v16749_v10, 3 }
 0x2f9   :  { %4257 = vmatpush.bf16.msrb.mxu2 %v11740_v27  ;;  %v11548_v27 = vor.u32 %v15095_v20, %v11545_v22 }
 0x2fa   :  { %4270 = vmatpush.bf16.msrb.mxu3 %v11868_v35 }
 0x2fb   :  { %4232 = vmatpush.bf16.msrb.mxu0 %v11468_v44 }
 0x2fc   :  { %4245 = vmatpush.bf16.msrb.mxu1 %v11596_v46 }
 0x2fd   :  { %4258 = vmatpush.bf16.msrb.mxu2 %v11724_v47 }
 0x2fe   :  { %4271 = vmatpush.bf16.msrb.mxu3 %v11852_v53 }
 0x2ff   :  { %4233 = vmatpush.bf16.msrb.mxu0 %v11452_v60 }
 0x300   :  { %4246 = vmatpush.bf16.msrb.mxu1 %v11580_v63 }
 0x301   :  { %4259 = vmatpush.bf16.msrb.mxu2 %v11708_v0 }
 0x302   :  { %4272 = vmatpush.bf16.msrb.mxu3 %v11836_v3 }
 0x303   :  { %4234 = vmatpush.bf16.msrb.mxu0 %v11436_v14 }
 0x304   :  { %4247 = vmatpush.bf16.msrb.mxu1 %v11564_v15 }
 0x305   :  { %4260 = vmatpush.bf16.msrb.mxu2 %v11692_v17 }
 0x306   :  { %4273 = vmatpush.bf16.msrb.mxu3 %v11820_v4 }
 0x307   :  { %4235 = vmatpush.bf16.msrb.mxu0 %v11420_v39  ;;  %v4029_v30 = vpop.f32.mrf.mxu0 }
 0x308   :  { %4248 = vmatpush.bf16.msrb.mxu1 %v11548_v27  ;;  %v4030_v33 = vadd.f32 %v4029_v30, %v4017_v61  ;;  %v4042_v34 = vpop.f32.mrf.mxu1 }
 0x309   :  { %4261 = vmatpush.bf16.msrb.mxu2 %v11676_v28 }
 0x30a   :  { %4274 = vmatpush.bf16.msrb.mxu3 %v11804_v29  ;;  %4236 = vmatmul.bf16.vlgmr.msrb.gmra.mxu0 %v16721_v16  ;;  %v4043_v35 = vadd.f32 %v4042_v34, %v4030_v33 }
 0x30b   :  { %4249 = vmatmul.bf16.vlgmr.msrb.gmra.mxu1 %v16724_v31  ;;  %v2578_v31 = vperm.slane %v16749_v10, 2 }
 0x30c   :  { %4262 = vmatmul.bf16.vlgmr.msrb.gmra.mxu2 %v16727_v50 }
 0x30d   :  { %4275 = vmatmul.bf16.vlgmr.msrb.gmra.mxu3 %v16730_v5 }
 0x30f   :  { %v4055_v36 = vpop.f32.mrf.mxu2  ;;  %v4031_v42 = vpop.f32.mrf.mxu0 }
 0x310   :  { %v4056_v37 = vadd.f32 %v4055_v36, %v4043_v35  ;;  %v4068_v40 = vpop.f32.mrf.mxu3  ;;  %v4044_v43 = vpop.f32.mrf.mxu1 }
 0x312   :  { %v4069_v41 = vadd.f32 %v4068_v40, %v4056_v37 }
 0x314   :  { %v4281_v44 = vmax.f32 %v4069_v41, 0.0 }
 0x316   :  { %v16773_v46 = vpack.c.bf16 %v4281_v44, %v4281_v44 }
 0x317   :  { %v4057_v16 = vpop.f32.mrf.mxu2 }
 0x318   :  { %v4070_v47 = vpop.f32.mrf.mxu3 }
 0x327   :  { %v4081_v50 = vpop.f32.mrf.mxu0 }
 0x328   :  { %v4082_v48 = vadd.f32 %v4081_v50, %v2578_v31  ;;  %v4094_v5 = vpop.f32.mrf.mxu1 }
 0x32a   :  { %v4095_v49 = vadd.f32 %v4094_v5, %v4082_v48 }
 0x32f   :  { %v4107_v51 = vpop.f32.mrf.mxu2  ;;  %v4083_v1 = vpop.f32.mrf.mxu0 }
 0x330   :  { %v4108_v52 = vadd.f32 %v4107_v51, %v4095_v49  ;;  %v4120_v53 = vpop.f32.mrf.mxu3  ;;  %v4096_v55 = vpop.f32.mrf.mxu1 }
 0x332   :  { %v4121_v54 = vadd.f32 %v4120_v53, %v4108_v52 }
 0x337   :  { %v4109_v56 = vpop.f32.mrf.mxu2 }
 0x338   :  { %v4122_v57 = vpop.f32.mrf.mxu3 }
 0x347   :  { %v4133_v58 = vpop.f32.mrf.mxu0 }
 0x348   :  { %v4134_v59 = vadd.f32 %v4133_v58, %v4121_v54  ;;  %v4146_v60 = vpop.f32.mrf.mxu1 }
 0x34a   :  { %v4147_v61 = vadd.f32 %v4146_v60, %v4134_v59 }
 0x34f   :  { %v4159_v62 = vpop.f32.mrf.mxu2  ;;  %v4135_v7 = vpop.f32.mrf.mxu0 }
 0x350   :  { %v4160_v63 = vadd.f32 %v4159_v62, %v4147_v61  ;;  %v4172_v0 = vpop.f32.mrf.mxu3  ;;  %v4148_v2 = vpop.f32.mrf.mxu1 }
 0x352   :  { %v4173_v6 = vadd.f32 %v4172_v0, %v4160_v63 }
 0x354   :  { %v4282_v38 = vmax.f32 %v4173_v6, 0.0 }
 0x356   :  { %v16776_v3 = vpack.c.bf16 %v4282_v38, %v4282_v38 }
 0x357   :  { %v4161_v8 = vpop.f32.mrf.mxu2 }
 0x358   :  { %v4174_v9 = vpop.f32.mrf.mxu3 }
 0x367   :  { %v4185_v11 = vpop.f32.mrf.mxu0 }
 0x368   :  { %v4198_v12 = vpop.f32.mrf.mxu1  ;;  %v4186_v21 = vadd.f32 %v4185_v11, %v2579_v19 }
 0x36a   :  { %v4199_v4 = vadd.f32 %v4198_v12, %v4186_v21 }
 0x36f   :  { %v4211_v13 = vpop.f32.mrf.mxu2  ;;  %v4187_v15 = vpop.f32.mrf.mxu0 }
 0x370   :  { %v4224_v14 = vpop.f32.mrf.mxu3  ;;  %v4200_v17 = vpop.f32.mrf.mxu1  ;;  %v4212_v22 = vadd.f32 %v4211_v13, %v4199_v4 }
 0x372   :  { %v4225_v23 = vadd.f32 %v4224_v14, %v4212_v22 }
 0x377   :  { %v4213_v32 = vpop.f32.mrf.mxu2 }
 0x378   :  { %v4226_v20 = vpop.f32.mrf.mxu3 }
 0x387   :  { %v4237_v24 = vpop.f32.mrf.mxu0 }
 0x388   :  { %v4250_v45 = vpop.f32.mrf.mxu1  ;;  %v4238_v25 = vadd.f32 %v4237_v24, %v4225_v23 }
 0x38a   :  { %v4251_v26 = vadd.f32 %v4250_v45, %v4238_v25 }
 0x38f   :  { %v4263_v39 = vpop.f32.mrf.mxu2  ;;  %v4239_v29 = vpop.f32.mrf.mxu0 }
 0x390   :  { %v4264_v27 = vadd.f32 %v4263_v39, %v4251_v26  ;;  %v4276_v28 = vpop.f32.mrf.mxu3  ;;  %v4252_v30 = vpop.f32.mrf.mxu1 }
 0x392   :  { %v4277_v33 = vadd.f32 %v4276_v28, %v4264_v27 }
 0x394   :  { %v4283_v34 = vmax.f32 %v4277_v33, 0.0 }
 0x396   :  { %v16779_v35 = vpack.c.bf16 %v4283_v34, %v4283_v34 }
 0x397   :  { %v4265_v10 = vpop.f32.mrf.mxu2 }
 0x398   :  { %v4278_v36 = vpop.f32.mrf.mxu3 }
 0x399   :  { %16446 = dma.done.wait [#allocation11 + $0x2], 8192 }
 0x39a   :  { %16447 = vsyncadd [#allocation11 + $0x2], 4294959104  ;;  %v11975_v37 = vld [vmem:[#allocation4 + $0x70] sm:$0xf]  ;;  %v15205_v40 = vld [vmem:[#allocation4 + $0x74] sm:$0xf0] }
 0x39b   :  { %v12039_v41 = vld [vmem:[#allocation4 + $0xf0] sm:$0xf]  ;;  %v11976_v42 = vor.u32 %v15205_v40, %v11975_v37  ;;  %v15221_v43 = vld [vmem:[#allocation4 + $0xf4] sm:$0xf0]  ;;  %v11967_v5 = vld [vmem:[#allocation4 + $0x60] sm:$0xf] }
 0x39c   :  { %v12103_v44 = vld [vmem:[#allocation4 + $0x170] sm:$0xf]  ;;  %v15237_v16 = vld [vmem:[#allocation4 + $0x174] sm:$0xf0]  ;;  %v12040_v47 = vor.u32 %v15221_v43, %v12039_v41  ;;  %v15203_v51 = vld [vmem:[#allocation4 + $0x64] sm:$0xf0] }
 0x39d   :  { %v12104_v31 = vor.u32 %v15237_v16, %v12103_v44  ;;  %v12167_v50 = vld [vmem:[#allocation4 + $0x1f0] sm:$0xf]  ;;  %v15253_v48 = vld [vmem:[#allocation4 + $0x1f4] sm:$0xf0]  ;;  %4681 = vmatpush.bf16.msra.mxu0 %v11976_v42  ;;  %v12031_v52 = vld [vmem:[#allocation4 + $0xe0] sm:$0xf]  ;;  %v11968_v54 = vor.u32 %v15203_v51, %v11967_v5 }
 0x39e   :  { %v12168_v49 = vor.u32 %v15253_v48, %v12167_v50  ;;  %v15219_v53 = vld [vmem:[#allocation4 + $0xe4] sm:$0xf0]  ;;  %4694 = vmatpush.bf16.msra.mxu1 %v12040_v47  ;;  %v12095_v55 = vld [vmem:[#allocation4 + $0x160] sm:$0xf]  ;;  %v11959_v60 = vld [vmem:[#allocation4 + $0x50] sm:$0xf] }
 0x39f   :  { %4707 = vmatpush.bf16.msra.mxu2 %v12104_v31  ;;  %v12032_v1 = vor.u32 %v15219_v53, %v12031_v52  ;;  %v15235_v56 = vld [vmem:[#allocation4 + $0x164] sm:$0xf0]  ;;  %v12159_v57 = vld [vmem:[#allocation4 + $0x1e0] sm:$0xf]  ;;  %v15201_v61 = vld [vmem:[#allocation4 + $0x54] sm:$0xf0] }
 0x3a0   :  { %4720 = vmatpush.bf16.msra.mxu3 %v12168_v49  ;;  %v12096_v58 = vor.u32 %v15235_v56, %v12095_v55  ;;  %v15251_v59 = vld [vmem:[#allocation4 + $0x1e4] sm:$0xf0]  ;;  %v12023_v63 = vld [vmem:[#allocation4 + $0xd0] sm:$0xf]  ;;  %v15217_v0 = vld [vmem:[#allocation4 + $0xd4] sm:$0xf0]  ;;  %v11960_v7 = vor.u32 %v15201_v61, %v11959_v60 }
 0x3a1   :  { %v12160_v62 = vor.u32 %v15251_v59, %v12159_v57  ;;  %v12087_v6 = vld [vmem:[#allocation4 + $0x150] sm:$0xf]  ;;  %4682 = vmatpush.bf16.msra.mxu0 %v11968_v54  ;;  %v15233_v2 = vld [vmem:[#allocation4 + $0x154] sm:$0xf0]  ;;  %v12024_v9 = vor.u32 %v15217_v0, %v12023_v63  ;;  %v11951_v12 = vld [vmem:[#allocation4 + $0x40] sm:$0xf] }
 0x3a2   :  { %v12151_v38 = vld [vmem:[#allocation4 + $0x1d0] sm:$0xf]  ;;  %v15249_v8 = vld [vmem:[#allocation4 + $0x1d4] sm:$0xf0]  ;;  %4695 = vmatpush.bf16.msra.mxu1 %v12032_v1  ;;  %v12088_v11 = vor.u32 %v15233_v2, %v12087_v6  ;;  %v15199_v13 = vld [vmem:[#allocation4 + $0x44] sm:$0xf0] }
 0x3a3   :  { %4708 = vmatpush.bf16.msra.mxu2 %v12096_v58  ;;  %v12015_v14 = vld [vmem:[#allocation4 + $0xc0] sm:$0xf]  ;;  %v12152_v15 = vor.u32 %v15249_v8, %v12151_v38  ;;  %v15215_v17 = vld [vmem:[#allocation4 + $0xc4] sm:$0xf0]  ;;  %v11952_v4 = vor.u32 %v15199_v13, %v11951_v12  ;;  %v11943_v24 = vld [vmem:[#allocation4 + $0x30] sm:$0xf] }
 0x3a4   :  { %4721 = vmatpush.bf16.msra.mxu3 %v12160_v62  ;;  %v12079_v19 = vld [vmem:[#allocation4 + $0x140] sm:$0xf]  ;;  %v15231_v32 = vld [vmem:[#allocation4 + $0x144] sm:$0xf0]  ;;  %v12016_v22 = vor.u32 %v15215_v17, %v12015_v14  ;;  %v15197_v45 = vld [vmem:[#allocation4 + $0x34] sm:$0xf0] }
 0x3a5   :  { %v12143_v20 = vld [vmem:[#allocation4 + $0x1c0] sm:$0xf]  ;;  %v15247_v21 = vld [vmem:[#allocation4 + $0x1c4] sm:$0xf0]  ;;  %4683 = vmatpush.bf16.msra.mxu0 %v11960_v7  ;;  %v12080_v23 = vor.u32 %v15231_v32, %v12079_v19  ;;  %v12007_v25 = vld [vmem:[#allocation4 + $0xb0] sm:$0xf]  ;;  %v11944_v33 = vor.u32 %v15197_v45, %v11943_v24 }
 0x3a6   :  { %4696 = vmatpush.bf16.msra.mxu1 %v12024_v9  ;;  %v12144_v26 = vor.u32 %v15247_v21, %v12143_v20  ;;  %v15213_v39 = vld [vmem:[#allocation4 + $0xb4] sm:$0xf0]  ;;  %v12071_v27 = vld [vmem:[#allocation4 + $0x130] sm:$0xf]  ;;  %v11935_v36 = vld [vmem:[#allocation4 + $0x20] sm:$0xf] }
 0x3a7   :  { %4709 = vmatpush.bf16.msra.mxu2 %v12088_v11  ;;  %v15229_v28 = vld [vmem:[#allocation4 + $0x134] sm:$0xf0]  ;;  %v12135_v29 = vld [vmem:[#allocation4 + $0x1b0] sm:$0xf]  ;;  %v12008_v34 = vor.u32 %v15213_v39, %v12007_v25  ;;  %v15195_v37 = vld [vmem:[#allocation4 + $0x24] sm:$0xf0] }
 0x3a8   :  { %4722 = vmatpush.bf16.msra.mxu3 %v12152_v15  ;;  %v15245_v30 = vld [vmem:[#allocation4 + $0x1b4] sm:$0xf0]  ;;  %v12072_v10 = vor.u32 %v15229_v28, %v12071_v27  ;;  %v11999_v40 = vld [vmem:[#allocation4 + $0xa0] sm:$0xf]  ;;  %v15211_v42 = vld [vmem:[#allocation4 + $0xa4] sm:$0xf0]  ;;  %v11936_v31 = vor.u32 %v15195_v37, %v11935_v36 }
 0x3a9   :  { %4684 = vmatpush.bf16.msra.mxu0 %v11952_v4  ;;  %v12136_v41 = vor.u32 %v15245_v30, %v12135_v29  ;;  %v12063_v43 = vld [vmem:[#allocation4 + $0x120] sm:$0xf]  ;;  %v15227_v44 = vld [vmem:[#allocation4 + $0x124] sm:$0xf0]  ;;  %v12000_v50 = vor.u32 %v15211_v42, %v11999_v40  ;;  %v11927_v5 = vld [vmem:[#allocation4 + $0x10] sm:$0xf] }
 0x3aa   :  { %4697 = vmatpush.bf16.msra.mxu1 %v12016_v22  ;;  %v12127_v16 = vld [vmem:[#allocation4 + $0x1a0] sm:$0xf]  ;;  %v15243_v47 = vld [vmem:[#allocation4 + $0x1a4] sm:$0xf0]  ;;  %v12064_v48 = vor.u32 %v15227_v44, %v12063_v43  ;;  %v15193_v49 = vld [vmem:[#allocation4 + $0x14] sm:$0xf0] }
 0x3ab   :  { %4710 = vmatpush.bf16.msra.mxu2 %v12080_v23  ;;  %v11991_v51 = vld [vmem:[#allocation4 + $0x90] sm:$0xf]  ;;  %v12128_v52 = vor.u32 %v15243_v47, %v12127_v16  ;;  %v15209_v53 = vld [vmem:[#allocation4 + $0x94] sm:$0xf0]  ;;  %v11928_v57 = vor.u32 %v15193_v49, %v11927_v5  ;;  %v11919_v58 = vld [vmem:[#allocation4] sm:$0xf] }
 0x3ac   :  { %4723 = vmatpush.bf16.msra.mxu3 %v12144_v26  ;;  %v12055_v54 = vld [vmem:[#allocation4 + $0x110] sm:$0xf]  ;;  %v15225_v1 = vld [vmem:[#allocation4 + $0x114] sm:$0xf0]  ;;  %v15191_v59 = vld [vmem:[#allocation4 + $0x4] sm:$0xf0]  ;;  %v11992_v60 = vor.u32 %v15209_v53, %v11991_v51 }
 0x3ad   :  { %4685 = vmatpush.bf16.msra.mxu0 %v11944_v33  ;;  %v12119_v55 = vld [vmem:[#allocation4 + $0x190] sm:$0xf]  ;;  %v15241_v56 = vld [vmem:[#allocation4 + $0x194] sm:$0xf0]  ;;  %v12056_v61 = vor.u32 %v15225_v1, %v12055_v54  ;;  %v11983_v62 = vld [vmem:[#allocation4 + $0x80] sm:$0xf]  ;;  %v11920_v12 = vor.u32 %v15191_v59, %v11919_v58 }
 0x3ae   :  { %4698 = vmatpush.bf16.msra.mxu1 %v12008_v34  ;;  %v15207_v63 = vld [vmem:[#allocation4 + $0x84] sm:$0xf0]  ;;  %v12047_v0 = vld [vmem:[#allocation4 + $0x100] sm:$0xf]  ;;  %v12120_v6 = vor.u32 %v15241_v56, %v12119_v55  ;;  %v15204_v8 = vld [vmem:[#allocation4 + $0x74] sm:$0xf] }
 0x3af   :  { %4711 = vmatpush.bf16.msra.mxu2 %v12072_v10  ;;  %v15223_v7 = vld [vmem:[#allocation4 + $0x104] sm:$0xf0]  ;;  %v12111_v2 = vld [vmem:[#allocation4 + $0x180] sm:$0xf]  ;;  %v11977_v9 = vld [vmem:[#allocation4 + $0x78] sm:$0xf0]  ;;  %v11984_v17 = vor.u32 %v15207_v63, %v11983_v62 }
 0x3b0   :  { %4724 = vmatpush.bf16.msra.mxu3 %v12136_v41  ;;  %v15239_v38 = vld [vmem:[#allocation4 + $0x184] sm:$0xf0]  ;;  %v15220_v11 = vld [vmem:[#allocation4 + $0xf4] sm:$0xf]  ;;  %v12041_v13 = vld [vmem:[#allocation4 + $0xf8] sm:$0xf0]  ;;  %v12048_v19 = vor.u32 %v15223_v7, %v12047_v0  ;;  %v11980_v4 = vor.u32 %v15204_v8, %v11977_v9 }
 0x3b1   :  { %4686 = vmatpush.bf16.msra.mxu0 %v11936_v31  ;;  %v15236_v14 = vld [vmem:[#allocation4 + $0x174] sm:$0xf]  ;;  %v12105_v15 = vld [vmem:[#allocation4 + $0x178] sm:$0xf0]  ;;  %v12112_v21 = vor.u32 %v15239_v38, %v12111_v2  ;;  %v12044_v22 = vor.u32 %v15220_v11, %v12041_v13  ;;  %v15202_v24 = vld [vmem:[#allocation4 + $0x64] sm:$0xf] }
 0x3b2   :  { %4699 = vmatpush.bf16.msra.mxu1 %v12000_v50  ;;  %v15252_v32 = vld [vmem:[#allocation4 + $0x1f4] sm:$0xf]  ;;  %v12169_v20 = vld [vmem:[#allocation4 + $0x1f8] sm:$0xf0]  ;;  %v12108_v23 = vor.u32 %v15236_v14, %v12105_v15  ;;  %v11969_v45 = vld [vmem:[#allocation4 + $0x68] sm:$0xf0] }
 0x3b3   :  { %4712 = vmatpush.bf16.msra.mxu2 %v12064_v48  ;;  %v15218_v25 = vld [vmem:[#allocation4 + $0xe4] sm:$0xf]  ;;  %v12172_v26 = vor.u32 %v15252_v32, %v12169_v20  ;;  %v12033_v39 = vld [vmem:[#allocation4 + $0xe8] sm:$0xf0]  ;;  %v11972_v33 = vor.u32 %v15202_v24, %v11969_v45  ;;  %v15200_v36 = vld [vmem:[#allocation4 + $0x54] sm:$0xf] }
 0x3b4   :  { %4725 = vmatpush.bf16.msra.mxu3 %v12128_v52  ;;  %v15234_v27 = vld [vmem:[#allocation4 + $0x164] sm:$0xf]  ;;  %v12097_v28 = vld [vmem:[#allocation4 + $0x168] sm:$0xf0]  ;;  %v12036_v34 = vor.u32 %v15218_v25, %v12033_v39  ;;  %v11961_v37 = vld [vmem:[#allocation4 + $0x58] sm:$0xf0] }
 0x3b5   :  { %4687 = vmatpush.bf16.msra.mxu0 %v11928_v57  ;;  %v15250_v29 = vld [vmem:[#allocation4 + $0x1e4] sm:$0xf]  ;;  %v12161_v30 = vld [vmem:[#allocation4 + $0x1e8] sm:$0xf0]  ;;  %v12100_v10 = vor.u32 %v15234_v27, %v12097_v28  ;;  %v15216_v40 = vld [vmem:[#allocation4 + $0xd4] sm:$0xf]  ;;  %v11964_v31 = vor.u32 %v15200_v36, %v11961_v37 }
 0x3b6   :  { %4700 = vmatpush.bf16.msra.mxu1 %v11992_v60  ;;  %v12164_v41 = vor.u32 %v15250_v29, %v12161_v30  ;;  %v12025_v42 = vld [vmem:[#allocation4 + $0xd8] sm:$0xf0]  ;;  %v15232_v43 = vld [vmem:[#allocation4 + $0x154] sm:$0xf]  ;;  %v15198_v5 = vld [vmem:[#allocation4 + $0x44] sm:$0xf] }
 0x3b7   :  { %4713 = vmatpush.bf16.msra.mxu2 %v12056_v61  ;;  %v12089_v44 = vld [vmem:[#allocation4 + $0x158] sm:$0xf0]  ;;  %v15248_v16 = vld [vmem:[#allocation4 + $0x1d4] sm:$0xf]  ;;  %v12028_v50 = vor.u32 %v15216_v40, %v12025_v42  ;;  %v11953_v49 = vld [vmem:[#allocation4 + $0x48] sm:$0xf0] }
 0x3b8   :  { %4726 = vmatpush.bf16.msra.mxu3 %v12120_v6  ;;  %v12153_v47 = vld [vmem:[#allocation4 + $0x1d8] sm:$0xf0]  ;;  %v12092_v48 = vor.u32 %v15232_v43, %v12089_v44  ;;  %v15214_v51 = vld [vmem:[#allocation4 + $0xc4] sm:$0xf]  ;;  %v12017_v53 = vld [vmem:[#allocation4 + $0xc8] sm:$0xf0]  ;;  %v11956_v57 = vor.u32 %v15198_v5, %v11953_v49 }
 0x3b9   :  { %4688 = vmatpush.bf16.msra.mxu0 %v11920_v12  ;;  %v12156_v52 = vor.u32 %v15248_v16, %v12153_v47  ;;  %v15230_v54 = vld [vmem:[#allocation4 + $0x144] sm:$0xf]  ;;  %v12081_v1 = vld [vmem:[#allocation4 + $0x148] sm:$0xf0]  ;;  %v12020_v58 = vor.u32 %v15214_v51, %v12017_v53  ;;  %v15196_v60 = vld [vmem:[#allocation4 + $0x34] sm:$0xf] }
 0x3ba   :  { %4701 = vmatpush.bf16.msra.mxu1 %v11984_v17  ;;  %v15246_v55 = vld [vmem:[#allocation4 + $0x1c4] sm:$0xf]  ;;  %v12145_v56 = vld [vmem:[#allocation4 + $0x1c8] sm:$0xf0]  ;;  %v12084_v59 = vor.u32 %v15230_v54, %v12081_v1  ;;  %v11945_v61 = vld [vmem:[#allocation4 + $0x38] sm:$0xf0] }
 0x3bb   :  { %4714 = vmatpush.bf16.msra.mxu2 %v12048_v19  ;;  %v15212_v62 = vld [vmem:[#allocation4 + $0xb4] sm:$0xf]  ;;  %v12148_v63 = vor.u32 %v15246_v55, %v12145_v56  ;;  %v12009_v0 = vld [vmem:[#allocation4 + $0xb8] sm:$0xf0]  ;;  %v11948_v8 = vor.u32 %v15196_v60, %v11945_v61  ;;  %v15194_v12 = vld [vmem:[#allocation4 + $0x24] sm:$0xf] }
 0x3bc   :  { %4727 = vmatpush.bf16.msra.mxu3 %v12112_v21  ;;  %4689 = vmatmul.bf16.vlgmr.msra.gmra.mxu0 %v16762_v18  ;;  %v15228_v6 = vld [vmem:[#allocation4 + $0x134] sm:$0xf]  ;;  %v12073_v7 = vld [vmem:[#allocation4 + $0x138] sm:$0xf0]  ;;  %v12012_v9 = vor.u32 %v15212_v62, %v12009_v0  ;;  %v11937_v13 = vld [vmem:[#allocation4 + $0x28] sm:$0xf0] }
 0x3bd   :  { %4733 = vmatpush.bf16.msrb.mxu0 %v11980_v4  ;;  %4702 = vmatmul.bf16.vlgmr.msra.gmra.mxu1 %v16773_v46  ;;  %v15244_v2 = vld [vmem:[#allocation4 + $0x1b4] sm:$0xf]  ;;  %v12137_v38 = vld [vmem:[#allocation4 + $0x1b8] sm:$0xf0]  ;;  %v12076_v11 = vor.u32 %v15228_v6, %v12073_v7  ;;  %v15210_v14 = vld [vmem:[#allocation4 + $0xa4] sm:$0xf]  ;;  %v11940_v4 = vor.u32 %v15194_v12, %v11937_v13 }
 0x3be   :  { %4746 = vmatpush.bf16.msrb.mxu1 %v12044_v22  ;;  %4715 = vmatmul.bf16.vlgmr.msra.gmra.mxu2 %v16776_v3  ;;  %v12140_v15 = vor.u32 %v15244_v2, %v12137_v38  ;;  %v12001_v17 = vld [vmem:[#allocation4 + $0xa8] sm:$0xf0]  ;;  %v15226_v19 = vld [vmem:[#allocation4 + $0x124] sm:$0xf]  ;;  %v15192_v24 = vld [vmem:[#allocation4 + $0x14] sm:$0xf] }
 0x3bf   :  { %4759 = vmatpush.bf16.msrb.mxu2 %v12108_v23  ;;  %4728 = vmatmul.bf16.vlgmr.msra.gmra.mxu3 %v16779_v35  ;;  %v12065_v32 = vld [vmem:[#allocation4 + $0x128] sm:$0xf0]  ;;  %v15242_v20 = vld [vmem:[#allocation4 + $0x1a4] sm:$0xf]  ;;  %v12004_v22 = vor.u32 %v15210_v14, %v12001_v17  ;;  %v11929_v45 = vld [vmem:[#allocation4 + $0x18] sm:$0xf0] }
 0x3c0   :  { %4772 = vmatpush.bf16.msrb.mxu3 %v12172_v26  ;;  %v12129_v21 = vld [vmem:[#allocation4 + $0x1a8] sm:$0xf0]  ;;  %v12068_v23 = vor.u32 %v15226_v19, %v12065_v32  ;;  %v15208_v25 = vld [vmem:[#allocation4 + $0x94] sm:$0xf]  ;;  %v11993_v39 = vld [vmem:[#allocation4 + $0x98] sm:$0xf0] }
 0x3c1   :  { %4734 = vmatpush.bf16.msrb.mxu0 %v11972_v33  ;;  %v12132_v26 = vor.u32 %v15242_v20, %v12129_v21  ;;  %v15224_v27 = vld [vmem:[#allocation4 + $0x114] sm:$0xf]  ;;  %v12057_v28 = vld [vmem:[#allocation4 + $0x118] sm:$0xf0]  ;;  %v11932_v33 = vor.u32 %v15192_v24, %v11929_v45  ;;  %v15190_v36 = vld [vmem:[#allocation4 + $0x4] sm:$0xf] }
 0x3c2   :  { %4747 = vmatpush.bf16.msrb.mxu1 %v12036_v34  ;;  %v15240_v29 = vld [vmem:[#allocation4 + $0x194] sm:$0xf]  ;;  %v12121_v30 = vld [vmem:[#allocation4 + $0x198] sm:$0xf0]  ;;  %v11996_v34 = vor.u32 %v15208_v25, %v11993_v39  ;;  %v11921_v37 = vld [vmem:[#allocation4 + $0x8] sm:$0xf0] }
 0x3c3   :  { %4760 = vmatpush.bf16.msrb.mxu2 %v12100_v10  ;;  %v12060_v10 = vor.u32 %v15224_v27, %v12057_v28  ;;  %v15206_v40 = vld [vmem:[#allocation4 + $0x84] sm:$0xf]  ;;  %v11985_v42 = vld [vmem:[#allocation4 + $0x88] sm:$0xf0]  ;;  %v4355_v49 = vld [vmem:[#allocation20] sm:$0x3] }
 0x3c4   :  { %4773 = vmatpush.bf16.msrb.mxu3 %v12164_v41  ;;  %v12124_v41 = vor.u32 %v15240_v29, %v12121_v30  ;;  %v15222_v43 = vld [vmem:[#allocation4 + $0x104] sm:$0xf]  ;;  %v12049_v44 = vld [vmem:[#allocation4 + $0x108] sm:$0xf0]  ;;  %v4357_v51 = vperm.slane %v4355_v49, 0 }
 0x3c5   :  { %4735 = vmatpush.bf16.msrb.mxu0 %v11964_v31  ;;  %v15238_v16 = vld [vmem:[#allocation4 + $0x184] sm:$0xf]  ;;  %v12113_v47 = vld [vmem:[#allocation4 + $0x188] sm:$0xf0]  ;;  %v11924_v31 = vor.u32 %v15190_v36, %v11921_v37 }
 0x3c6   :  { %4748 = vmatpush.bf16.msrb.mxu1 %v12028_v50  ;;  %v11988_v50 = vor.u32 %v15206_v40, %v11985_v42  ;;  %v12116_v5 = vor.u32 %v15238_v16, %v12113_v47 }
 0x3c7   :  { %4761 = vmatpush.bf16.msrb.mxu2 %v12092_v48  ;;  %v12052_v48 = vor.u32 %v15222_v43, %v12049_v44 }
 0x3c8   :  { %4774 = vmatpush.bf16.msrb.mxu3 %v12156_v52 }
 0x3c9   :  { %4736 = vmatpush.bf16.msrb.mxu0 %v11956_v57 }
 0x3ca   :  { %4749 = vmatpush.bf16.msrb.mxu1 %v12020_v58 }
 0x3cb   :  { %4762 = vmatpush.bf16.msrb.mxu2 %v12084_v59 }
 0x3cc   :  { %4775 = vmatpush.bf16.msrb.mxu3 %v12148_v63  ;;  %v4358_v63 = vperm.slane %v4355_v49, 1 }
 0x3cd   :  { %4737 = vmatpush.bf16.msrb.mxu0 %v11948_v8 }
 0x3ce   :  { %4750 = vmatpush.bf16.msrb.mxu1 %v12012_v9 }
 0x3cf   :  { %4763 = vmatpush.bf16.msrb.mxu2 %v12076_v11 }
 0x3d0   :  { %4776 = vmatpush.bf16.msrb.mxu3 %v12140_v15 }
 0x3d1   :  { %4738 = vmatpush.bf16.msrb.mxu0 %v11940_v4 }
 0x3d2   :  { %4751 = vmatpush.bf16.msrb.mxu1 %v12004_v22 }
 0x3d3   :  { %4764 = vmatpush.bf16.msrb.mxu2 %v12068_v23 }
 0x3d4   :  { %4777 = vmatpush.bf16.msrb.mxu3 %v12132_v26 }
 0x3d5   :  { %4739 = vmatpush.bf16.msrb.mxu0 %v11932_v33 }
 0x3d6   :  { %4752 = vmatpush.bf16.msrb.mxu1 %v11996_v34 }
 0x3d7   :  { %4765 = vmatpush.bf16.msrb.mxu2 %v12060_v10 }
 0x3d8   :  { %4778 = vmatpush.bf16.msrb.mxu3 %v12124_v41 }
 0x3d9   :  { %4740 = vmatpush.bf16.msrb.mxu0 %v11924_v31 }
 0x3da   :  { %4753 = vmatpush.bf16.msrb.mxu1 %v11988_v50 }
 0x3db   :  { %4766 = vmatpush.bf16.msrb.mxu2 %v12052_v48 }
 0x3dc   :  { %4779 = vmatpush.bf16.msrb.mxu3 %v12116_v5  ;;  %4741 = vmatmul.bf16.vlgmr.msrb.gmra.mxu0 %v16762_v18 }
 0x3dd   :  { %4754 = vmatmul.bf16.vlgmr.msrb.gmra.mxu1 %v16773_v46 }
 0x3de   :  { %4767 = vmatmul.bf16.vlgmr.msrb.gmra.mxu2 %v16776_v3 }
 0x3df   :  { %4780 = vmatmul.bf16.vlgmr.msrb.gmra.mxu3 %v16779_v35 }
 0x439   :  { %v4690_v52 = vpop.f32.mrf.mxu0 }
 0x43a   :  { %v4691_v53 = vadd.f32 %v4690_v52, %v4357_v51  ;;  %v4703_v54 = vpop.f32.mrf.mxu1 }
 0x43c   :  { %v4704_v1 = vadd.f32 %v4703_v54, %v4691_v53 }
 0x441   :  { %v4716_v55 = vpop.f32.mrf.mxu2  ;;  %v4692_v59 = vpop.f32.mrf.mxu0 }
 0x442   :  { %v4717_v56 = vadd.f32 %v4716_v55, %v4704_v1  ;;  %v4729_v57 = vpop.f32.mrf.mxu3  ;;  %v4705_v60 = vpop.f32.mrf.mxu1 }
 0x444   :  { %v4730_v58 = vadd.f32 %v4729_v57, %v4717_v56 }
 0x446   :  { %v4785_v61 = vmax.f32 %v4730_v58, 0.0 }
 0x448   :  { %v4787_v18 = vpack.c.bf16 %v4785_v61, %v4785_v61 }
 0x449   :  { %v4718_v62 = vpop.f32.mrf.mxu2 }
 0x44a   :  { %v4731_v46 = vpop.f32.mrf.mxu3 }
 0x459   :  { %v4742_v3 = vpop.f32.mrf.mxu0 }
 0x45a   :  { %v4743_v0 = vadd.f32 %v4742_v3, %v4358_v63  ;;  %v4755_v35 = vpop.f32.mrf.mxu1 }
 0x45c   :  { %v4756_v6 = vadd.f32 %v4755_v35, %v4743_v0 }
 0x461   :  { %v4768_v7 = vpop.f32.mrf.mxu2  ;;  %v4744_v8 = vpop.f32.mrf.mxu0 }
 0x462   :  { %v4769_v2 = vadd.f32 %v4768_v7, %v4756_v6  ;;  %v4781_v38 = vpop.f32.mrf.mxu3  ;;  %v4757_v9 = vpop.f32.mrf.mxu1 }
 0x464   :  { %v4782_v11 = vadd.f32 %v4781_v38, %v4769_v2 }
 0x466   :  { %v4786_v12 = vmax.f32 %v4782_v11, 0.0 }
 0x468   :  { %v4788_v13 = vpack.c.bf16 %v4786_v12, %v4786_v12 }
 0x469   :  { %v4770_v14 = vpop.f32.mrf.mxu2 }
 0x46a   :  { %v4783_v15 = vpop.f32.mrf.mxu3 }
 0x46b   :  { %16448 = dma.done.wait [#allocation11 + $0x3], 2048 }
 0x46c   :  { %16449 = vsyncadd [#allocation11 + $0x3], 4294965248  ;;  %v15261_v17 = vld [vmem:[#allocation5 + $0x38] sm:$0xff]  ;;  %v15260_v32 = vld [vmem:[#allocation5 + $0x30] sm:$0xff] }
 0x46d   :  { %v15269_v19 = vld [vmem:[#allocation5 + $0x78] sm:$0xff]  ;;  %4925 = vmatpush.bf16.msra.mxu0 %v15261_v17  ;;  %v15268_v20 = vld [vmem:[#allocation5 + $0x70] sm:$0xff]  ;;  %v15259_v21 = vld [vmem:[#allocation5 + $0x28] sm:$0xff] }
 0x46e   :  { %4938 = vmatpush.bf16.msra.mxu1 %v15269_v19  ;;  %v15267_v4 = vld [vmem:[#allocation5 + $0x68] sm:$0xff]  ;;  %v15258_v22 = vld [vmem:[#allocation5 + $0x20] sm:$0xff]  ;;  %v15257_v24 = vld [vmem:[#allocation5 + $0x18] sm:$0xff] }
 0x46f   :  { %v15266_v23 = vld [vmem:[#allocation5 + $0x60] sm:$0xff]  ;;  %v15265_v45 = vld [vmem:[#allocation5 + $0x58] sm:$0xff]  ;;  %v15256_v25 = vld [vmem:[#allocation5 + $0x10] sm:$0xff] }
 0x470   :  { %v15264_v26 = vld [vmem:[#allocation5 + $0x50] sm:$0xff]  ;;  %v15255_v39 = vld [vmem:[#allocation5 + $0x8] sm:$0xff]  ;;  %v15254_v28 = vld [vmem:[#allocation5] sm:$0xff] }
 0x471   :  { %4926 = vmatpush.bf16.msra.mxu0 %v15260_v32  ;;  %v15263_v27 = vld [vmem:[#allocation5 + $0x48] sm:$0xff]  ;;  %v15262_v29 = vld [vmem:[#allocation5 + $0x40] sm:$0xff]  ;;  %v15900_v30 = vld [vmem:[#allocation21] ss:$0 sm:$0xff] }
 0x472   :  { %4939 = vmatpush.bf16.msra.mxu1 %v15268_v20 }
 0x475   :  { %4927 = vmatpush.bf16.msra.mxu0 %v15259_v21 }
 0x476   :  { %4940 = vmatpush.bf16.msra.mxu1 %v15267_v4 }
 0x479   :  { %4928 = vmatpush.bf16.msra.mxu0 %v15258_v22 }
 0x47a   :  { %4941 = vmatpush.bf16.msra.mxu1 %v15266_v23 }
 0x47d   :  { %4929 = vmatpush.bf16.msra.mxu0 %v15257_v24 }
 0x47e   :  { %4942 = vmatpush.bf16.msra.mxu1 %v15265_v45 }
 0x481   :  { %4930 = vmatpush.bf16.msra.mxu0 %v15256_v25 }
 0x482   :  { %4943 = vmatpush.bf16.msra.mxu1 %v15264_v26 }
 0x485   :  { %4931 = vmatpush.bf16.msra.mxu0 %v15255_v39 }
 0x486   :  { %4944 = vmatpush.bf16.msra.mxu1 %v15263_v27 }
 0x489   :  { %4932 = vmatpush.bf16.msra.mxu0 %v15254_v28 }
 0x48a   :  { %4945 = vmatpush.bf16.msra.mxu1 %v15262_v29 }
 0x48c   :  { %4933 = vmatmul.bf16.vlgmr.msra.gmra.mxu0 %v4787_v18 }
 0x48d   :  { %4946 = vmatmul.bf16.vlgmr.msra.gmra.mxu1 %v4788_v13 }
 0x509   :  { %v4934_v33 = vpop.f32.mrf.mxu0 }
 0x50a   :  { %v4947_v34 = vpop.f32.mrf.mxu1  ;;  %v4935_v10 = vadd.f32 %v15900_v30, %v4934_v33 }
 0x50c   :  { %v4948_v36 = vadd.f32 %v4947_v34, %v4935_v10 }
 0x50e   :  { %v4951_v37 = vmax.f32 %v4948_v36, 0.0 }
 0x511   :  { %v4936_v40 = vpop.f32.mrf.mxu0 }
 0x512   :  { %v4949_v41 = vpop.f32.mrf.mxu1 }
 0x513   :  { %16450 = dma.done.wait [#allocation11 + $0x4], 2048 }
 0x514   :  { %16451 = vsyncadd [#allocation11 + $0x4], 4294965248  ;;  %v15277_v42 = vld [vmem:[#allocation6 + $0x38] sm:$0xff]  ;;  %v15276_v44 = vld [vmem:[#allocation6 + $0x30] sm:$0xff]  ;;  %v4987_v57 = vpack.c.bf16 %v4951_v37, %v4951_v37 }
 0x515   :  { %v15285_v43 = vld [vmem:[#allocation6 + $0x78] sm:$0xff]  ;;  %5089 = vmatpush.bf16.msra.mxu2 %v15277_v42  ;;  %v15284_v16 = vld [vmem:[#allocation6 + $0x70] sm:$0xff]  ;;  %5119 = vmatpush.bf16.msrb.mxu0 %v15277_v42  ;;  %v15275_v47 = vld [vmem:[#allocation6 + $0x28] sm:$0xff] }
 0x516   :  { %5102 = vmatpush.bf16.msra.mxu3 %v15285_v43  ;;  %5132 = vmatpush.bf16.msrb.mxu1 %v15285_v43  ;;  %v15283_v31 = vld [vmem:[#allocation6 + $0x68] sm:$0xff]  ;;  %v15274_v50 = vld [vmem:[#allocation6 + $0x20] sm:$0xff]  ;;  %v15273_v5 = vld [vmem:[#allocation6 + $0x18] sm:$0xff] }
 0x517   :  { %v15282_v48 = vld [vmem:[#allocation6 + $0x60] sm:$0xff]  ;;  %v15281_v49 = vld [vmem:[#allocation6 + $0x58] sm:$0xff]  ;;  %v15272_v51 = vld [vmem:[#allocation6 + $0x10] sm:$0xff] }
 0x518   :  { %v15280_v52 = vld [vmem:[#allocation6 + $0x50] sm:$0xff]  ;;  %v15271_v53 = vld [vmem:[#allocation6 + $0x8] sm:$0xff]  ;;  %v15270_v1 = vld [vmem:[#allocation6] sm:$0xff] }
 0x519   :  { %5090 = vmatpush.bf16.msra.mxu2 %v15276_v44  ;;  %5120 = vmatpush.bf16.msrb.mxu0 %v15276_v44  ;;  %v15279_v54 = vld [vmem:[#allocation6 + $0x48] sm:$0xff]  ;;  %v15278_v55 = vld [vmem:[#allocation6 + $0x40] sm:$0xff]  ;;  %v15901_v61 = vld [vmem:[#allocation23] ss:$0 sm:$0xff] }
 0x51a   :  { %5103 = vmatpush.bf16.msra.mxu3 %v15284_v16  ;;  %5133 = vmatpush.bf16.msrb.mxu1 %v15284_v16  ;;  %v4986_v56 = vld [vmem:[#allocation15] sm:$0xff]  ;;  %v5116_v59 = vld [vmem:[#allocation17] sm:$0xff] }
 0x51b   :  { %v4988_v58 = vpack.c.bf16 %v4986_v56, %v4986_v56  ;;  %v5118_v60 = vpack.c.bf16 %v5116_v59, %v5116_v59 }
 0x51d   :  { %5091 = vmatpush.bf16.msra.mxu2 %v15275_v47  ;;  %5121 = vmatpush.bf16.msrb.mxu0 %v15275_v47 }
 0x51e   :  { %5104 = vmatpush.bf16.msra.mxu3 %v15283_v31  ;;  %5134 = vmatpush.bf16.msrb.mxu1 %v15283_v31 }
 0x521   :  { %5092 = vmatpush.bf16.msra.mxu2 %v15274_v50  ;;  %5122 = vmatpush.bf16.msrb.mxu0 %v15274_v50 }
 0x522   :  { %5105 = vmatpush.bf16.msra.mxu3 %v15282_v48  ;;  %5135 = vmatpush.bf16.msrb.mxu1 %v15282_v48 }
 0x525   :  { %5093 = vmatpush.bf16.msra.mxu2 %v15273_v5  ;;  %5123 = vmatpush.bf16.msrb.mxu0 %v15273_v5 }
 0x526   :  { %5106 = vmatpush.bf16.msra.mxu3 %v15281_v49  ;;  %5136 = vmatpush.bf16.msrb.mxu1 %v15281_v49 }
 0x529   :  { %5094 = vmatpush.bf16.msra.mxu2 %v15272_v51  ;;  %5124 = vmatpush.bf16.msrb.mxu0 %v15272_v51 }
 0x52a   :  { %5107 = vmatpush.bf16.msra.mxu3 %v15280_v52  ;;  %5137 = vmatpush.bf16.msrb.mxu1 %v15280_v52 }
 0x52d   :  { %5095 = vmatpush.bf16.msra.mxu2 %v15271_v53  ;;  %5125 = vmatpush.bf16.msrb.mxu0 %v15271_v53 }
 0x52e   :  { %5108 = vmatpush.bf16.msra.mxu3 %v15279_v54  ;;  %5138 = vmatpush.bf16.msrb.mxu1 %v15279_v54 }
 0x531   :  { %5096 = vmatpush.bf16.msra.mxu2 %v15270_v1  ;;  %5126 = vmatpush.bf16.msrb.mxu0 %v15270_v1 }
 0x532   :  { %5109 = vmatpush.bf16.msra.mxu3 %v15278_v55  ;;  %5139 = vmatpush.bf16.msrb.mxu1 %v15278_v55 }
 0x534   :  { %5097 = vmatmul.bf16.vlgmr.msra.gmra.mxu2 %v4987_v57 }
 0x535   :  { %5110 = vmatmul.bf16.vlgmr.msra.gmra.mxu3 %v4988_v58  ;;  %5140 = vmatmul.bf16.vlgmr.msrb.gmra.mxu1 %v5118_v60 }
 0x5b2   :  { %v5141_v7 = vpop.f32.mrf.mxu1 }
 0x5b7   :  { %v5098_v18 = vpop.f32.mrf.mxu2 }
 0x5b8   :  { %v5111_v62 = vpop.f32.mrf.mxu3  ;;  %v5099_v46 = vadd.f32 %v15901_v61, %v5098_v18 }
 0x5ba   :  { %v5112_v63 = vadd.f32 %v5111_v62, %v5099_v46  ;;  %v5143_v2 = vpop.f32.mrf.mxu1 }
 0x5bc   :  { %v16789_v3 = vmax.f32 %v5112_v63, 0.0 }
 0x5be   :  { %v5117_v0 = vpack.c.bf16 %v16789_v3, %v16789_v3 }
 0x5bf   :  { %v5100_v35 = vpop.f32.mrf.mxu2 }
 0x5c0   :  { %v5113_v6 = vpop.f32.mrf.mxu3  ;;  %5127 = vmatmul.bf16.vlgmr.msrb.gmra.mxu0 %v5117_v0 }
 0x63d   :  { %v5128_v38 = vpop.f32.mrf.mxu0 }
 0x63e   :  { %v5129_v8 = vadd.f32 %v15901_v61, %v5128_v38 }
 0x640   :  { %v5142_v9 = vadd.f32 %v5141_v7, %v5129_v8 }
 0x642   :  { %v16793_v11 = vmax.f32 %v5142_v9, 0.0 }
 0x644   :  { %v16797_v12 = vpack.c.bf16 %v16793_v11, %v16793_v11 }
 0x645   :  { %v5130_v13 = vpop.f32.mrf.mxu0 }
 0x646   :  { %16452 = dma.done.wait [#allocation11 + $0x5], 2048 }
 0x647   :  { %16453 = vsyncadd [#allocation11 + $0x5], 4294965248  ;;  %v12359_v14 = vld [vmem:[#allocation7 + $0x70] sm:$0xf]  ;;  %v15301_v15 = vld [vmem:[#allocation7 + $0x74] sm:$0xf0] }
 0x648   :  { %v15300_v17 = vld [vmem:[#allocation7 + $0x74] sm:$0xf]  ;;  %v12360_v19 = vor.u32 %v15301_v15, %v12359_v14  ;;  %v12361_v32 = vld [vmem:[#allocation7 + $0x78] sm:$0xf0]  ;;  %v12351_v20 = vld [vmem:[#allocation7 + $0x60] sm:$0xf] }
 0x649   :  { %v15299_v21 = vld [vmem:[#allocation7 + $0x64] sm:$0xf0]  ;;  %v12364_v4 = vor.u32 %v15300_v17, %v12361_v32  ;;  %v15298_v22 = vld [vmem:[#allocation7 + $0x64] sm:$0xf]  ;;  %v12353_v23 = vld [vmem:[#allocation7 + $0x68] sm:$0xf0] }
 0x64a   :  { %5253 = vmatpush.bf16.msrb.mxu2 %v12360_v19  ;;  %v12352_v24 = vor.u32 %v15299_v21, %v12351_v20  ;;  %v12356_v45 = vor.u32 %v15298_v22, %v12353_v23  ;;  %v12343_v25 = vld [vmem:[#allocation7 + $0x50] sm:$0xf]  ;;  %v15297_v26 = vld [vmem:[#allocation7 + $0x54] sm:$0xf0]  ;;  %v15296_v39 = vld [vmem:[#allocation7 + $0x54] sm:$0xf] }
 0x64b   :  { %5266 = vmatpush.bf16.msrb.mxu3 %v12364_v4  ;;  %v12345_v27 = vld [vmem:[#allocation7 + $0x58] sm:$0xf0]  ;;  %v12344_v28 = vor.u32 %v15297_v26, %v12343_v25  ;;  %v12335_v30 = vld [vmem:[#allocation7 + $0x40] sm:$0xf]  ;;  %v15295_v33 = vld [vmem:[#allocation7 + $0x44] sm:$0xf0] }
 0x64c   :  { %v12348_v29 = vor.u32 %v15296_v39, %v12345_v27  ;;  %v15294_v34 = vld [vmem:[#allocation7 + $0x44] sm:$0xf]  ;;  %v12337_v10 = vld [vmem:[#allocation7 + $0x48] sm:$0xf0]  ;;  %v12336_v36 = vor.u32 %v15295_v33, %v12335_v30  ;;  %v12327_v40 = vld [vmem:[#allocation7 + $0x30] sm:$0xf] }
 0x64d   :  { %v12340_v37 = vor.u32 %v15294_v34, %v12337_v10  ;;  %v15293_v41 = vld [vmem:[#allocation7 + $0x34] sm:$0xf0]  ;;  %v15292_v42 = vld [vmem:[#allocation7 + $0x34] sm:$0xf]  ;;  %v12329_v43 = vld [vmem:[#allocation7 + $0x38] sm:$0xf0] }
 0x64e   :  { %5254 = vmatpush.bf16.msrb.mxu2 %v12352_v24  ;;  %v12328_v44 = vor.u32 %v15293_v41, %v12327_v40  ;;  %v12332_v16 = vor.u32 %v15292_v42, %v12329_v43  ;;  %v12319_v47 = vld [vmem:[#allocation7 + $0x20] sm:$0xf]  ;;  %v15291_v31 = vld [vmem:[#allocation7 + $0x24] sm:$0xf0]  ;;  %v15290_v50 = vld [vmem:[#allocation7 + $0x24] sm:$0xf] }
 0x64f   :  { %5267 = vmatpush.bf16.msrb.mxu3 %v12356_v45  ;;  %v12321_v48 = vld [vmem:[#allocation7 + $0x28] sm:$0xf0]  ;;  %v12320_v5 = vor.u32 %v15291_v31, %v12319_v47  ;;  %v12311_v51 = vld [vmem:[#allocation7 + $0x10] sm:$0xf]  ;;  %v15289_v52 = vld [vmem:[#allocation7 + $0x14] sm:$0xf0] }
 0x650   :  { %v12324_v49 = vor.u32 %v15290_v50, %v12321_v48  ;;  %v15288_v53 = vld [vmem:[#allocation7 + $0x14] sm:$0xf]  ;;  %v12313_v54 = vld [vmem:[#allocation7 + $0x18] sm:$0xf0]  ;;  %v12312_v1 = vor.u32 %v15289_v52, %v12311_v51  ;;  %v12303_v56 = vld [vmem:[#allocation7] sm:$0xf] }
 0x651   :  { %v12316_v55 = vor.u32 %v15288_v53, %v12313_v54  ;;  %v15287_v57 = vld [vmem:[#allocation7 + $0x4] sm:$0xf0]  ;;  %v15286_v58 = vld [vmem:[#allocation7 + $0x4] sm:$0xf]  ;;  %v12305_v59 = vld [vmem:[#allocation7 + $0x8] sm:$0xf0] }
 0x652   :  { %5255 = vmatpush.bf16.msrb.mxu2 %v12344_v28  ;;  %v12304_v60 = vor.u32 %v15287_v57, %v12303_v56  ;;  %v12308_v61 = vor.u32 %v15286_v58, %v12305_v59  ;;  %v5167_v18 = vld [vmem:[#allocation24] sm:$0x3] }
 0x653   :  { %5268 = vmatpush.bf16.msrb.mxu3 %v12348_v29  ;;  %v5169_v62 = vperm.slane %v5167_v18, 0  ;;  %v5170_v46 = vperm.slane %v5167_v18, 1 }
 0x656   :  { %5256 = vmatpush.bf16.msrb.mxu2 %v12336_v36 }
 0x657   :  { %5269 = vmatpush.bf16.msrb.mxu3 %v12340_v37 }
 0x65a   :  { %5257 = vmatpush.bf16.msrb.mxu2 %v12328_v44 }
 0x65b   :  { %5270 = vmatpush.bf16.msrb.mxu3 %v12332_v16 }
 0x65e   :  { %5258 = vmatpush.bf16.msrb.mxu2 %v12320_v5 }
 0x65f   :  { %5271 = vmatpush.bf16.msrb.mxu3 %v12324_v49 }
 0x662   :  { %5259 = vmatpush.bf16.msrb.mxu2 %v12312_v1 }
 0x663   :  { %5272 = vmatpush.bf16.msrb.mxu3 %v12316_v55 }
 0x666   :  { %5260 = vmatpush.bf16.msrb.mxu2 %v12304_v60 }
 0x667   :  { %5273 = vmatpush.bf16.msrb.mxu3 %v12308_v61 }
 0x669   :  { %5261 = vmatmul.bf16.vlgmr.msrb.gmra.mxu2 %v16797_v12 }
 0x66a   :  { %5274 = vmatmul.bf16.vlgmr.msrb.gmra.mxu3 %v16797_v12 }
 0x6ec   :  { %v5262_v63 = vpop.f32.mrf.mxu2 }
 0x6ed   :  { %v5263_v0 = vadd.f32 %v5262_v63, %v5169_v62  ;;  %v5275_v35 = vpop.f32.mrf.mxu3 }
 0x6ee   :  { %v5276_v6 = vadd.f32 %v5275_v35, %v5170_v46 }
 0x6ef   :  { %v5279_v7 = vmax.f32 %v5263_v0, 0.0 }
 0x6f0   :  { %v5280_v2 = vmax.f32 %v5276_v6, 0.0 }
 0x6f1   :  { %v16801_v38 = vpack.c.bf16 %v5279_v7, %v5279_v7 }
 0x6f2   :  { %v16803_v8 = vpack.c.bf16 %v5280_v2, %v5280_v2 }
 0x6f4   :  { %v5264_v9 = vpop.f32.mrf.mxu2 }
 0x6f5   :  { %v5277_v13 = vpop.f32.mrf.mxu3 }
 0x6f6   :  { %16454 = dma.done.wait [#allocation11 + $0x6], 8192 }
 0x6f7   :  { %16455 = vsyncadd [#allocation11 + $0x6], 4294959104  ;;  %v12479_v14 = vld [vmem:[#allocation8 + $0xe0] sm:$0xf]  ;;  %v15332_v15 = vld [vmem:[#allocation8 + $0xec] sm:$0xf0] }
 0x6f8   :  { %v12607_v12 = vld [vmem:[#allocation8 + $0x1e0] sm:$0xf]  ;;  %v12480_v17 = vor.u32 %v15332_v15, %v12479_v14  ;;  %v15364_v19 = vld [vmem:[#allocation8 + $0x1ec] sm:$0xf0]  ;;  %v15330_v32 = vld [vmem:[#allocation8 + $0xe4] sm:$0xf] }
 0x6f9   :  { %v12481_v20 = vld [vmem:[#allocation8 + $0xf0] sm:$0xf0]  ;;  %v12608_v21 = vor.u32 %v15364_v19, %v12607_v12  ;;  %v15362_v22 = vld [vmem:[#allocation8 + $0x1e4] sm:$0xf]  ;;  %v12463_v24 = vld [vmem:[#allocation8 + $0xc0] sm:$0xf] }
 0x6fa   :  { %v12484_v4 = vor.u32 %v15330_v32, %v12481_v20  ;;  %v12609_v23 = vld [vmem:[#allocation8 + $0x1f0] sm:$0xf0]  ;;  %5680 = vmatpush.bf16.msra.mxu0 %v12480_v17  ;;  %v15328_v25 = vld [vmem:[#allocation8 + $0xcc] sm:$0xf0]  ;;  %v12591_v26 = vld [vmem:[#allocation8 + $0x1c0] sm:$0xf] }
 0x6fb   :  { %v12612_v45 = vor.u32 %v15362_v22, %v12609_v23  ;;  %v15360_v39 = vld [vmem:[#allocation8 + $0x1cc] sm:$0xf0]  ;;  %5693 = vmatpush.bf16.msra.mxu1 %v12608_v21  ;;  %v12464_v27 = vor.u32 %v15328_v25, %v12463_v24  ;;  %v15326_v29 = vld [vmem:[#allocation8 + $0xc4] sm:$0xf]  ;;  %v12465_v30 = vld [vmem:[#allocation8 + $0xd0] sm:$0xf0] }
 0x6fc   :  { %5706 = vmatpush.bf16.msra.mxu2 %v12484_v4  ;;  %v12592_v28 = vor.u32 %v15360_v39, %v12591_v26  ;;  %v15358_v33 = vld [vmem:[#allocation8 + $0x1c4] sm:$0xf]  ;;  %v12468_v34 = vor.u32 %v15326_v29, %v12465_v30  ;;  %v12593_v10 = vld [vmem:[#allocation8 + $0x1d0] sm:$0xf0]  ;;  %v12447_v36 = vld [vmem:[#allocation8 + $0xa0] sm:$0xf] }
 0x6fd   :  { %5719 = vmatpush.bf16.msra.mxu3 %v12612_v45  ;;  %v15324_v37 = vld [vmem:[#allocation8 + $0xac] sm:$0xf0]  ;;  %v12596_v40 = vor.u32 %v15358_v33, %v12593_v10  ;;  %v12575_v41 = vld [vmem:[#allocation8 + $0x1a0] sm:$0xf]  ;;  %v15322_v43 = vld [vmem:[#allocation8 + $0xa4] sm:$0xf] }
 0x6fe   :  { %v15356_v42 = vld [vmem:[#allocation8 + $0x1ac] sm:$0xf0]  ;;  %5681 = vmatpush.bf16.msra.mxu0 %v12464_v27  ;;  %v12448_v44 = vor.u32 %v15324_v37, %v12447_v36  ;;  %v12449_v16 = vld [vmem:[#allocation8 + $0xb0] sm:$0xf0]  ;;  %v15354_v47 = vld [vmem:[#allocation8 + $0x1a4] sm:$0xf] }
 0x6ff   :  { %v12577_v31 = vld [vmem:[#allocation8 + $0x1b0] sm:$0xf0]  ;;  %5694 = vmatpush.bf16.msra.mxu1 %v12592_v28  ;;  %v12576_v50 = vor.u32 %v15356_v42, %v12575_v41  ;;  %v12452_v48 = vor.u32 %v15322_v43, %v12449_v16  ;;  %v12431_v5 = vld [vmem:[#allocation8 + $0x80] sm:$0xf]  ;;  %v15320_v49 = vld [vmem:[#allocation8 + $0x8c] sm:$0xf0] }
 0x700   :  { %5707 = vmatpush.bf16.msra.mxu2 %v12468_v34  ;;  %v12559_v51 = vld [vmem:[#allocation8 + $0x180] sm:$0xf]  ;;  %v12580_v52 = vor.u32 %v15354_v47, %v12577_v31  ;;  %v15352_v53 = vld [vmem:[#allocation8 + $0x18c] sm:$0xf0]  ;;  %v15318_v54 = vld [vmem:[#allocation8 + $0x84] sm:$0xf]  ;;  %v12432_v57 = vor.u32 %v15320_v49, %v12431_v5 }
 0x701   :  { %5720 = vmatpush.bf16.msra.mxu3 %v12596_v40  ;;  %v12433_v1 = vld [vmem:[#allocation8 + $0x90] sm:$0xf0]  ;;  %v15350_v55 = vld [vmem:[#allocation8 + $0x184] sm:$0xf]  ;;  %v12560_v58 = vor.u32 %v15352_v53, %v12559_v51  ;;  %v12415_v60 = vld [vmem:[#allocation8 + $0x60] sm:$0xf] }
 0x702   :  { %v12561_v56 = vld [vmem:[#allocation8 + $0x190] sm:$0xf0]  ;;  %5682 = vmatpush.bf16.msra.mxu0 %v12448_v44  ;;  %v12436_v59 = vor.u32 %v15318_v54, %v12433_v1  ;;  %v15316_v61 = vld [vmem:[#allocation8 + $0x6c] sm:$0xf0]  ;;  %v12543_v18 = vld [vmem:[#allocation8 + $0x160] sm:$0xf] }
 0x703   :  { %5695 = vmatpush.bf16.msra.mxu1 %v12576_v50  ;;  %v12564_v62 = vor.u32 %v15350_v55, %v12561_v56  ;;  %v15348_v46 = vld [vmem:[#allocation8 + $0x16c] sm:$0xf0]  ;;  %v15314_v63 = vld [vmem:[#allocation8 + $0x64] sm:$0xf]  ;;  %v12417_v0 = vld [vmem:[#allocation8 + $0x70] sm:$0xf0]  ;;  %v12416_v7 = vor.u32 %v15316_v61, %v12415_v60 }
 0x704   :  { %5708 = vmatpush.bf16.msra.mxu2 %v12452_v48  ;;  %v15346_v35 = vld [vmem:[#allocation8 + $0x164] sm:$0xf]  ;;  %v12545_v6 = vld [vmem:[#allocation8 + $0x170] sm:$0xf0]  ;;  %v12544_v2 = vor.u32 %v15348_v46, %v12543_v18  ;;  %v12420_v9 = vor.u32 %v15314_v63, %v12417_v0  ;;  %v12399_v13 = vld [vmem:[#allocation8 + $0x40] sm:$0xf] }
 0x705   :  { %5721 = vmatpush.bf16.msra.mxu3 %v12580_v52  ;;  %v15312_v14 = vld [vmem:[#allocation8 + $0x4c] sm:$0xf0]  ;;  %v12527_v15 = vld [vmem:[#allocation8 + $0x140] sm:$0xf]  ;;  %v12548_v12 = vor.u32 %v15346_v35, %v12545_v6  ;;  %v15310_v19 = vld [vmem:[#allocation8 + $0x44] sm:$0xf] }
 0x706   :  { %5683 = vmatpush.bf16.msra.mxu0 %v12432_v57  ;;  %v15344_v17 = vld [vmem:[#allocation8 + $0x14c] sm:$0xf0]  ;;  %v12401_v32 = vld [vmem:[#allocation8 + $0x50] sm:$0xf0]  ;;  %v15342_v20 = vld [vmem:[#allocation8 + $0x144] sm:$0xf]  ;;  %v12400_v4 = vor.u32 %v15312_v14, %v12399_v13 }
 0x707   :  { %5696 = vmatpush.bf16.msra.mxu1 %v12560_v58  ;;  %v12529_v21 = vld [vmem:[#allocation8 + $0x150] sm:$0xf0]  ;;  %v12528_v22 = vor.u32 %v15344_v17, %v12527_v15  ;;  %v12404_v23 = vor.u32 %v15310_v19, %v12401_v32  ;;  %v12383_v24 = vld [vmem:[#allocation8 + $0x20] sm:$0xf]  ;;  %v15308_v45 = vld [vmem:[#allocation8 + $0x2c] sm:$0xf0] }
 0x708   :  { %5709 = vmatpush.bf16.msra.mxu2 %v12436_v59  ;;  %v12511_v25 = vld [vmem:[#allocation8 + $0x120] sm:$0xf]  ;;  %v12532_v26 = vor.u32 %v15342_v20, %v12529_v21  ;;  %v15340_v39 = vld [vmem:[#allocation8 + $0x12c] sm:$0xf0]  ;;  %v15306_v27 = vld [vmem:[#allocation8 + $0x24] sm:$0xf]  ;;  %v12384_v33 = vor.u32 %v15308_v45, %v12383_v24 }
 0x709   :  { %5722 = vmatpush.bf16.msra.mxu3 %v12564_v62  ;;  %v12385_v28 = vld [vmem:[#allocation8 + $0x30] sm:$0xf0]  ;;  %v15338_v29 = vld [vmem:[#allocation8 + $0x124] sm:$0xf]  ;;  %v12367_v34 = vld [vmem:[#allocation8] sm:$0xf]  ;;  %v12512_v36 = vor.u32 %v15340_v39, %v12511_v25 }
 0x70a   :  { %5684 = vmatpush.bf16.msra.mxu0 %v12416_v7  ;;  %v12513_v30 = vld [vmem:[#allocation8 + $0x130] sm:$0xf0]  ;;  %v15304_v10 = vld [vmem:[#allocation8 + $0xc] sm:$0xf0]  ;;  %v12388_v37 = vor.u32 %v15306_v27, %v12385_v28  ;;  %v12495_v40 = vld [vmem:[#allocation8 + $0x100] sm:$0xf] }
 0x70b   :  { %5697 = vmatpush.bf16.msra.mxu1 %v12544_v2  ;;  %v15336_v41 = vld [vmem:[#allocation8 + $0x10c] sm:$0xf0]  ;;  %v15302_v42 = vld [vmem:[#allocation8 + $0x4] sm:$0xf]  ;;  %v12516_v43 = vor.u32 %v15338_v29, %v12513_v30  ;;  %v12369_v44 = vld [vmem:[#allocation8 + $0x10] sm:$0xf0]  ;;  %v12368_v5 = vor.u32 %v15304_v10, %v12367_v34 }
 0x70c   :  { %5710 = vmatpush.bf16.msra.mxu2 %v12420_v9  ;;  %v15334_v16 = vld [vmem:[#allocation8 + $0x104] sm:$0xf]  ;;  %v12497_v47 = vld [vmem:[#allocation8 + $0x110] sm:$0xf0]  ;;  %v12487_v31 = vld [vmem:[#allocation8 + $0xe8] sm:$0xf]  ;;  %v12496_v53 = vor.u32 %v15336_v41, %v12495_v40  ;;  %v12372_v54 = vor.u32 %v15302_v42, %v12369_v44 }
 0x70d   :  { %5723 = vmatpush.bf16.msra.mxu3 %v12548_v12  ;;  %v15333_v50 = vld [vmem:[#allocation8 + $0xf4] sm:$0xf0]  ;;  %v12615_v48 = vld [vmem:[#allocation8 + $0x1e8] sm:$0xf]  ;;  %v15331_v51 = vld [vmem:[#allocation8 + $0xec] sm:$0xf]  ;;  %v12500_v56 = vor.u32 %v15334_v16, %v12497_v47 }
 0x70e   :  { %5685 = vmatpush.bf16.msra.mxu0 %v12400_v4  ;;  %v15365_v49 = vld [vmem:[#allocation8 + $0x1f4] sm:$0xf0]  ;;  %v12489_v52 = vld [vmem:[#allocation8 + $0xf8] sm:$0xf0]  ;;  %v15363_v1 = vld [vmem:[#allocation8 + $0x1ec] sm:$0xf]  ;;  %v12488_v57 = vor.u32 %v15333_v50, %v12487_v31 }
 0x70f   :  { %5698 = vmatpush.bf16.msra.mxu1 %v12528_v22  ;;  %v12617_v55 = vld [vmem:[#allocation8 + $0x1f8] sm:$0xf0]  ;;  %v12616_v58 = vor.u32 %v15365_v49, %v12615_v48  ;;  %v12492_v59 = vor.u32 %v15331_v51, %v12489_v52  ;;  %v12471_v60 = vld [vmem:[#allocation8 + $0xc8] sm:$0xf]  ;;  %v15329_v61 = vld [vmem:[#allocation8 + $0xd4] sm:$0xf0] }
 0x710   :  { %5711 = vmatpush.bf16.msra.mxu2 %v12404_v23  ;;  %v12599_v18 = vld [vmem:[#allocation8 + $0x1c8] sm:$0xf]  ;;  %v12620_v62 = vor.u32 %v15363_v1, %v12617_v55  ;;  %v15361_v46 = vld [vmem:[#allocation8 + $0x1d4] sm:$0xf0]  ;;  %v15327_v63 = vld [vmem:[#allocation8 + $0xcc] sm:$0xf]  ;;  %v12472_v7 = vor.u32 %v15329_v61, %v12471_v60 }
 0x711   :  { %5724 = vmatpush.bf16.msra.mxu3 %v12532_v26  ;;  %v12473_v0 = vld [vmem:[#allocation8 + $0xd8] sm:$0xf0]  ;;  %v15359_v35 = vld [vmem:[#allocation8 + $0x1cc] sm:$0xf]  ;;  %v12600_v2 = vor.u32 %v15361_v46, %v12599_v18  ;;  %v12455_v13 = vld [vmem:[#allocation8 + $0xa8] sm:$0xf] }
 0x712   :  { %5686 = vmatpush.bf16.msra.mxu0 %v12384_v33  ;;  %v12601_v6 = vld [vmem:[#allocation8 + $0x1d8] sm:$0xf0]  ;;  %v12476_v9 = vor.u32 %v15327_v63, %v12473_v0  ;;  %v15325_v14 = vld [vmem:[#allocation8 + $0xb4] sm:$0xf0]  ;;  %v12583_v15 = vld [vmem:[#allocation8 + $0x1a8] sm:$0xf] }
 0x713   :  { %5699 = vmatpush.bf16.msra.mxu1 %v12512_v36  ;;  %v12604_v12 = vor.u32 %v15359_v35, %v12601_v6  ;;  %v15357_v17 = vld [vmem:[#allocation8 + $0x1b4] sm:$0xf0]  ;;  %v15323_v19 = vld [vmem:[#allocation8 + $0xac] sm:$0xf]  ;;  %v12457_v32 = vld [vmem:[#allocation8 + $0xb8] sm:$0xf0]  ;;  %v12456_v4 = vor.u32 %v15325_v14, %v12455_v13 }
 0x714   :  { %5712 = vmatpush.bf16.msra.mxu2 %v12388_v37  ;;  %v15355_v20 = vld [vmem:[#allocation8 + $0x1ac] sm:$0xf]  ;;  %v12585_v21 = vld [vmem:[#allocation8 + $0x1b8] sm:$0xf0]  ;;  %v12584_v22 = vor.u32 %v15357_v17, %v12583_v15  ;;  %v12460_v23 = vor.u32 %v15323_v19, %v12457_v32  ;;  %v12439_v24 = vld [vmem:[#allocation8 + $0x88] sm:$0xf] }
 0x715   :  { %5725 = vmatpush.bf16.msra.mxu3 %v12516_v43  ;;  %v15321_v45 = vld [vmem:[#allocation8 + $0x94] sm:$0xf0]  ;;  %v12567_v25 = vld [vmem:[#allocation8 + $0x188] sm:$0xf]  ;;  %v12588_v26 = vor.u32 %v15355_v20, %v12585_v21  ;;  %v15319_v27 = vld [vmem:[#allocation8 + $0x8c] sm:$0xf] }
 0x716   :  { %5687 = vmatpush.bf16.msra.mxu0 %v12368_v5  ;;  %v15353_v39 = vld [vmem:[#allocation8 + $0x194] sm:$0xf0]  ;;  %v12441_v28 = vld [vmem:[#allocation8 + $0x98] sm:$0xf0]  ;;  %v15351_v29 = vld [vmem:[#allocation8 + $0x18c] sm:$0xf]  ;;  %v12440_v33 = vor.u32 %v15321_v45, %v12439_v24 }
 0x717   :  { %5700 = vmatpush.bf16.msra.mxu1 %v12496_v53  ;;  %v12569_v30 = vld [vmem:[#allocation8 + $0x198] sm:$0xf0]  ;;  %v12568_v34 = vor.u32 %v15353_v39, %v12567_v25  ;;  %v12444_v10 = vor.u32 %v15319_v27, %v12441_v28  ;;  %v12423_v36 = vld [vmem:[#allocation8 + $0x68] sm:$0xf]  ;;  %v15317_v37 = vld [vmem:[#allocation8 + $0x74] sm:$0xf0] }
 0x718   :  { %5713 = vmatpush.bf16.msra.mxu2 %v12372_v54  ;;  %v12551_v40 = vld [vmem:[#allocation8 + $0x168] sm:$0xf]  ;;  %v12572_v41 = vor.u32 %v15351_v29, %v12569_v30  ;;  %v15349_v42 = vld [vmem:[#allocation8 + $0x174] sm:$0xf0]  ;;  %v15315_v43 = vld [vmem:[#allocation8 + $0x6c] sm:$0xf]  ;;  %v12424_v31 = vor.u32 %v15317_v37, %v12423_v36 }
 0x719   :  { %5726 = vmatpush.bf16.msra.mxu3 %v12500_v56  ;;  %5688 = vmatmul.bf16.vlgmr.msra.gmra.mxu0 %v16801_v38  ;;  %v12425_v44 = vld [vmem:[#allocation8 + $0x78] sm:$0xf0]  ;;  %v15347_v16 = vld [vmem:[#allocation8 + $0x16c] sm:$0xf]  ;;  %v12552_v50 = vor.u32 %v15349_v42, %v12551_v40  ;;  %v12407_v5 = vld [vmem:[#allocation8 + $0x48] sm:$0xf] }
 0x71a   :  { %5732 = vmatpush.bf16.msrb.mxu0 %v12488_v57  ;;  %5701 = vmatmul.bf16.vlgmr.msra.gmra.mxu1 %v16803_v8  ;;  %v12553_v47 = vld [vmem:[#allocation8 + $0x178] sm:$0xf0]  ;;  %v12428_v48 = vor.u32 %v15315_v43, %v12425_v44  ;;  %v15313_v49 = vld [vmem:[#allocation8 + $0x54] sm:$0xf0]  ;;  %v12535_v51 = vld [vmem:[#allocation8 + $0x148] sm:$0xf] }
 0x71b   :  { %5745 = vmatpush.bf16.msrb.mxu1 %v12616_v58  ;;  %5714 = vmatmul.bf16.vlgmr.msra.gmra.mxu2 %v16801_v38  ;;  %v12556_v52 = vor.u32 %v15347_v16, %v12553_v47  ;;  %v15345_v53 = vld [vmem:[#allocation8 + $0x154] sm:$0xf0]  ;;  %v15311_v54 = vld [vmem:[#allocation8 + $0x4c] sm:$0xf]  ;;  %v12409_v1 = vld [vmem:[#allocation8 + $0x58] sm:$0xf0]  ;;  %v12408_v57 = vor.u32 %v15313_v49, %v12407_v5 }
 0x71c   :  { %5758 = vmatpush.bf16.msrb.mxu2 %v12492_v59  ;;  %5727 = vmatmul.bf16.vlgmr.msra.gmra.mxu3 %v16803_v8  ;;  %v15343_v55 = vld [vmem:[#allocation8 + $0x14c] sm:$0xf]  ;;  %v12537_v56 = vld [vmem:[#allocation8 + $0x158] sm:$0xf0]  ;;  %v12536_v58 = vor.u32 %v15345_v53, %v12535_v51  ;;  %v12412_v59 = vor.u32 %v15311_v54, %v12409_v1  ;;  %v12391_v60 = vld [vmem:[#allocation8 + $0x28] sm:$0xf] }
 0x71d   :  { %5771 = vmatpush.bf16.msrb.mxu3 %v12620_v62  ;;  %v15309_v61 = vld [vmem:[#allocation8 + $0x34] sm:$0xf0]  ;;  %v12519_v18 = vld [vmem:[#allocation8 + $0x128] sm:$0xf]  ;;  %v12540_v62 = vor.u32 %v15343_v55, %v12537_v56  ;;  %v15307_v63 = vld [vmem:[#allocation8 + $0x2c] sm:$0xf] }
 0x71e   :  { %5733 = vmatpush.bf16.msrb.mxu0 %v12472_v7  ;;  %v15341_v46 = vld [vmem:[#allocation8 + $0x134] sm:$0xf0]  ;;  %v12393_v0 = vld [vmem:[#allocation8 + $0x38] sm:$0xf0]  ;;  %v15339_v35 = vld [vmem:[#allocation8 + $0x12c] sm:$0xf]  ;;  %v12392_v7 = vor.u32 %v15309_v61, %v12391_v60 }
 0x71f   :  { %5746 = vmatpush.bf16.msrb.mxu1 %v12600_v2  ;;  %v12521_v6 = vld [vmem:[#allocation8 + $0x138] sm:$0xf0]  ;;  %v12520_v2 = vor.u32 %v15341_v46, %v12519_v18  ;;  %v12375_v13 = vld [vmem:[#allocation8 + $0x8] sm:$0xf]  ;;  %v15305_v14 = vld [vmem:[#allocation8 + $0x14] sm:$0xf0] }
 0x720   :  { %5759 = vmatpush.bf16.msrb.mxu2 %v12476_v9  ;;  %v12396_v9 = vor.u32 %v15307_v63, %v12393_v0  ;;  %v12503_v15 = vld [vmem:[#allocation8 + $0x108] sm:$0xf]  ;;  %v15337_v17 = vld [vmem:[#allocation8 + $0x114] sm:$0xf0]  ;;  %v15303_v19 = vld [vmem:[#allocation8 + $0xc] sm:$0xf] }
 0x721   :  { %5772 = vmatpush.bf16.msrb.mxu3 %v12604_v12  ;;  %v12524_v12 = vor.u32 %v15339_v35, %v12521_v6  ;;  %v12377_v32 = vld [vmem:[#allocation8 + $0x18] sm:$0xf0]  ;;  %v15335_v20 = vld [vmem:[#allocation8 + $0x10c] sm:$0xf] }
 0x722   :  { %5734 = vmatpush.bf16.msrb.mxu0 %v12456_v4  ;;  %v12505_v21 = vld [vmem:[#allocation8 + $0x118] sm:$0xf0]  ;;  %v12376_v4 = vor.u32 %v15305_v14, %v12375_v13 }
 0x723   :  { %5747 = vmatpush.bf16.msrb.mxu1 %v12584_v22  ;;  %v12504_v22 = vor.u32 %v15337_v17, %v12503_v15  ;;  %v12508_v24 = vor.u32 %v15335_v20, %v12505_v21  ;;  %v5350_v45 = vld [vmem:[#allocation26] sm:$0xf] }
 0x724   :  { %5760 = vmatpush.bf16.msrb.mxu2 %v12460_v23  ;;  %v12380_v23 = vor.u32 %v15303_v19, %v12377_v32  ;;  %v5352_v25 = vperm.slane %v5350_v45, 0  ;;  %v5353_v28 = vperm.slane %v5350_v45, 1  ;;  %v5354_v44 = vperm.slane %v5350_v45, 2 }
 0x725   :  { %5773 = vmatpush.bf16.msrb.mxu3 %v12588_v26 }
 0x726   :  { %5735 = vmatpush.bf16.msrb.mxu0 %v12440_v33 }
 0x727   :  { %5748 = vmatpush.bf16.msrb.mxu1 %v12568_v34 }
 0x728   :  { %5761 = vmatpush.bf16.msrb.mxu2 %v12444_v10 }
 0x729   :  { %5774 = vmatpush.bf16.msrb.mxu3 %v12572_v41 }
 0x72a   :  { %5736 = vmatpush.bf16.msrb.mxu0 %v12424_v31 }
 0x72b   :  { %5749 = vmatpush.bf16.msrb.mxu1 %v12552_v50 }
 0x72c   :  { %5762 = vmatpush.bf16.msrb.mxu2 %v12428_v48  ;;  %v5355_v48 = vperm.slane %v5350_v45, 3 }
 0x72d   :  { %5775 = vmatpush.bf16.msrb.mxu3 %v12556_v52 }
 0x72e   :  { %5737 = vmatpush.bf16.msrb.mxu0 %v12408_v57 }
 0x72f   :  { %5750 = vmatpush.bf16.msrb.mxu1 %v12536_v58 }
 0x730   :  { %5763 = vmatpush.bf16.msrb.mxu2 %v12412_v59 }
 0x731   :  { %5776 = vmatpush.bf16.msrb.mxu3 %v12540_v62 }
 0x732   :  { %5738 = vmatpush.bf16.msrb.mxu0 %v12392_v7 }
 0x733   :  { %5751 = vmatpush.bf16.msrb.mxu1 %v12520_v2 }
 0x734   :  { %5764 = vmatpush.bf16.msrb.mxu2 %v12396_v9 }
 0x735   :  { %5777 = vmatpush.bf16.msrb.mxu3 %v12524_v12 }
 0x736   :  { %5739 = vmatpush.bf16.msrb.mxu0 %v12376_v4 }
 0x737   :  { %5752 = vmatpush.bf16.msrb.mxu1 %v12504_v22 }
 0x738   :  { %5765 = vmatpush.bf16.msrb.mxu2 %v12380_v23 }
 0x739   :  { %5778 = vmatpush.bf16.msrb.mxu3 %v12508_v24  ;;  %5740 = vmatmul.bf16.vlgmr.msrb.gmra.mxu0 %v16801_v38 }
 0x73a   :  { %5753 = vmatmul.bf16.vlgmr.msrb.gmra.mxu1 %v16803_v8 }
 0x73b   :  { %5766 = vmatmul.bf16.vlgmr.msrb.gmra.mxu2 %v16801_v38 }
 0x73c   :  { %5779 = vmatmul.bf16.vlgmr.msrb.gmra.mxu3 %v16803_v8 }
 0x796   :  { %v5689_v26 = vpop.f32.mrf.mxu0 }
 0x797   :  { %v5690_v39 = vadd.f32 %v5689_v26, %v5352_v25  ;;  %v5702_v27 = vpop.f32.mrf.mxu1 }
 0x799   :  { %v5703_v29 = vadd.f32 %v5702_v27, %v5690_v39 }
 0x79b   :  { %v5784_v30 = vmax.f32 %v5703_v29, 0.0 }
 0x79d   :  { %v16813_v36 = vpack.c.bf16 %v5784_v30, %v5784_v30 }
 0x79e   :  { %v5715_v33 = vpop.f32.mrf.mxu2  ;;  %v5691_v40 = vpop.f32.mrf.mxu0 }
 0x79f   :  { %v5716_v34 = vadd.f32 %v5715_v33, %v5353_v28  ;;  %v5728_v10 = vpop.f32.mrf.mxu3  ;;  %v5704_v41 = vpop.f32.mrf.mxu1 }
 0x7a1   :  { %v5729_v37 = vadd.f32 %v5728_v10, %v5716_v34 }
 0x7a3   :  { %v5785_v42 = vmax.f32 %v5729_v37, 0.0 }
 0x7a5   :  { %v16815_v38 = vpack.c.bf16 %v5785_v42, %v5785_v42 }
 0x7a6   :  { %v5717_v8 = vpop.f32.mrf.mxu2 }
 0x7a7   :  { %v5730_v43 = vpop.f32.mrf.mxu3 }
 0x7b6   :  { %v5741_v16 = vpop.f32.mrf.mxu0 }
 0x7b7   :  { %v5742_v47 = vadd.f32 %v5741_v16, %v5354_v44  ;;  %v5754_v31 = vpop.f32.mrf.mxu1 }
 0x7b9   :  { %v5755_v50 = vadd.f32 %v5754_v31, %v5742_v47 }
 0x7bb   :  { %v5786_v5 = vmax.f32 %v5755_v50, 0.0 }
 0x7bd   :  { %v16817_v49 = vpack.c.bf16 %v5786_v5, %v5786_v5 }
 0x7be   :  { %v5767_v51 = vpop.f32.mrf.mxu2  ;;  %v5743_v54 = vpop.f32.mrf.mxu0 }
 0x7bf   :  { %v5768_v52 = vadd.f32 %v5767_v51, %v5355_v48  ;;  %v5780_v53 = vpop.f32.mrf.mxu3  ;;  %v5756_v1 = vpop.f32.mrf.mxu1 }
 0x7c1   :  { %v5781_v55 = vadd.f32 %v5780_v53, %v5768_v52 }
 0x7c3   :  { %v5787_v56 = vmax.f32 %v5781_v55, 0.0 }
 0x7c5   :  { %v16819_v57 = vpack.c.bf16 %v5787_v56, %v5787_v56 }
 0x7c6   :  { %v5769_v58 = vpop.f32.mrf.mxu2 }
 0x7c7   :  { %v5782_v59 = vpop.f32.mrf.mxu3 }
 0x7c8   :  { %16456 = dma.done.wait [#allocation11 + $0x7], 32768 }
 0x7c9   :  { %16457 = vsyncadd [#allocation11 + $0x7], 4294934528  ;;  %v12847_v60 = vld [vmem:[#allocation9 + $0x1c0] sm:$0xf] }
 0x7ca   :  { %v15426_v61 = vld [vmem:[#allocation9 + $0x1dc] sm:$0xf0] }
 0x7cb   :  { %v13103_v18 = vld [vmem:[#allocation9 + $0x3c0] sm:$0xf]  ;;  %v12848_v62 = vor.u32 %v15426_v61, %v12847_v60 }
 0x7cc   :  { %v15490_v46 = vld [vmem:[#allocation9 + $0x3dc] sm:$0xf0] }
 0x7cd   :  { %v13359_v63 = vld [vmem:[#allocation9 + $0x5c0] sm:$0xf]  ;;  %v13104_v35 = vor.u32 %v15490_v46, %v13103_v18  ;;  %7348 = vmatpush.bf16.msra.mxu0 %v12848_v62 }
 0x7ce   :  { %v15554_v0 = vld [vmem:[#allocation9 + $0x5dc] sm:$0xf0] }
 0x7cf   :  { %v13360_v6 = vor.u32 %v15554_v0, %v13359_v63  ;;  %v13615_v7 = vld [vmem:[#allocation9 + $0x7c0] sm:$0xf]  ;;  %7361 = vmatpush.bf16.msra.mxu1 %v13104_v35 }
 0x7d0   :  { %v15618_v2 = vld [vmem:[#allocation9 + $0x7dc] sm:$0xf0] }
 0x7d1   :  { %v12815_v9 = vld [vmem:[#allocation9 + $0x180] sm:$0xf]  ;;  %v13616_v13 = vor.u32 %v15618_v2, %v13615_v7  ;;  %7374 = vmatpush.bf16.msra.mxu2 %v13360_v6 }
 0x7d2   :  { %v15418_v14 = vld [vmem:[#allocation9 + $0x19c] sm:$0xf0] }
 0x7d3   :  { %v13071_v15 = vld [vmem:[#allocation9 + $0x380] sm:$0xf]  ;;  %v12816_v17 = vor.u32 %v15418_v14, %v12815_v9  ;;  %7387 = vmatpush.bf16.msra.mxu3 %v13616_v13 }
 0x7d4   :  { %v15482_v12 = vld [vmem:[#allocation9 + $0x39c] sm:$0xf0] }
 0x7d5   :  { %v13072_v19 = vor.u32 %v15482_v12, %v13071_v15  ;;  %v13327_v32 = vld [vmem:[#allocation9 + $0x580] sm:$0xf]  ;;  %7349 = vmatpush.bf16.msra.mxu0 %v12816_v17 }
 0x7d6   :  { %v15546_v20 = vld [vmem:[#allocation9 + $0x59c] sm:$0xf0] }
 0x7d7   :  { %v13583_v21 = vld [vmem:[#allocation9 + $0x780] sm:$0xf]  ;;  %v13328_v4 = vor.u32 %v15546_v20, %v13327_v32  ;;  %7362 = vmatpush.bf16.msra.mxu1 %v13072_v19 }
 0x7d8   :  { %v15610_v22 = vld [vmem:[#allocation9 + $0x79c] sm:$0xf0] }
 0x7d9   :  { %v12783_v23 = vld [vmem:[#allocation9 + $0x140] sm:$0xf]  ;;  %v13584_v45 = vor.u32 %v15610_v22, %v13583_v21  ;;  %7375 = vmatpush.bf16.msra.mxu2 %v13328_v4 }
 0x7da   :  { %v15410_v24 = vld [vmem:[#allocation9 + $0x15c] sm:$0xf0] }
 0x7db   :  { %v13039_v25 = vld [vmem:[#allocation9 + $0x340] sm:$0xf]  ;;  %v12784_v27 = vor.u32 %v15410_v24, %v12783_v23  ;;  %7388 = vmatpush.bf16.msra.mxu3 %v13584_v45 }
 0x7dc   :  { %v15474_v26 = vld [vmem:[#allocation9 + $0x35c] sm:$0xf0] }
 0x7dd   :  { %v13295_v39 = vld [vmem:[#allocation9 + $0x540] sm:$0xf]  ;;  %v13040_v33 = vor.u32 %v15474_v26, %v13039_v25  ;;  %7350 = vmatpush.bf16.msra.mxu0 %v12784_v27 }
 0x7de   :  { %v15538_v28 = vld [vmem:[#allocation9 + $0x55c] sm:$0xf0] }
 0x7df   :  { %v13551_v29 = vld [vmem:[#allocation9 + $0x740] sm:$0xf]  ;;  %v13296_v34 = vor.u32 %v15538_v28, %v13295_v39  ;;  %7363 = vmatpush.bf16.msra.mxu1 %v13040_v33 }
 0x7e0   :  { %v15602_v30 = vld [vmem:[#allocation9 + $0x75c] sm:$0xf0] }
 0x7e1   :  { %v12751_v10 = vld [vmem:[#allocation9 + $0x100] sm:$0xf]  ;;  %v13552_v41 = vor.u32 %v15602_v30, %v13551_v29  ;;  %7376 = vmatpush.bf16.msra.mxu2 %v13296_v34  ;;  %v15422_v34 = vld [vmem:[#allocation9 + $0x1c4] sm:$0xf] }
 0x7e2   :  { %v15402_v37 = vld [vmem:[#allocation9 + $0x11c] sm:$0xf0] }
 0x7e3   :  { %v13007_v40 = vld [vmem:[#allocation9 + $0x300] sm:$0xf]  ;;  %v12752_v47 = vor.u32 %v15402_v37, %v12751_v10  ;;  %7389 = vmatpush.bf16.msra.mxu3 %v13552_v41  ;;  %v12849_v10 = vld [vmem:[#allocation9 + $0x1e0] sm:$0xf0] }
 0x7e4   :  { %v15466_v42 = vld [vmem:[#allocation9 + $0x31c] sm:$0xf0]  ;;  %v15486_v37 = vld [vmem:[#allocation9 + $0x3c4] sm:$0xf] }
 0x7e5   :  { %v13263_v8 = vld [vmem:[#allocation9 + $0x500] sm:$0xf]  ;;  %v13008_v31 = vor.u32 %v15466_v42, %v13007_v40  ;;  %7351 = vmatpush.bf16.msra.mxu0 %v12752_v47  ;;  %v13105_v41 = vld [vmem:[#allocation9 + $0x3e0] sm:$0xf0] }
 0x7e6   :  { %v15530_v43 = vld [vmem:[#allocation9 + $0x51c] sm:$0xf0]  ;;  %v15550_v42 = vld [vmem:[#allocation9 + $0x5c4] sm:$0xf] }
 0x7e7   :  { %v13519_v44 = vld [vmem:[#allocation9 + $0x700] sm:$0xf]  ;;  %v13264_v50 = vor.u32 %v15530_v43, %v13263_v8  ;;  %7364 = vmatpush.bf16.msra.mxu1 %v13008_v31  ;;  %v13361_v8 = vld [vmem:[#allocation9 + $0x5e0] sm:$0xf0] }
 0x7e8   :  { %v15594_v16 = vld [vmem:[#allocation9 + $0x71c] sm:$0xf0]  ;;  %v13617_v47 = vld [vmem:[#allocation9 + $0x7e0] sm:$0xf0] }
 0x7e9   :  { %v12719_v48 = vld [vmem:[#allocation9 + $0xc0] sm:$0xf]  ;;  %v13520_v52 = vor.u32 %v15594_v16, %v13519_v44  ;;  %7377 = vmatpush.bf16.msra.mxu2 %v13264_v50  ;;  %v15614_v16 = vld [vmem:[#allocation9 + $0x7c4] sm:$0xf]  ;;  %v12852_v50 = vor.u32 %v15422_v34, %v12849_v10 }
 0x7ea   :  { %v15394_v5 = vld [vmem:[#allocation9 + $0xdc] sm:$0xf0]  ;;  %v15582_v34 = vld [vmem:[#allocation9 + $0x6c4] sm:$0xf] }
 0x7eb   :  { %v12975_v51 = vld [vmem:[#allocation9 + $0x2c0] sm:$0xf]  ;;  %v12720_v58 = vor.u32 %v15394_v5, %v12719_v48  ;;  %7390 = vmatpush.bf16.msra.mxu3 %v13520_v52  ;;  %v13108_v48 = vor.u32 %v15486_v37, %v13105_v41  ;;  %v13364_v5 = vor.u32 %v15550_v42, %v13361_v8  ;;  %v12817_v52 = vld [vmem:[#allocation9 + $0x1a0] sm:$0xf0] }
 0x7ec   :  { %v15458_v53 = vld [vmem:[#allocation9 + $0x2dc] sm:$0xf0]  ;;  %v13489_v10 = vld [vmem:[#allocation9 + $0x6e0] sm:$0xf0] }
 0x7ed   :  { %v13231_v54 = vld [vmem:[#allocation9 + $0x4c0] sm:$0xf]  ;;  %v12976_v59 = vor.u32 %v15458_v53, %v12975_v51  ;;  %7352 = vmatpush.bf16.msra.mxu0 %v12720_v58  ;;  %v15414_v51 = vld [vmem:[#allocation9 + $0x184] sm:$0xf] }
 0x7ee   :  { %v15522_v1 = vld [vmem:[#allocation9 + $0x4dc] sm:$0xf0]  ;;  %v15478_v53 = vld [vmem:[#allocation9 + $0x384] sm:$0xf] }
 0x7ef   :  { %v13487_v55 = vld [vmem:[#allocation9 + $0x6c0] sm:$0xf]  ;;  %v13232_v60 = vor.u32 %v15522_v1, %v13231_v54  ;;  %7365 = vmatpush.bf16.msra.mxu1 %v12976_v59  ;;  %v13620_v54 = vor.u32 %v15614_v16, %v13617_v47  ;;  %v13073_v1 = vld [vmem:[#allocation9 + $0x3a0] sm:$0xf0] }
 0x7f0   :  { %v15586_v56 = vld [vmem:[#allocation9 + $0x6dc] sm:$0xf0]  ;;  %v15606_v58 = vld [vmem:[#allocation9 + $0x784] sm:$0xf] }
 0x7f1   :  { %v12687_v61 = vld [vmem:[#allocation9 + $0x80] sm:$0xf]  ;;  %v13488_v46 = vor.u32 %v15586_v56, %v13487_v55  ;;  %7378 = vmatpush.bf16.msra.mxu2 %v13232_v60  ;;  %v15542_v55 = vld [vmem:[#allocation9 + $0x584] sm:$0xf]  ;;  %v12820_v60 = vor.u32 %v15414_v51, %v12817_v52 }
 0x7f2   :  { %v15386_v18 = vld [vmem:[#allocation9 + $0x9c] sm:$0xf0]  ;;  %v13329_v56 = vld [vmem:[#allocation9 + $0x5a0] sm:$0xf0] }
 0x7f3   :  { %v12943_v62 = vld [vmem:[#allocation9 + $0x280] sm:$0xf]  ;;  %v12688_v2 = vor.u32 %v15386_v18, %v12687_v61  ;;  %7391 = vmatpush.bf16.msra.mxu3 %v13488_v46  ;;  %v13585_v59 = vld [vmem:[#allocation9 + $0x7a0] sm:$0xf0]  ;;  %v13076_v61 = vor.u32 %v15478_v53, %v13073_v1  ;;  %v13332_v18 = vor.u32 %v15542_v55, %v13329_v56 }
 0x7f4   :  { %v15450_v63 = vld [vmem:[#allocation9 + $0x29c] sm:$0xf0]  ;;  %v12785_v46 = vld [vmem:[#allocation9 + $0x160] sm:$0xf0] }
 0x7f5   :  { %v13199_v0 = vld [vmem:[#allocation9 + $0x480] sm:$0xf]  ;;  %v12944_v9 = vor.u32 %v15450_v63, %v12943_v62  ;;  %7353 = vmatpush.bf16.msra.mxu0 %v12688_v2  ;;  %v15406_v62 = vld [vmem:[#allocation9 + $0x144] sm:$0xf] }
 0x7f6   :  { %v15514_v35 = vld [vmem:[#allocation9 + $0x49c] sm:$0xf0]  ;;  %v15470_v63 = vld [vmem:[#allocation9 + $0x344] sm:$0xf] }
 0x7f7   :  { %v13455_v6 = vld [vmem:[#allocation9 + $0x680] sm:$0xf]  ;;  %v13200_v13 = vor.u32 %v15514_v35, %v13199_v0  ;;  %7366 = vmatpush.bf16.msra.mxu1 %v12944_v9  ;;  %v13588_v0 = vor.u32 %v15606_v58, %v13585_v59  ;;  %v13041_v35 = vld [vmem:[#allocation9 + $0x360] sm:$0xf0] }
 0x7f8   :  { %v15578_v7 = vld [vmem:[#allocation9 + $0x69c] sm:$0xf0]  ;;  %v15598_v2 = vld [vmem:[#allocation9 + $0x744] sm:$0xf] }
 0x7f9   :  { %v12655_v14 = vld [vmem:[#allocation9 + $0x40] sm:$0xf]  ;;  %v13456_v17 = vor.u32 %v15578_v7, %v13455_v6  ;;  %7379 = vmatpush.bf16.msra.mxu2 %v13200_v13  ;;  %v15534_v6 = vld [vmem:[#allocation9 + $0x544] sm:$0xf]  ;;  %v12788_v13 = vor.u32 %v15406_v62, %v12785_v46 }
 0x7fa   :  { %v15378_v15 = vld [vmem:[#allocation9 + $0x5c] sm:$0xf0]  ;;  %v13297_v7 = vld [vmem:[#allocation9 + $0x560] sm:$0xf0] }
 0x7fb   :  { %v12911_v12 = vld [vmem:[#allocation9 + $0x240] sm:$0xf]  ;;  %v12656_v22 = vor.u32 %v15378_v15, %v12655_v14  ;;  %7392 = vmatpush.bf16.msra.mxu3 %v13456_v17  ;;  %v13553_v9 = vld [vmem:[#allocation9 + $0x760] sm:$0xf0]  ;;  %v13044_v14 = vor.u32 %v15470_v63, %v13041_v35  ;;  %v13300_v15 = vor.u32 %v15534_v6, %v13297_v7 }
 0x7fc   :  { %v15442_v19 = vld [vmem:[#allocation9 + $0x25c] sm:$0xf0]  ;;  %v12753_v17 = vld [vmem:[#allocation9 + $0x120] sm:$0xf0] }
 0x7fd   :  { %v13167_v32 = vld [vmem:[#allocation9 + $0x440] sm:$0xf]  ;;  %v12912_v45 = vor.u32 %v15442_v19, %v12911_v12  ;;  %7354 = vmatpush.bf16.msra.mxu0 %v12656_v22  ;;  %v15398_v12 = vld [vmem:[#allocation9 + $0x104] sm:$0xf] }
 0x7fe   :  { %v15506_v20 = vld [vmem:[#allocation9 + $0x45c] sm:$0xf0]  ;;  %v15462_v19 = vld [vmem:[#allocation9 + $0x304] sm:$0xf] }
 0x7ff   :  { %v13423_v21 = vld [vmem:[#allocation9 + $0x640] sm:$0xf]  ;;  %v13168_v25 = vor.u32 %v15506_v20, %v13167_v32  ;;  %7367 = vmatpush.bf16.msra.mxu1 %v12912_v45  ;;  %v13556_v32 = vor.u32 %v15598_v2, %v13553_v9  ;;  %v13009_v20 = vld [vmem:[#allocation9 + $0x320] sm:$0xf0] }
 0x800   :  { %v15570_v4 = vld [vmem:[#allocation9 + $0x65c] sm:$0xf0]  ;;  %v15590_v22 = vld [vmem:[#allocation9 + $0x704] sm:$0xf]  ;;  %v13012_v45 = vor.u32 %v15462_v19, %v13009_v20  ;;  %v13367_v20 = vld [vmem:[#allocation9 + $0x5c8] sm:$0xf] }
 0x801   :  { %v12623_v23 = vld [vmem:[#allocation9] sm:$0xf]  ;;  %v13424_v28 = vor.u32 %v15570_v4, %v13423_v21  ;;  %7380 = vmatpush.bf16.msra.mxu2 %v13168_v25  ;;  %v15526_v21 = vld [vmem:[#allocation9 + $0x504] sm:$0xf] }
 0x802   :  { %v15370_v24 = vld [vmem:[#allocation9 + $0x1c] sm:$0xf0]  ;;  %v13265_v4 = vld [vmem:[#allocation9 + $0x520] sm:$0xf0] }
 0x803   :  { %v12879_v26 = vld [vmem:[#allocation9 + $0x200] sm:$0xf]  ;;  %v12624_v40 = vor.u32 %v15370_v24, %v12623_v23  ;;  %7393 = vmatpush.bf16.msra.mxu3 %v13424_v28  ;;  %v13521_v23 = vld [vmem:[#allocation9 + $0x720] sm:$0xf0]  ;;  %v12756_v24 = vor.u32 %v15398_v12, %v12753_v17  ;;  %v13268_v25 = vor.u32 %v15526_v21, %v13265_v4  ;;  %v15427_v12 = vld [vmem:[#allocation9 + $0x1e4] sm:$0xf0] }
 0x804   :  { %v15434_v39 = vld [vmem:[#allocation9 + $0x21c] sm:$0xf0]  ;;  %v13524_v28 = vor.u32 %v15590_v22, %v13521_v23  ;;  %v15382_v42 = vld [vmem:[#allocation9 + $0x84] sm:$0xf]  ;;  %v13111_v17 = vld [vmem:[#allocation9 + $0x3c8] sm:$0xf] }
 0x805   :  { %v13135_v27 = vld [vmem:[#allocation9 + $0x400] sm:$0xf]  ;;  %v12880_v43 = vor.u32 %v15434_v39, %v12879_v26  ;;  %7355 = vmatpush.bf16.msra.mxu0 %v12624_v40  ;;  %v15390_v26 = vld [vmem:[#allocation9 + $0xc4] sm:$0xf]  ;;  %v15555_v21 = vld [vmem:[#allocation9 + $0x5e4] sm:$0xf0] }
 0x806   :  { %v15498_v29 = vld [vmem:[#allocation9 + $0x41c] sm:$0xf0]  ;;  %v12721_v39 = vld [vmem:[#allocation9 + $0xe0] sm:$0xf0]  ;;  %v13623_v23 = vld [vmem:[#allocation9 + $0x7c8] sm:$0xf] }
 0x807   :  { %v13391_v30 = vld [vmem:[#allocation9 + $0x600] sm:$0xf]  ;;  %v13136_v44 = vor.u32 %v15498_v29, %v13135_v27  ;;  %7368 = vmatpush.bf16.msra.mxu1 %v12880_v43  ;;  %v15454_v27 = vld [vmem:[#allocation9 + $0x2c4] sm:$0xf]  ;;  %v12724_v37 = vor.u32 %v15390_v26, %v12721_v39  ;;  %v13368_v39 = vor.u32 %v15555_v21, %v13367_v20  ;;  %v12695_v20 = vld [vmem:[#allocation9 + $0x88] sm:$0xf] }
 0x808   :  { %v15562_v33 = vld [vmem:[#allocation9 + $0x61c] sm:$0xf0]  ;;  %7356 = vmatmul.bf16.vlgmr.msra.gmra.mxu0 %v16813_v36  ;;  %v12977_v29 = vld [vmem:[#allocation9 + $0x2e0] sm:$0xf0]  ;;  %v15387_v21 = vld [vmem:[#allocation9 + $0xa4] sm:$0xf0] }
 0x809   :  { %v13392_v31 = vor.u32 %v15562_v33, %v13391_v30  ;;  %7381 = vmatpush.bf16.msra.mxu2 %v13136_v44  ;;  %7400 = vmatpush.bf16.msrb.mxu0 %v12852_v50  ;;  %v15518_v30 = vld [vmem:[#allocation9 + $0x4c4] sm:$0xf]  ;;  %v12980_v40 = vor.u32 %v15454_v27, %v12977_v29  ;;  %v13492_v44 = vor.u32 %v15582_v34, %v13489_v10  ;;  %v12823_v27 = vld [vmem:[#allocation9 + $0x188] sm:$0xf] }
 0x80a   :  { %7369 = vmatmul.bf16.vlgmr.msra.gmra.mxu1 %v16815_v38  ;;  %v13233_v33 = vld [vmem:[#allocation9 + $0x4e0] sm:$0xf0]  ;;  %v13079_v29 = vld [vmem:[#allocation9 + $0x388] sm:$0xf] }
 0x80b   :  { %7394 = vmatpush.bf16.msra.mxu3 %v13392_v31  ;;  %7413 = vmatpush.bf16.msrb.mxu1 %v13108_v48  ;;  %v13236_v41 = vor.u32 %v15518_v30, %v13233_v33  ;;  %v12689_v8 = vld [vmem:[#allocation9 + $0xa0] sm:$0xf0]  ;;  %v15483_v33 = vld [vmem:[#allocation9 + $0x3a4] sm:$0xf0] }
 0x80c   :  { %7382 = vmatmul.bf16.vlgmr.msra.gmra.mxu2 %v16817_v49  ;;  %v15446_v43 = vld [vmem:[#allocation9 + $0x284] sm:$0xf]  ;;  %v13335_v34 = vld [vmem:[#allocation9 + $0x588] sm:$0xf] }
 0x80d   :  { %7426 = vmatpush.bf16.msrb.mxu2 %v13364_v5  ;;  %7401 = vmatpush.bf16.msrb.mxu0 %v12820_v60  ;;  %v12945_v16 = vld [vmem:[#allocation9 + $0x2a0] sm:$0xf0]  ;;  %v12692_v5 = vor.u32 %v15382_v42, %v12689_v8  ;;  %v15547_v10 = vld [vmem:[#allocation9 + $0x5a4] sm:$0xf0]  ;;  %v13080_v42 = vor.u32 %v15483_v33, %v13079_v29 }
 0x80e   :  { %7395 = vmatmul.bf16.vlgmr.msra.gmra.mxu3 %v16819_v57  ;;  %v15510_v47 = vld [vmem:[#allocation9 + $0x484] sm:$0xf]  ;;  %v12948_v51 = vor.u32 %v15446_v43, %v12945_v16  ;;  %v13336_v8 = vor.u32 %v15547_v10, %v13335_v34  ;;  %v12791_v43 = vld [vmem:[#allocation9 + $0x148] sm:$0xf] }
 0x80f   :  { %7439 = vmatpush.bf16.msrb.mxu3 %v13620_v54  ;;  %7414 = vmatpush.bf16.msrb.mxu1 %v13076_v61  ;;  %v13201_v31 = vld [vmem:[#allocation9 + $0x4a0] sm:$0xf0]  ;;  %v13047_v16 = vld [vmem:[#allocation9 + $0x348] sm:$0xf] }
 0x810   :  { %v15574_v50 = vld [vmem:[#allocation9 + $0x684] sm:$0xf]  ;;  %v13204_v52 = vor.u32 %v15510_v47, %v13201_v31  ;;  %v15475_v31 = vld [vmem:[#allocation9 + $0x364] sm:$0xf0] }
 0x811   :  { %7427 = vmatpush.bf16.msrb.mxu2 %v13332_v18  ;;  %7402 = vmatpush.bf16.msrb.mxu0 %v12788_v13  ;;  %v13457_v48 = vld [vmem:[#allocation9 + $0x6a0] sm:$0xf0]  ;;  %v12663_v29 = vld [vmem:[#allocation9 + $0x48] sm:$0xf] }
 0x812   :  { %v15374_v53 = vld [vmem:[#allocation9 + $0x44] sm:$0xf]  ;;  %v13460_v55 = vor.u32 %v15574_v50, %v13457_v48  ;;  %v13303_v50 = vld [vmem:[#allocation9 + $0x548] sm:$0xf] }
 0x813   :  { %7440 = vmatpush.bf16.msrb.mxu3 %v13588_v0  ;;  %7415 = vmatpush.bf16.msrb.mxu1 %v13044_v14  ;;  %v12657_v54 = vld [vmem:[#allocation9 + $0x60] sm:$0xf0]  ;;  %v15539_v48 = vld [vmem:[#allocation9 + $0x564] sm:$0xf0] }
 0x814   :  { %v15438_v1 = vld [vmem:[#allocation9 + $0x244] sm:$0xf]  ;;  %v12660_v18 = vor.u32 %v15374_v53, %v12657_v54  ;;  %v13048_v53 = vor.u32 %v15475_v31, %v13047_v16  ;;  %v13304_v54 = vor.u32 %v15539_v48, %v13303_v50  ;;  %v12919_v33 = vld [vmem:[#allocation9 + $0x248] sm:$0xf] }
 0x815   :  { %7428 = vmatpush.bf16.msrb.mxu2 %v13300_v15  ;;  %7403 = vmatpush.bf16.msrb.mxu0 %v12756_v24  ;;  %v12913_v56 = vld [vmem:[#allocation9 + $0x260] sm:$0xf0]  ;;  %v12855_v15 = vld [vmem:[#allocation9 + $0x1c8] sm:$0xf] }
 0x816   :  { %v15502_v58 = vld [vmem:[#allocation9 + $0x444] sm:$0xf]  ;;  %v12916_v63 = vor.u32 %v15438_v1, %v12913_v56  ;;  %v15619_v24 = vld [vmem:[#allocation9 + $0x7e4] sm:$0xf0] }
 0x817   :  { %7441 = vmatpush.bf16.msrb.mxu3 %v13556_v32  ;;  %7416 = vmatpush.bf16.msrb.mxu1 %v13012_v45  ;;  %v13169_v59 = vld [vmem:[#allocation9 + $0x460] sm:$0xf0]  ;;  %v15491_v32 = vld [vmem:[#allocation9 + $0x3e4] sm:$0xf0]  ;;  %v13624_v30 = vor.u32 %v15619_v24, %v13623_v23 }
 0x818   :  { %v15566_v60 = vld [vmem:[#allocation9 + $0x644] sm:$0xf]  ;;  %v13172_v0 = vor.u32 %v15502_v58, %v13169_v59  ;;  %v13112_v26 = vor.u32 %v15491_v32, %v13111_v17  ;;  %v12759_v1 = vld [vmem:[#allocation9 + $0x108] sm:$0xf] }
 0x819   :  { %7429 = vmatpush.bf16.msrb.mxu2 %v13268_v25  ;;  %7404 = vmatpush.bf16.msrb.mxu0 %v12724_v37  ;;  %v13425_v61 = vld [vmem:[#allocation9 + $0x660] sm:$0xf0]  ;;  %v12856_v25 = vor.u32 %v15427_v12, %v12855_v15  ;;  %v13591_v37 = vld [vmem:[#allocation9 + $0x788] sm:$0xf] }
 0x81a   :  { %v15366_v62 = vld [vmem:[#allocation9 + $0x4] sm:$0xf]  ;;  %v13428_v2 = vor.u32 %v15566_v60, %v13425_v61  ;;  %v13015_v56 = vld [vmem:[#allocation9 + $0x308] sm:$0xf] }
 0x81b   :  { %7442 = vmatpush.bf16.msrb.mxu3 %v13524_v28  ;;  %7417 = vmatpush.bf16.msrb.mxu1 %v12980_v40  ;;  %v12625_v46 = vld [vmem:[#allocation9 + $0x20] sm:$0xf0]  ;;  %v15419_v28 = vld [vmem:[#allocation9 + $0x1a4] sm:$0xf0] }
 0x81c   :  { %v15430_v35 = vld [vmem:[#allocation9 + $0x204] sm:$0xf]  ;;  %v12628_v19 = vor.u32 %v15366_v62, %v12625_v46  ;;  %v15611_v40 = vld [vmem:[#allocation9 + $0x7a4] sm:$0xf0] }
 0x81d   :  { %7430 = vmatpush.bf16.msrb.mxu2 %v13236_v41  ;;  %7405 = vmatpush.bf16.msrb.mxu0 %v12692_v5  ;;  %v12881_v6 = vld [vmem:[#allocation9 + $0x220] sm:$0xf0]  ;;  %v12824_v41 = vor.u32 %v15419_v28, %v12823_v27  ;;  %v13592_v47 = vor.u32 %v15611_v40, %v13591_v37  ;;  %v13559_v5 = vld [vmem:[#allocation9 + $0x748] sm:$0xf] }
 0x81e   :  { %v15494_v7 = vld [vmem:[#allocation9 + $0x404] sm:$0xf]  ;;  %v12884_v4 = vor.u32 %v15430_v35, %v12881_v6  ;;  %v15467_v59 = vld [vmem:[#allocation9 + $0x324] sm:$0xf0] }
 0x81f   :  { %7443 = vmatpush.bf16.msrb.mxu3 %v13492_v44  ;;  %7418 = vmatpush.bf16.msrb.mxu1 %v12948_v51  ;;  %v13137_v9 = vld [vmem:[#allocation9 + $0x420] sm:$0xf0]  ;;  %v15411_v44 = vld [vmem:[#allocation9 + $0x164] sm:$0xf0] }
 0x820   :  { %v15558_v13 = vld [vmem:[#allocation9 + $0x604] sm:$0xf]  ;;  %v13140_v22 = vor.u32 %v15494_v7, %v13137_v9  ;;  %v15603_v51 = vld [vmem:[#allocation9 + $0x764] sm:$0xf0] }
 0x821   :  { %7431 = vmatpush.bf16.msrb.mxu2 %v13204_v52  ;;  %v13393_v14 = vld [vmem:[#allocation9 + $0x620] sm:$0xf0]  ;;  %7406 = vmatpush.bf16.msrb.mxu0 %v12660_v18  ;;  %v12792_v52 = vor.u32 %v15411_v44, %v12791_v43  ;;  %v13560_v58 = vor.u32 %v15603_v51, %v13559_v5  ;;  %v13271_v60 = vld [vmem:[#allocation9 + $0x508] sm:$0xf] }
 0x822   :  { %v13396_v45 = vor.u32 %v15558_v13, %v13393_v14  ;;  %v15531_v61 = vld [vmem:[#allocation9 + $0x524] sm:$0xf0] }
 0x823   :  { %7444 = vmatpush.bf16.msrb.mxu3 %v13460_v55  ;;  %7419 = vmatpush.bf16.msrb.mxu1 %v12916_v63  ;;  %v15403_v55 = vld [vmem:[#allocation9 + $0x124] sm:$0xf0]  ;;  %v13016_v63 = vor.u32 %v15467_v59, %v13015_v56  ;;  %v15551_v59 = vld [vmem:[#allocation9 + $0x5cc] sm:$0xf] }
 0x824   :  { %v13527_v18 = vld [vmem:[#allocation9 + $0x708] sm:$0xf]  ;;  %v12760_v46 = vor.u32 %v15403_v55, %v12759_v1  ;;  %v12857_v1 = vld [vmem:[#allocation9 + $0x1e8] sm:$0xf0] }
 0x825   :  { %7432 = vmatpush.bf16.msrb.mxu2 %v13172_v0  ;;  %7407 = vmatpush.bf16.msrb.mxu0 %v12628_v19  ;;  %v15595_v62 = vld [vmem:[#allocation9 + $0x724] sm:$0xf0]  ;;  %v13272_v0 = vor.u32 %v15531_v61, %v13271_v60  ;;  %v15487_v55 = vld [vmem:[#allocation9 + $0x3cc] sm:$0xf] }
 0x826   :  { %v12727_v35 = vld [vmem:[#allocation9 + $0xc8] sm:$0xf]  ;;  %v13369_v60 = vld [vmem:[#allocation9 + $0x5e8] sm:$0xf0] }
 0x827   :  { %7445 = vmatpush.bf16.msrb.mxu3 %v13428_v2  ;;  %7420 = vmatpush.bf16.msrb.mxu1 %v12884_v4  ;;  %v15395_v6 = vld [vmem:[#allocation9 + $0xe4] sm:$0xf0]  ;;  %v13528_v2 = vor.u32 %v15595_v62, %v13527_v18  ;;  %v15615_v62 = vld [vmem:[#allocation9 + $0x7cc] sm:$0xf] }
 0x828   :  { %7408 = vmatmul.bf16.vlgmr.msrb.gmra.mxu0 %v16813_v36  ;;  %v12983_v7 = vld [vmem:[#allocation9 + $0x2c8] sm:$0xf]  ;;  %v12728_v17 = vor.u32 %v15395_v6, %v12727_v35  ;;  %v13372_v6 = vor.u32 %v15551_v59, %v13369_v60  ;;  %v15383_v59 = vld [vmem:[#allocation9 + $0x8c] sm:$0xf] }
 0x829   :  { %7433 = vmatpush.bf16.msrb.mxu2 %v13140_v22  ;;  %7452 = vmatpush.bf16.msra.mxu0 %v12856_v25  ;;  %v15459_v9 = vld [vmem:[#allocation9 + $0x2e4] sm:$0xf0]  ;;  %v12697_v60 = vld [vmem:[#allocation9 + $0xa8] sm:$0xf0] }
 0x82a   :  { %7421 = vmatmul.bf16.vlgmr.msrb.gmra.mxu1 %v16815_v38  ;;  %v13239_v13 = vld [vmem:[#allocation9 + $0x4c8] sm:$0xf]  ;;  %v12984_v19 = vor.u32 %v15459_v9, %v12983_v7  ;;  %v15415_v7 = vld [vmem:[#allocation9 + $0x18c] sm:$0xf] }
 0x82b   :  { %7446 = vmatpush.bf16.msrb.mxu3 %v13396_v45  ;;  %7465 = vmatpush.bf16.msra.mxu1 %v13112_v26  ;;  %v15523_v14 = vld [vmem:[#allocation9 + $0x4e4] sm:$0xf0]  ;;  %v15479_v9 = vld [vmem:[#allocation9 + $0x38c] sm:$0xf] }
 0x82c   :  { %7434 = vmatmul.bf16.vlgmr.msrb.gmra.mxu2 %v16817_v49  ;;  %v13495_v15 = vld [vmem:[#allocation9 + $0x6c8] sm:$0xf]  ;;  %v13240_v32 = vor.u32 %v15523_v14, %v13239_v13  ;;  %v13081_v14 = vld [vmem:[#allocation9 + $0x3a8] sm:$0xf0] }
 0x82d   :  { %7478 = vmatpush.bf16.msra.mxu2 %v13368_v39  ;;  %7453 = vmatpush.bf16.msra.mxu0 %v12824_v41  ;;  %v15587_v12 = vld [vmem:[#allocation9 + $0x6e4] sm:$0xf0]  ;;  %v12696_v39 = vor.u32 %v15387_v21, %v12695_v20  ;;  %v13084_v20 = vor.u32 %v15479_v9, %v13081_v14  ;;  %v15375_v9 = vld [vmem:[#allocation9 + $0x4c] sm:$0xf] }
 0x82e   :  { %7447 = vmatmul.bf16.vlgmr.msrb.gmra.mxu3 %v16819_v57  ;;  %v12951_v4 = vld [vmem:[#allocation9 + $0x288] sm:$0xf]  ;;  %v13496_v22 = vor.u32 %v15587_v12, %v13495_v15  ;;  %v15543_v15 = vld [vmem:[#allocation9 + $0x58c] sm:$0xf] }
 0x82f   :  { %7491 = vmatpush.bf16.msra.mxu3 %v13624_v30  ;;  %7466 = vmatpush.bf16.msra.mxu1 %v13080_v42  ;;  %v15451_v23 = vld [vmem:[#allocation9 + $0x2a4] sm:$0xf0]  ;;  %v13337_v12 = vld [vmem:[#allocation9 + $0x5a8] sm:$0xf0] }
 0x830   :  { %v13207_v24 = vld [vmem:[#allocation9 + $0x488] sm:$0xf]  ;;  %v12952_v27 = vor.u32 %v15451_v23, %v12951_v4  ;;  %v13340_v21 = vor.u32 %v15543_v15, %v13337_v12  ;;  %v15407_v4 = vld [vmem:[#allocation9 + $0x14c] sm:$0xf] }
 0x831   :  { %7479 = vmatpush.bf16.msra.mxu2 %v13336_v8  ;;  %7454 = vmatpush.bf16.msra.mxu0 %v12792_v52  ;;  %v15515_v45 = vld [vmem:[#allocation9 + $0x4a4] sm:$0xf0]  ;;  %v15471_v23 = vld [vmem:[#allocation9 + $0x34c] sm:$0xf] }
 0x832   :  { %v13463_v25 = vld [vmem:[#allocation9 + $0x688] sm:$0xf]  ;;  %v13208_v28 = vor.u32 %v15515_v45, %v13207_v24  ;;  %v13049_v45 = vld [vmem:[#allocation9 + $0x368] sm:$0xf0] }
 0x833   :  { %7492 = vmatpush.bf16.msra.mxu3 %v13592_v47  ;;  %7467 = vmatpush.bf16.msra.mxu1 %v13048_v53  ;;  %v15579_v26 = vld [vmem:[#allocation9 + $0x6a4] sm:$0xf0]  ;;  %v15439_v14 = vld [vmem:[#allocation9 + $0x24c] sm:$0xf] }
 0x834   :  { %v15379_v30 = vld [vmem:[#allocation9 + $0x64] sm:$0xf0]  ;;  %v13464_v34 = vor.u32 %v15579_v26, %v13463_v25  ;;  %v15535_v25 = vld [vmem:[#allocation9 + $0x54c] sm:$0xf] }
 0x835   :  { %7480 = vmatpush.bf16.msra.mxu2 %v13304_v54  ;;  %7455 = vmatpush.bf16.msra.mxu0 %v12760_v46  ;;  %v15443_v10 = vld [vmem:[#allocation9 + $0x264] sm:$0xf0]  ;;  %v12664_v8 = vor.u32 %v15379_v30, %v12663_v29  ;;  %v15423_v54 = vld [vmem:[#allocation9 + $0x1cc] sm:$0xf]  ;;  %v13052_v29 = vor.u32 %v15471_v23, %v13049_v45 }
 0x836   :  { %v13175_v37 = vld [vmem:[#allocation9 + $0x448] sm:$0xf]  ;;  %v12920_v16 = vor.u32 %v15443_v10, %v12919_v33  ;;  %v13625_v46 = vld [vmem:[#allocation9 + $0x7e8] sm:$0xf0] }
 0x837   :  { %7493 = vmatpush.bf16.msra.mxu3 %v13560_v58  ;;  %7468 = vmatpush.bf16.msra.mxu1 %v13016_v63  ;;  %v15507_v40 = vld [vmem:[#allocation9 + $0x464] sm:$0xf0]  ;;  %v13113_v58 = vld [vmem:[#allocation9 + $0x3e8] sm:$0xf0]  ;;  %v13628_v13 = vor.u32 %v15615_v62, %v13625_v46 }
 0x838   :  { %v13431_v41 = vld [vmem:[#allocation9 + $0x648] sm:$0xf]  ;;  %v13176_v47 = vor.u32 %v15507_v40, %v13175_v37  ;;  %v13116_v35 = vor.u32 %v15487_v55, %v13113_v58  ;;  %v13305_v26 = vld [vmem:[#allocation9 + $0x568] sm:$0xf0] }
 0x839   :  { %7481 = vmatpush.bf16.msra.mxu2 %v13272_v0  ;;  %7456 = vmatpush.bf16.msra.mxu0 %v12728_v17  ;;  %v15571_v42 = vld [vmem:[#allocation9 + $0x664] sm:$0xf0]  ;;  %v12860_v0 = vor.u32 %v15423_v54, %v12857_v1  ;;  %v15607_v17 = vld [vmem:[#allocation9 + $0x78c] sm:$0xf]  ;;  %v13308_v30 = vor.u32 %v15535_v25, %v13305_v26 }
 0x83a   :  { %v12631_v43 = vld [vmem:[#allocation9 + $0x8] sm:$0xf]  ;;  %v13432_v5 = vor.u32 %v15571_v42, %v13431_v41  ;;  %v15399_v33 = vld [vmem:[#allocation9 + $0x10c] sm:$0xf] }
 0x83b   :  { %7494 = vmatpush.bf16.msra.mxu3 %v13528_v2  ;;  %7469 = vmatpush.bf16.msra.mxu1 %v12984_v19  ;;  %v15371_v44 = vld [vmem:[#allocation9 + $0x24] sm:$0xf0]  ;;  %v12825_v2 = vld [vmem:[#allocation9 + $0x1a8] sm:$0xf0] }
 0x83c   :  { %v12887_v31 = vld [vmem:[#allocation9 + $0x208] sm:$0xf]  ;;  %v12632_v56 = vor.u32 %v15371_v44, %v12631_v43  ;;  %v13593_v19 = vld [vmem:[#allocation9 + $0x7a8] sm:$0xf0] }
 0x83d   :  { %7482 = vmatpush.bf16.msra.mxu2 %v13240_v32  ;;  %7457 = vmatpush.bf16.msra.mxu0 %v12696_v39  ;;  %v15435_v50 = vld [vmem:[#allocation9 + $0x224] sm:$0xf0]  ;;  %v12828_v32 = vor.u32 %v15415_v7, %v12825_v2  ;;  %v13596_v24 = vor.u32 %v15607_v17, %v13593_v19  ;;  %v15599_v39 = vld [vmem:[#allocation9 + $0x74c] sm:$0xf] }
 0x83e   :  { %v13143_v48 = vld [vmem:[#allocation9 + $0x408] sm:$0xf]  ;;  %v12888_v61 = vor.u32 %v15435_v50, %v12887_v31  ;;  %v15463_v10 = vld [vmem:[#allocation9 + $0x30c] sm:$0xf] }
 0x83f   :  { %7495 = vmatpush.bf16.msra.mxu3 %v13496_v22  ;;  %7470 = vmatpush.bf16.msra.mxu1 %v12952_v27  ;;  %v15499_v51 = vld [vmem:[#allocation9 + $0x424] sm:$0xf0]  ;;  %v12793_v22 = vld [vmem:[#allocation9 + $0x168] sm:$0xf0] }
 0x840   :  { %v13399_v52 = vld [vmem:[#allocation9 + $0x608] sm:$0xf]  ;;  %v13144_v18 = vor.u32 %v15499_v51, %v13143_v48  ;;  %v13561_v27 = vld [vmem:[#allocation9 + $0x768] sm:$0xf0] }
 0x841   :  { %7483 = vmatpush.bf16.msra.mxu2 %v13208_v28  ;;  %v15563_v53 = vld [vmem:[#allocation9 + $0x624] sm:$0xf0]  ;;  %7458 = vmatpush.bf16.msra.mxu0 %v12664_v8  ;;  %v12796_v28 = vor.u32 %v15407_v4, %v12793_v22  ;;  %v13564_v37 = vor.u32 %v15599_v39, %v13561_v27  ;;  %v13017_v40 = vld [vmem:[#allocation9 + $0x328] sm:$0xf0] }
 0x842   :  { %v13400_v63 = vor.u32 %v15563_v53, %v13399_v52  ;;  %v15527_v41 = vld [vmem:[#allocation9 + $0x50c] sm:$0xf] }
 0x843   :  { %7496 = vmatpush.bf16.msra.mxu3 %v13464_v34  ;;  %7471 = vmatpush.bf16.msra.mxu1 %v12920_v16  ;;  %v12761_v34 = vld [vmem:[#allocation9 + $0x128] sm:$0xf0]  ;;  %v13020_v16 = vor.u32 %v15463_v10, %v13017_v40  ;;  %v13375_v40 = vld [vmem:[#allocation9 + $0x5d0] sm:$0xf] }
 0x844   :  { %v13273_v42 = vld [vmem:[#allocation9 + $0x528] sm:$0xf0]  ;;  %v12764_v44 = vor.u32 %v15399_v33, %v12761_v34  ;;  %v15428_v33 = vld [vmem:[#allocation9 + $0x1ec] sm:$0xf0] }
 0x845   :  { %7484 = vmatpush.bf16.msra.mxu2 %v13176_v47  ;;  %7459 = vmatpush.bf16.msra.mxu0 %v12632_v56  ;;  %v15591_v8 = vld [vmem:[#allocation9 + $0x70c] sm:$0xf]  ;;  %v13276_v47 = vor.u32 %v15527_v41, %v13273_v42  ;;  %v13119_v34 = vld [vmem:[#allocation9 + $0x3d0] sm:$0xf] }
 0x846   :  { %v13529_v43 = vld [vmem:[#allocation9 + $0x728] sm:$0xf0]  ;;  %v15556_v41 = vld [vmem:[#allocation9 + $0x5ec] sm:$0xf0] }
 0x847   :  { %7497 = vmatpush.bf16.msra.mxu3 %v13432_v5  ;;  %7472 = vmatpush.bf16.msra.mxu1 %v12888_v61  ;;  %v15391_v31 = vld [vmem:[#allocation9 + $0xcc] sm:$0xf]  ;;  %v13532_v5 = vor.u32 %v15591_v8, %v13529_v43  ;;  %v13631_v43 = vld [vmem:[#allocation9 + $0x7d0] sm:$0xf] }
 0x848   :  { %7460 = vmatmul.bf16.vlgmr.msra.gmra.mxu0 %v16813_v36  ;;  %v12729_v50 = vld [vmem:[#allocation9 + $0xe8] sm:$0xf0] }
 0x849   :  { %7485 = vmatpush.bf16.msra.mxu2 %v13144_v18  ;;  %7504 = vmatpush.bf16.msrb.mxu0 %v12860_v0  ;;  %v15455_v48 = vld [vmem:[#allocation9 + $0x2cc] sm:$0xf]  ;;  %v12732_v55 = vor.u32 %v15391_v31, %v12729_v50  ;;  %v13376_v50 = vor.u32 %v15556_v41, %v13375_v40  ;;  %v12703_v40 = vld [vmem:[#allocation9 + $0x90] sm:$0xf] }
 0x84a   :  { %7473 = vmatmul.bf16.vlgmr.msra.gmra.mxu1 %v16815_v38  ;;  %v12985_v51 = vld [vmem:[#allocation9 + $0x2e8] sm:$0xf0]  ;;  %v15388_v41 = vld [vmem:[#allocation9 + $0xac] sm:$0xf0] }
 0x84b   :  { %7498 = vmatpush.bf16.msra.mxu3 %v13400_v63  ;;  %7517 = vmatpush.bf16.msrb.mxu1 %v13116_v35  ;;  %v15519_v52 = vld [vmem:[#allocation9 + $0x4cc] sm:$0xf]  ;;  %v12988_v56 = vor.u32 %v15455_v48, %v12985_v51  ;;  %v12831_v48 = vld [vmem:[#allocation9 + $0x190] sm:$0xf] }
 0x84c   :  { %7486 = vmatmul.bf16.vlgmr.msra.gmra.mxu2 %v16817_v49  ;;  %v13241_v53 = vld [vmem:[#allocation9 + $0x4e8] sm:$0xf0]  ;;  %v13087_v51 = vld [vmem:[#allocation9 + $0x390] sm:$0xf] }
 0x84d   :  { %7530 = vmatpush.bf16.msrb.mxu2 %v13372_v6  ;;  %7505 = vmatpush.bf16.msrb.mxu0 %v12828_v32  ;;  %v15583_v54 = vld [vmem:[#allocation9 + $0x6cc] sm:$0xf]  ;;  %v13244_v58 = vor.u32 %v15519_v52, %v13241_v53  ;;  %v12700_v6 = vor.u32 %v15383_v59, %v12697_v60  ;;  %v15484_v53 = vld [vmem:[#allocation9 + $0x3ac] sm:$0xf0] }
 0x84e   :  { %7499 = vmatmul.bf16.vlgmr.msra.gmra.mxu3 %v16819_v57  ;;  %v13497_v1 = vld [vmem:[#allocation9 + $0x6e8] sm:$0xf0]  ;;  %v13088_v59 = vor.u32 %v15484_v53, %v13087_v51  ;;  %v12671_v51 = vld [vmem:[#allocation9 + $0x50] sm:$0xf] }
 0x84f   :  { %7543 = vmatpush.bf16.msrb.mxu3 %v13628_v13  ;;  %7518 = vmatpush.bf16.msrb.mxu1 %v13084_v20  ;;  %v15447_v61 = vld [vmem:[#allocation9 + $0x28c] sm:$0xf]  ;;  %v13500_v18 = vor.u32 %v15583_v54, %v13497_v1  ;;  %v13343_v54 = vld [vmem:[#allocation9 + $0x590] sm:$0xf] }
 0x850   :  { %v12953_v62 = vld [vmem:[#allocation9 + $0x2a8] sm:$0xf0]  ;;  %v15548_v1 = vld [vmem:[#allocation9 + $0x5ac] sm:$0xf0] }
 0x851   :  { %7531 = vmatpush.bf16.msrb.mxu2 %v13340_v21  ;;  %7506 = vmatpush.bf16.msrb.mxu0 %v12796_v28  ;;  %v15511_v46 = vld [vmem:[#allocation9 + $0x48c] sm:$0xf]  ;;  %v12956_v7 = vor.u32 %v15447_v61, %v12953_v62  ;;  %v13344_v60 = vor.u32 %v15548_v1, %v13343_v54  ;;  %v12799_v61 = vld [vmem:[#allocation9 + $0x150] sm:$0xf] }
 0x852   :  { %v13209_v63 = vld [vmem:[#allocation9 + $0x4a8] sm:$0xf0]  ;;  %v13055_v62 = vld [vmem:[#allocation9 + $0x350] sm:$0xf] }
 0x853   :  { %7544 = vmatpush.bf16.msrb.mxu3 %v13596_v24  ;;  %7519 = vmatpush.bf16.msrb.mxu1 %v13052_v29  ;;  %v15575_v0 = vld [vmem:[#allocation9 + $0x68c] sm:$0xf]  ;;  %v13212_v2 = vor.u32 %v15511_v46, %v13209_v63  ;;  %v15476_v63 = vld [vmem:[#allocation9 + $0x36c] sm:$0xf0] }
 0x854   :  { %v13465_v35 = vld [vmem:[#allocation9 + $0x6a8] sm:$0xf0]  ;;  %v12927_v53 = vld [vmem:[#allocation9 + $0x250] sm:$0xf] }
 0x855   :  { %7532 = vmatpush.bf16.msrb.mxu2 %v13308_v30  ;;  %7507 = vmatpush.bf16.msrb.mxu0 %v12764_v44  ;;  %v12665_v13 = vld [vmem:[#allocation9 + $0x68] sm:$0xf0]  ;;  %v13468_v15 = vor.u32 %v15575_v0, %v13465_v35  ;;  %v12863_v30 = vld [vmem:[#allocation9 + $0x1d0] sm:$0xf] }
 0x856   :  { %v12921_v12 = vld [vmem:[#allocation9 + $0x268] sm:$0xf0]  ;;  %v12668_v21 = vor.u32 %v15375_v9, %v12665_v13  ;;  %v15620_v44 = vld [vmem:[#allocation9 + $0x7ec] sm:$0xf0]  ;;  %v13056_v9 = vor.u32 %v15476_v63, %v13055_v62 }
 0x857   :  { %7545 = vmatpush.bf16.msrb.mxu3 %v13564_v37  ;;  %7520 = vmatpush.bf16.msrb.mxu1 %v13020_v16  ;;  %v15503_v17 = vld [vmem:[#allocation9 + $0x44c] sm:$0xf]  ;;  %v12924_v23 = vor.u32 %v15439_v14, %v12921_v12  ;;  %v15492_v37 = vld [vmem:[#allocation9 + $0x3ec] sm:$0xf0]  ;;  %v13632_v52 = vor.u32 %v15620_v44, %v13631_v43 }
 0x858   :  { %v13177_v19 = vld [vmem:[#allocation9 + $0x468] sm:$0xf0]  ;;  %v13120_v31 = vor.u32 %v15492_v37, %v13119_v34  ;;  %v13311_v0 = vld [vmem:[#allocation9 + $0x550] sm:$0xf] }
 0x859   :  { %7533 = vmatpush.bf16.msrb.mxu2 %v13276_v47  ;;  %7508 = vmatpush.bf16.msrb.mxu0 %v12732_v55  ;;  %v15567_v32 = vld [vmem:[#allocation9 + $0x64c] sm:$0xf]  ;;  %v13180_v24 = vor.u32 %v15503_v17, %v13177_v19  ;;  %v12864_v47 = vor.u32 %v15428_v33, %v12863_v30  ;;  %v13599_v55 = vld [vmem:[#allocation9 + $0x790] sm:$0xf] }
 0x85a   :  { %v13433_v20 = vld [vmem:[#allocation9 + $0x668] sm:$0xf0]  ;;  %v15540_v35 = vld [vmem:[#allocation9 + $0x56c] sm:$0xf0] }
 0x85b   :  { %7546 = vmatpush.bf16.msrb.mxu3 %v13532_v5  ;;  %7521 = vmatpush.bf16.msrb.mxu1 %v12988_v56  ;;  %v15367_v4 = vld [vmem:[#allocation9 + $0xc] sm:$0xf]  ;;  %v13436_v39 = vor.u32 %v15567_v32, %v13433_v20  ;;  %v15420_v5 = vld [vmem:[#allocation9 + $0x1ac] sm:$0xf0]  ;;  %v13312_v13 = vor.u32 %v15540_v35, %v13311_v0 }
 0x85c   :  { %v12633_v22 = vld [vmem:[#allocation9 + $0x28] sm:$0xf0]  ;;  %v15612_v56 = vld [vmem:[#allocation9 + $0x7ac] sm:$0xf0] }
 0x85d   :  { %7534 = vmatpush.bf16.msrb.mxu2 %v13244_v58  ;;  %7509 = vmatpush.bf16.msrb.mxu0 %v12700_v6  ;;  %v15431_v45 = vld [vmem:[#allocation9 + $0x20c] sm:$0xf]  ;;  %v12636_v10 = vor.u32 %v15367_v4, %v12633_v22  ;;  %v12832_v58 = vor.u32 %v15420_v5, %v12831_v48  ;;  %v13600_v46 = vor.u32 %v15612_v56, %v13599_v55  ;;  %v13567_v6 = vld [vmem:[#allocation9 + $0x750] sm:$0xf] }
 0x85e   :  { %v12889_v25 = vld [vmem:[#allocation9 + $0x228] sm:$0xf0]  ;;  %v12767_v14 = vld [vmem:[#allocation9 + $0x110] sm:$0xf] }
 0x85f   :  { %7547 = vmatpush.bf16.msrb.mxu3 %v13500_v18  ;;  %7522 = vmatpush.bf16.msrb.mxu1 %v12956_v7  ;;  %v15495_v26 = vld [vmem:[#allocation9 + $0x40c] sm:$0xf]  ;;  %v12892_v42 = vor.u32 %v15431_v45, %v12889_v25  ;;  %v15412_v18 = vld [vmem:[#allocation9 + $0x16c] sm:$0xf0] }
 0x860   :  { %v13145_v27 = vld [vmem:[#allocation9 + $0x428] sm:$0xf0]  ;;  %v15604_v7 = vld [vmem:[#allocation9 + $0x76c] sm:$0xf0] }
 0x861   :  { %7535 = vmatpush.bf16.msrb.mxu2 %v13212_v2  ;;  %v15559_v28 = vld [vmem:[#allocation9 + $0x60c] sm:$0xf]  ;;  %7510 = vmatpush.bf16.msrb.mxu0 %v12668_v21  ;;  %v13148_v8 = vor.u32 %v15495_v26, %v13145_v27  ;;  %v12800_v2 = vor.u32 %v15412_v18, %v12799_v61  ;;  %v13023_v12 = vld [vmem:[#allocation9 + $0x310] sm:$0xf]  ;;  %v13568_v17 = vor.u32 %v15604_v7, %v13567_v6 }
 0x862   :  { %v13401_v29 = vld [vmem:[#allocation9 + $0x628] sm:$0xf0]  ;;  %v15468_v19 = vld [vmem:[#allocation9 + $0x32c] sm:$0xf0] }
 0x863   :  { %7548 = vmatpush.bf16.msrb.mxu3 %v13468_v15  ;;  %7523 = vmatpush.bf16.msrb.mxu1 %v12924_v23  ;;  %v13404_v16 = vor.u32 %v15559_v28, %v13401_v29  ;;  %v15404_v15 = vld [vmem:[#allocation9 + $0x12c] sm:$0xf0]  ;;  %v13024_v23 = vor.u32 %v15468_v19, %v13023_v12  ;;  %v15552_v19 = vld [vmem:[#allocation9 + $0x5d4] sm:$0xf] }
 0x864   :  { %v13279_v32 = vld [vmem:[#allocation9 + $0x510] sm:$0xf]  ;;  %v12768_v22 = vor.u32 %v15404_v15, %v12767_v14  ;;  %v12865_v14 = vld [vmem:[#allocation9 + $0x1f0] sm:$0xf0] }
 0x865   :  { %7536 = vmatpush.bf16.msrb.mxu2 %v13180_v24  ;;  %7511 = vmatpush.bf16.msrb.mxu0 %v12636_v10  ;;  %v15532_v20 = vld [vmem:[#allocation9 + $0x52c] sm:$0xf0]  ;;  %v15488_v15 = vld [vmem:[#allocation9 + $0x3d4] sm:$0xf] }
 0x866   :  { %v13535_v21 = vld [vmem:[#allocation9 + $0x710] sm:$0xf]  ;;  %v13280_v24 = vor.u32 %v15532_v20, %v13279_v32  ;;  %v13377_v32 = vld [vmem:[#allocation9 + $0x5f0] sm:$0xf0] }
 0x867   :  { %7549 = vmatpush.bf16.msrb.mxu3 %v13436_v39  ;;  %7524 = vmatpush.bf16.msrb.mxu1 %v12892_v42  ;;  %v15596_v4 = vld [vmem:[#allocation9 + $0x72c] sm:$0xf0] }
 0x868   :  { %7512 = vmatmul.bf16.vlgmr.msrb.gmra.mxu0 %v16813_v36  ;;  %v12735_v45 = vld [vmem:[#allocation9 + $0xd0] sm:$0xf]  ;;  %v13536_v39 = vor.u32 %v15596_v4, %v13535_v21  ;;  %v15616_v4 = vld [vmem:[#allocation9 + $0x7d4] sm:$0xf] }
 0x869   :  { %7537 = vmatpush.bf16.msrb.mxu2 %v13148_v8  ;;  %7556 = vmatpush.bf16.msra.mxu0 %v12864_v47  ;;  %v15396_v25 = vld [vmem:[#allocation9 + $0xec] sm:$0xf0] }
 0x86a   :  { %7525 = vmatmul.bf16.vlgmr.msrb.gmra.mxu1 %v16815_v38  ;;  %v12991_v26 = vld [vmem:[#allocation9 + $0x2d0] sm:$0xf]  ;;  %v12736_v34 = vor.u32 %v15396_v25, %v12735_v45  ;;  %v13380_v25 = vor.u32 %v15552_v19, %v13377_v32  ;;  %v15584_v19 = vld [vmem:[#allocation9 + $0x6d4] sm:$0xf] }
 0x86b   :  { %7550 = vmatpush.bf16.msrb.mxu3 %v13404_v16  ;;  %7569 = vmatpush.bf16.msra.mxu1 %v13120_v31  ;;  %v15460_v27 = vld [vmem:[#allocation9 + $0x2ec] sm:$0xf0]  ;;  %v13505_v32 = vld [vmem:[#allocation9 + $0x6f0] sm:$0xf0] }
 0x86c   :  { %7538 = vmatmul.bf16.vlgmr.msrb.gmra.mxu2 %v16817_v49  ;;  %v13247_v28 = vld [vmem:[#allocation9 + $0x4d0] sm:$0xf]  ;;  %v12992_v10 = vor.u32 %v15460_v27, %v12991_v26  ;;  %v15416_v26 = vld [vmem:[#allocation9 + $0x194] sm:$0xf] }
 0x86d   :  { %7582 = vmatpush.bf16.msra.mxu2 %v13376_v50  ;;  %7557 = vmatpush.bf16.msra.mxu0 %v12832_v58  ;;  %v15524_v29 = vld [vmem:[#allocation9 + $0x4ec] sm:$0xf0]  ;;  %v12704_v50 = vor.u32 %v15388_v41, %v12703_v40  ;;  %v15480_v27 = vld [vmem:[#allocation9 + $0x394] sm:$0xf] }
 0x86e   :  { %7551 = vmatmul.bf16.vlgmr.msrb.gmra.mxu3 %v16819_v57  ;;  %v13503_v30 = vld [vmem:[#allocation9 + $0x6d0] sm:$0xf]  ;;  %v13248_v37 = vor.u32 %v15524_v29, %v13247_v28  ;;  %v13089_v29 = vld [vmem:[#allocation9 + $0x3b0] sm:$0xf0] }
 0x86f   :  { %7595 = vmatpush.bf16.msra.mxu3 %v13632_v52  ;;  %7570 = vmatpush.bf16.msra.mxu1 %v13088_v59  ;;  %v15588_v33 = vld [vmem:[#allocation9 + $0x6ec] sm:$0xf0]  ;;  %v15408_v40 = vld [vmem:[#allocation9 + $0x154] sm:$0xf]  ;;  %v13092_v41 = vor.u32 %v15480_v27, %v13089_v29 }
 0x870   :  { %v12959_v42 = vld [vmem:[#allocation9 + $0x290] sm:$0xf]  ;;  %v13504_v8 = vor.u32 %v15588_v33, %v13503_v30  ;;  %v15544_v30 = vld [vmem:[#allocation9 + $0x594] sm:$0xf] }
 0x871   :  { %7583 = vmatpush.bf16.msra.mxu2 %v13344_v60  ;;  %7558 = vmatpush.bf16.msra.mxu0 %v12800_v2  ;;  %v15452_v43 = vld [vmem:[#allocation9 + $0x2ac] sm:$0xf0]  ;;  %v13345_v33 = vld [vmem:[#allocation9 + $0x5b0] sm:$0xf0] }
 0x872   :  { %v13215_v44 = vld [vmem:[#allocation9 + $0x490] sm:$0xf]  ;;  %v12960_v48 = vor.u32 %v15452_v43, %v12959_v42  ;;  %v13348_v42 = vor.u32 %v15544_v30, %v13345_v33  ;;  %v15472_v43 = vld [vmem:[#allocation9 + $0x354] sm:$0xf] }
 0x873   :  { %7596 = vmatpush.bf16.msra.mxu3 %v13600_v46  ;;  %7571 = vmatpush.bf16.msra.mxu1 %v13056_v9  ;;  %v15516_v16 = vld [vmem:[#allocation9 + $0x4ac] sm:$0xf0]  ;;  %v15512_v27 = vld [vmem:[#allocation9 + $0x494] sm:$0xf] }
 0x874   :  { %v13471_v47 = vld [vmem:[#allocation9 + $0x690] sm:$0xf]  ;;  %v13216_v5 = vor.u32 %v15516_v16, %v13215_v44  ;;  %v13057_v44 = vld [vmem:[#allocation9 + $0x370] sm:$0xf0] }
 0x875   :  { %7584 = vmatpush.bf16.msra.mxu2 %v13312_v13  ;;  %7559 = vmatpush.bf16.msra.mxu0 %v12768_v22  ;;  %v15580_v31 = vld [vmem:[#allocation9 + $0x6ac] sm:$0xf0]  ;;  %v15424_v13 = vld [vmem:[#allocation9 + $0x1d4] sm:$0xf] }
 0x876   :  { %v15380_v52 = vld [vmem:[#allocation9 + $0x6c] sm:$0xf0]  ;;  %v13472_v54 = vor.u32 %v15580_v31, %v13471_v47  ;;  %v13633_v22 = vld [vmem:[#allocation9 + $0x7f0] sm:$0xf0] }
 0x877   :  { %7597 = vmatpush.bf16.msra.mxu3 %v13568_v17  ;;  %7572 = vmatpush.bf16.msra.mxu1 %v13024_v23  ;;  %v15444_v1 = vld [vmem:[#allocation9 + $0x26c] sm:$0xf0]  ;;  %v12672_v60 = vor.u32 %v15380_v52, %v12671_v51  ;;  %v13121_v17 = vld [vmem:[#allocation9 + $0x3f0] sm:$0xf0]  ;;  %v13636_v28 = vor.u32 %v15616_v4, %v13633_v22 }
 0x878   :  { %v13183_v55 = vld [vmem:[#allocation9 + $0x450] sm:$0xf]  ;;  %v12928_v62 = vor.u32 %v15444_v1, %v12927_v53  ;;  %v13124_v45 = vor.u32 %v15488_v15, %v13121_v17  ;;  %v15536_v47 = vld [vmem:[#allocation9 + $0x554] sm:$0xf]  ;;  %v13060_v53 = vor.u32 %v15472_v43, %v13057_v44 }
 0x879   :  { %7585 = vmatpush.bf16.msra.mxu2 %v13280_v24  ;;  %7560 = vmatpush.bf16.msra.mxu0 %v12736_v34  ;;  %v15508_v56 = vld [vmem:[#allocation9 + $0x46c] sm:$0xf0]  ;;  %v12868_v24 = vor.u32 %v15424_v13, %v12865_v14  ;;  %v15608_v34 = vld [vmem:[#allocation9 + $0x794] sm:$0xf] }
 0x87a   :  { %v13439_v58 = vld [vmem:[#allocation9 + $0x650] sm:$0xf]  ;;  %v13184_v46 = vor.u32 %v15508_v56, %v13183_v55  ;;  %v13313_v31 = vld [vmem:[#allocation9 + $0x570] sm:$0xf0] }
 0x87b   :  { %7598 = vmatpush.bf16.msra.mxu3 %v13536_v39  ;;  %7573 = vmatpush.bf16.msra.mxu1 %v12992_v10  ;;  %v15572_v59 = vld [vmem:[#allocation9 + $0x66c] sm:$0xf0]  ;;  %v12833_v39 = vld [vmem:[#allocation9 + $0x1b0] sm:$0xf0] }
 0x87c   :  { %v12639_v61 = vld [vmem:[#allocation9 + $0x10] sm:$0xf]  ;;  %v13440_v6 = vor.u32 %v15572_v59, %v13439_v58  ;;  %v13601_v10 = vld [vmem:[#allocation9 + $0x7b0] sm:$0xf0] }
 0x87d   :  { %7586 = vmatpush.bf16.msra.mxu2 %v13248_v37  ;;  %7561 = vmatpush.bf16.msra.mxu0 %v12704_v50  ;;  %v15372_v18 = vld [vmem:[#allocation9 + $0x2c] sm:$0xf0]  ;;  %v12836_v37 = vor.u32 %v15416_v26, %v12833_v39  ;;  %v13604_v16 = vor.u32 %v15608_v34, %v13601_v10  ;;  %v16841_v50 = vld [vmem:[%s16968_s19] sm:$0xff]  ;;  %v15400_v52 = vld [vmem:[#allocation9 + $0x114] sm:$0xf]  ;;  %v13508_v26 = vor.u32 %v15584_v19, %v13505_v32 }
 0x87e   :  { %v12895_v63 = vld [vmem:[#allocation9 + $0x210] sm:$0xf]  ;;  %v12640_v12 = vor.u32 %v15372_v18, %v12639_v61  ;;  %v12769_v1 = vld [vmem:[#allocation9 + $0x130] sm:$0xf0]  ;;  %v6052_v56 = vperm.slane %v16841_v50, 0 }
 0x87f   :  { %7599 = vmatpush.bf16.msra.mxu3 %v13504_v8  ;;  %7574 = vmatpush.bf16.msra.mxu1 %v12960_v48  ;;  %v15436_v0 = vld [vmem:[#allocation9 + $0x22c] sm:$0xf0]  ;;  %v12801_v8 = vld [vmem:[#allocation9 + $0x170] sm:$0xf0]  ;;  %v13639_v32 = vld [vmem:[#allocation9 + $0x7d8] sm:$0xf] }
 0x880   :  { %v13151_v35 = vld [vmem:[#allocation9 + $0x410] sm:$0xf]  ;;  %v12896_v20 = vor.u32 %v15436_v0, %v12895_v63  ;;  %v15600_v48 = vld [vmem:[#allocation9 + $0x754] sm:$0xf]  ;;  %v12804_v51 = vor.u32 %v15408_v40, %v12801_v8 }
 0x881   :  { %7587 = vmatpush.bf16.msra.mxu2 %v13216_v5  ;;  %v15500_v7 = vld [vmem:[#allocation9 + $0x42c] sm:$0xf0]  ;;  %7562 = vmatpush.bf16.msra.mxu0 %v12672_v60  ;;  %v13569_v5 = vld [vmem:[#allocation9 + $0x770] sm:$0xf0] }
 0x882   :  { %v13407_v2 = vld [vmem:[#allocation9 + $0x610] sm:$0xf]  ;;  %v13152_v21 = vor.u32 %v15500_v7, %v13151_v35  ;;  %v15464_v55 = vld [vmem:[#allocation9 + $0x314] sm:$0xf]  ;;  %v13572_v58 = vor.u32 %v15600_v48, %v13569_v5 }
 0x883   :  { %7600 = vmatpush.bf16.msra.mxu3 %v13472_v54  ;;  %v15564_v9 = vld [vmem:[#allocation9 + $0x62c] sm:$0xf0]  ;;  %7575 = vmatpush.bf16.msra.mxu1 %v12928_v62  ;;  %v13316_v54 = vor.u32 %v15536_v47, %v13313_v31  ;;  %v13025_v59 = vld [vmem:[#allocation9 + $0x330] sm:$0xf0] }
 0x884   :  { %v13408_v23 = vor.u32 %v15564_v9, %v13407_v2  ;;  %v15528_v60 = vld [vmem:[#allocation9 + $0x514] sm:$0xf]  ;;  %v13028_v0 = vor.u32 %v15464_v55, %v13025_v59 }
 0x885   :  { %7588 = vmatpush.bf16.msra.mxu2 %v13184_v46  ;;  %7563 = vmatpush.bf16.msra.mxu0 %v12640_v12  ;;  %v13281_v61 = vld [vmem:[#allocation9 + $0x530] sm:$0xf0]  ;;  %v12772_v46 = vor.u32 %v15400_v52, %v12769_v1  ;;  %v7357_v63 = vpop.f32.mrf.mxu0 }
 0x886   :  { %v15592_v18 = vld [vmem:[#allocation9 + $0x714] sm:$0xf]  ;;  %v13284_v35 = vor.u32 %v15528_v60, %v13281_v61  ;;  %v7358_v9 = vadd.f32 %v7357_v63, %v6052_v56 }
 0x887   :  { %7601 = vmatpush.bf16.msra.mxu3 %v13440_v6  ;;  %7576 = vmatpush.bf16.msra.mxu1 %v12896_v20  ;;  %v13537_v62 = vld [vmem:[#allocation9 + $0x730] sm:$0xf0]  ;;  %v7370_v13 = vpop.f32.mrf.mxu1 }
 0x888   :  { %7564 = vmatmul.bf16.vlgmr.msra.gmra.mxu0 %v16813_v36  ;;  %v15392_v6 = vld [vmem:[#allocation9 + $0xd4] sm:$0xf]  ;;  %v13540_v14 = vor.u32 %v15592_v18, %v13537_v62  ;;  %v7371_v20 = vadd.f32 %v7370_v13, %v7358_v9  ;;  %v13127_v9 = vld [vmem:[#allocation9 + $0x3d8] sm:$0xf] }
 0x889   :  { %7589 = vmatpush.bf16.msra.mxu2 %v13152_v21  ;;  %7608 = vmatpush.bf16.msrb.mxu0 %v12868_v24  ;;  %v12737_v7 = vld [vmem:[#allocation9 + $0xf0] sm:$0xf0] }
 0x88a   :  { %7577 = vmatmul.bf16.vlgmr.msra.gmra.mxu1 %v16815_v38  ;;  %v15456_v2 = vld [vmem:[#allocation9 + $0x2d4] sm:$0xf]  ;;  %v12740_v21 = vor.u32 %v15392_v6, %v12737_v7  ;;  %v12871_v7 = vld [vmem:[#allocation9 + $0x1d8] sm:$0xf] }
 0x88b   :  { %7602 = vmatpush.bf16.msra.mxu3 %v13408_v23  ;;  %7621 = vmatpush.bf16.msrb.mxu1 %v13124_v45  ;;  %v12993_v15 = vld [vmem:[#allocation9 + $0x2f0] sm:$0xf0] }
 0x88c   :  { %7590 = vmatmul.bf16.vlgmr.msra.gmra.mxu2 %v16817_v49  ;;  %v15520_v12 = vld [vmem:[#allocation9 + $0x4d4] sm:$0xf]  ;;  %v12996_v4 = vor.u32 %v15456_v2, %v12993_v15  ;;  %v15429_v2 = vld [vmem:[#allocation9 + $0x1f4] sm:$0xf0] }
 0x88d   :  { %7634 = vmatpush.bf16.msrb.mxu2 %v13380_v25  ;;  %7609 = vmatpush.bf16.msrb.mxu0 %v12836_v37  ;;  %v13249_v17 = vld [vmem:[#allocation9 + $0x4f0] sm:$0xf0]  ;;  %v13383_v15 = vld [vmem:[#allocation9 + $0x5d8] sm:$0xf] }
 0x88e   :  { %7603 = vmatmul.bf16.vlgmr.msra.gmra.mxu3 %v16819_v57  ;;  %v13252_v22 = vor.u32 %v15520_v12, %v13249_v17  ;;  %v15384_v23 = vld [vmem:[#allocation9 + $0x94] sm:$0xf]  ;;  %v15557_v12 = vld [vmem:[#allocation9 + $0x5f4] sm:$0xf0] }
 0x88f   :  { %7647 = vmatpush.bf16.msrb.mxu3 %v13636_v28  ;;  %7622 = vmatpush.bf16.msrb.mxu1 %v13092_v41  ;;  %v12705_v24 = vld [vmem:[#allocation9 + $0xb0] sm:$0xf0]  ;;  %v7383_v25 = vpop.f32.mrf.mxu2  ;;  %v7359_v41 = vpop.f32.mrf.mxu0 }
 0x890   :  { %v15448_v45 = vld [vmem:[#allocation9 + $0x294] sm:$0xf]  ;;  %v7384_v29 = vadd.f32 %v7383_v25, %v7371_v20  ;;  %v12708_v10 = vor.u32 %v15384_v23, %v12705_v24  ;;  %v7372_v47 = vpop.f32.mrf.mxu1  ;;  %v15621_v20 = vld [vmem:[#allocation9 + $0x7f4] sm:$0xf0]  ;;  %v13384_v23 = vor.u32 %v15557_v12, %v13383_v15 }
 0x891   :  { %7635 = vmatpush.bf16.msrb.mxu2 %v13348_v42  ;;  %7610 = vmatpush.bf16.msrb.mxu0 %v12804_v51  ;;  %v12961_v39 = vld [vmem:[#allocation9 + $0x2b0] sm:$0xf0]  ;;  %v7396_v30 = vpop.f32.mrf.mxu3  ;;  %v12839_v24 = vld [vmem:[#allocation9 + $0x198] sm:$0xf] }
 0x892   :  { %v13217_v28 = vld [vmem:[#allocation9 + $0x4b0] sm:$0xf0]  ;;  %v7397_v40 = vadd.f32 %v7396_v30, %v7384_v29  ;;  %v12964_v42 = vor.u32 %v15448_v45, %v12961_v39  ;;  %v15421_v45 = vld [vmem:[#allocation9 + $0x1b4] sm:$0xf0] }
 0x893   :  { %7648 = vmatpush.bf16.msrb.mxu3 %v13604_v16  ;;  %7623 = vmatpush.bf16.msrb.mxu1 %v13060_v53  ;;  %v15576_v33 = vld [vmem:[#allocation9 + $0x694] sm:$0xf]  ;;  %v13220_v8 = vor.u32 %v15512_v27, %v13217_v28  ;;  %v13095_v25 = vld [vmem:[#allocation9 + $0x398] sm:$0xf] }
 0x894   :  { %v13473_v34 = vld [vmem:[#allocation9 + $0x6b0] sm:$0xf0]  ;;  %v7764_v51 = vmax.f32 %v7397_v40, 0.0  ;;  %v15485_v39 = vld [vmem:[#allocation9 + $0x3b4] sm:$0xf0] }
 0x895   :  { %7636 = vmatpush.bf16.msrb.mxu2 %v13316_v54  ;;  %7611 = vmatpush.bf16.msrb.mxu0 %v12772_v46  ;;  %v15376_v37 = vld [vmem:[#allocation9 + $0x54] sm:$0xf]  ;;  %v13476_v31 = vor.u32 %v15576_v33, %v13473_v34  ;;  %v13351_v27 = vld [vmem:[#allocation9 + $0x598] sm:$0xf]  ;;  %v12840_v33 = vor.u32 %v15421_v45, %v12839_v24  ;;  %v13096_v34 = vor.u32 %v15485_v39, %v13095_v25 }
 0x896   :  { %v12673_v43 = vld [vmem:[#allocation9 + $0x70] sm:$0xf0]  ;;  %v16847_v56 = vpack.c.bf16 %v7764_v51, %v7764_v51  ;;  %v15549_v28 = vld [vmem:[#allocation9 + $0x5b4] sm:$0xf0] }
 0x897   :  { %7649 = vmatpush.bf16.msrb.mxu3 %v13572_v58  ;;  %7624 = vmatpush.bf16.msrb.mxu1 %v13028_v0  ;;  %v15440_v44 = vld [vmem:[#allocation9 + $0x254] sm:$0xf]  ;;  %v12676_v54 = vor.u32 %v15376_v37, %v12673_v43  ;;  %v7385_v62 = vpop.f32.mrf.mxu2  ;;  %v13607_v29 = vld [vmem:[#allocation9 + $0x798] sm:$0xf] }
 0x898   :  { %v12929_v16 = vld [vmem:[#allocation9 + $0x270] sm:$0xf0]  ;;  %v15613_v30 = vld [vmem:[#allocation9 + $0x7b4] sm:$0xf0] }
 0x899   :  { %7637 = vmatpush.bf16.msrb.mxu2 %v13284_v35  ;;  %7612 = vmatpush.bf16.msrb.mxu0 %v12740_v21  ;;  %v15504_v48 = vld [vmem:[#allocation9 + $0x454] sm:$0xf]  ;;  %v12932_v58 = vor.u32 %v15440_v44, %v12929_v16  ;;  %v7398_v6 = vpop.f32.mrf.mxu3  ;;  %v12807_v37 = vld [vmem:[#allocation9 + $0x158] sm:$0xf] }
 0x89a   :  { %v13185_v5 = vld [vmem:[#allocation9 + $0x470] sm:$0xf0]  ;;  %v15413_v40 = vld [vmem:[#allocation9 + $0x174] sm:$0xf0] }
 0x89b   :  { %7650 = vmatpush.bf16.msrb.mxu3 %v13540_v14  ;;  %7625 = vmatpush.bf16.msrb.mxu1 %v12996_v4  ;;  %v15568_v52 = vld [vmem:[#allocation9 + $0x654] sm:$0xf]  ;;  %v13188_v59 = vor.u32 %v15504_v48, %v13185_v5  ;;  %v15493_v14 = vld [vmem:[#allocation9 + $0x3f4] sm:$0xf0]  ;;  %v12872_v4 = vor.u32 %v15429_v2, %v12871_v7 }
 0x89c   :  { %v13441_v53 = vld [vmem:[#allocation9 + $0x670] sm:$0xf0]  ;;  %v13063_v41 = vld [vmem:[#allocation9 + $0x358] sm:$0xf] }
 0x89d   :  { %7638 = vmatpush.bf16.msrb.mxu2 %v13252_v22  ;;  %7613 = vmatpush.bf16.msrb.mxu0 %v12708_v10  ;;  %v15368_v1 = vld [vmem:[#allocation9 + $0x14] sm:$0xf]  ;;  %v13444_v46 = vor.u32 %v15568_v52, %v13441_v53  ;;  %v13128_v22 = vor.u32 %v15493_v14, %v13127_v9  ;;  %v13352_v10 = vor.u32 %v15549_v28, %v13351_v27  ;;  %v13319_v43 = vld [vmem:[#allocation9 + $0x558] sm:$0xf] }
 0x89e   :  { %v12641_v55 = vld [vmem:[#allocation9 + $0x30] sm:$0xf0]  ;;  %v15541_v44 = vld [vmem:[#allocation9 + $0x574] sm:$0xf0] }
 0x89f   :  { %7651 = vmatpush.bf16.msrb.mxu3 %v13508_v26  ;;  %7626 = vmatpush.bf16.msrb.mxu1 %v12964_v42  ;;  %v15432_v60 = vld [vmem:[#allocation9 + $0x214] sm:$0xf]  ;;  %v12644_v13 = vor.u32 %v15368_v1, %v12641_v55  ;;  %v13640_v26 = vor.u32 %v15621_v20, %v13639_v32  ;;  %v13608_v42 = vor.u32 %v15613_v30, %v13607_v29  ;;  %v13575_v16 = vld [vmem:[#allocation9 + $0x758] sm:$0xf] }
 0x8a0   :  { %v12897_v61 = vld [vmem:[#allocation9 + $0x230] sm:$0xf0]  ;;  %v15605_v47 = vld [vmem:[#allocation9 + $0x774] sm:$0xf0]  ;;  %v13320_v51 = vor.u32 %v15541_v44, %v13319_v43 }
 0x8a1   :  { %7639 = vmatpush.bf16.msrb.mxu2 %v13220_v8  ;;  %v15496_v18 = vld [vmem:[#allocation9 + $0x414] sm:$0xf]  ;;  %7614 = vmatpush.bf16.msrb.mxu0 %v12676_v54  ;;  %v12900_v17 = vor.u32 %v15432_v60, %v12897_v61  ;;  %v15477_v8 = vld [vmem:[#allocation9 + $0x374] sm:$0xf0]  ;;  %v6053_v54 = vperm.slane %v16841_v50, 1  ;;  %v13576_v1 = vor.u32 %v15605_v47, %v13575_v16 }
 0x8a2   :  { %v13153_v63 = vld [vmem:[#allocation9 + $0x430] sm:$0xf0]  ;;  %v12775_v48 = vld [vmem:[#allocation9 + $0x118] sm:$0xf]  ;;  %v13064_v5 = vor.u32 %v15477_v8, %v13063_v41 }
 0x8a3   :  { %7652 = vmatpush.bf16.msrb.mxu3 %v13476_v31  ;;  %v15560_v0 = vld [vmem:[#allocation9 + $0x614] sm:$0xf]  ;;  %7627 = vmatpush.bf16.msrb.mxu1 %v12932_v58  ;;  %v13156_v19 = vor.u32 %v15496_v18, %v13153_v63  ;;  %v12808_v31 = vor.u32 %v15413_v40, %v12807_v37  ;;  %v15405_v52 = vld [vmem:[#allocation9 + $0x134] sm:$0xf0] }
 0x8a4   :  { %v13409_v35 = vld [vmem:[#allocation9 + $0x630] sm:$0xf0]  ;;  %v13031_v53 = vld [vmem:[#allocation9 + $0x318] sm:$0xf]  ;;  %v12776_v18 = vor.u32 %v15405_v52, %v12775_v48 }
 0x8a5   :  { %7640 = vmatpush.bf16.msrb.mxu2 %v13188_v59  ;;  %v13412_v21 = vor.u32 %v15560_v0, %v13409_v35  ;;  %7615 = vmatpush.bf16.msrb.mxu0 %v12644_v13  ;;  %v15469_v55 = vld [vmem:[#allocation9 + $0x334] sm:$0xf0]  ;;  %v7409_v62 = vpop.f32.mrf.mxu0 }
 0x8a6   :  { %v13287_v58 = vld [vmem:[#allocation9 + $0x518] sm:$0xf]  ;;  %v7410_v7 = vadd.f32 %v7409_v62, %v6053_v54 }
 0x8a7   :  { %7653 = vmatpush.bf16.msrb.mxu3 %v13444_v46  ;;  %7628 = vmatpush.bf16.msrb.mxu1 %v12900_v17  ;;  %v15533_v59 = vld [vmem:[#allocation9 + $0x534] sm:$0xf0]  ;;  %v13032_v46 = vor.u32 %v15469_v55, %v13031_v53  ;;  %v7422_v2 = vpop.f32.mrf.mxu1 }
 0x8a8   :  { %7616 = vmatmul.bf16.vlgmr.msrb.gmra.mxu0 %v16813_v36  ;;  %v13543_v60 = vld [vmem:[#allocation9 + $0x718] sm:$0xf]  ;;  %v13288_v63 = vor.u32 %v15533_v59, %v13287_v58 }
 0x8a9   :  { %7641 = vmatpush.bf16.msrb.mxu2 %v13156_v19  ;;  %7660 = vmatpush.bf16.msra.mxu0 %v12872_v4  ;;  %v15597_v61 = vld [vmem:[#allocation9 + $0x734] sm:$0xf0]  ;;  %v7423_v19 = vadd.f32 %v7422_v2, %v7410_v7  ;;  %v12873_v7 = vld [vmem:[#allocation9 + $0x1f8] sm:$0xf0] }
 0x8aa   :  { %7629 = vmatmul.bf16.vlgmr.msrb.gmra.mxu1 %v16815_v38  ;;  %v12743_v0 = vld [vmem:[#allocation9 + $0xd8] sm:$0xf]  ;;  %v13544_v9 = vor.u32 %v15597_v61, %v13543_v60  ;;  %v15489_v2 = vld [vmem:[#allocation9 + $0x3dc] sm:$0xf] }
 0x8ab   :  { %7654 = vmatpush.bf16.msrb.mxu3 %v13412_v21  ;;  %7673 = vmatpush.bf16.msra.mxu1 %v13128_v22  ;;  %v15397_v35 = vld [vmem:[#allocation9 + $0xf4] sm:$0xf0] }
 0x8ac   :  { %7642 = vmatmul.bf16.vlgmr.msrb.gmra.mxu2 %v16817_v49  ;;  %v12999_v6 = vld [vmem:[#allocation9 + $0x2d8] sm:$0xf]  ;;  %v12744_v32 = vor.u32 %v15397_v35, %v12743_v0 }
 0x8ad   :  { %7686 = vmatpush.bf16.msra.mxu2 %v13384_v23  ;;  %7661 = vmatpush.bf16.msra.mxu0 %v12840_v33  ;;  %v15461_v13 = vld [vmem:[#allocation9 + $0x2f4] sm:$0xf0]  ;;  %v7411_v37 = vpop.f32.mrf.mxu0 }
 0x8ae   :  { %7655 = vmatmul.bf16.vlgmr.msrb.gmra.mxu3 %v16819_v57  ;;  %v13255_v14 = vld [vmem:[#allocation9 + $0x4d8] sm:$0xf]  ;;  %v13000_v20 = vor.u32 %v15461_v13, %v12999_v6  ;;  %v15425_v6 = vld [vmem:[#allocation9 + $0x1dc] sm:$0xf] }
 0x8af   :  { %7699 = vmatpush.bf16.msra.mxu3 %v13640_v26  ;;  %7674 = vmatpush.bf16.msra.mxu1 %v13096_v34  ;;  %v15525_v15 = vld [vmem:[#allocation9 + $0x4f4] sm:$0xf0]  ;;  %v7435_v24 = vpop.f32.mrf.mxu2  ;;  %v7424_v44 = vpop.f32.mrf.mxu1  ;;  %v13129_v13 = vld [vmem:[#allocation9 + $0x3f8] sm:$0xf0] }
 0x8b0   :  { %v13511_v12 = vld [vmem:[#allocation9 + $0x6d8] sm:$0xf]  ;;  %v13256_v21 = vor.u32 %v15525_v15, %v13255_v14  ;;  %v7436_v27 = vadd.f32 %v7435_v24, %v7423_v19  ;;  %v15553_v14 = vld [vmem:[#allocation9 + $0x5dc] sm:$0xf] }
 0x8b1   :  { %7687 = vmatpush.bf16.msra.mxu2 %v13352_v10  ;;  %7662 = vmatpush.bf16.msra.mxu0 %v12808_v31  ;;  %v15589_v17 = vld [vmem:[#allocation9 + $0x6f4] sm:$0xf0]  ;;  %v7448_v28 = vpop.f32.mrf.mxu3  ;;  %v13385_v15 = vld [vmem:[#allocation9 + $0x5f8] sm:$0xf0] }
 0x8b2   :  { %v12711_v4 = vld [vmem:[#allocation9 + $0x98] sm:$0xf]  ;;  %v13512_v45 = vor.u32 %v15589_v17, %v13511_v12  ;;  %v7449_v10 = vadd.f32 %v7448_v28, %v7436_v27  ;;  %v15617_v19 = vld [vmem:[#allocation9 + $0x7dc] sm:$0xf] }
 0x8b3   :  { %7700 = vmatpush.bf16.msra.mxu3 %v13608_v42  ;;  %7675 = vmatpush.bf16.msra.mxu1 %v13064_v5  ;;  %v15389_v22 = vld [vmem:[#allocation9 + $0xb4] sm:$0xf0]  ;;  %v12841_v24 = vld [vmem:[#allocation9 + $0x1b8] sm:$0xf0] }
 0x8b4   :  { %v12967_v23 = vld [vmem:[#allocation9 + $0x298] sm:$0xf]  ;;  %v12712_v33 = vor.u32 %v15389_v22, %v12711_v4  ;;  %v7765_v48 = vmax.f32 %v7449_v10, 0.0  ;;  %v13132_v4 = vor.u32 %v15489_v2, %v13129_v13  ;;  %v13388_v22 = vor.u32 %v15553_v14, %v13385_v15  ;;  %v13353_v27 = vld [vmem:[#allocation9 + $0x5b8] sm:$0xf0] }
 0x8b5   :  { %7688 = vmatpush.bf16.msra.mxu2 %v13320_v51  ;;  %7663 = vmatpush.bf16.msra.mxu0 %v12776_v18  ;;  %v15453_v25 = vld [vmem:[#allocation9 + $0x2b4] sm:$0xf0]  ;;  %v15609_v28 = vld [vmem:[#allocation9 + $0x79c] sm:$0xf] }
 0x8b6   :  { %v13223_v26 = vld [vmem:[#allocation9 + $0x498] sm:$0xf]  ;;  %v12968_v40 = vor.u32 %v15453_v25, %v12967_v23  ;;  %v15417_v23 = vld [vmem:[#allocation9 + $0x19c] sm:$0xf] }
 0x8b7   :  { %7701 = vmatpush.bf16.msra.mxu3 %v13576_v1  ;;  %7676 = vmatpush.bf16.msra.mxu1 %v13032_v46  ;;  %v15517_v39 = vld [vmem:[#allocation9 + $0x4b4] sm:$0xf0]  ;;  %v16854_v1 = vpack.c.bf16 %v7765_v48, %v7765_v48  ;;  %v7437_v18 = vpop.f32.mrf.mxu2  ;;  %v15409_v10 = vld [vmem:[#allocation9 + $0x15c] sm:$0xf] }
 0x8b8   :  { %v13479_v29 = vld [vmem:[#allocation9 + $0x698] sm:$0xf]  ;;  %v13224_v41 = vor.u32 %v15517_v39, %v13223_v26  ;;  %v13097_v26 = vld [vmem:[#allocation9 + $0x3b8] sm:$0xf0] }
 0x8b9   :  { %7689 = vmatpush.bf16.msra.mxu2 %v13288_v63  ;;  %v15581_v30 = vld [vmem:[#allocation9 + $0x6b4] sm:$0xf0]  ;;  %7664 = vmatpush.bf16.msra.mxu0 %v12744_v32  ;;  %v7450_v35 = vpop.f32.mrf.mxu3  ;;  %v13641_v32 = vld [vmem:[#allocation9 + $0x7f8] sm:$0xf0] }
 0x8ba   :  { %v12679_v34 = vld [vmem:[#allocation9 + $0x58] sm:$0xf]  ;;  %v13480_v16 = vor.u32 %v15581_v30, %v13479_v29  ;;  %v13644_v25 = vor.u32 %v15617_v19, %v13641_v32  ;;  %v15545_v39 = vld [vmem:[#allocation9 + $0x59c] sm:$0xf]  ;;  %v12844_v30 = vor.u32 %v15417_v23, %v12841_v24 }
 0x8bb   :  { %7702 = vmatpush.bf16.msra.mxu3 %v13544_v9  ;;  %7677 = vmatpush.bf16.msra.mxu1 %v13000_v20  ;;  %v15381_v42 = vld [vmem:[#allocation9 + $0x74] sm:$0xf0]  ;;  %v13609_v29 = vld [vmem:[#allocation9 + $0x7b8] sm:$0xf0] }
 0x8bc   :  { %v12935_v8 = vld [vmem:[#allocation9 + $0x258] sm:$0xf]  ;;  %v12680_v52 = vor.u32 %v15381_v42, %v12679_v34  ;;  %v13356_v34 = vor.u32 %v15545_v39, %v13353_v27  ;;  %v12809_v37 = vld [vmem:[#allocation9 + $0x178] sm:$0xf0] }
 0x8bd   :  { %7690 = vmatpush.bf16.msra.mxu2 %v13256_v21  ;;  %v15445_v43 = vld [vmem:[#allocation9 + $0x274] sm:$0xf0]  ;;  %7665 = vmatpush.bf16.msra.mxu0 %v12712_v33  ;;  %v12876_v21 = vor.u32 %v15425_v6, %v12873_v7  ;;  %v13065_v42 = vld [vmem:[#allocation9 + $0x378] sm:$0xf0] }
 0x8be   :  { %v13191_v47 = vld [vmem:[#allocation9 + $0x458] sm:$0xf]  ;;  %v12936_v55 = vor.u32 %v15445_v43, %v12935_v8  ;;  %v15537_v8 = vld [vmem:[#allocation9 + $0x55c] sm:$0xf] }
 0x8bf   :  { %7703 = vmatpush.bf16.msra.mxu3 %v13512_v45  ;;  %v15509_v31 = vld [vmem:[#allocation9 + $0x474] sm:$0xf0]  ;;  %7678 = vmatpush.bf16.msra.mxu1 %v12968_v40  ;;  %v15481_v45 = vld [vmem:[#allocation9 + $0x39c] sm:$0xf] }
 0x8c0   :  { %v13447_v5 = vld [vmem:[#allocation9 + $0x658] sm:$0xf]  ;;  %v13192_v58 = vor.u32 %v15509_v31, %v13191_v47  ;;  %v13100_v33 = vor.u32 %v15481_v45, %v13097_v26  ;;  %v15473_v40 = vld [vmem:[#allocation9 + $0x35c] sm:$0xf]  ;;  %v12812_v47 = vor.u32 %v15409_v10, %v12809_v37 }
 0x8c1   :  { %v15573_v51 = vld [vmem:[#allocation9 + $0x674] sm:$0xf0]  ;;  %7691 = vmatpush.bf16.msra.mxu2 %v13224_v41  ;;  %7666 = vmatpush.bf16.msra.mxu0 %v12680_v52  ;;  %v13612_v41 = vor.u32 %v15609_v28, %v13609_v29  ;;  %v13321_v43 = vld [vmem:[#allocation9 + $0x578] sm:$0xf0]  ;;  %v13068_v48 = vor.u32 %v15473_v40, %v13065_v42 }
 0x8c2   :  { %v12647_v53 = vld [vmem:[#allocation9 + $0x18] sm:$0xf]  ;;  %v13448_v62 = vor.u32 %v15573_v51, %v13447_v5  ;;  %v15601_v44 = vld [vmem:[#allocation9 + $0x75c] sm:$0xf]  ;;  %v13324_v5 = vor.u32 %v15537_v8, %v13321_v43 }
 0x8c3   :  { %v15373_v54 = vld [vmem:[#allocation9 + $0x34] sm:$0xf0]  ;;  %7704 = vmatpush.bf16.msra.mxu3 %v13480_v16  ;;  %7679 = vmatpush.bf16.msra.mxu1 %v12936_v55  ;;  %v13577_v16 = vld [vmem:[#allocation9 + $0x778] sm:$0xf0] }
 0x8c4   :  { %v12903_v59 = vld [vmem:[#allocation9 + $0x218] sm:$0xf]  ;;  %v12648_v9 = vor.u32 %v15373_v54, %v12647_v53  ;;  %v15401_v31 = vld [vmem:[#allocation9 + $0x11c] sm:$0xf]  ;;  %v6054_v53 = vperm.slane %v16841_v50, 2  ;;  %v13580_v54 = vor.u32 %v15601_v44, %v13577_v16 }
 0x8c5   :  { %v15437_v60 = vld [vmem:[#allocation9 + $0x234] sm:$0xf0]  ;;  %7692 = vmatpush.bf16.msra.mxu2 %v13192_v58  ;;  %v12777_v51 = vld [vmem:[#allocation9 + $0x138] sm:$0xf0] }
 0x8c6   :  { %v13159_v61 = vld [vmem:[#allocation9 + $0x418] sm:$0xf]  ;;  %v12904_v12 = vor.u32 %v15437_v60, %v12903_v59  ;;  %7667 = vmatpush.bf16.msra.mxu0 %v12648_v9  ;;  %v15465_v52 = vld [vmem:[#allocation9 + $0x31c] sm:$0xf]  ;;  %v12780_v18 = vor.u32 %v15401_v31, %v12777_v51 }
 0x8c7   :  { %v15501_v46 = vld [vmem:[#allocation9 + $0x434] sm:$0xf0]  ;;  %7705 = vmatpush.bf16.msra.mxu3 %v13448_v62  ;;  %v13033_v55 = vld [vmem:[#allocation9 + $0x338] sm:$0xf0]  ;;  %v7461_v62 = vpop.f32.mrf.mxu0  ;;  %v7474_v2 = vpop.f32.mrf.mxu1 }
 0x8c8   :  { %v13415_v63 = vld [vmem:[#allocation9 + $0x618] sm:$0xf]  ;;  %v13160_v17 = vor.u32 %v15501_v46, %v13159_v61  ;;  %7680 = vmatpush.bf16.msra.mxu1 %v12904_v12  ;;  %v15529_v58 = vld [vmem:[#allocation9 + $0x51c] sm:$0xf]  ;;  %v13036_v46 = vor.u32 %v15465_v52, %v13033_v55  ;;  %v7462_v7 = vadd.f32 %v7461_v62, %v6054_v53 }
 0x8c9   :  { %v15565_v0 = vld [vmem:[#allocation9 + $0x634] sm:$0xf0]  ;;  %7668 = vmatmul.bf16.vlgmr.msra.gmra.mxu0 %v16813_v36  ;;  %v13289_v59 = vld [vmem:[#allocation9 + $0x538] sm:$0xf0] }
 0x8ca   :  { %v13416_v20 = vor.u32 %v15565_v0, %v13415_v63  ;;  %7693 = vmatpush.bf16.msra.mxu2 %v13160_v17  ;;  %7712 = vmatpush.bf16.msrb.mxu0 %v12876_v21  ;;  %v15593_v60 = vld [vmem:[#allocation9 + $0x71c] sm:$0xf]  ;;  %v13292_v63 = vor.u32 %v15529_v58, %v13289_v59  ;;  %v7475_v19 = vadd.f32 %v7474_v2, %v7462_v7 }
 0x8cb   :  { %7681 = vmatmul.bf16.vlgmr.msra.gmra.mxu1 %v16815_v38  ;;  %v13545_v61 = vld [vmem:[#allocation9 + $0x738] sm:$0xf0] }
 0x8cc   :  { %7706 = vmatpush.bf16.msra.mxu3 %v13416_v20  ;;  %7725 = vmatpush.bf16.msrb.mxu1 %v13132_v4  ;;  %v15393_v0 = vld [vmem:[#allocation9 + $0xdc] sm:$0xf]  ;;  %v13548_v9 = vor.u32 %v15593_v60, %v13545_v61 }
 0x8cd   :  { %7694 = vmatmul.bf16.vlgmr.msra.gmra.mxu2 %v16817_v49  ;;  %v12745_v35 = vld [vmem:[#allocation9 + $0xf8] sm:$0xf0] }
 0x8ce   :  { %7738 = vmatpush.bf16.msrb.mxu2 %v13388_v22  ;;  %7713 = vmatpush.bf16.msrb.mxu0 %v12844_v30  ;;  %v15457_v6 = vld [vmem:[#allocation9 + $0x2dc] sm:$0xf]  ;;  %v12748_v32 = vor.u32 %v15393_v0, %v12745_v35 }
 0x8cf   :  { %7707 = vmatmul.bf16.vlgmr.msra.gmra.mxu3 %v16819_v57  ;;  %v13001_v13 = vld [vmem:[#allocation9 + $0x2f8] sm:$0xf0]  ;;  %v7487_v24 = vpop.f32.mrf.mxu2  ;;  %v7463_v37 = vpop.f32.mrf.mxu0 }
 0x8d0   :  { %7751 = vmatpush.bf16.msrb.mxu3 %v13644_v25  ;;  %7726 = vmatpush.bf16.msrb.mxu1 %v13100_v33  ;;  %v15521_v14 = vld [vmem:[#allocation9 + $0x4dc] sm:$0xf]  ;;  %v13004_v20 = vor.u32 %v15457_v6, %v13001_v13  ;;  %v7488_v27 = vadd.f32 %v7487_v24, %v7475_v19  ;;  %v7476_v44 = vpop.f32.mrf.mxu1 }
 0x8d1   :  { %v13257_v15 = vld [vmem:[#allocation9 + $0x4f8] sm:$0xf0]  ;;  %v7500_v28 = vpop.f32.mrf.mxu3 }
 0x8d2   :  { %7739 = vmatpush.bf16.msrb.mxu2 %v13356_v34  ;;  %7714 = vmatpush.bf16.msrb.mxu0 %v12812_v47  ;;  %v15585_v12 = vld [vmem:[#allocation9 + $0x6dc] sm:$0xf]  ;;  %v13260_v21 = vor.u32 %v15521_v14, %v13257_v15  ;;  %v7501_v10 = vadd.f32 %v7500_v28, %v7488_v27  ;;  %v6055_v14 = vperm.slane %v16841_v50, 3 }
 0x8d3   :  { %v13513_v17 = vld [vmem:[#allocation9 + $0x6f8] sm:$0xf0] }
 0x8d4   :  { %7752 = vmatpush.bf16.msrb.mxu3 %v13612_v41  ;;  %7727 = vmatpush.bf16.msrb.mxu1 %v13068_v48  ;;  %v15385_v4 = vld [vmem:[#allocation9 + $0x9c] sm:$0xf]  ;;  %v13516_v45 = vor.u32 %v15585_v12, %v13513_v17  ;;  %v7766_v48 = vmax.f32 %v7501_v10, 0.0 }
 0x8d5   :  { %v12713_v22 = vld [vmem:[#allocation9 + $0xb8] sm:$0xf0] }
 0x8d6   :  { %7740 = vmatpush.bf16.msrb.mxu2 %v13324_v5  ;;  %7715 = vmatpush.bf16.msrb.mxu0 %v12780_v18  ;;  %v15449_v23 = vld [vmem:[#allocation9 + $0x29c] sm:$0xf]  ;;  %v12716_v33 = vor.u32 %v15385_v4, %v12713_v22  ;;  %v16861_v53 = vpack.c.bf16 %v7766_v48, %v7766_v48 }
 0x8d7   :  { %v12969_v25 = vld [vmem:[#allocation9 + $0x2b8] sm:$0xf0]  ;;  %v7489_v61 = vpop.f32.mrf.mxu2 }
 0x8d8   :  { %7753 = vmatpush.bf16.msrb.mxu3 %v13580_v54  ;;  %7728 = vmatpush.bf16.msrb.mxu1 %v13036_v46  ;;  %v15513_v26 = vld [vmem:[#allocation9 + $0x49c] sm:$0xf]  ;;  %v12972_v40 = vor.u32 %v15449_v23, %v12969_v25 }
 0x8d9   :  { %v13225_v39 = vld [vmem:[#allocation9 + $0x4b8] sm:$0xf0]  ;;  %v7502_v0 = vpop.f32.mrf.mxu3 }
 0x8da   :  { %7741 = vmatpush.bf16.msrb.mxu2 %v13292_v63  ;;  %v15577_v29 = vld [vmem:[#allocation9 + $0x69c] sm:$0xf]  ;;  %7716 = vmatpush.bf16.msrb.mxu0 %v12748_v32  ;;  %v13228_v41 = vor.u32 %v15513_v26, %v13225_v39 }
 0x8db   :  { %v13481_v30 = vld [vmem:[#allocation9 + $0x6b8] sm:$0xf0] }
 0x8dc   :  { %7754 = vmatpush.bf16.msrb.mxu3 %v13548_v9  ;;  %v15377_v34 = vld [vmem:[#allocation9 + $0x5c] sm:$0xf]  ;;  %7729 = vmatpush.bf16.msrb.mxu1 %v13004_v20  ;;  %v13484_v16 = vor.u32 %v15577_v29, %v13481_v30 }
 0x8dd   :  { %v12681_v42 = vld [vmem:[#allocation9 + $0x78] sm:$0xf0] }
 0x8de   :  { %7742 = vmatpush.bf16.msrb.mxu2 %v13260_v21  ;;  %v15441_v8 = vld [vmem:[#allocation9 + $0x25c] sm:$0xf]  ;;  %7717 = vmatpush.bf16.msrb.mxu0 %v12716_v33  ;;  %v12684_v52 = vor.u32 %v15377_v34, %v12681_v42  ;;  %v6057_v42 = vperm.slane %v16841_v50, 5 }
 0x8df   :  { %v12937_v43 = vld [vmem:[#allocation9 + $0x278] sm:$0xf0] }
 0x8e0   :  { %7755 = vmatpush.bf16.msrb.mxu3 %v13516_v45  ;;  %v15505_v47 = vld [vmem:[#allocation9 + $0x45c] sm:$0xf]  ;;  %7730 = vmatpush.bf16.msrb.mxu1 %v12972_v40  ;;  %v12940_v54 = vor.u32 %v15441_v8, %v12937_v43 }
 0x8e1   :  { %v13193_v31 = vld [vmem:[#allocation9 + $0x478] sm:$0xf0] }
 0x8e2   :  { %v15569_v5 = vld [vmem:[#allocation9 + $0x65c] sm:$0xf]  ;;  %7743 = vmatpush.bf16.msrb.mxu2 %v13228_v41  ;;  %v13196_v55 = vor.u32 %v15505_v47, %v13193_v31  ;;  %7718 = vmatpush.bf16.msrb.mxu0 %v12684_v52 }
 0x8e3   :  { %v13449_v51 = vld [vmem:[#allocation9 + $0x678] sm:$0xf0] }
 0x8e4   :  { %v15369_v58 = vld [vmem:[#allocation9 + $0x1c] sm:$0xf]  ;;  %7756 = vmatpush.bf16.msrb.mxu3 %v13484_v16  ;;  %v13452_v18 = vor.u32 %v15569_v5, %v13449_v51  ;;  %7731 = vmatpush.bf16.msrb.mxu1 %v12940_v54 }
 0x8e5   :  { %v12649_v59 = vld [vmem:[#allocation9 + $0x38] sm:$0xf0]  ;;  %v7513_v15 = vpop.f32.mrf.mxu0 }
 0x8e6   :  { %v15433_v60 = vld [vmem:[#allocation9 + $0x21c] sm:$0xf]  ;;  %v12652_v7 = vor.u32 %v15369_v58, %v12649_v59  ;;  %7744 = vmatpush.bf16.msrb.mxu2 %v13196_v55  ;;  %v7514_v12 = vadd.f32 %v7513_v15, %v6055_v14 }
 0x8e7   :  { %v12905_v62 = vld [vmem:[#allocation9 + $0x238] sm:$0xf0]  ;;  %v7526_v17 = vpop.f32.mrf.mxu1 }
 0x8e8   :  { %v15497_v46 = vld [vmem:[#allocation9 + $0x41c] sm:$0xf]  ;;  %v12908_v2 = vor.u32 %v15433_v60, %v12905_v62  ;;  %7757 = vmatpush.bf16.msrb.mxu3 %v13452_v18  ;;  %7719 = vmatpush.bf16.msrb.mxu0 %v12652_v7  ;;  %v7527_v19 = vadd.f32 %v7526_v17, %v7514_v12  ;;  %v6058_v60 = vperm.slane %v16841_v50, 6  ;;  %v6059_v12 = vperm.slane %v16841_v50, 7 }
 0x8e9   :  { %v13161_v63 = vld [vmem:[#allocation9 + $0x438] sm:$0xf0] }
 0x8ea   :  { %v15561_v35 = vld [vmem:[#allocation9 + $0x61c] sm:$0xf]  ;;  %v13164_v9 = vor.u32 %v15497_v46, %v13161_v63  ;;  %7732 = vmatpush.bf16.msrb.mxu1 %v12908_v2 }
 0x8eb   :  { %v13417_v6 = vld [vmem:[#allocation9 + $0x638] sm:$0xf0]  ;;  %7720 = vmatmul.bf16.vlgmr.msrb.gmra.mxu0 %v16813_v36 }
 0x8ec   :  { %v13420_v13 = vor.u32 %v15561_v35, %v13417_v6  ;;  %7745 = vmatpush.bf16.msrb.mxu2 %v13164_v9 }
 0x8ed   :  { %7733 = vmatmul.bf16.vlgmr.msrb.gmra.mxu1 %v16815_v38  ;;  %v7515_v22 = vpop.f32.mrf.mxu0 }
 0x8ee   :  { %7758 = vmatpush.bf16.msrb.mxu3 %v13420_v13 }
 0x8ef   :  { %7746 = vmatmul.bf16.vlgmr.msrb.gmra.mxu2 %v16817_v49  ;;  %v7539_v32 = vpop.f32.mrf.mxu2  ;;  %v7528_v23 = vpop.f32.mrf.mxu1  ;;  %v6056_v49 = vperm.slane %v16841_v50, 4 }
 0x8f0   :  { %v7540_v20 = vadd.f32 %v7539_v32, %v7527_v19 }
 0x8f1   :  { %7759 = vmatmul.bf16.vlgmr.msrb.gmra.mxu3 %v16819_v57  ;;  %v7552_v21 = vpop.f32.mrf.mxu3 }
 0x8f2   :  { %v7553_v4 = vadd.f32 %v7552_v21, %v7540_v20 }
 0x8f4   :  { %v7767_v24 = vmax.f32 %v7553_v4, 0.0 }
 0x8f6   :  { %v16868_v36 = vpack.c.bf16 %v7767_v24, %v7767_v24 }
 0x8f7   :  { %v7541_v38 = vpop.f32.mrf.mxu2 }
 0x8f9   :  { %v7554_v45 = vpop.f32.mrf.mxu3 }
 0x905   :  { %v7565_v57 = vpop.f32.mrf.mxu0 }
 0x906   :  { %v7566_v25 = vadd.f32 %v7565_v57, %v6056_v49 }
 0x907   :  { %v7578_v26 = vpop.f32.mrf.mxu1 }
 0x908   :  { %v7579_v39 = vadd.f32 %v7578_v26, %v7566_v25 }
 0x90d   :  { %v7567_v33 = vpop.f32.mrf.mxu0 }
 0x90f   :  { %v7591_v27 = vpop.f32.mrf.mxu2  ;;  %v7580_v34 = vpop.f32.mrf.mxu1 }
 0x910   :  { %v7592_v28 = vadd.f32 %v7591_v27, %v7579_v39 }
 0x911   :  { %v7604_v29 = vpop.f32.mrf.mxu3 }
 0x912   :  { %v7605_v30 = vadd.f32 %v7604_v29, %v7592_v28 }
 0x914   :  { %v7768_v10 = vmax.f32 %v7605_v30, 0.0 }
 0x916   :  { %v16871_v37 = vpack.c.bf16 %v7768_v10, %v7768_v10 }
 0x917   :  { %v7593_v40 = vpop.f32.mrf.mxu2 }
 0x919   :  { %v7606_v41 = vpop.f32.mrf.mxu3 }
 0x925   :  { %v7617_v8 = vpop.f32.mrf.mxu0 }
 0x926   :  { %v7618_v43 = vadd.f32 %v7617_v8, %v6057_v42 }
 0x927   :  { %v7630_v44 = vpop.f32.mrf.mxu1 }
 0x928   :  { %v7631_v16 = vadd.f32 %v7630_v44, %v7618_v43 }
 0x92d   :  { %v7619_v51 = vpop.f32.mrf.mxu0 }
 0x92f   :  { %v7643_v47 = vpop.f32.mrf.mxu2  ;;  %v7632_v52 = vpop.f32.mrf.mxu1 }
 0x930   :  { %v7644_v31 = vadd.f32 %v7643_v47, %v7631_v16 }
 0x931   :  { %v7656_v48 = vpop.f32.mrf.mxu3 }
 0x932   :  { %v7657_v5 = vadd.f32 %v7656_v48, %v7644_v31 }
 0x934   :  { %v7769_v54 = vmax.f32 %v7657_v5, 0.0 }
 0x936   :  { %v16874_v55 = vpack.c.bf16 %v7769_v54, %v7769_v54 }
 0x937   :  { %v7645_v58 = vpop.f32.mrf.mxu2 }
 0x939   :  { %v7658_v59 = vpop.f32.mrf.mxu3 }
 0x946   :  { %v7669_v61 = vpop.f32.mrf.mxu0 }
 0x947   :  { %v7670_v18 = vadd.f32 %v7669_v61, %v6058_v60 }
 0x948   :  { %v7682_v62 = vpop.f32.mrf.mxu1 }
 0x949   :  { %v7683_v46 = vadd.f32 %v7682_v62, %v7670_v18 }
 0x94e   :  { %v7671_v7 = vpop.f32.mrf.mxu0 }
 0x950   :  { %v7695_v63 = vpop.f32.mrf.mxu2  ;;  %v7684_v2 = vpop.f32.mrf.mxu1 }
 0x951   :  { %v7696_v0 = vadd.f32 %v7695_v63, %v7683_v46 }
 0x952   :  { %v7708_v35 = vpop.f32.mrf.mxu3 }
 0x953   :  { %v7709_v6 = vadd.f32 %v7708_v35, %v7696_v0 }
 0x955   :  { %v7770_v9 = vmax.f32 %v7709_v6, 0.0 }
 0x957   :  { %v16877_v13 = vpack.c.bf16 %v7770_v9, %v7770_v9 }
 0x958   :  { %v7697_v14 = vpop.f32.mrf.mxu2 }
 0x95a   :  { %v7710_v15 = vpop.f32.mrf.mxu3 }
 0x968   :  { %v7721_v17 = vpop.f32.mrf.mxu0 }
 0x969   :  { %v7722_v19 = vadd.f32 %v7721_v17, %v6059_v12 }
 0x96a   :  { %v7734_v32 = vpop.f32.mrf.mxu1 }
 0x96b   :  { %v7735_v20 = vadd.f32 %v7734_v32, %v7722_v19 }
 0x970   :  { %v7723_v23 = vpop.f32.mrf.mxu0 }
 0x972   :  { %v7747_v21 = vpop.f32.mrf.mxu2  ;;  %v7736_v24 = vpop.f32.mrf.mxu1 }
 0x973   :  { %v7748_v4 = vadd.f32 %v7747_v21, %v7735_v20 }
 0x974   :  { %v7760_v22 = vpop.f32.mrf.mxu3 }
 0x975   :  { %v7761_v38 = vadd.f32 %v7760_v22, %v7748_v4 }
 0x977   :  { %v7771_v45 = vmax.f32 %v7761_v38, 0.0 }
 0x979   :  { %v16880_v49 = vpack.c.bf16 %v7771_v45, %v7771_v45 }
 0x97a   :  { %v7749_v57 = vpop.f32.mrf.mxu2 }
 0x97c   :  { %v7762_v25 = vpop.f32.mrf.mxu3 }
 0x97d   :  { %16458 = dma.done.wait [#allocation11 + $0x8], 32768 }
 0x97e   :  { %16459 = vsyncadd [#allocation11 + $0x8], 4294934528  ;;  %9752 = vst [vmem:[#allocation30] sm:$0xff] %v16789_v3  ;;  %v13759_v50 = vld [vmem:[#allocation10 + $0xe0] sm:$0xf]  ;;  %s16483_s19 = smov [#allocation30]  }
 0x97f   :  { %9753 = vst [vmem:[#allocation32] sm:$0xff] %v16793_v11  ;;  %v15652_v26 = vld [vmem:[#allocation10 + $0xec] sm:$0xf0]  ;;  %v13887_v39 = vld [vmem:[#allocation10 + $0x1e0] sm:$0xf]  ;;  %s9770_s13 = sshll.u32 %s16483_s19, 4  ;;  %s9771_s13 = int_to_ptr.vmem [resolvable:$true] %s9770_s13 }
 0x980   :  { %v13760_v27 = vor.u32 %v15652_v26, %v13759_v50  ;;  %v15684_v28 = vld [vmem:[#allocation10 + $0x1ec] sm:$0xf0]  ;;  %v14015_v29 = vld [vmem:[#allocation10 + $0x2e0] sm:$0xf]  ;;  %s9772_s1 = sshll.u32 %s16971_s22, 4  ;;  %s16484_s26 = smov [#allocation32]   ;;  %s9773_s1 = int_to_ptr.hbm [resolvable:$true] %s9772_s1 }
 0x981   :  { %v15716_v30 = vld [vmem:[#allocation10 + $0x2ec] sm:$0xf0]  ;;  %v13888_v33 = vor.u32 %v15684_v28, %v13887_v39  ;;  %v14143_v10 = vld [vmem:[#allocation10 + $0x3e0] sm:$0xf]  ;;  %9775 = dma.vmem_to_hbm [thread:$0]  %s9771_s13, 128, %s9773_s1, [#allocation31]  }
 0x982   :  { %v14016_v34 = vor.u32 %v15716_v30, %v14015_v29  ;;  %v15748_v40 = vld [vmem:[#allocation10 + $0x3ec] sm:$0xf0]  ;;  %v13743_v41 = vld [vmem:[#allocation10 + $0xc0] sm:$0xf]  ;;  %9328 = vmatpush.bf16.msra.mxu0 %v13760_v27  ;;  %s9781_s2 = sshll.u32 %s16484_s26, 4  ;;  %s9783_s6 = sshll.u32 %s16972_s23, 4  ;;  %s9782_s2 = int_to_ptr.vmem [resolvable:$true] %s9781_s2  ;;  %s9784_s6 = int_to_ptr.hbm [resolvable:$true] %s9783_s6 }
 0x983   :  { %v14144_v42 = vor.u32 %v15748_v40, %v14143_v10  ;;  %v15648_v8 = vld [vmem:[#allocation10 + $0xcc] sm:$0xf0]  ;;  %v13871_v43 = vld [vmem:[#allocation10 + $0x1c0] sm:$0xf]  ;;  %9341 = vmatpush.bf16.msra.mxu1 %v13888_v33  ;;  %9786 = dma.vmem_to_hbm [thread:$0]  %s9782_s2, 128, %s9784_s6, [#allocation31]  }
 0x984   :  { %v15680_v44 = vld [vmem:[#allocation10 + $0x1cc] sm:$0xf0]  ;;  %9354 = vmatpush.bf16.msra.mxu2 %v14016_v34  ;;  %v13744_v3 = vor.u32 %v15648_v8, %v13743_v41  ;;  %v13999_v16 = vld [vmem:[#allocation10 + $0x2c0] sm:$0xf]  ;;  %s16485_s22 = smov [#allocation29]   ;;  %s9761_s28 = sshll.u32 %s16970_s21, 4  ;;  %s9762_s28 = int_to_ptr.hbm [resolvable:$true] %s9761_s28 }
 0x985   :  { %v13872_v11 = vor.u32 %v15680_v44, %v13871_v43  ;;  %v15712_v47 = vld [vmem:[#allocation10 + $0x2cc] sm:$0xf0]  ;;  %v14127_v31 = vld [vmem:[#allocation10 + $0x3c0] sm:$0xf]  ;;  %9367 = vmatpush.bf16.msra.mxu3 %v14144_v42  ;;  %s9759_s23 = sshll.u32 %s16485_s22, 4  ;;  %s9760_s23 = int_to_ptr.vmem [resolvable:$true] %s9759_s23 }
 0x986   :  { %v14000_v48 = vor.u32 %v15712_v47, %v13999_v16  ;;  %v15744_v5 = vld [vmem:[#allocation10 + $0x3cc] sm:$0xf0]  ;;  %v13727_v51 = vld [vmem:[#allocation10 + $0xa0] sm:$0xf]  ;;  %9329 = vmatpush.bf16.msra.mxu0 %v13744_v3 }
 0x987   :  { %v15644_v52 = vld [vmem:[#allocation10 + $0xac] sm:$0xf0]  ;;  %v14128_v54 = vor.u32 %v15744_v5, %v14127_v31  ;;  %v13855_v58 = vld [vmem:[#allocation10 + $0x1a0] sm:$0xf]  ;;  %9342 = vmatpush.bf16.msra.mxu1 %v13872_v11 }
 0x988   :  { %v15676_v59 = vld [vmem:[#allocation10 + $0x1ac] sm:$0xf0]  ;;  %v13983_v60 = vld [vmem:[#allocation10 + $0x2a0] sm:$0xf]  ;;  %v13728_v61 = vor.u32 %v15644_v52, %v13727_v51  ;;  %9355 = vmatpush.bf16.msra.mxu2 %v14000_v48 }
 0x989   :  { %v15708_v18 = vld [vmem:[#allocation10 + $0x2ac] sm:$0xf0]  ;;  %v14111_v62 = vld [vmem:[#allocation10 + $0x3a0] sm:$0xf]  ;;  %v13856_v63 = vor.u32 %v15676_v59, %v13855_v58  ;;  %9368 = vmatpush.bf16.msra.mxu3 %v14128_v54 }
 0x98a   :  { %v15740_v46 = vld [vmem:[#allocation10 + $0x3ac] sm:$0xf0]  ;;  %v13984_v0 = vor.u32 %v15708_v18, %v13983_v60  ;;  %v13711_v35 = vld [vmem:[#allocation10 + $0x80] sm:$0xf]  ;;  %9330 = vmatpush.bf16.msra.mxu0 %v13728_v61 }
 0x98b   :  { %v15640_v6 = vld [vmem:[#allocation10 + $0x8c] sm:$0xf0]  ;;  %v13839_v7 = vld [vmem:[#allocation10 + $0x180] sm:$0xf]  ;;  %v14112_v2 = vor.u32 %v15740_v46, %v14111_v62  ;;  %9343 = vmatpush.bf16.msra.mxu1 %v13856_v63 }
 0x98c   :  { %v15672_v9 = vld [vmem:[#allocation10 + $0x18c] sm:$0xf0]  ;;  %v13967_v14 = vld [vmem:[#allocation10 + $0x280] sm:$0xf]  ;;  %v13712_v19 = vor.u32 %v15640_v6, %v13711_v35  ;;  %9356 = vmatpush.bf16.msra.mxu2 %v13984_v0 }
 0x98d   :  { %v15704_v15 = vld [vmem:[#allocation10 + $0x28c] sm:$0xf0]  ;;  %v14095_v12 = vld [vmem:[#allocation10 + $0x380] sm:$0xf]  ;;  %v13840_v32 = vor.u32 %v15672_v9, %v13839_v7  ;;  %9369 = vmatpush.bf16.msra.mxu3 %v14112_v2 }
 0x98e   :  { %v15736_v17 = vld [vmem:[#allocation10 + $0x38c] sm:$0xf0]  ;;  %v13968_v20 = vor.u32 %v15704_v15, %v13967_v14  ;;  %v13695_v21 = vld [vmem:[#allocation10 + $0x60] sm:$0xf]  ;;  %9331 = vmatpush.bf16.msra.mxu0 %v13712_v19 }
 0x98f   :  { %v15636_v4 = vld [vmem:[#allocation10 + $0x6c] sm:$0xf0]  ;;  %v13823_v22 = vld [vmem:[#allocation10 + $0x160] sm:$0xf]  ;;  %v14096_v23 = vor.u32 %v15736_v17, %v14095_v12  ;;  %9344 = vmatpush.bf16.msra.mxu1 %v13840_v32 }
 0x990   :  { %v15668_v24 = vld [vmem:[#allocation10 + $0x16c] sm:$0xf0]  ;;  %v13951_v38 = vld [vmem:[#allocation10 + $0x260] sm:$0xf]  ;;  %v13696_v50 = vor.u32 %v15636_v4, %v13695_v21  ;;  %9357 = vmatpush.bf16.msra.mxu2 %v13968_v20 }
 0x991   :  { %v15700_v45 = vld [vmem:[#allocation10 + $0x26c] sm:$0xf0]  ;;  %v14079_v57 = vld [vmem:[#allocation10 + $0x360] sm:$0xf]  ;;  %v13824_v26 = vor.u32 %v15668_v24, %v13823_v22  ;;  %9370 = vmatpush.bf16.msra.mxu3 %v14096_v23 }
 0x992   :  { %v15732_v25 = vld [vmem:[#allocation10 + $0x36c] sm:$0xf0]  ;;  %v13952_v39 = vor.u32 %v15700_v45, %v13951_v38  ;;  %v13679_v27 = vld [vmem:[#allocation10 + $0x40] sm:$0xf]  ;;  %9332 = vmatpush.bf16.msra.mxu0 %v13696_v50 }
 0x993   :  { %v15632_v28 = vld [vmem:[#allocation10 + $0x4c] sm:$0xf0]  ;;  %v13807_v29 = vld [vmem:[#allocation10 + $0x140] sm:$0xf]  ;;  %v14080_v30 = vor.u32 %v15732_v25, %v14079_v57  ;;  %9345 = vmatpush.bf16.msra.mxu1 %v13824_v26 }
 0x994   :  { %v15664_v33 = vld [vmem:[#allocation10 + $0x14c] sm:$0xf0]  ;;  %v13935_v34 = vld [vmem:[#allocation10 + $0x240] sm:$0xf]  ;;  %v13680_v42 = vor.u32 %v15632_v28, %v13679_v27  ;;  %9358 = vmatpush.bf16.msra.mxu2 %v13952_v39 }
 0x995   :  { %v15696_v10 = vld [vmem:[#allocation10 + $0x24c] sm:$0xf0]  ;;  %v14063_v40 = vld [vmem:[#allocation10 + $0x340] sm:$0xf]  ;;  %v13808_v8 = vor.u32 %v15664_v33, %v13807_v29  ;;  %9371 = vmatpush.bf16.msra.mxu3 %v14080_v30 }
 0x996   :  { %v15728_v41 = vld [vmem:[#allocation10 + $0x34c] sm:$0xf0]  ;;  %v13936_v43 = vor.u32 %v15696_v10, %v13935_v34  ;;  %v13663_v44 = vld [vmem:[#allocation10 + $0x20] sm:$0xf]  ;;  %9333 = vmatpush.bf16.msra.mxu0 %v13680_v42 }
 0x997   :  { %v15628_v3 = vld [vmem:[#allocation10 + $0x2c] sm:$0xf0]  ;;  %v13791_v11 = vld [vmem:[#allocation10 + $0x120] sm:$0xf]  ;;  %v14064_v16 = vor.u32 %v15728_v41, %v14063_v40  ;;  %9346 = vmatpush.bf16.msra.mxu1 %v13808_v8 }
 0x998   :  { %v15660_v47 = vld [vmem:[#allocation10 + $0x12c] sm:$0xf0]  ;;  %v13919_v31 = vld [vmem:[#allocation10 + $0x220] sm:$0xf]  ;;  %v13664_v52 = vor.u32 %v15628_v3, %v13663_v44  ;;  %9359 = vmatpush.bf16.msra.mxu2 %v13936_v43 }
 0x999   :  { %v15692_v48 = vld [vmem:[#allocation10 + $0x22c] sm:$0xf0]  ;;  %v14047_v5 = vld [vmem:[#allocation10 + $0x320] sm:$0xf]  ;;  %v13792_v59 = vor.u32 %v15660_v47, %v13791_v11  ;;  %9372 = vmatpush.bf16.msra.mxu3 %v14064_v16 }
 0x99a   :  { %v15724_v51 = vld [vmem:[#allocation10 + $0x32c] sm:$0xf0]  ;;  %v13647_v54 = vld [vmem:[#allocation10] sm:$0xf]  ;;  %v13920_v60 = vor.u32 %v15692_v48, %v13919_v31  ;;  %9334 = vmatpush.bf16.msra.mxu0 %v13664_v52 }
 0x99b   :  { %v15624_v58 = vld [vmem:[#allocation10 + $0xc] sm:$0xf0]  ;;  %v13775_v61 = vld [vmem:[#allocation10 + $0x100] sm:$0xf]  ;;  %v14048_v46 = vor.u32 %v15724_v51, %v14047_v5  ;;  %9347 = vmatpush.bf16.msra.mxu1 %v13792_v59 }
 0x99c   :  { %v15656_v18 = vld [vmem:[#allocation10 + $0x10c] sm:$0xf0]  ;;  %v13903_v62 = vld [vmem:[#allocation10 + $0x200] sm:$0xf]  ;;  %v13648_v9 = vor.u32 %v15624_v58, %v13647_v54  ;;  %9360 = vmatpush.bf16.msra.mxu2 %v13920_v60 }
 0x99d   :  { %v15688_v63 = vld [vmem:[#allocation10 + $0x20c] sm:$0xf0]  ;;  %v14031_v0 = vld [vmem:[#allocation10 + $0x300] sm:$0xf]  ;;  %v13776_v17 = vor.u32 %v15656_v18, %v13775_v61  ;;  %9373 = vmatpush.bf16.msra.mxu3 %v14048_v46 }
 0x99e   :  { %v15720_v35 = vld [vmem:[#allocation10 + $0x30c] sm:$0xf0]  ;;  %v14271_v6 = vld [vmem:[#allocation10 + $0x4e0] sm:$0xf]  ;;  %v13904_v19 = vor.u32 %v15688_v63, %v13903_v62  ;;  %9335 = vmatpush.bf16.msra.mxu0 %v13648_v9 }
 0x99f   :  { %v15780_v7 = vld [vmem:[#allocation10 + $0x4ec] sm:$0xf0]  ;;  %v14399_v2 = vld [vmem:[#allocation10 + $0x5e0] sm:$0xf]  ;;  %v14032_v21 = vor.u32 %v15720_v35, %v14031_v0  ;;  %9348 = vmatpush.bf16.msra.mxu1 %v13776_v17 }
 0x9a0   :  { %v15812_v14 = vld [vmem:[#allocation10 + $0x5ec] sm:$0xf0]  ;;  %v14527_v15 = vld [vmem:[#allocation10 + $0x6e0] sm:$0xf]  ;;  %v14272_v4 = vor.u32 %v15780_v7, %v14271_v6  ;;  %9361 = vmatpush.bf16.msra.mxu2 %v13904_v19 }
 0x9a1   :  { %v15844_v12 = vld [vmem:[#allocation10 + $0x6ec] sm:$0xf0]  ;;  %v14655_v32 = vld [vmem:[#allocation10 + $0x7e0] sm:$0xf]  ;;  %v14400_v22 = vor.u32 %v15812_v14, %v14399_v2  ;;  %9374 = vmatpush.bf16.msra.mxu3 %v14032_v21  ;;  %9336 = vmatmul.bf16.vlgmr.msra.gmra.mxu0 %v16847_v56 }
 0x9a2   :  { %v15876_v20 = vld [vmem:[#allocation10 + $0x7ec] sm:$0xf0]  ;;  %v14528_v23 = vor.u32 %v15844_v12, %v14527_v15  ;;  %v14255_v24 = vld [vmem:[#allocation10 + $0x4c0] sm:$0xf]  ;;  %9380 = vmatpush.bf16.msrb.mxu0 %v14272_v4  ;;  %9349 = vmatmul.bf16.vlgmr.msra.gmra.mxu1 %v16854_v1 }
 0x9a3   :  { %v15776_v38 = vld [vmem:[#allocation10 + $0x4cc] sm:$0xf0]  ;;  %v14383_v45 = vld [vmem:[#allocation10 + $0x5c0] sm:$0xf]  ;;  %v14656_v57 = vor.u32 %v15876_v20, %v14655_v32  ;;  %9393 = vmatpush.bf16.msrb.mxu1 %v14400_v22  ;;  %9362 = vmatmul.bf16.vlgmr.msra.gmra.mxu2 %v16861_v53 }
 0x9a4   :  { %v15808_v25 = vld [vmem:[#allocation10 + $0x5cc] sm:$0xf0]  ;;  %v14511_v50 = vld [vmem:[#allocation10 + $0x6c0] sm:$0xf]  ;;  %v14256_v28 = vor.u32 %v15776_v38, %v14255_v24  ;;  %9406 = vmatpush.bf16.msrb.mxu2 %v14528_v23  ;;  %9375 = vmatmul.bf16.vlgmr.msra.gmra.mxu3 %v16868_v36 }
 0x9a5   :  { %v15840_v26 = vld [vmem:[#allocation10 + $0x6cc] sm:$0xf0]  ;;  %v14639_v39 = vld [vmem:[#allocation10 + $0x7c0] sm:$0xf]  ;;  %v14384_v29 = vor.u32 %v15808_v25, %v14383_v45  ;;  %9419 = vmatpush.bf16.msrb.mxu3 %v14656_v57 }
 0x9a6   :  { %v15872_v27 = vld [vmem:[#allocation10 + $0x7cc] sm:$0xf0]  ;;  %v14512_v30 = vor.u32 %v15840_v26, %v14511_v50  ;;  %v14239_v33 = vld [vmem:[#allocation10 + $0x4a0] sm:$0xf]  ;;  %9381 = vmatpush.bf16.msrb.mxu0 %v14256_v28 }
 0x9a7   :  { %v15772_v34 = vld [vmem:[#allocation10 + $0x4ac] sm:$0xf0]  ;;  %v14367_v10 = vld [vmem:[#allocation10 + $0x5a0] sm:$0xf]  ;;  %v14640_v40 = vor.u32 %v15872_v27, %v14639_v39  ;;  %9394 = vmatpush.bf16.msrb.mxu1 %v14384_v29 }
 0x9a8   :  { %v15804_v41 = vld [vmem:[#allocation10 + $0x5ac] sm:$0xf0]  ;;  %v14495_v42 = vld [vmem:[#allocation10 + $0x6a0] sm:$0xf]  ;;  %v14240_v3 = vor.u32 %v15772_v34, %v14239_v33  ;;  %9407 = vmatpush.bf16.msrb.mxu2 %v14512_v30 }
 0x9a9   :  { %v15836_v8 = vld [vmem:[#allocation10 + $0x6ac] sm:$0xf0]  ;;  %v14623_v43 = vld [vmem:[#allocation10 + $0x7a0] sm:$0xf]  ;;  %v14368_v11 = vor.u32 %v15804_v41, %v14367_v10  ;;  %9420 = vmatpush.bf16.msrb.mxu3 %v14640_v40 }
 0x9aa   :  { %v15868_v44 = vld [vmem:[#allocation10 + $0x7ac] sm:$0xf0]  ;;  %v14496_v16 = vor.u32 %v15836_v8, %v14495_v42  ;;  %v14223_v47 = vld [vmem:[#allocation10 + $0x480] sm:$0xf]  ;;  %9382 = vmatpush.bf16.msrb.mxu0 %v14240_v3 }
 0x9ab   :  { %v15768_v31 = vld [vmem:[#allocation10 + $0x48c] sm:$0xf0]  ;;  %v14351_v48 = vld [vmem:[#allocation10 + $0x580] sm:$0xf]  ;;  %v14624_v5 = vor.u32 %v15868_v44, %v14623_v43  ;;  %9395 = vmatpush.bf16.msrb.mxu1 %v14368_v11 }
 0x9ac   :  { %v15800_v51 = vld [vmem:[#allocation10 + $0x58c] sm:$0xf0]  ;;  %v14479_v52 = vld [vmem:[#allocation10 + $0x680] sm:$0xf]  ;;  %v14224_v60 = vor.u32 %v15768_v31, %v14223_v47  ;;  %9408 = vmatpush.bf16.msrb.mxu2 %v14496_v16  ;;  %v15650_v31 = vld [vmem:[#allocation10 + $0xe4] sm:$0xf] }
 0x9ad   :  { %v15832_v54 = vld [vmem:[#allocation10 + $0x68c] sm:$0xf0]  ;;  %v14607_v58 = vld [vmem:[#allocation10 + $0x780] sm:$0xf]  ;;  %v14352_v61 = vor.u32 %v15800_v51, %v14351_v48  ;;  %9421 = vmatpush.bf16.msrb.mxu3 %v14624_v5  ;;  %v13761_v48 = vld [vmem:[#allocation10 + $0xf0] sm:$0xf0] }
 0x9ae   :  { %v15864_v59 = vld [vmem:[#allocation10 + $0x78c] sm:$0xf0]  ;;  %v14480_v18 = vor.u32 %v15832_v54, %v14479_v52  ;;  %v14207_v62 = vld [vmem:[#allocation10 + $0x460] sm:$0xf]  ;;  %9383 = vmatpush.bf16.msrb.mxu0 %v14224_v60  ;;  %v15682_v5 = vld [vmem:[#allocation10 + $0x1e4] sm:$0xf] }
 0x9af   :  { %v15764_v46 = vld [vmem:[#allocation10 + $0x46c] sm:$0xf0]  ;;  %v14335_v63 = vld [vmem:[#allocation10 + $0x560] sm:$0xf]  ;;  %v14608_v0 = vor.u32 %v15864_v59, %v14607_v58  ;;  %9396 = vmatpush.bf16.msrb.mxu1 %v14352_v61  ;;  %v13889_v52 = vld [vmem:[#allocation10 + $0x1f0] sm:$0xf0] }
 0x9b0   :  { %v15796_v35 = vld [vmem:[#allocation10 + $0x56c] sm:$0xf0]  ;;  %v14463_v6 = vld [vmem:[#allocation10 + $0x660] sm:$0xf]  ;;  %v14208_v14 = vor.u32 %v15764_v46, %v14207_v62  ;;  %9409 = vmatpush.bf16.msrb.mxu2 %v14480_v18  ;;  %v15714_v54 = vld [vmem:[#allocation10 + $0x2e4] sm:$0xf]  ;;  %v13764_v46 = vor.u32 %v15650_v31, %v13761_v48 }
 0x9b1   :  { %v15828_v7 = vld [vmem:[#allocation10 + $0x66c] sm:$0xf0]  ;;  %v14591_v2 = vld [vmem:[#allocation10 + $0x760] sm:$0xf]  ;;  %v14336_v15 = vor.u32 %v15796_v35, %v14335_v63  ;;  %9422 = vmatpush.bf16.msrb.mxu3 %v14608_v0  ;;  %v14017_v58 = vld [vmem:[#allocation10 + $0x2f0] sm:$0xf0]  ;;  %v13892_v63 = vor.u32 %v15682_v5, %v13889_v52 }
 0x9b2   :  { %v15860_v9 = vld [vmem:[#allocation10 + $0x76c] sm:$0xf0]  ;;  %v14464_v12 = vor.u32 %v15828_v7, %v14463_v6  ;;  %v14191_v17 = vld [vmem:[#allocation10 + $0x440] sm:$0xf]  ;;  %9384 = vmatpush.bf16.msrb.mxu0 %v14208_v14  ;;  %v15746_v61 = vld [vmem:[#allocation10 + $0x3e4] sm:$0xf]  ;;  %v14020_v0 = vor.u32 %v15714_v54, %v14017_v58 }
 0x9b3   :  { %v15760_v19 = vld [vmem:[#allocation10 + $0x44c] sm:$0xf0]  ;;  %v14319_v32 = vld [vmem:[#allocation10 + $0x540] sm:$0xf]  ;;  %v14592_v20 = vor.u32 %v15860_v9, %v14591_v2  ;;  %9397 = vmatpush.bf16.msrb.mxu1 %v14336_v15  ;;  %v14145_v18 = vld [vmem:[#allocation10 + $0x3f0] sm:$0xf0] }
 0x9b4   :  { %v15792_v21 = vld [vmem:[#allocation10 + $0x54c] sm:$0xf0]  ;;  %v14447_v4 = vld [vmem:[#allocation10 + $0x640] sm:$0xf]  ;;  %v14192_v38 = vor.u32 %v15760_v19, %v14191_v17  ;;  %9410 = vmatpush.bf16.msrb.mxu2 %v14464_v12  ;;  %v15646_v35 = vld [vmem:[#allocation10 + $0xc4] sm:$0xf]  ;;  %v14148_v2 = vor.u32 %v15746_v61, %v14145_v18 }
 0x9b5   :  { %v15824_v22 = vld [vmem:[#allocation10 + $0x64c] sm:$0xf0]  ;;  %v14575_v23 = vld [vmem:[#allocation10 + $0x740] sm:$0xf]  ;;  %v14320_v45 = vor.u32 %v15792_v21, %v14319_v32  ;;  %9423 = vmatpush.bf16.msrb.mxu3 %v14592_v20  ;;  %v13745_v6 = vld [vmem:[#allocation10 + $0xd0] sm:$0xf0] }
 0x9b6   :  { %v15856_v24 = vld [vmem:[#allocation10 + $0x74c] sm:$0xf0]  ;;  %v14448_v57 = vor.u32 %v15824_v22, %v14447_v4  ;;  %v14175_v25 = vld [vmem:[#allocation10 + $0x420] sm:$0xf]  ;;  %9385 = vmatpush.bf16.msrb.mxu0 %v14192_v38  ;;  %v15678_v7 = vld [vmem:[#allocation10 + $0x1c4] sm:$0xf]  ;;  %v13748_v19 = vor.u32 %v15646_v35, %v13745_v6 }
 0x9b7   :  { %v15756_v50 = vld [vmem:[#allocation10 + $0x42c] sm:$0xf0]  ;;  %v14303_v26 = vld [vmem:[#allocation10 + $0x520] sm:$0xf]  ;;  %v14576_v39 = vor.u32 %v15856_v24, %v14575_v23  ;;  %9398 = vmatpush.bf16.msrb.mxu1 %v14320_v45  ;;  %v13873_v9 = vld [vmem:[#allocation10 + $0x1d0] sm:$0xf0] }
 0x9b8   :  { %v15788_v27 = vld [vmem:[#allocation10 + $0x52c] sm:$0xf0]  ;;  %v14431_v28 = vld [vmem:[#allocation10 + $0x620] sm:$0xf]  ;;  %v14176_v34 = vor.u32 %v15756_v50, %v14175_v25  ;;  %9411 = vmatpush.bf16.msrb.mxu2 %v14448_v57  ;;  %v15710_v14 = vld [vmem:[#allocation10 + $0x2c4] sm:$0xf]  ;;  %v13876_v32 = vor.u32 %v15678_v7, %v13873_v9 }
 0x9b9   :  { %v15820_v29 = vld [vmem:[#allocation10 + $0x62c] sm:$0xf0]  ;;  %v14559_v30 = vld [vmem:[#allocation10 + $0x720] sm:$0xf]  ;;  %v14304_v41 = vor.u32 %v15788_v27, %v14303_v26  ;;  %9424 = vmatpush.bf16.msrb.mxu3 %v14576_v39  ;;  %v14001_v15 = vld [vmem:[#allocation10 + $0x2d0] sm:$0xf0] }
 0x9ba   :  { %v15852_v33 = vld [vmem:[#allocation10 + $0x72c] sm:$0xf0]  ;;  %v14159_v10 = vld [vmem:[#allocation10 + $0x400] sm:$0xf]  ;;  %v14432_v42 = vor.u32 %v15820_v29, %v14431_v28  ;;  %9386 = vmatpush.bf16.msrb.mxu0 %v14176_v34  ;;  %v15742_v12 = vld [vmem:[#allocation10 + $0x3c4] sm:$0xf]  ;;  %v14004_v20 = vor.u32 %v15710_v14, %v14001_v15 }
 0x9bb   :  { %v15752_v40 = vld [vmem:[#allocation10 + $0x40c] sm:$0xf0]  ;;  %v14287_v8 = vld [vmem:[#allocation10 + $0x500] sm:$0xf]  ;;  %v14560_v3 = vor.u32 %v15852_v33, %v14559_v30  ;;  %9399 = vmatpush.bf16.msrb.mxu1 %v14304_v41  ;;  %v14129_v17 = vld [vmem:[#allocation10 + $0x3d0] sm:$0xf0] }
 0x9bc   :  { %v15784_v43 = vld [vmem:[#allocation10 + $0x50c] sm:$0xf0]  ;;  %v14415_v44 = vld [vmem:[#allocation10 + $0x600] sm:$0xf]  ;;  %v14160_v51 = vor.u32 %v15752_v40, %v14159_v10  ;;  %9412 = vmatpush.bf16.msrb.mxu2 %v14432_v42  ;;  %v15642_v21 = vld [vmem:[#allocation10 + $0xa4] sm:$0xf]  ;;  %v14132_v23 = vor.u32 %v15742_v12, %v14129_v17 }
 0x9bd   :  { %v15816_v11 = vld [vmem:[#allocation10 + $0x60c] sm:$0xf0]  ;;  %v14543_v16 = vld [vmem:[#allocation10 + $0x700] sm:$0xf]  ;;  %v14288_v59 = vor.u32 %v15784_v43, %v14287_v8  ;;  %9425 = vmatpush.bf16.msrb.mxu3 %v14560_v3  ;;  %v13729_v4 = vld [vmem:[#allocation10 + $0xb0] sm:$0xf0] }
 0x9be   :  { %v15848_v47 = vld [vmem:[#allocation10 + $0x70c] sm:$0xf0]  ;;  %v14416_v60 = vor.u32 %v15816_v11, %v14415_v44  ;;  %9387 = vmatpush.bf16.msrb.mxu0 %v14160_v51  ;;  %v15674_v22 = vld [vmem:[#allocation10 + $0x1a4] sm:$0xf]  ;;  %v13857_v24 = vld [vmem:[#allocation10 + $0x1b0] sm:$0xf0]  ;;  %v13732_v50 = vor.u32 %v15642_v21, %v13729_v4 }
 0x9bf   :  { %v14544_v62 = vor.u32 %v15848_v47, %v14543_v16  ;;  %9400 = vmatpush.bf16.msrb.mxu1 %v14288_v59  ;;  %v15706_v38 = vld [vmem:[#allocation10 + $0x2a4] sm:$0xf]  ;;  %v13985_v45 = vld [vmem:[#allocation10 + $0x2b0] sm:$0xf0]  ;;  %v13860_v26 = vor.u32 %v15674_v22, %v13857_v24 }
 0x9c0   :  { %9413 = vmatpush.bf16.msrb.mxu2 %v14416_v60  ;;  %v15738_v57 = vld [vmem:[#allocation10 + $0x3a4] sm:$0xf]  ;;  %v14113_v25 = vld [vmem:[#allocation10 + $0x3b0] sm:$0xf0]  ;;  %v13988_v39 = vor.u32 %v15706_v38, %v13985_v45 }
 0x9c1   :  { %9426 = vmatpush.bf16.msrb.mxu3 %v14544_v62  ;;  %9388 = vmatmul.bf16.vlgmr.msrb.gmra.mxu0 %v16871_v37  ;;  %v15638_v27 = vld [vmem:[#allocation10 + $0x84] sm:$0xf]  ;;  %v13713_v28 = vld [vmem:[#allocation10 + $0x90] sm:$0xf0]  ;;  %v14116_v30 = vor.u32 %v15738_v57, %v14113_v25 }
 0x9c2   :  { %9432 = vmatpush.bf16.msra.mxu0 %v13764_v46  ;;  %9401 = vmatmul.bf16.vlgmr.msrb.gmra.mxu1 %v16874_v55  ;;  %v15670_v29 = vld [vmem:[#allocation10 + $0x184] sm:$0xf]  ;;  %v13841_v33 = vld [vmem:[#allocation10 + $0x190] sm:$0xf0]  ;;  %v13716_v42 = vor.u32 %v15638_v27, %v13713_v28 }
 0x9c3   :  { %9445 = vmatpush.bf16.msra.mxu1 %v13892_v63  ;;  %9414 = vmatmul.bf16.vlgmr.msrb.gmra.mxu2 %v16877_v13  ;;  %v15702_v34 = vld [vmem:[#allocation10 + $0x284] sm:$0xf]  ;;  %v13969_v10 = vld [vmem:[#allocation10 + $0x290] sm:$0xf0]  ;;  %v13844_v8 = vor.u32 %v15670_v29, %v13841_v33 }
 0x9c4   :  { %9458 = vmatpush.bf16.msra.mxu2 %v14020_v0  ;;  %9427 = vmatmul.bf16.vlgmr.msrb.gmra.mxu3 %v16880_v49  ;;  %v15734_v40 = vld [vmem:[#allocation10 + $0x384] sm:$0xf]  ;;  %v14097_v41 = vld [vmem:[#allocation10 + $0x390] sm:$0xf0]  ;;  %v13972_v43 = vor.u32 %v15702_v34, %v13969_v10 }
 0x9c5   :  { %9471 = vmatpush.bf16.msra.mxu3 %v14148_v2  ;;  %v15634_v44 = vld [vmem:[#allocation10 + $0x64] sm:$0xf]  ;;  %v13697_v3 = vld [vmem:[#allocation10 + $0x70] sm:$0xf0]  ;;  %v14100_v16 = vor.u32 %v15734_v40, %v14097_v41 }
 0x9c6   :  { %9433 = vmatpush.bf16.msra.mxu0 %v13748_v19  ;;  %v15666_v11 = vld [vmem:[#allocation10 + $0x164] sm:$0xf]  ;;  %v13825_v47 = vld [vmem:[#allocation10 + $0x170] sm:$0xf0]  ;;  %v13700_v52 = vor.u32 %v15634_v44, %v13697_v3 }
 0x9c7   :  { %9446 = vmatpush.bf16.msra.mxu1 %v13876_v32  ;;  %v15698_v31 = vld [vmem:[#allocation10 + $0x264] sm:$0xf]  ;;  %v13953_v48 = vld [vmem:[#allocation10 + $0x270] sm:$0xf0]  ;;  %v13828_v54 = vor.u32 %v15666_v11, %v13825_v47 }
 0x9c8   :  { %9459 = vmatpush.bf16.msra.mxu2 %v14004_v20  ;;  %v15730_v5 = vld [vmem:[#allocation10 + $0x364] sm:$0xf]  ;;  %v14081_v51 = vld [vmem:[#allocation10 + $0x370] sm:$0xf0]  ;;  %v13956_v58 = vor.u32 %v15698_v31, %v13953_v48 }
 0x9c9   :  { %9472 = vmatpush.bf16.msra.mxu3 %v14132_v23  ;;  %v15630_v59 = vld [vmem:[#allocation10 + $0x44] sm:$0xf]  ;;  %v13681_v60 = vld [vmem:[#allocation10 + $0x50] sm:$0xf0]  ;;  %v14084_v18 = vor.u32 %v15730_v5, %v14081_v51 }
 0x9ca   :  { %9434 = vmatpush.bf16.msra.mxu0 %v13732_v50  ;;  %v15662_v61 = vld [vmem:[#allocation10 + $0x144] sm:$0xf]  ;;  %v13809_v62 = vld [vmem:[#allocation10 + $0x150] sm:$0xf0]  ;;  %v13684_v6 = vor.u32 %v15630_v59, %v13681_v60 }
 0x9cb   :  { %9447 = vmatpush.bf16.msra.mxu1 %v13860_v26  ;;  %v15694_v46 = vld [vmem:[#allocation10 + $0x244] sm:$0xf]  ;;  %v13937_v63 = vld [vmem:[#allocation10 + $0x250] sm:$0xf0]  ;;  %v13812_v7 = vor.u32 %v15662_v61, %v13809_v62 }
 0x9cc   :  { %9460 = vmatpush.bf16.msra.mxu2 %v13988_v39  ;;  %v15726_v0 = vld [vmem:[#allocation10 + $0x344] sm:$0xf]  ;;  %v14065_v35 = vld [vmem:[#allocation10 + $0x350] sm:$0xf0]  ;;  %v13940_v2 = vor.u32 %v15694_v46, %v13937_v63 }
 0x9cd   :  { %9473 = vmatpush.bf16.msra.mxu3 %v14116_v30  ;;  %v15626_v9 = vld [vmem:[#allocation10 + $0x24] sm:$0xf]  ;;  %v13665_v14 = vld [vmem:[#allocation10 + $0x30] sm:$0xf0]  ;;  %v14068_v12 = vor.u32 %v15726_v0, %v14065_v35 }
 0x9ce   :  { %9435 = vmatpush.bf16.msra.mxu0 %v13716_v42  ;;  %v15658_v15 = vld [vmem:[#allocation10 + $0x124] sm:$0xf]  ;;  %v13793_v17 = vld [vmem:[#allocation10 + $0x130] sm:$0xf0]  ;;  %v13668_v4 = vor.u32 %v15626_v9, %v13665_v14 }
 0x9cf   :  { %9448 = vmatpush.bf16.msra.mxu1 %v13844_v8  ;;  %v15690_v19 = vld [vmem:[#allocation10 + $0x224] sm:$0xf]  ;;  %v13921_v32 = vld [vmem:[#allocation10 + $0x230] sm:$0xf0]  ;;  %v13796_v24 = vor.u32 %v15658_v15, %v13793_v17 }
 0x9d0   :  { %9461 = vmatpush.bf16.msra.mxu2 %v13972_v43  ;;  %v15722_v20 = vld [vmem:[#allocation10 + $0x324] sm:$0xf]  ;;  %v14049_v21 = vld [vmem:[#allocation10 + $0x330] sm:$0xf0]  ;;  %v13924_v38 = vor.u32 %v15690_v19, %v13921_v32 }
 0x9d1   :  { %9474 = vmatpush.bf16.msra.mxu3 %v14100_v16  ;;  %v15622_v22 = vld [vmem:[#allocation10 + $0x4] sm:$0xf]  ;;  %v13649_v23 = vld [vmem:[#allocation10 + $0x10] sm:$0xf0]  ;;  %v14052_v50 = vor.u32 %v15722_v20, %v14049_v21 }
 0x9d2   :  { %9436 = vmatpush.bf16.msra.mxu0 %v13700_v52  ;;  %v15654_v45 = vld [vmem:[#allocation10 + $0x104] sm:$0xf]  ;;  %v13777_v57 = vld [vmem:[#allocation10 + $0x110] sm:$0xf0]  ;;  %v13652_v33 = vor.u32 %v15622_v22, %v13649_v23 }
 0x9d3   :  { %9449 = vmatpush.bf16.msra.mxu1 %v13828_v54  ;;  %v15686_v25 = vld [vmem:[#allocation10 + $0x204] sm:$0xf]  ;;  %v13905_v26 = vld [vmem:[#allocation10 + $0x210] sm:$0xf0]  ;;  %v13780_v41 = vor.u32 %v15654_v45, %v13777_v57 }
 0x9d4   :  { %9462 = vmatpush.bf16.msra.mxu2 %v13956_v58  ;;  %v15718_v39 = vld [vmem:[#allocation10 + $0x304] sm:$0xf]  ;;  %v14033_v27 = vld [vmem:[#allocation10 + $0x310] sm:$0xf0]  ;;  %v13908_v42 = vor.u32 %v15686_v25, %v13905_v26 }
 0x9d5   :  { %9475 = vmatpush.bf16.msra.mxu3 %v14084_v18  ;;  %v15778_v28 = vld [vmem:[#allocation10 + $0x4e4] sm:$0xf]  ;;  %v14273_v29 = vld [vmem:[#allocation10 + $0x4f0] sm:$0xf0]  ;;  %v14036_v44 = vor.u32 %v15718_v39, %v14033_v27 }
 0x9d6   :  { %9437 = vmatpush.bf16.msra.mxu0 %v13684_v6  ;;  %v15810_v30 = vld [vmem:[#allocation10 + $0x5e4] sm:$0xf]  ;;  %v14401_v34 = vld [vmem:[#allocation10 + $0x5f0] sm:$0xf0]  ;;  %v14276_v3 = vor.u32 %v15778_v28, %v14273_v29 }
 0x9d7   :  { %9450 = vmatpush.bf16.msra.mxu1 %v13812_v7  ;;  %v15842_v10 = vld [vmem:[#allocation10 + $0x6e4] sm:$0xf]  ;;  %v14529_v40 = vld [vmem:[#allocation10 + $0x6f0] sm:$0xf0]  ;;  %v14404_v11 = vor.u32 %v15810_v30, %v14401_v34 }
 0x9d8   :  { %9463 = vmatpush.bf16.msra.mxu2 %v13940_v2  ;;  %v15874_v8 = vld [vmem:[#allocation10 + $0x7e4] sm:$0xf]  ;;  %v14657_v43 = vld [vmem:[#allocation10 + $0x7f0] sm:$0xf0]  ;;  %v14532_v16 = vor.u32 %v15842_v10, %v14529_v40 }
 0x9d9   :  { %9476 = vmatpush.bf16.msra.mxu3 %v14068_v12  ;;  %v15774_v47 = vld [vmem:[#allocation10 + $0x4c4] sm:$0xf]  ;;  %v14257_v31 = vld [vmem:[#allocation10 + $0x4d0] sm:$0xf0]  ;;  %v14660_v5 = vor.u32 %v15874_v8, %v14657_v43 }
 0x9da   :  { %9438 = vmatpush.bf16.msra.mxu0 %v13668_v4  ;;  %v15806_v48 = vld [vmem:[#allocation10 + $0x5c4] sm:$0xf]  ;;  %v14385_v51 = vld [vmem:[#allocation10 + $0x5d0] sm:$0xf0]  ;;  %v14260_v60 = vor.u32 %v15774_v47, %v14257_v31 }
 0x9db   :  { %9451 = vmatpush.bf16.msra.mxu1 %v13796_v24  ;;  %v15838_v52 = vld [vmem:[#allocation10 + $0x6c4] sm:$0xf]  ;;  %v14513_v54 = vld [vmem:[#allocation10 + $0x6d0] sm:$0xf0]  ;;  %v14388_v61 = vor.u32 %v15806_v48, %v14385_v51 }
 0x9dc   :  { %9464 = vmatpush.bf16.msra.mxu2 %v13924_v38  ;;  %v15870_v58 = vld [vmem:[#allocation10 + $0x7c4] sm:$0xf]  ;;  %v14641_v59 = vld [vmem:[#allocation10 + $0x7d0] sm:$0xf0]  ;;  %v14516_v18 = vor.u32 %v15838_v52, %v14513_v54 }
 0x9dd   :  { %9477 = vmatpush.bf16.msra.mxu3 %v14052_v50  ;;  %v15770_v62 = vld [vmem:[#allocation10 + $0x4a4] sm:$0xf]  ;;  %v14241_v46 = vld [vmem:[#allocation10 + $0x4b0] sm:$0xf0]  ;;  %v14644_v0 = vor.u32 %v15870_v58, %v14641_v59 }
 0x9de   :  { %9439 = vmatpush.bf16.msra.mxu0 %v13652_v33  ;;  %v15802_v63 = vld [vmem:[#allocation10 + $0x5a4] sm:$0xf]  ;;  %v14369_v35 = vld [vmem:[#allocation10 + $0x5b0] sm:$0xf0]  ;;  %v14244_v14 = vor.u32 %v15770_v62, %v14241_v46 }
 0x9df   :  { %9452 = vmatpush.bf16.msra.mxu1 %v13780_v41  ;;  %v15834_v6 = vld [vmem:[#allocation10 + $0x6a4] sm:$0xf]  ;;  %v14497_v7 = vld [vmem:[#allocation10 + $0x6b0] sm:$0xf0]  ;;  %v14372_v15 = vor.u32 %v15802_v63, %v14369_v35 }
 0x9e0   :  { %9465 = vmatpush.bf16.msra.mxu2 %v13908_v42  ;;  %v15866_v2 = vld [vmem:[#allocation10 + $0x7a4] sm:$0xf]  ;;  %v14625_v9 = vld [vmem:[#allocation10 + $0x7b0] sm:$0xf0]  ;;  %v14500_v12 = vor.u32 %v15834_v6, %v14497_v7 }
 0x9e1   :  { %9478 = vmatpush.bf16.msra.mxu3 %v14036_v44  ;;  %9440 = vmatmul.bf16.vlgmr.msra.gmra.mxu0 %v16847_v56  ;;  %v15766_v17 = vld [vmem:[#allocation10 + $0x484] sm:$0xf]  ;;  %v14225_v19 = vld [vmem:[#allocation10 + $0x490] sm:$0xf0]  ;;  %v14628_v20 = vor.u32 %v15866_v2, %v14625_v9 }
 0x9e2   :  { %9484 = vmatpush.bf16.msrb.mxu0 %v14276_v3  ;;  %9453 = vmatmul.bf16.vlgmr.msra.gmra.mxu1 %v16854_v1  ;;  %v15798_v32 = vld [vmem:[#allocation10 + $0x584] sm:$0xf]  ;;  %v14353_v21 = vld [vmem:[#allocation10 + $0x590] sm:$0xf0]  ;;  %v14228_v38 = vor.u32 %v15766_v17, %v14225_v19  ;;  %v13767_v19 = vld [vmem:[#allocation10 + $0xe8] sm:$0xf] }
 0x9e3   :  { %9497 = vmatpush.bf16.msrb.mxu1 %v14404_v11  ;;  %9466 = vmatmul.bf16.vlgmr.msra.gmra.mxu2 %v16861_v53  ;;  %v15830_v4 = vld [vmem:[#allocation10 + $0x684] sm:$0xf]  ;;  %v14481_v22 = vld [vmem:[#allocation10 + $0x690] sm:$0xf0]  ;;  %v14356_v45 = vor.u32 %v15798_v32, %v14353_v21  ;;  %v15653_v32 = vld [vmem:[#allocation10 + $0xf4] sm:$0xf0] }
 0x9e4   :  { %9510 = vmatpush.bf16.msrb.mxu2 %v14532_v16  ;;  %9479 = vmatmul.bf16.vlgmr.msra.gmra.mxu3 %v16868_v36  ;;  %v15862_v23 = vld [vmem:[#allocation10 + $0x784] sm:$0xf]  ;;  %v14609_v24 = vld [vmem:[#allocation10 + $0x790] sm:$0xf0]  ;;  %v14484_v57 = vor.u32 %v15830_v4, %v14481_v22  ;;  %v15685_v4 = vld [vmem:[#allocation10 + $0x1f4] sm:$0xf0] }
 0x9e5   :  { %9523 = vmatpush.bf16.msrb.mxu3 %v14660_v5  ;;  %v15762_v25 = vld [vmem:[#allocation10 + $0x464] sm:$0xf]  ;;  %v14209_v50 = vld [vmem:[#allocation10 + $0x470] sm:$0xf0]  ;;  %v14612_v39 = vor.u32 %v15862_v23, %v14609_v24  ;;  %v14023_v22 = vld [vmem:[#allocation10 + $0x2e8] sm:$0xf] }
 0x9e6   :  { %9485 = vmatpush.bf16.msrb.mxu0 %v14260_v60  ;;  %v15794_v26 = vld [vmem:[#allocation10 + $0x564] sm:$0xf]  ;;  %v14337_v27 = vld [vmem:[#allocation10 + $0x570] sm:$0xf0]  ;;  %v14212_v34 = vor.u32 %v15762_v25, %v14209_v50  ;;  %v15717_v23 = vld [vmem:[#allocation10 + $0x2f4] sm:$0xf0]  ;;  %v13768_v50 = vor.u32 %v15653_v32, %v13767_v19 }
 0x9e7   :  { %9498 = vmatpush.bf16.msrb.mxu1 %v14388_v61  ;;  %v15826_v28 = vld [vmem:[#allocation10 + $0x664] sm:$0xf]  ;;  %v14465_v29 = vld [vmem:[#allocation10 + $0x670] sm:$0xf0]  ;;  %v14340_v10 = vor.u32 %v15794_v26, %v14337_v27  ;;  %v13751_v27 = vld [vmem:[#allocation10 + $0xc8] sm:$0xf] }
 0x9e8   :  { %9511 = vmatpush.bf16.msrb.mxu2 %v14516_v18  ;;  %v15858_v30 = vld [vmem:[#allocation10 + $0x764] sm:$0xf]  ;;  %v14593_v33 = vld [vmem:[#allocation10 + $0x770] sm:$0xf0]  ;;  %v14468_v40 = vor.u32 %v15826_v28, %v14465_v29  ;;  %v15649_v28 = vld [vmem:[#allocation10 + $0xd4] sm:$0xf0] }
 0x9e9   :  { %9524 = vmatpush.bf16.msrb.mxu3 %v14644_v0  ;;  %v15758_v41 = vld [vmem:[#allocation10 + $0x444] sm:$0xf]  ;;  %v14193_v42 = vld [vmem:[#allocation10 + $0x450] sm:$0xf0]  ;;  %v14596_v43 = vor.u32 %v15858_v30, %v14593_v33  ;;  %v13879_v29 = vld [vmem:[#allocation10 + $0x1c8] sm:$0xf] }
 0x9ea   :  { %9486 = vmatpush.bf16.msrb.mxu0 %v14244_v14  ;;  %v15790_v8 = vld [vmem:[#allocation10 + $0x544] sm:$0xf]  ;;  %v14321_v44 = vld [vmem:[#allocation10 + $0x550] sm:$0xf0]  ;;  %v14196_v31 = vor.u32 %v15758_v41, %v14193_v42  ;;  %v15681_v33 = vld [vmem:[#allocation10 + $0x1d4] sm:$0xf0]  ;;  %v13752_v42 = vor.u32 %v15649_v28, %v13751_v27 }
 0x9eb   :  { %9499 = vmatpush.bf16.msrb.mxu1 %v14372_v15  ;;  %v15822_v3 = vld [vmem:[#allocation10 + $0x644] sm:$0xf]  ;;  %v14449_v11 = vld [vmem:[#allocation10 + $0x650] sm:$0xf0]  ;;  %v14324_v48 = vor.u32 %v15790_v8, %v14321_v44  ;;  %v15745_v41 = vld [vmem:[#allocation10 + $0x3d4] sm:$0xf0]  ;;  %v13880_v8 = vor.u32 %v15681_v33, %v13879_v29 }
 0x9ec   :  { %9512 = vmatpush.bf16.msrb.mxu2 %v14500_v12  ;;  %v15854_v16 = vld [vmem:[#allocation10 + $0x744] sm:$0xf]  ;;  %v14577_v47 = vld [vmem:[#allocation10 + $0x750] sm:$0xf0]  ;;  %v14452_v5 = vor.u32 %v15822_v3, %v14449_v11  ;;  %v13735_v44 = vld [vmem:[#allocation10 + $0xa8] sm:$0xf] }
 0x9ed   :  { %9525 = vmatpush.bf16.msrb.mxu3 %v14628_v20  ;;  %v15754_v51 = vld [vmem:[#allocation10 + $0x424] sm:$0xf]  ;;  %v14177_v52 = vld [vmem:[#allocation10 + $0x430] sm:$0xf0]  ;;  %v14580_v58 = vor.u32 %v15854_v16, %v14577_v47  ;;  %v13895_v20 = vld [vmem:[#allocation10 + $0x1e8] sm:$0xf] }
 0x9ee   :  { %9487 = vmatpush.bf16.msrb.mxu0 %v14228_v38  ;;  %v15786_v54 = vld [vmem:[#allocation10 + $0x524] sm:$0xf]  ;;  %v14305_v59 = vld [vmem:[#allocation10 + $0x530] sm:$0xf0]  ;;  %v14180_v46 = vor.u32 %v15754_v51, %v14177_v52  ;;  %v13896_v26 = vor.u32 %v15685_v4, %v13895_v20  ;;  %v15645_v3 = vld [vmem:[#allocation10 + $0xb4] sm:$0xf0] }
 0x9ef   :  { %9500 = vmatpush.bf16.msrb.mxu1 %v14356_v45  ;;  %v15818_v60 = vld [vmem:[#allocation10 + $0x624] sm:$0xf]  ;;  %v14433_v61 = vld [vmem:[#allocation10 + $0x630] sm:$0xf0]  ;;  %v14308_v35 = vor.u32 %v15786_v54, %v14305_v59  ;;  %v14151_v45 = vld [vmem:[#allocation10 + $0x3e8] sm:$0xf]  ;;  %v13736_v52 = vor.u32 %v15645_v3, %v13735_v44 }
 0x9f0   :  { %9513 = vmatpush.bf16.msrb.mxu2 %v14484_v57  ;;  %v15850_v18 = vld [vmem:[#allocation10 + $0x724] sm:$0xf]  ;;  %v14561_v62 = vld [vmem:[#allocation10 + $0x730] sm:$0xf0]  ;;  %v14436_v6 = vor.u32 %v15818_v60, %v14433_v61  ;;  %v15749_v57 = vld [vmem:[#allocation10 + $0x3f4] sm:$0xf0] }
 0x9f1   :  { %9526 = vmatpush.bf16.msrb.mxu3 %v14612_v39  ;;  %v15750_v63 = vld [vmem:[#allocation10 + $0x404] sm:$0xf]  ;;  %v14161_v0 = vld [vmem:[#allocation10 + $0x410] sm:$0xf0]  ;;  %v14564_v14 = vor.u32 %v15850_v18, %v14561_v62  ;;  %v14024_v39 = vor.u32 %v15717_v23, %v14023_v22  ;;  %v14152_v30 = vor.u32 %v15749_v57, %v14151_v45  ;;  %v13863_v11 = vld [vmem:[#allocation10 + $0x1a8] sm:$0xf] }
 0x9f2   :  { %9488 = vmatpush.bf16.msrb.mxu0 %v14212_v34  ;;  %v15782_v7 = vld [vmem:[#allocation10 + $0x504] sm:$0xf]  ;;  %v14289_v2 = vld [vmem:[#allocation10 + $0x510] sm:$0xf0]  ;;  %v14164_v21 = vor.u32 %v15750_v63, %v14161_v0  ;;  %v14007_v34 = vld [vmem:[#allocation10 + $0x2c8] sm:$0xf] }
 0x9f3   :  { %9501 = vmatpush.bf16.msrb.mxu1 %v14340_v10  ;;  %v15814_v9 = vld [vmem:[#allocation10 + $0x604] sm:$0xf]  ;;  %v14417_v15 = vld [vmem:[#allocation10 + $0x610] sm:$0xf0]  ;;  %v14292_v24 = vor.u32 %v15782_v7, %v14289_v2  ;;  %v15713_v10 = vld [vmem:[#allocation10 + $0x2d4] sm:$0xf0] }
 0x9f4   :  { %9514 = vmatpush.bf16.msrb.mxu2 %v14468_v40  ;;  %v15846_v12 = vld [vmem:[#allocation10 + $0x704] sm:$0xf]  ;;  %v14545_v17 = vld [vmem:[#allocation10 + $0x710] sm:$0xf0]  ;;  %v14420_v38 = vor.u32 %v15814_v9, %v14417_v15  ;;  %v14135_v40 = vld [vmem:[#allocation10 + $0x3c8] sm:$0xf] }
 0x9f5   :  { %9527 = vmatpush.bf16.msrb.mxu3 %v14596_v43  ;;  %v14548_v25 = vor.u32 %v15846_v12, %v14545_v17  ;;  %v14008_v43 = vor.u32 %v15713_v10, %v14007_v34  ;;  %v14136_v16 = vor.u32 %v15745_v41, %v14135_v40  ;;  %v15677_v47 = vld [vmem:[#allocation10 + $0x1b4] sm:$0xf0]  ;;  %v13719_v59 = vld [vmem:[#allocation10 + $0x88] sm:$0xf] }
 0x9f6   :  { %9489 = vmatpush.bf16.msrb.mxu0 %v14196_v31  ;;  %v13991_v31 = vld [vmem:[#allocation10 + $0x2a8] sm:$0xf]  ;;  %v15741_v51 = vld [vmem:[#allocation10 + $0x3b4] sm:$0xf0]  ;;  %v13864_v54 = vor.u32 %v15677_v47, %v13863_v11 }
 0x9f7   :  { %9502 = vmatpush.bf16.msrb.mxu1 %v14324_v48  ;;  %v15709_v48 = vld [vmem:[#allocation10 + $0x2b4] sm:$0xf0]  ;;  %v13847_v61 = vld [vmem:[#allocation10 + $0x188] sm:$0xf] }
 0x9f8   :  { %9515 = vmatpush.bf16.msrb.mxu2 %v14452_v5  ;;  %v14119_v5 = vld [vmem:[#allocation10 + $0x3a8] sm:$0xf]  ;;  %v15641_v60 = vld [vmem:[#allocation10 + $0x94] sm:$0xf0] }
 0x9f9   :  { %9528 = vmatpush.bf16.msrb.mxu3 %v14580_v58  ;;  %v13992_v58 = vor.u32 %v15709_v48, %v13991_v31  ;;  %v14120_v18 = vor.u32 %v15741_v51, %v14119_v5  ;;  %v15673_v62 = vld [vmem:[#allocation10 + $0x194] sm:$0xf0]  ;;  %v14103_v0 = vld [vmem:[#allocation10 + $0x388] sm:$0xf] }
 0x9fa   :  { %9490 = vmatpush.bf16.msrb.mxu0 %v14180_v46  ;;  %v13975_v46 = vld [vmem:[#allocation10 + $0x288] sm:$0xf]  ;;  %v15705_v63 = vld [vmem:[#allocation10 + $0x294] sm:$0xf0]  ;;  %v13848_v7 = vor.u32 %v15673_v62, %v13847_v61 }
 0x9fb   :  { %9503 = vmatpush.bf16.msrb.mxu1 %v14308_v35  ;;  %v15737_v35 = vld [vmem:[#allocation10 + $0x394] sm:$0xf0]  ;;  %v13976_v2 = vor.u32 %v15705_v63, %v13975_v46  ;;  %v13703_v9 = vld [vmem:[#allocation10 + $0x68] sm:$0xf] }
 0x9fc   :  { %9516 = vmatpush.bf16.msrb.mxu2 %v14436_v6  ;;  %v13720_v6 = vor.u32 %v15641_v60, %v13719_v59  ;;  %v13831_v15 = vld [vmem:[#allocation10 + $0x168] sm:$0xf]  ;;  %v14104_v12 = vor.u32 %v15737_v35, %v14103_v0  ;;  %v15669_v17 = vld [vmem:[#allocation10 + $0x174] sm:$0xf0] }
 0x9fd   :  { %9529 = vmatpush.bf16.msrb.mxu3 %v14564_v14  ;;  %v15637_v14 = vld [vmem:[#allocation10 + $0x74] sm:$0xf0]  ;;  %v13959_v19 = vld [vmem:[#allocation10 + $0x268] sm:$0xf]  ;;  %v13832_v22 = vor.u32 %v15669_v17, %v13831_v15 }
 0x9fe   :  { %9491 = vmatpush.bf16.msrb.mxu0 %v14164_v21  ;;  %v15701_v32 = vld [vmem:[#allocation10 + $0x274] sm:$0xf0]  ;;  %v14087_v20 = vld [vmem:[#allocation10 + $0x368] sm:$0xf]  ;;  %v13704_v4 = vor.u32 %v15637_v14, %v13703_v9 }
 0x9ff   :  { %9504 = vmatpush.bf16.msrb.mxu1 %v14292_v24  ;;  %v15733_v21 = vld [vmem:[#allocation10 + $0x374] sm:$0xf0]  ;;  %v13960_v23 = vor.u32 %v15701_v32, %v13959_v19  ;;  %v13687_v24 = vld [vmem:[#allocation10 + $0x48] sm:$0xf] }
 0xa00   :  { %9517 = vmatpush.bf16.msrb.mxu2 %v14420_v38  ;;  %v15633_v38 = vld [vmem:[#allocation10 + $0x54] sm:$0xf0]  ;;  %v13815_v45 = vld [vmem:[#allocation10 + $0x148] sm:$0xf]  ;;  %v14088_v57 = vor.u32 %v15733_v21, %v14087_v20 }
 0xa01   :  { %9530 = vmatpush.bf16.msrb.mxu3 %v14548_v25  ;;  %9492 = vmatmul.bf16.vlgmr.msrb.gmra.mxu0 %v16871_v37  ;;  %v15665_v25 = vld [vmem:[#allocation10 + $0x154] sm:$0xf0]  ;;  %v13688_v28 = vor.u32 %v15633_v38, %v13687_v24  ;;  %v13671_v33 = vld [vmem:[#allocation10 + $0x28] sm:$0xf] }
 0xa02   :  { %9536 = vmatpush.bf16.msra.mxu0 %v13768_v50  ;;  %9505 = vmatmul.bf16.vlgmr.msrb.gmra.mxu1 %v16874_v55  ;;  %v13943_v50 = vld [vmem:[#allocation10 + $0x248] sm:$0xf]  ;;  %v15729_v27 = vld [vmem:[#allocation10 + $0x354] sm:$0xf0]  ;;  %v13816_v29 = vor.u32 %v15665_v25, %v13815_v45 }
 0xa03   :  { %9549 = vmatpush.bf16.msra.mxu1 %v13896_v26  ;;  %9518 = vmatmul.bf16.vlgmr.msrb.gmra.mxu2 %v16877_v13  ;;  %v15697_v26 = vld [vmem:[#allocation10 + $0x254] sm:$0xf0]  ;;  %v13799_v10 = vld [vmem:[#allocation10 + $0x128] sm:$0xf] }
 0xa04   :  { %9562 = vmatpush.bf16.msra.mxu2 %v14024_v39  ;;  %9531 = vmatmul.bf16.vlgmr.msrb.gmra.mxu3 %v16880_v49  ;;  %v14071_v39 = vld [vmem:[#allocation10 + $0x348] sm:$0xf]  ;;  %v15629_v34 = vld [vmem:[#allocation10 + $0x34] sm:$0xf0] }
 0xa05   :  { %9575 = vmatpush.bf16.msra.mxu3 %v14152_v30  ;;  %v13944_v30 = vor.u32 %v15697_v26, %v13943_v50  ;;  %v14072_v40 = vor.u32 %v15729_v27, %v14071_v39  ;;  %v15661_v41 = vld [vmem:[#allocation10 + $0x134] sm:$0xf0]  ;;  %v13672_v3 = vor.u32 %v15629_v34, %v13671_v33  ;;  %v13655_v11 = vld [vmem:[#allocation10 + $0x8] sm:$0xf] }
 0xa06   :  { %9537 = vmatpush.bf16.msra.mxu0 %v13752_v42  ;;  %v13927_v42 = vld [vmem:[#allocation10 + $0x228] sm:$0xf]  ;;  %v15725_v44 = vld [vmem:[#allocation10 + $0x334] sm:$0xf0]  ;;  %v13800_v47 = vor.u32 %v15661_v41, %v13799_v10 }
 0xa07   :  { %9550 = vmatpush.bf16.msra.mxu1 %v13880_v8  ;;  %v15693_v8 = vld [vmem:[#allocation10 + $0x234] sm:$0xf0]  ;;  %v13783_v48 = vld [vmem:[#allocation10 + $0x108] sm:$0xf] }
 0xa08   :  { %9563 = vmatpush.bf16.msra.mxu2 %v14008_v43  ;;  %v14055_v43 = vld [vmem:[#allocation10 + $0x328] sm:$0xf]  ;;  %v13928_v31 = vor.u32 %v15693_v8, %v13927_v42  ;;  %v15657_v5 = vld [vmem:[#allocation10 + $0x114] sm:$0xf0] }
 0xa09   :  { %9576 = vmatpush.bf16.msra.mxu3 %v14136_v16  ;;  %v15625_v16 = vld [vmem:[#allocation10 + $0x14] sm:$0xf0]  ;;  %v13911_v51 = vld [vmem:[#allocation10 + $0x208] sm:$0xf]  ;;  %v13784_v35 = vor.u32 %v15657_v5, %v13783_v48 }
 0xa0a   :  { %9538 = vmatpush.bf16.msra.mxu0 %v13736_v52  ;;  %v14056_v52 = vor.u32 %v15725_v44, %v14055_v43  ;;  %v15721_v59 = vld [vmem:[#allocation10 + $0x314] sm:$0xf0]  ;;  %v14279_v60 = vld [vmem:[#allocation10 + $0x4e8] sm:$0xf]  ;;  %v13656_v62 = vor.u32 %v15625_v16, %v13655_v11 }
 0xa0b   :  { %9551 = vmatpush.bf16.msra.mxu1 %v13864_v54  ;;  %v15689_v54 = vld [vmem:[#allocation10 + $0x214] sm:$0xf0]  ;;  %v14535_v63 = vld [vmem:[#allocation10 + $0x6e8] sm:$0xf] }
 0xa0c   :  { %9564 = vmatpush.bf16.msra.mxu2 %v13992_v58  ;;  %v14039_v58 = vld [vmem:[#allocation10 + $0x308] sm:$0xf]  ;;  %v15781_v61 = vld [vmem:[#allocation10 + $0x4f4] sm:$0xf0] }
 0xa0d   :  { %9577 = vmatpush.bf16.msra.mxu3 %v14120_v18  ;;  %v14407_v18 = vld [vmem:[#allocation10 + $0x5e8] sm:$0xf]  ;;  %v15813_v46 = vld [vmem:[#allocation10 + $0x5f4] sm:$0xf0]  ;;  %v14040_v9 = vor.u32 %v15721_v59, %v14039_v58  ;;  %v14280_v14 = vor.u32 %v15781_v61, %v14279_v60 }
 0xa0e   :  { %9539 = vmatpush.bf16.msra.mxu0 %v13720_v6  ;;  %v15845_v0 = vld [vmem:[#allocation10 + $0x6f4] sm:$0xf0]  ;;  %v13912_v6 = vor.u32 %v15689_v54, %v13911_v51  ;;  %v14408_v15 = vor.u32 %v15813_v46, %v14407_v18  ;;  %v14263_v17 = vld [vmem:[#allocation10 + $0x4c8] sm:$0xf] }
 0xa0f   :  { %9552 = vmatpush.bf16.msra.mxu1 %v13848_v7  ;;  %v14663_v7 = vld [vmem:[#allocation10 + $0x7e8] sm:$0xf]  ;;  %v15777_v19 = vld [vmem:[#allocation10 + $0x4d4] sm:$0xf0] }
 0xa10   :  { %9565 = vmatpush.bf16.msra.mxu2 %v13976_v2  ;;  %v15877_v2 = vld [vmem:[#allocation10 + $0x7f4] sm:$0xf0]  ;;  %v14391_v32 = vld [vmem:[#allocation10 + $0x5c8] sm:$0xf]  ;;  %v14264_v38 = vor.u32 %v15777_v19, %v14263_v17 }
 0xa11   :  { %9578 = vmatpush.bf16.msra.mxu3 %v14104_v12  ;;  %v14536_v12 = vor.u32 %v15845_v0, %v14535_v63  ;;  %v14664_v20 = vor.u32 %v15877_v2, %v14663_v7  ;;  %v15809_v21 = vld [vmem:[#allocation10 + $0x5d4] sm:$0xf0]  ;;  %v14247_v25 = vld [vmem:[#allocation10 + $0x4a8] sm:$0xf] }
 0xa12   :  { %9540 = vmatpush.bf16.msra.mxu0 %v13704_v4  ;;  %v14519_v4 = vld [vmem:[#allocation10 + $0x6c8] sm:$0xf]  ;;  %v15873_v24 = vld [vmem:[#allocation10 + $0x7d4] sm:$0xf0]  ;;  %v14392_v45 = vor.u32 %v15809_v21, %v14391_v32 }
 0xa13   :  { %9553 = vmatpush.bf16.msra.mxu1 %v13832_v22  ;;  %v15841_v22 = vld [vmem:[#allocation10 + $0x6d4] sm:$0xf0]  ;;  %v14375_v26 = vld [vmem:[#allocation10 + $0x5a8] sm:$0xf] }
 0xa14   :  { %9566 = vmatpush.bf16.msra.mxu2 %v13960_v23  ;;  %v14647_v23 = vld [vmem:[#allocation10 + $0x7c8] sm:$0xf]  ;;  %v15773_v50 = vld [vmem:[#allocation10 + $0x4b4] sm:$0xf0] }
 0xa15   :  { %9579 = vmatpush.bf16.msra.mxu3 %v14088_v57  ;;  %v14520_v57 = vor.u32 %v15841_v22, %v14519_v4  ;;  %v14648_v39 = vor.u32 %v15873_v24, %v14647_v23  ;;  %v15805_v27 = vld [vmem:[#allocation10 + $0x5b4] sm:$0xf0]  ;;  %v14248_v34 = vor.u32 %v15773_v50, %v14247_v25  ;;  %v14231_v41 = vld [vmem:[#allocation10 + $0x488] sm:$0xf]  ;;  %v16912_v22 = vld [vmem:[#allocation27] sm:$0xf] }
 0xa16   :  { %9541 = vmatpush.bf16.msra.mxu0 %v13688_v28  ;;  %v14503_v28 = vld [vmem:[#allocation10 + $0x6a8] sm:$0xf]  ;;  %v15869_v33 = vld [vmem:[#allocation10 + $0x7b4] sm:$0xf0]  ;;  %v14376_v10 = vor.u32 %v15805_v27, %v14375_v26 }
 0xa17   :  { %9554 = vmatpush.bf16.msra.mxu1 %v13816_v29  ;;  %v15837_v29 = vld [vmem:[#allocation10 + $0x6b4] sm:$0xf0]  ;;  %v14359_v8 = vld [vmem:[#allocation10 + $0x588] sm:$0xf] }
 0xa18   :  { %9567 = vmatpush.bf16.msra.mxu2 %v13944_v30  ;;  %v14631_v30 = vld [vmem:[#allocation10 + $0x7a8] sm:$0xf]  ;;  %v15769_v42 = vld [vmem:[#allocation10 + $0x494] sm:$0xf0] }
 0xa19   :  { %9580 = vmatpush.bf16.msra.mxu3 %v14072_v40  ;;  %v14504_v40 = vor.u32 %v15837_v29, %v14503_v28  ;;  %v14632_v43 = vor.u32 %v15869_v33, %v14631_v30  ;;  %v15801_v44 = vld [vmem:[#allocation10 + $0x594] sm:$0xf0]  ;;  %v14615_v16 = vld [vmem:[#allocation10 + $0x788] sm:$0xf]  ;;  %v8040_v33 = vperm.slane %v16912_v22, 0 }
 0xa1a   :  { %9542 = vmatpush.bf16.msra.mxu0 %v13672_v3  ;;  %v14487_v3 = vld [vmem:[#allocation10 + $0x688] sm:$0xf]  ;;  %v15833_v11 = vld [vmem:[#allocation10 + $0x694] sm:$0xf0]  ;;  %v14360_v5 = vor.u32 %v15801_v44, %v14359_v8 }
 0xa1b   :  { %9555 = vmatpush.bf16.msra.mxu1 %v13800_v47  ;;  %v15865_v47 = vld [vmem:[#allocation10 + $0x794] sm:$0xf0]  ;;  %v14488_v51 = vor.u32 %v15833_v11, %v14487_v3  ;;  %v14343_v58 = vld [vmem:[#allocation10 + $0x568] sm:$0xf] }
 0xa1c   :  { %9568 = vmatpush.bf16.msra.mxu2 %v13928_v31  ;;  %v14232_v31 = vor.u32 %v15769_v42, %v14231_v41  ;;  %v15765_v54 = vld [vmem:[#allocation10 + $0x474] sm:$0xf0]  ;;  %v14616_v60 = vor.u32 %v15865_v47, %v14615_v16  ;;  %v14471_v18 = vld [vmem:[#allocation10 + $0x668] sm:$0xf] }
 0xa1d   :  { %9581 = vmatpush.bf16.msra.mxu3 %v14056_v52  ;;  %v14215_v52 = vld [vmem:[#allocation10 + $0x468] sm:$0xf]  ;;  %v15797_v61 = vld [vmem:[#allocation10 + $0x574] sm:$0xf0] }
 0xa1e   :  { %9543 = vmatpush.bf16.msra.mxu0 %v13656_v62  ;;  %v16904_v48 = vpop.f32.mrf.mxu0  ;;  %v15829_v62 = vld [vmem:[#allocation10 + $0x674] sm:$0xf0]  ;;  %v14599_v46 = vld [vmem:[#allocation10 + $0x768] sm:$0xf]  ;;  %v14216_v0 = vor.u32 %v15765_v54, %v14215_v52  ;;  %v13769_v52 = vld [vmem:[#allocation10 + $0xf8] sm:$0xf0] }
 0xa1f   :  { %9556 = vmatpush.bf16.msra.mxu1 %v13784_v35  ;;  %v16906_v59 = vpop.f32.mrf.mxu1  ;;  %v15861_v63 = vld [vmem:[#allocation10 + $0x774] sm:$0xf0]  ;;  %v14344_v35 = vor.u32 %v15797_v61, %v14343_v58  ;;  %v14199_v7 = vld [vmem:[#allocation10 + $0x448] sm:$0xf]  ;;  %v15683_v54 = vld [vmem:[#allocation10 + $0x1ec] sm:$0xf]  ;;  %v9338_v58 = vadd.f32 %v16904_v48, %v8040_v33 }
 0xa20   :  { %9569 = vmatpush.bf16.msra.mxu2 %v13912_v6  ;;  %v14472_v6 = vor.u32 %v15829_v62, %v14471_v18  ;;  %v15761_v2 = vld [vmem:[#allocation10 + $0x454] sm:$0xf0]  ;;  %v14455_v17 = vld [vmem:[#allocation10 + $0x648] sm:$0xf]  ;;  %v13897_v61 = vld [vmem:[#allocation10 + $0x1f8] sm:$0xf0] }
 0xa21   :  { %9582 = vmatpush.bf16.msra.mxu3 %v14040_v9  ;;  %9544 = vmatmul.bf16.vlgmr.msra.gmra.mxu0 %v16847_v56  ;;  %v14327_v9 = vld [vmem:[#allocation10 + $0x548] sm:$0xf]  ;;  %v15825_v19 = vld [vmem:[#allocation10 + $0x654] sm:$0xf0]  ;;  %v14200_v4 = vor.u32 %v15761_v2, %v14199_v7  ;;  %v15715_v18 = vld [vmem:[#allocation10 + $0x2ec] sm:$0xf]  ;;  %v13900_v2 = vor.u32 %v15683_v54, %v13897_v61 }
 0xa22   :  { %9588 = vmatpush.bf16.msrb.mxu0 %v14280_v14  ;;  %9557 = vmatmul.bf16.vlgmr.msra.gmra.mxu1 %v16854_v1  ;;  %v15857_v21 = vld [vmem:[#allocation10 + $0x754] sm:$0xf0]  ;;  %v14311_v25 = vld [vmem:[#allocation10 + $0x528] sm:$0xf]  ;;  %v14025_v62 = vld [vmem:[#allocation10 + $0x2f8] sm:$0xf0] }
 0xa23   :  { %9601 = vmatpush.bf16.msrb.mxu1 %v14408_v15  ;;  %9570 = vmatmul.bf16.vlgmr.msra.gmra.mxu2 %v16861_v53  ;;  %v14600_v15 = vor.u32 %v15861_v63, %v14599_v46  ;;  %v14439_v27 = vld [vmem:[#allocation10 + $0x628] sm:$0xf]  ;;  %v15821_v28 = vld [vmem:[#allocation10 + $0x634] sm:$0xf0]  ;;  %v13753_v48 = vld [vmem:[#allocation10 + $0xd8] sm:$0xf0] }
 0xa24   :  { %9614 = vmatpush.bf16.msrb.mxu2 %v14536_v12  ;;  %9583 = vmatmul.bf16.vlgmr.msra.gmra.mxu3 %v16868_v36  ;;  %v15793_v12 = vld [vmem:[#allocation10 + $0x554] sm:$0xf0]  ;;  %v14567_v29 = vld [vmem:[#allocation10 + $0x728] sm:$0xf]  ;;  %v14440_v42 = vor.u32 %v15821_v28, %v14439_v27  ;;  %v13865_v27 = vld [vmem:[#allocation10 + $0x1b8] sm:$0xf0] }
 0xa25   :  { %9627 = vmatpush.bf16.msrb.mxu3 %v14664_v20  ;;  %v14583_v20 = vld [vmem:[#allocation10 + $0x748] sm:$0xf]  ;;  %v14328_v24 = vor.u32 %v15793_v12, %v14327_v9  ;;  %v15853_v30 = vld [vmem:[#allocation10 + $0x734] sm:$0xf0]  ;;  %v14028_v9 = vor.u32 %v15715_v18, %v14025_v62  ;;  %v15647_v12 = vld [vmem:[#allocation10 + $0xcc] sm:$0xf] }
 0xa26   :  { %9589 = vmatpush.bf16.msrb.mxu0 %v14264_v38  ;;  %v16908_v14 = vpop.f32.mrf.mxu2  ;;  %v9339_v23 = vpop.f32.mrf.mxu0  ;;  %v14456_v38 = vor.u32 %v15825_v19, %v14455_v17  ;;  %v14584_v26 = vor.u32 %v15857_v21, %v14583_v20  ;;  %v14295_v8 = vld [vmem:[#allocation10 + $0x508] sm:$0xf]  ;;  %v14568_v11 = vor.u32 %v15853_v30, %v14567_v29  ;;  %v15817_v16 = vld [vmem:[#allocation10 + $0x614] sm:$0xf0]  ;;  %v15679_v17 = vld [vmem:[#allocation10 + $0x1cc] sm:$0xf] }
 0xa27   :  { %9602 = vmatpush.bf16.msrb.mxu1 %v14392_v45  ;;  %v16910_v32 = vpop.f32.mrf.mxu3  ;;  %v14183_v45 = vld [vmem:[#allocation10 + $0x428] sm:$0xf]  ;;  %v9352_v50 = vpop.f32.mrf.mxu1  ;;  %v13881_v20 = vld [vmem:[#allocation10 + $0x1d8] sm:$0xf0]  ;;  %v15711_v21 = vld [vmem:[#allocation10 + $0x2cc] sm:$0xf] }
 0xa28   :  { %9615 = vmatpush.bf16.msrb.mxu2 %v14520_v57  ;;  %v15757_v57 = vld [vmem:[#allocation10 + $0x434] sm:$0xf0]  ;;  %v14423_v44 = vld [vmem:[#allocation10 + $0x608] sm:$0xf]  ;;  %v15743_v23 = vld [vmem:[#allocation10 + $0x3cc] sm:$0xf] }
 0xa29   :  { %9628 = vmatpush.bf16.msrb.mxu3 %v14648_v39  ;;  %v15789_v39 = vld [vmem:[#allocation10 + $0x534] sm:$0xf0]  ;;  %v14551_v47 = vld [vmem:[#allocation10 + $0x708] sm:$0xf]  ;;  %v14424_v63 = vor.u32 %v15817_v16, %v14423_v44  ;;  %v13737_v50 = vld [vmem:[#allocation10 + $0xb8] sm:$0xf0] }
 0xa2a   :  { %9590 = vmatpush.bf16.msrb.mxu0 %v14248_v34  ;;  %v14184_v34 = vor.u32 %v15757_v57, %v14183_v45  ;;  %v14312_v41 = vor.u32 %v15789_v39, %v14311_v25  ;;  %v13884_v45 = vor.u32 %v15679_v17, %v13881_v20  ;;  %v15643_v25 = vld [vmem:[#allocation10 + $0xac] sm:$0xf]  ;;  %v13993_v29 = vld [vmem:[#allocation10 + $0x2b8] sm:$0xf0] }
 0xa2b   :  { %9603 = vmatpush.bf16.msrb.mxu1 %v14376_v10  ;;  %v14167_v10 = vld [vmem:[#allocation10 + $0x408] sm:$0xf]  ;;  %v15707_v28 = vld [vmem:[#allocation10 + $0x2ac] sm:$0xf]  ;;  %v14121_v33 = vld [vmem:[#allocation10 + $0x3b8] sm:$0xf0] }
 0xa2c   :  { %9616 = vmatpush.bf16.msrb.mxu2 %v14504_v40  ;;  %v15753_v40 = vld [vmem:[#allocation10 + $0x414] sm:$0xf0]  ;;  %v15739_v30 = vld [vmem:[#allocation10 + $0x3ac] sm:$0xf]  ;;  %v13849_v44 = vld [vmem:[#allocation10 + $0x198] sm:$0xf0] }
 0xa2d   :  { %9629 = vmatpush.bf16.msrb.mxu3 %v14632_v43  ;;  %v15785_v43 = vld [vmem:[#allocation10 + $0x514] sm:$0xf0]  ;;  %v15735_v16 = vld [vmem:[#allocation10 + $0x38c] sm:$0xf]  ;;  %v13705_v54 = vld [vmem:[#allocation10 + $0x78] sm:$0xf0] }
 0xa2e   :  { %9591 = vmatpush.bf16.msrb.mxu0 %v14232_v31  ;;  %v9365_v3 = vpop.f32.mrf.mxu2  ;;  %v15849_v31 = vld [vmem:[#allocation10 + $0x714] sm:$0xf0]  ;;  %v14296_v46 = vor.u32 %v15785_v43, %v14295_v8  ;;  %v15671_v8 = vld [vmem:[#allocation10 + $0x18c] sm:$0xf]  ;;  %v14124_v43 = vor.u32 %v15739_v30, %v14121_v33  ;;  %v13833_v62 = vld [vmem:[#allocation10 + $0x178] sm:$0xf0] }
 0xa2f   :  { %9604 = vmatpush.bf16.msrb.mxu1 %v14360_v5  ;;  %v9378_v5 = vpop.f32.mrf.mxu3  ;;  %v15703_v3 = vld [vmem:[#allocation10 + $0x28c] sm:$0xf]  ;;  %v13817_v20 = vld [vmem:[#allocation10 + $0x158] sm:$0xf0] }
 0xa30   :  { %9617 = vmatpush.bf16.msrb.mxu2 %v14488_v51  ;;  %v15651_v51 = vld [vmem:[#allocation10 + $0xec] sm:$0xf] }
 0xa31   :  { %9630 = vmatpush.bf16.msrb.mxu3 %v14616_v60  ;;  %v14168_v60 = vor.u32 %v15753_v40, %v14167_v10  ;;  %v13772_v7 = vor.u32 %v15651_v51, %v13769_v52  ;;  %v13996_v40 = vor.u32 %v15707_v28, %v13993_v29  ;;  %v13852_v51 = vor.u32 %v15671_v8, %v13849_v44  ;;  %v15659_v28 = vld [vmem:[#allocation10 + $0x12c] sm:$0xf]  ;;  %v13801_v29 = vld [vmem:[#allocation10 + $0x138] sm:$0xf0] }
 0xa32   :  { %9592 = vmatpush.bf16.msrb.mxu0 %v14216_v0  ;;  %v15747_v0 = vld [vmem:[#allocation10 + $0x3ec] sm:$0xf]  ;;  %v13804_v44 = vor.u32 %v15659_v28, %v13801_v29  ;;  %v14505_v29 = vld [vmem:[#allocation10 + $0x6b8] sm:$0xf0] }
 0xa33   :  { %9605 = vmatpush.bf16.msrb.mxu1 %v14344_v35  ;;  %v14153_v35 = vld [vmem:[#allocation10 + $0x3f8] sm:$0xf0]  ;;  %v15623_v8 = vld [vmem:[#allocation10 + $0xc] sm:$0xf] }
 0xa34   :  { %9618 = vmatpush.bf16.msrb.mxu2 %v14472_v6  ;;  %v14552_v6 = vor.u32 %v15849_v31, %v14551_v47  ;;  %v14156_v19 = vor.u32 %v15747_v0, %v14153_v35  ;;  %v14105_v47 = vld [vmem:[#allocation10 + $0x398] sm:$0xf0]  ;;  %v15731_v0 = vld [vmem:[#allocation10 + $0x36c] sm:$0xf] }
 0xa35   :  { %9631 = vmatpush.bf16.msrb.mxu3 %v14600_v15  ;;  %v9351_v15 = vadd.f32 %v16906_v59, %v9338_v58  ;;  %v15667_v58 = vld [vmem:[#allocation10 + $0x16c] sm:$0xf]  ;;  %v14108_v18 = vor.u32 %v15735_v16, %v14105_v47  ;;  %v14089_v35 = vld [vmem:[#allocation10 + $0x378] sm:$0xf0] }
 0xa36   :  { %9593 = vmatpush.bf16.msrb.mxu0 %v14200_v4  ;;  %v14009_v4 = vld [vmem:[#allocation10 + $0x2d8] sm:$0xf0]  ;;  %v15687_v47 = vld [vmem:[#allocation10 + $0x20c] sm:$0xf] }
 0xa37   :  { %9606 = vmatpush.bf16.msrb.mxu1 %v14328_v24  ;;  %v14137_v24 = vld [vmem:[#allocation10 + $0x3d8] sm:$0xf0]  ;;  %v14012_v57 = vor.u32 %v15711_v21, %v14009_v4  ;;  %v9364_v59 = vadd.f32 %v16908_v14, %v9351_v15  ;;  %v15631_v15 = vld [vmem:[#allocation10 + $0x4c] sm:$0xf] }
 0xa38   :  { %9619 = vmatpush.bf16.msrb.mxu2 %v14456_v38  ;;  %v13756_v38 = vor.u32 %v15647_v12, %v13753_v48  ;;  %v14140_v39 = vor.u32 %v15743_v23, %v14137_v24  ;;  %v13689_v12 = vld [vmem:[#allocation10 + $0x58] sm:$0xf0]  ;;  %v15663_v48 = vld [vmem:[#allocation10 + $0x14c] sm:$0xf] }
 0xa39   :  { %9632 = vmatpush.bf16.msrb.mxu3 %v14584_v26  ;;  %v15675_v26 = vld [vmem:[#allocation10 + $0x1ac] sm:$0xf]  ;;  %v9377_v14 = vadd.f32 %v16910_v32, %v9364_v59  ;;  %v13945_v4 = vld [vmem:[#allocation10 + $0x258] sm:$0xf0] }
 0xa3a   :  { %9594 = vmatpush.bf16.msrb.mxu0 %v14184_v34  ;;  %v13740_v34 = vor.u32 %v15643_v25, %v13737_v50  ;;  %v13868_v10 = vor.u32 %v15675_v26, %v13865_v27  ;;  %v15635_v32 = vld [vmem:[#allocation10 + $0x6c] sm:$0xf]  ;;  %v13820_v26 = vor.u32 %v15663_v48, %v13817_v20  ;;  %v13673_v27 = vld [vmem:[#allocation10 + $0x38] sm:$0xf0] }
 0xa3b   :  { %9607 = vmatpush.bf16.msrb.mxu1 %v14312_v41  ;;  %v15639_v41 = vld [vmem:[#allocation10 + $0x8c] sm:$0xf]  ;;  %v13785_v16 = vld [vmem:[#allocation10 + $0x118] sm:$0xf0] }
 0xa3c   :  { %9620 = vmatpush.bf16.msrb.mxu2 %v14440_v42  ;;  %v13721_v42 = vld [vmem:[#allocation10 + $0x98] sm:$0xf0]  ;;  %v15695_v21 = vld [vmem:[#allocation10 + $0x24c] sm:$0xf] }
 0xa3d   :  { %9633 = vmatpush.bf16.msrb.mxu3 %v14568_v11  ;;  %v13977_v11 = vld [vmem:[#allocation10 + $0x298] sm:$0xf0]  ;;  %v13724_v31 = vor.u32 %v15639_v41, %v13721_v42  ;;  %v15627_v25 = vld [vmem:[#allocation10 + $0x2c] sm:$0xf] }
 0xa3e   :  { %9595 = vmatpush.bf16.msrb.mxu0 %v14168_v60  ;;  %v9389_v5 = vpop.f32.mrf.mxu0  ;;  %v13980_v52 = vor.u32 %v15703_v3, %v13977_v11  ;;  %v14057_v41 = vld [vmem:[#allocation10 + $0x338] sm:$0xf0]  ;;  %v13676_v42 = vor.u32 %v15627_v25, %v13673_v27  ;;  %v15655_v11 = vld [vmem:[#allocation10 + $0x10c] sm:$0xf] }
 0xa3f   :  { %9608 = vmatpush.bf16.msrb.mxu1 %v14296_v46  ;;  %v9390_v60 = vadd.f32 %v9389_v5, %v9377_v14  ;;  %v9402_v61 = vpop.f32.mrf.mxu1  ;;  %v15699_v46 = vld [vmem:[#allocation10 + $0x26c] sm:$0xf]  ;;  %v14377_v27 = vld [vmem:[#allocation10 + $0x5b8] sm:$0xf0] }
 0xa40   :  { %9621 = vmatpush.bf16.msrb.mxu2 %v14424_v63  ;;  %v13961_v63 = vld [vmem:[#allocation10 + $0x278] sm:$0xf0]  ;;  %v15691_v14 = vld [vmem:[#allocation10 + $0x22c] sm:$0xf] }
 0xa41   :  { %9634 = vmatpush.bf16.msrb.mxu3 %v14552_v6  ;;  %9596 = vmatmul.bf16.vlgmr.msrb.gmra.mxu0 %v16871_v37  ;;  %v9403_v6 = vadd.f32 %v9402_v61, %v9390_v60  ;;  %v14281_v60 = vld [vmem:[#allocation10 + $0x4f8] sm:$0xf0]  ;;  %v15811_v61 = vld [vmem:[#allocation10 + $0x5ec] sm:$0xf] }
 0xa42   :  { %9640 = vmatpush.bf16.msra.mxu0 %v13772_v7  ;;  %9609 = vmatmul.bf16.vlgmr.msrb.gmra.mxu1 %v16874_v55  ;;  %v13708_v7 = vor.u32 %v15635_v32, %v13705_v54  ;;  %v14041_v32 = vld [vmem:[#allocation10 + $0x318] sm:$0xf0]  ;;  %v15775_v48 = vld [vmem:[#allocation10 + $0x4cc] sm:$0xf] }
 0xa43   :  { %9653 = vmatpush.bf16.msra.mxu1 %v13900_v2  ;;  %9622 = vmatmul.bf16.vlgmr.msrb.gmra.mxu2 %v16877_v13  ;;  %v13836_v2 = vor.u32 %v15667_v58, %v13833_v62  ;;  %v15779_v58 = vld [vmem:[#allocation10 + $0x4ec] sm:$0xf]  ;;  %v14409_v62 = vld [vmem:[#allocation10 + $0x5f8] sm:$0xf0] }
 0xa44   :  { %9666 = vmatpush.bf16.msra.mxu2 %v14028_v9  ;;  %9635 = vmatmul.bf16.vlgmr.msrb.gmra.mxu3 %v16880_v49  ;;  %v13964_v9 = vor.u32 %v15699_v46, %v13961_v63  ;;  %v15843_v46 = vld [vmem:[#allocation10 + $0x6ec] sm:$0xf]  ;;  %v14537_v63 = vld [vmem:[#allocation10 + $0x6f8] sm:$0xf0] }
 0xa45   :  { %9679 = vmatpush.bf16.msra.mxu3 %v14156_v19  ;;  %v14092_v19 = vor.u32 %v15731_v0, %v14089_v35  ;;  %v13788_v0 = vor.u32 %v15655_v11, %v13785_v16  ;;  %v15771_v25 = vld [vmem:[#allocation10 + $0x4ac] sm:$0xf] }
 0xa46   :  { %9641 = vmatpush.bf16.msra.mxu0 %v13756_v38  ;;  %v9415_v17 = vpop.f32.mrf.mxu2  ;;  %v15727_v38 = vld [vmem:[#allocation10 + $0x34c] sm:$0xf]  ;;  %v9391_v50 = vpop.f32.mrf.mxu0 }
 0xa47   :  { %9654 = vmatpush.bf16.msra.mxu1 %v13884_v45  ;;  %v9416_v23 = vadd.f32 %v9415_v17, %v9403_v6  ;;  %v9428_v24 = vpop.f32.mrf.mxu3  ;;  %v14073_v45 = vld [vmem:[#allocation10 + $0x358] sm:$0xf0]  ;;  %v9404_v30 = vpop.f32.mrf.mxu1  ;;  %v15875_v6 = vld [vmem:[#allocation10 + $0x7ec] sm:$0xf] }
 0xa48   :  { %9667 = vmatpush.bf16.msra.mxu2 %v14012_v57  ;;  %v13692_v57 = vor.u32 %v15631_v15, %v13689_v12  ;;  %v14076_v33 = vor.u32 %v15727_v38, %v14073_v45  ;;  %v14412_v15 = vor.u32 %v15811_v61, %v14409_v62  ;;  %v14540_v12 = vor.u32 %v15843_v46, %v14537_v63  ;;  %v14265_v17 = vld [vmem:[#allocation10 + $0x4d8] sm:$0xf0]  ;;  %v15835_v28 = vld [vmem:[#allocation10 + $0x6ac] sm:$0xf] }
 0xa49   :  { %9680 = vmatpush.bf16.msra.mxu3 %v14140_v39  ;;  %v9429_v59 = vadd.f32 %v9428_v24, %v9416_v23  ;;  %v13948_v39 = vor.u32 %v15695_v21, %v13945_v4  ;;  %v14393_v21 = vld [vmem:[#allocation10 + $0x5d8] sm:$0xf0]  ;;  %v15839_v4 = vld [vmem:[#allocation10 + $0x6cc] sm:$0xf]  ;;  %v14268_v45 = vor.u32 %v15775_v48, %v14265_v17 }
 0xa4a   :  { %9642 = vmatpush.bf16.msra.mxu0 %v13740_v34  ;;  %v14521_v23 = vld [vmem:[#allocation10 + $0x6d8] sm:$0xf0]  ;;  %v15871_v24 = vld [vmem:[#allocation10 + $0x7cc] sm:$0xf] }
 0xa4b   :  { %9655 = vmatpush.bf16.msra.mxu1 %v13868_v10  ;;  %v9744_v34 = vmax.f32 %v9429_v59, 0.0  ;;  %v13929_v10 = vld [vmem:[#allocation10 + $0x238] sm:$0xf0]  ;;  %v14524_v59 = vor.u32 %v15839_v4, %v14521_v23  ;;  %v15867_v30 = vld [vmem:[#allocation10 + $0x7ac] sm:$0xf] }
 0xa4c   :  { %9668 = vmatpush.bf16.msra.mxu2 %v13996_v40  ;;  %v15723_v40 = vld [vmem:[#allocation10 + $0x32c] sm:$0xf]  ;;  %v13932_v3 = vor.u32 %v15691_v14, %v13929_v10  ;;  %v14649_v38 = vld [vmem:[#allocation10 + $0x7d8] sm:$0xf0]  ;;  %v14508_v10 = vor.u32 %v15835_v28, %v14505_v29 }
 0xa4d   :  { %9681 = vmatpush.bf16.msra.mxu3 %v14124_v43  ;;  %9748 = vst [vmem:[#allocation29] sm:$0xff] %v9744_v34  ;;  %v13657_v43 = vld [vmem:[#allocation10 + $0x18] sm:$0xf0]  ;;  %v14060_v5 = vor.u32 %v15723_v40, %v14057_v41  ;;  %v15767_v40 = vld [vmem:[#allocation10 + $0x48c] sm:$0xf] }
 0xa4e   :  { %9643 = vmatpush.bf16.msra.mxu0 %v13724_v31  ;;  %v9417_v31 = vpop.f32.mrf.mxu2  ;;  %v14249_v50 = vld [vmem:[#allocation10 + $0x4b8] sm:$0xf0]  ;;  %v15759_v63 = vld [vmem:[#allocation10 + $0x44c] sm:$0xf] }
 0xa4f   :  { %9656 = vmatpush.bf16.msra.mxu1 %v13852_v51  ;;  %v13913_v51 = vld [vmem:[#allocation10 + $0x218] sm:$0xf0]  ;;  %v9430_v54 = vpop.f32.mrf.mxu3  ;;  %v14252_v34 = vor.u32 %v15771_v25, %v14249_v50  ;;  %v15855_v48 = vld [vmem:[#allocation10 + $0x74c] sm:$0xf] }
 0xa50   :  { %9669 = vmatpush.bf16.msra.mxu2 %v13980_v52  ;;  %v15719_v52 = vld [vmem:[#allocation10 + $0x30c] sm:$0xf]  ;;  %v13916_v35 = vor.u32 %v15687_v47, %v13913_v51  ;;  %v14233_v41 = vld [vmem:[#allocation10 + $0x498] sm:$0xf0] }
 0xa51   :  { %9682 = vmatpush.bf16.msra.mxu3 %v14108_v18  ;;  %v13660_v18 = vor.u32 %v15623_v8, %v13657_v43  ;;  %v14361_v8 = vld [vmem:[#allocation10 + $0x598] sm:$0xf0]  ;;  %v15831_v43 = vld [vmem:[#allocation10 + $0x68c] sm:$0xf] }
 0xa52   :  { %9644 = vmatpush.bf16.msra.mxu0 %v13708_v7  ;;  %v14665_v7 = vld [vmem:[#allocation10 + $0x7f8] sm:$0xf0]  ;;  %v15763_v47 = vld [vmem:[#allocation10 + $0x46c] sm:$0xf] }
 0xa53   :  { %9657 = vmatpush.bf16.msra.mxu1 %v13836_v2  ;;  %v14044_v2 = vor.u32 %v15719_v52, %v14041_v32  ;;  %v14668_v20 = vor.u32 %v15875_v6, %v14665_v7  ;;  %v14217_v31 = vld [vmem:[#allocation10 + $0x478] sm:$0xf0]  ;;  %v15827_v54 = vld [vmem:[#allocation10 + $0x66c] sm:$0xf] }
 0xa54   :  { %9670 = vmatpush.bf16.msra.mxu2 %v13964_v9  ;;  %v14284_v9 = vor.u32 %v15779_v58, %v14281_v60  ;;  %v14345_v32 = vld [vmem:[#allocation10 + $0x578] sm:$0xf0]  ;;  %v15859_v60 = vld [vmem:[#allocation10 + $0x76c] sm:$0xf] }
 0xa55   :  { %9683 = vmatpush.bf16.msra.mxu3 %v14092_v19  ;;  %v15807_v19 = vld [vmem:[#allocation10 + $0x5cc] sm:$0xf]  ;;  %v14473_v58 = vld [vmem:[#allocation10 + $0x678] sm:$0xf0] }
 0xa56   :  { %9645 = vmatpush.bf16.msra.mxu0 %v13692_v57  ;;  %v14396_v57 = vor.u32 %v15807_v19, %v14393_v21  ;;  %v14601_v61 = vld [vmem:[#allocation10 + $0x778] sm:$0xf0]  ;;  %v14476_v46 = vor.u32 %v15827_v54, %v14473_v58  ;;  %v15755_v23 = vld [vmem:[#allocation10 + $0x42c] sm:$0xf] }
 0xa57   :  { %9658 = vmatpush.bf16.msra.mxu1 %v13820_v26  ;;  %v15803_v26 = vld [vmem:[#allocation10 + $0x5ac] sm:$0xf]  ;;  %v14604_v7 = vor.u32 %v15859_v60, %v14601_v61  ;;  %v14585_v17 = vld [vmem:[#allocation10 + $0x758] sm:$0xf0] }
 0xa58   :  { %9671 = vmatpush.bf16.msra.mxu2 %v13948_v39  ;;  %v14652_v39 = vor.u32 %v15871_v24, %v14649_v38  ;;  %v14380_v14 = vor.u32 %v15803_v26, %v14377_v27  ;;  %v14185_v24 = vld [vmem:[#allocation10 + $0x438] sm:$0xf0]  ;;  %v15787_v38 = vld [vmem:[#allocation10 + $0x52c] sm:$0xf]  ;;  %v8041_v27 = vperm.slane %v16912_v22, 1 }
 0xa59   :  { %9684 = vmatpush.bf16.msra.mxu3 %v14076_v33  ;;  %v14633_v33 = vld [vmem:[#allocation10 + $0x7b8] sm:$0xf0]  ;;  %v15819_v25 = vld [vmem:[#allocation10 + $0x62c] sm:$0xf]  ;;  %v14188_v28 = vor.u32 %v15755_v23, %v14185_v24 }
 0xa5a   :  { %9646 = vmatpush.bf16.msra.mxu0 %v13676_v42  ;;  %v14636_v42 = vor.u32 %v15867_v30, %v14633_v33  ;;  %v14441_v50 = vld [vmem:[#allocation10 + $0x638] sm:$0xf0]  ;;  %v15851_v26 = vld [vmem:[#allocation10 + $0x72c] sm:$0xf] }
 0xa5b   :  { %9659 = vmatpush.bf16.msra.mxu1 %v13804_v44  ;;  %v15863_v44 = vld [vmem:[#allocation10 + $0x78c] sm:$0xf]  ;;  %v14444_v30 = vor.u32 %v15819_v25, %v14441_v50 }
 0xa5c   :  { %9672 = vmatpush.bf16.msra.mxu2 %v13932_v3  ;;  %v14617_v3 = vld [vmem:[#allocation10 + $0x798] sm:$0xf0]  ;;  %v15751_v33 = vld [vmem:[#allocation10 + $0x40c] sm:$0xf] }
 0xa5d   :  { %9685 = vmatpush.bf16.msra.mxu3 %v14060_v5  ;;  %v15795_v5 = vld [vmem:[#allocation10 + $0x56c] sm:$0xf]  ;;  %v14620_v52 = vor.u32 %v15863_v44, %v14617_v3 }
 0xa5e   :  { %9647 = vmatpush.bf16.msra.mxu0 %v13660_v18  ;;  %v16927_v11 = vpop.f32.mrf.mxu0  ;;  %v14220_v18 = vor.u32 %v15763_v47, %v14217_v31  ;;  %v14348_v62 = vor.u32 %v15795_v5, %v14345_v32 }
 0xa5f   :  { %9660 = vmatpush.bf16.msra.mxu1 %v13788_v0  ;;  %v16929_v51 = vpop.f32.mrf.mxu1  ;;  %v14201_v0 = vld [vmem:[#allocation10 + $0x458] sm:$0xf0]  ;;  %v9442_v44 = vadd.f32 %v16927_v11, %v8041_v27 }
 0xa60   :  { %9673 = vmatpush.bf16.msra.mxu2 %v13916_v35  ;;  %v15791_v35 = vld [vmem:[#allocation10 + $0x54c] sm:$0xf]  ;;  %v14204_v19 = vor.u32 %v15759_v63, %v14201_v0 }
 0xa61   :  { %9686 = vmatpush.bf16.msra.mxu3 %v14044_v2  ;;  %9648 = vmatmul.bf16.vlgmr.msra.gmra.mxu0 %v16847_v56  ;;  %v14236_v56 = vor.u32 %v15767_v40, %v14233_v41  ;;  %v14329_v2 = vld [vmem:[#allocation10 + $0x558] sm:$0xf0]  ;;  %v9455_v47 = vadd.f32 %v16929_v51, %v9442_v44 }
 0xa62   :  { %9692 = vmatpush.bf16.msrb.mxu0 %v14284_v9  ;;  %9661 = vmatmul.bf16.vlgmr.msra.gmra.mxu1 %v16854_v1  ;;  %v15823_v9 = vld [vmem:[#allocation10 + $0x64c] sm:$0xf]  ;;  %v14332_v21 = vor.u32 %v15791_v35, %v14329_v2  ;;  %v14297_v41 = vld [vmem:[#allocation10 + $0x518] sm:$0xf0] }
 0xa63   :  { %9705 = vmatpush.bf16.msrb.mxu1 %v14412_v15  ;;  %9674 = vmatmul.bf16.vlgmr.msra.gmra.mxu2 %v16861_v53  ;;  %v15799_v53 = vld [vmem:[#allocation10 + $0x58c] sm:$0xf]  ;;  %v14457_v15 = vld [vmem:[#allocation10 + $0x658] sm:$0xf0] }
 0xa64   :  { %9718 = vmatpush.bf16.msrb.mxu2 %v14540_v12  ;;  %9687 = vmatmul.bf16.vlgmr.msra.gmra.mxu3 %v16868_v36  ;;  %v14489_v36 = vld [vmem:[#allocation10 + $0x698] sm:$0xf0]  ;;  %v14364_v1 = vor.u32 %v15799_v53, %v14361_v8  ;;  %v14460_v4 = vor.u32 %v15823_v9, %v14457_v15  ;;  %v15815_v53 = vld [vmem:[#allocation10 + $0x60c] sm:$0xf] }
 0xa65   :  { %9731 = vmatpush.bf16.msrb.mxu3 %v14668_v20  ;;  %v14492_v16 = vor.u32 %v15831_v43, %v14489_v36  ;;  %v15847_v43 = vld [vmem:[#allocation10 + $0x70c] sm:$0xf]  ;;  %v14553_v36 = vld [vmem:[#allocation10 + $0x718] sm:$0xf0] }
 0xa66   :  { %9693 = vmatpush.bf16.msrb.mxu0 %v14268_v45  ;;  %v9467_v6 = vpop.f32.mrf.mxu2  ;;  %v9443_v20 = vpop.f32.mrf.mxu0 }
 0xa67   :  { %9706 = vmatpush.bf16.msrb.mxu1 %v14396_v57  ;;  %v9480_v12 = vpop.f32.mrf.mxu3  ;;  %v9456_v45 = vpop.f32.mrf.mxu1  ;;  %v14588_v57 = vor.u32 %v15855_v48, %v14585_v17  ;;  %v9468_v31 = vadd.f32 %v9467_v6, %v9455_v47 }
 0xa68   :  { %9719 = vmatpush.bf16.msrb.mxu2 %v14524_v59  ;;  %v14313_v59 = vld [vmem:[#allocation10 + $0x538] sm:$0xf0] }
 0xa69   :  { %9732 = vmatpush.bf16.msrb.mxu3 %v14652_v39  ;;  %v14569_v39 = vld [vmem:[#allocation10 + $0x738] sm:$0xf0]  ;;  %v14316_v29 = vor.u32 %v15787_v38, %v14313_v59  ;;  %v9481_v11 = vadd.f32 %v9480_v12, %v9468_v31 }
 0xa6a   :  { %9694 = vmatpush.bf16.msrb.mxu0 %v14252_v34  ;;  %v14169_v34 = vld [vmem:[#allocation10 + $0x418] sm:$0xf0]  ;;  %v14572_v40 = vor.u32 %v15851_v26, %v14569_v39 }
 0xa6b   :  { %9707 = vmatpush.bf16.msrb.mxu1 %v14380_v14  ;;  %v15783_v14 = vld [vmem:[#allocation10 + $0x50c] sm:$0xf]  ;;  %v14172_v3 = vor.u32 %v15751_v33, %v14169_v34  ;;  %v8043_v34 = vperm.slane %v16912_v22, 3 }
 0xa6c   :  { %9720 = vmatpush.bf16.msrb.mxu2 %v14508_v10 }
 0xa6d   :  { %9733 = vmatpush.bf16.msrb.mxu3 %v14636_v42  ;;  %v14425_v42 = vld [vmem:[#allocation10 + $0x618] sm:$0xf0] }
 0xa6e   :  { %9695 = vmatpush.bf16.msrb.mxu0 %v14236_v56  ;;  %v9469_v10 = vpop.f32.mrf.mxu2  ;;  %v14300_v56 = vor.u32 %v15783_v14, %v14297_v41 }
 0xa6f   :  { %9708 = vmatpush.bf16.msrb.mxu1 %v14364_v1  ;;  %v9482_v8 = vpop.f32.mrf.mxu3  ;;  %v14428_v1 = vor.u32 %v15815_v53, %v14425_v42 }
 0xa70   :  { %9721 = vmatpush.bf16.msrb.mxu2 %v14492_v16  ;;  %v14556_v16 = vor.u32 %v15847_v43, %v14553_v36 }
 0xa71   :  { %9734 = vmatpush.bf16.msrb.mxu3 %v14620_v52 }
 0xa72   :  { %9696 = vmatpush.bf16.msrb.mxu0 %v14220_v18 }
 0xa73   :  { %9709 = vmatpush.bf16.msrb.mxu1 %v14348_v62 }
 0xa74   :  { %9722 = vmatpush.bf16.msrb.mxu2 %v14476_v46 }
 0xa75   :  { %9735 = vmatpush.bf16.msrb.mxu3 %v14604_v7  ;;  %v8042_v7 = vperm.slane %v16912_v22, 2 }
 0xa76   :  { %9697 = vmatpush.bf16.msrb.mxu0 %v14204_v19 }
 0xa77   :  { %9710 = vmatpush.bf16.msrb.mxu1 %v14332_v21 }
 0xa78   :  { %9723 = vmatpush.bf16.msrb.mxu2 %v14460_v4 }
 0xa79   :  { %9736 = vmatpush.bf16.msrb.mxu3 %v14588_v57 }
 0xa7a   :  { %9698 = vmatpush.bf16.msrb.mxu0 %v14188_v28 }
 0xa7b   :  { %9711 = vmatpush.bf16.msrb.mxu1 %v14316_v29 }
 0xa7c   :  { %9724 = vmatpush.bf16.msrb.mxu2 %v14444_v30 }
 0xa7d   :  { %9737 = vmatpush.bf16.msrb.mxu3 %v14572_v40 }
 0xa7e   :  { %9699 = vmatpush.bf16.msrb.mxu0 %v14172_v3  ;;  %v9493_v5 = vpop.f32.mrf.mxu0 }
 0xa7f   :  { %9712 = vmatpush.bf16.msrb.mxu1 %v14300_v56  ;;  %v9494_v52 = vadd.f32 %v9493_v5, %v9481_v11  ;;  %v9506_v32 = vpop.f32.mrf.mxu1 }
 0xa80   :  { %9725 = vmatpush.bf16.msrb.mxu2 %v14428_v1 }
 0xa81   :  { %9738 = vmatpush.bf16.msrb.mxu3 %v14556_v16  ;;  %9700 = vmatmul.bf16.vlgmr.msrb.gmra.mxu0 %v16871_v37  ;;  %v9507_v54 = vadd.f32 %v9506_v32, %v9494_v52 }
 0xa82   :  { %9713 = vmatmul.bf16.vlgmr.msrb.gmra.mxu1 %v16874_v55 }
 0xa83   :  { %9726 = vmatmul.bf16.vlgmr.msrb.gmra.mxu2 %v16877_v13 }
 0xa84   :  { %9739 = vmatmul.bf16.vlgmr.msrb.gmra.mxu3 %v16880_v49 }
 0xa86   :  { %v9519_v37 = vpop.f32.mrf.mxu2  ;;  %v9495_v58 = vpop.f32.mrf.mxu0 }
 0xa87   :  { %v9520_v55 = vadd.f32 %v9519_v37, %v9507_v54  ;;  %v9532_v51 = vpop.f32.mrf.mxu3  ;;  %v9508_v49 = vpop.f32.mrf.mxu1 }
 0xa89   :  { %v9533_v13 = vadd.f32 %v9532_v51, %v9520_v55 }
 0xa8b   :  { %v9745_v60 = vmax.f32 %v9533_v13, 0.0 }
 0xa8d   :  { %9749 = vst [vmem:[#allocation29 + $0x8] sm:$0xff] %v9745_v60 }
 0xa8e   :  { %v9521_v61 = vpop.f32.mrf.mxu2 }
 0xa8f   :  { %v9534_v18 = vpop.f32.mrf.mxu3 }
 0xa9e   :  { %v9545_v62 = vpop.f32.mrf.mxu0 }
 0xa9f   :  { %v9558_v46 = vpop.f32.mrf.mxu1  ;;  %v9546_v15 = vadd.f32 %v9545_v62, %v8042_v7 }
 0xaa1   :  { %v9559_v12 = vadd.f32 %v9558_v46, %v9546_v15 }
 0xaa6   :  { %v9571_v63 = vpop.f32.mrf.mxu2  ;;  %v9547_v35 = vpop.f32.mrf.mxu0 }
 0xaa7   :  { %v9584_v0 = vpop.f32.mrf.mxu3  ;;  %v9560_v6 = vpop.f32.mrf.mxu1  ;;  %v9572_v48 = vadd.f32 %v9571_v63, %v9559_v12 }
 0xaa9   :  { %v9585_v17 = vadd.f32 %v9584_v0, %v9572_v48 }
 0xaae   :  { %v9573_v2 = vpop.f32.mrf.mxu2 }
 0xaaf   :  { %v9586_v9 = vpop.f32.mrf.mxu3 }
 0xabe   :  { %v9597_v19 = vpop.f32.mrf.mxu0 }
 0xabf   :  { %v9598_v20 = vadd.f32 %v9597_v19, %v9585_v17  ;;  %v9610_v21 = vpop.f32.mrf.mxu1 }
 0xac1   :  { %v9611_v4 = vadd.f32 %v9610_v21, %v9598_v20 }
 0xac6   :  { %v9623_v23 = vpop.f32.mrf.mxu2  ;;  %v9599_v57 = vpop.f32.mrf.mxu0 }
 0xac7   :  { %v9624_v24 = vadd.f32 %v9623_v23, %v9611_v4  ;;  %v9636_v38 = vpop.f32.mrf.mxu3  ;;  %v9612_v59 = vpop.f32.mrf.mxu1 }
 0xac9   :  { %v9637_v45 = vadd.f32 %v9636_v38, %v9624_v24 }
 0xacb   :  { %v9746_v25 = vmax.f32 %v9637_v45, 0.0 }
 0xacd   :  { %9750 = vst [vmem:[#allocation29 + $0x10] sm:$0xff] %v9746_v25 }
 0xace   :  { %v9625_v50 = vpop.f32.mrf.mxu2 }
 0xacf   :  { %v9638_v26 = vpop.f32.mrf.mxu3 }
 0xade   :  { %v9649_v39 = vpop.f32.mrf.mxu0 }
 0xadf   :  { %v9662_v27 = vpop.f32.mrf.mxu1  ;;  %v9650_v40 = vadd.f32 %v9649_v39, %v8043_v34 }
 0xae1   :  { %v9663_v41 = vadd.f32 %v9662_v27, %v9650_v40 }
 0xae6   :  { %v9675_v28 = vpop.f32.mrf.mxu2  ;;  %v9651_v30 = vpop.f32.mrf.mxu0 }
 0xae7   :  { %v9688_v29 = vpop.f32.mrf.mxu3  ;;  %v9664_v33 = vpop.f32.mrf.mxu1  ;;  %v9676_v53 = vadd.f32 %v9675_v28, %v9663_v41 }
 0xae9   :  { %v9689_v42 = vadd.f32 %v9688_v29, %v9676_v53 }
 0xaee   :  { %v9677_v14 = vpop.f32.mrf.mxu2 }
 0xaef   :  { %v9690_v10 = vpop.f32.mrf.mxu3 }
 0xafe   :  { %v9701_v8 = vpop.f32.mrf.mxu0 }
 0xaff   :  { %v9714_v43 = vpop.f32.mrf.mxu1  ;;  %v9702_v36 = vadd.f32 %v9701_v8, %v9689_v42 }
 0xb01   :  { %v9715_v44 = vadd.f32 %v9714_v43, %v9702_v36 }
 0xb06   :  { %v9727_v3 = vpop.f32.mrf.mxu2  ;;  %v9703_v16 = vpop.f32.mrf.mxu0 }
 0xb07   :  { %v9728_v56 = vadd.f32 %v9727_v3, %v9715_v44  ;;  %v9740_v1 = vpop.f32.mrf.mxu3  ;;  %v9716_v47 = vpop.f32.mrf.mxu1 }
 0xb09   :  { %v9741_v22 = vadd.f32 %v9740_v1, %v9728_v56 }
 0xb0b   :  { %v9747_v31 = vmax.f32 %v9741_v22, 0.0 }
 0xb0d   :  { %9751 = vst [vmem:[#allocation29 + $0x18] sm:$0xff] %v9747_v31 }
 0xb0e   :  { %v9729_v11 = vpop.f32.mrf.mxu2  ;;  %9764 = dma.vmem_to_hbm [thread:$0]  %s9760_s23, 512, %s9762_s28, [#allocation14]  }
 0xb0f   :  { %v9742_v5 = vpop.f32.mrf.mxu3 }
 0xb10   :  { %16460 = dma.done.wait [#allocation14], 512  }
 0xb11   :  { %16461 = vsyncadd [#allocation14], 4294966784 }
 0xb12   :  { %16462 = dma.done.wait [#allocation31], 256  }
 0xb13   :  { %16463 = vsyncadd [#allocation31], 4294967040 }
 0xb14   :  { %9799 = vsyncpa [#allocation13], 1 }
 0xb15   :  { %9800 = vsyncpa [#allocation16], 1 }
 0xb16   :  { %9801 = vsyncpa [#allocation19], 1 }
 0xb17   :  { %9802 = vsyncpa [#allocation22], 1 }
 0xb18   :  { %9803 = vsyncpa [#allocation25], 1 }
 0xb19   :  { %9804 = vsyncpa [#allocation28], 1 }
 0xb1a   :  { %9805 = vsyncpa [#allocation14], 1 }
 0xb1b   :  { %9806 = vsyncpa [#allocation31], 1 }
 0xb1c   :  { %9807 = vsyncmov [#allocation11] }
 0xb1f   :  { %s9808_s21 = vpop.sfrf %9807 }
 0xb20   :  { %p14669_p0 = scmp.ne.s32.totalorder %s9808_s21, 0 }
 0xb22   :  { %9812 = shalt.err (%p14669_p0)  }
 0xb23   :  { %9814 = vsyncmov [#allocation11 + $0x1] }
 0xb26   :  { %s9815_s29 = vpop.sfrf %9814 }
 0xb27   :  { %p14670_p1 = scmp.ne.s32.totalorder %s9815_s29, 0 }
 0xb29   :  { %9819 = shalt.err (%p14670_p1)  }
 0xb2a   :  { %9821 = vsyncmov [#allocation11 + $0x2] }
 0xb2d   :  { %s9822_s17 = vpop.sfrf %9821 }
 0xb2e   :  { %p14671_p2 = scmp.ne.s32.totalorder %s9822_s17, 0 }
 0xb30   :  { %9826 = shalt.err (%p14671_p2)  }
 0xb31   :  { %9828 = vsyncmov [#allocation11 + $0x3] }
 0xb34   :  { %s9829_s16 = vpop.sfrf %9828 }
 0xb35   :  { %p14672_p3 = scmp.ne.s32.totalorder %s9829_s16, 0 }
 0xb37   :  { %9833 = shalt.err (%p14672_p3)  }
 0xb38   :  { %9835 = vsyncmov [#allocation11 + $0x4] }
 0xb3b   :  { %s9836_s8 = vpop.sfrf %9835 }
 0xb3c   :  { %p14673_p4 = scmp.ne.s32.totalorder %s9836_s8, 0 }
 0xb3e   :  { %9840 = shalt.err (%p14673_p4)  }
 0xb3f   :  { %9842 = vsyncmov [#allocation11 + $0x5] }
 0xb42   :  { %s9843_s0 = vpop.sfrf %9842 }
 0xb43   :  { %p14674_p5 = scmp.ne.s32.totalorder %s9843_s0, 0 }
 0xb45   :  { %9847 = shalt.err (%p14674_p5)  }
 0xb46   :  { %9849 = vsyncmov [#allocation11 + $0x6] }
 0xb49   :  { %s9850_s3 = vpop.sfrf %9849 }
 0xb4a   :  { %p14675_p6 = scmp.ne.s32.totalorder %s9850_s3, 0 }
 0xb4c   :  { %9854 = shalt.err (%p14675_p6)  }
 0xb4d   :  { %9856 = vsyncmov [#allocation11 + $0x7] }
 0xb50   :  { %s9857_s18 = vpop.sfrf %9856 }
 0xb51   :  { %p14676_p7 = scmp.ne.s32.totalorder %s9857_s18, 0 }
 0xb53   :  { %9861 = shalt.err (%p14676_p7)  }
 0xb54   :  { %9863 = vsyncmov [#allocation11 + $0x8] }
 0xb57   :  { %s9864_s20 = vpop.sfrf %9863 }
 0xb58   :  { %p14677_p8 = scmp.ne.s32.totalorder %s9864_s20, 0 }
 0xb5a   :  { %9868 = shalt.err (%p14677_p8)  }

</bundles_post_ra>
